<compile_context>
chip_gen: v6e
topology: v6e:2x2x1
jax: 0.10.0
libtpu: 0.0.40
codegen_flags: <defaults>
</compile_context>

<pallas_src>
import functools

import numpy as np
import jax
import jax.numpy as jnp
from jax import lax
from jax.experimental import pallas as pl
from jax.experimental.pallas import tpu as pltpu

WIN = 5                       # win_length
LTS = 2 * WIN - 1             # line_type_size = 9
NDIR = 4
P = WIN // 2                  # conv half width (= 2)
DELTAS = tuple(k - P for k in range(WIN))          # (-2, -1, 0, 1, 2)
# direction unit steps (dh, dw): horizontal, vertical, main diagonal, anti diagonal
DIR_OFFSETS = ((0, 1), (1, 0), (1, 1), (1, -1))


def _edge_mask(pidx, ci, dh, dw, delta, H, W):
    """[Bt, H*W] bool: True where board position p shifted by delta*(dh, dw) stays on board."""
    ro, co = dh * delta, dw * delta
    conds = []
    if ro > 0:
        conds.append(pidx < (H - ro) * W)            # row bound on the flat index
    elif ro < 0:
        conds.append(pidx >= (-ro) * W)
    if co > 0:
        conds.append(ci < (W - co))
    elif co < 0:
        conds.append(ci >= (-co))
    m = conds[0]
    for c in conds[1:]:
        m = jnp.logical_and(m, c)
    return m


def _shift(arr, flat_step, mask, HW):
    """arr[..., p] sampled at flattened position p + flat_step, zero where off-board.

    NOTE: the wrap modulo uses the TRUE HW; if HW were ever lane-padded (e.g. 361->384
    for 19x19 boards) the masks and modulo would have to be updated together."""
    rolled = pltpu.roll(arr, shift=(-flat_step) % HW, axis=1)   # y[p] = arr[(p+flat_step)%HW]
    return jnp.where(mask, rolled, 0.0)


def _core_kernel(w_ref, dir_ref, point_ref, logit_ref, sv_ref, *, H, W, Bt):
    """One grid step == one block of Bt boards, batch packed into sublanes.

    w_ref     : SMEM f32[2*LTS*WIN]  flattened conv weights (scalar reads)
    dir_ref   : VMEM [NDIR, LTS, Bt, H*W] f32
    point_ref : VMEM [Bt, H*W]            f32
    logit_ref : VMEM [Bt, H*W]            f32 (lane- and sublane-dense slab store)
    sv_ref    : VMEM [Bt, 1]              f32
    """
    HW = H * W

    # Hoist every weight scalar out of the direction/tap/channel loops (cheap SMEM loads,
    # no repeated VMEM reads or re-broadcast boilerplate in the unrolled body).
    wv = [[[w_ref[(o * LTS + c) * WIN + k] for k in range(WIN)]
           for c in range(LTS)] for o in range(2)]

    pidx = lax.broadcasted_iota(jnp.int32, (Bt, HW), 1)
    if (W & (W - 1)) == 0:
        ci = jnp.bitwise_and(pidx, W - 1)            # column index (power-of-two fast path)
    else:
        ci = lax.rem(pidx, W)

    acc_l = jnp.zeros((Bt, HW), jnp.float32)
    acc_v = jnp.zeros((Bt, HW), jnp.float32)

    for d, (dh, dw) in enumerate(DIR_OFFSETS):
        step = dh * W + dw                           # flattened stride of this direction
        # Edge masks hoisted out of the channel/tap loops and shared by both conv stages.
        masks = {dl: _edge_mask(pidx, ci, dh, dw, dl, H, W) for dl in DELTAS if dl != 0}

        # --- Dir2DirSum: length-WIN sliding sum along (dh, dw), zero padded at edges.
        #     Per-channel loads stay inside the loop to keep live ranges bounded.
        s = []
        for c in range(LTS):
            xc = dir_ref[d, c]                       # [Bt, HW]
            sc = xc
            for dl in DELTAS:
                if dl != 0:
                    sc = sc + _shift(xc, dl * step, masks[dl], HW)
            s.append(sc)

        # --- Dir2PointConv2D: per-tap channel contraction as scalar-broadcast VPU
        #     multiply-adds on dense [Bt, HW] slabs, then tap-shifted (edge-masked)
        #     accumulation.  Logit/value outputs share the rolled/masked structure.
        for k in range(WIN):
            dl = DELTAS[k]
            tl = s[0] * wv[0][0][k]
            tv = s[0] * wv[1][0][k]
            for c in range(1, LTS):
                tl = tl + s[c] * wv[0][c][k]
                tv = tv + s[c] * wv[1][c][k]
            if dl == 0:
                acc_l = acc_l + tl
                acc_v = acc_v + tv
            else:
                acc_l = acc_l + _shift(tl, dl * step, masks[dl], HW)
                acc_v = acc_v + _shift(tv, dl * step, masks[dl], HW)

    # --- head: logit bias, board softmax (attention never materialized), tanh(value),
    #     done once on the whole [Bt, HW] block with axis=-1 reductions.
    point = point_ref[...]                           # [Bt, HW]
    logit = acc_l + 100.0 * (point - 1.0)
    logit_ref[...] = logit                           # dense slab store

    m = jnp.max(logit, axis=-1, keepdims=True)       # [Bt, 1]
    e = jnp.exp(logit - m)
    num = jnp.sum(e * acc_v, axis=-1, keepdims=True)
    den = jnp.sum(e, axis=-1, keepdims=True)
    sv_ref[...] = jnp.tanh(num / den)                # [Bt, 1]


def core_model_forward(point_encoded, dir_encoded, weight_kernel, *, batch_block=None):
    """point_encoded: [B, Cp, H, W] (NCHW), dir_encoded: [B, 4, LTS+2, H, W],
    weight_kernel: [2, LTS, WIN] (torch layout). Returns (logit [B, H*W], state_value [B])."""
    B, _, H, W = point_encoded.shape
    HW = H * W

    # FormatDirectionalInput(combine=False) + relayout in ONE fused expression:
    # drop first/last per-direction channel, put batch in sublanes and the flattened
    # board in lanes -> [NDIR, LTS, B, HW].  f32 on the wire.
    d = jnp.transpose(dir_encoded[:, :, 1:-1], (1, 2, 0, 3, 4))
    d = d.reshape(NDIR, LTS, B, HW).astype(jnp.float32)
    point0 = point_encoded[:, 0].reshape(B, HW).astype(jnp.float32)
    w_flat = jnp.asarray(weight_kernel, jnp.float32).reshape(2 * LTS * WIN)

    if batch_block is None:
        # Aim for >= 2 grid steps when the batch allows it (v7x has 2 TensorCores),
        # while amortizing per-step pipeline overhead with reasonably large blocks.
        target = pl.cdiv(B, 2) if B > 8 else B
        batch_block = min(64, max(1, target))
    Bt = 8 * pl.cdiv(int(batch_block), 8)            # sublane-aligned block
    nblk = pl.cdiv(B, Bt)
    Bpad = nblk * Bt
    if Bpad != B:
        pad = Bpad - B
        d = jnp.pad(d, ((0, 0), (0, 0), (0, pad), (0, 0)))
        point0 = jnp.pad(point0, ((0, pad), (0, 0)))

    kernel = functools.partial(_core_kernel, H=H, W=W, Bt=Bt)

    grid_spec = pl.GridSpec(
        grid=(nblk,),
        in_specs=[
            pl.BlockSpec(memory_space=pltpu.MemorySpace.SMEM),          # 90 weight scalars
            pl.BlockSpec((NDIR, LTS, Bt, HW), lambda i: (0, 0, i, 0)),  # dir block
            pl.BlockSpec((Bt, HW), lambda i: (i, 0)),                   # point block
        ],
        out_specs=[
            pl.BlockSpec((Bt, HW), lambda i: (i, 0)),
            pl.BlockSpec((Bt, 1), lambda i: (i, 0)),
        ],
    )

    logit, sv = pl.pallas_call(
        kernel,
        out_shape=(jax.ShapeDtypeStruct((Bpad, HW), jnp.float32),
                   jax.ShapeDtypeStruct((Bpad, 1), jnp.float32)),
        grid_spec=grid_spec,
        compiler_params=pltpu.CompilerParams(
            dimension_semantics=("parallel",)),      # batch blocks are independent
    )(w_flat, d, point0)

    return logit[:B], sv.reshape(Bpad)[:B]


def reference_forward(point_encoded, dir_encoded, weight_kernel):
    """Plain-JAX reference of the same semantics (NCHW, two 'same'-padded stages)."""
    B, _, H, W = point_encoded.shape
    d = dir_encoded[:, :, 1:-1]                                        # [B,4,LTS,H,W]
    dpad = jnp.pad(d, ((0, 0), (0, 0), (0, 0), (P, P), (P, P)))
    out = jnp.zeros((B, 2, H, W), jnp.float32)
    for di, (dh, dw) in enumerate(DIR_OFFSETS):
        s = jnp.zeros((B, LTS, H, W), jnp.float32)
        for k in range(WIN):
            oh = P + dh * (k - P)
            ow = P + dw * (k - P)
            s = s + dpad[:, di, :, oh:oh + H, ow:ow + W]
        spad = jnp.pad(s, ((0, 0), (0, 0), (P, P), (P, P)))
        for k in range(WIN):
            oh = P + dh * (k - P)
            ow = P + dw * (k - P)
            patch = spad[:, :, oh:oh + H, ow:ow + W]                   # [B,LTS,H,W]
            out = out + jnp.einsum('oc,bchw->bohw', weight_kernel[:, :, k], patch,
                                   precision=lax.Precision.HIGHEST)
    logit = (out[:, 0] + 100.0 * (point_encoded[:, 0] - 1.0)).reshape(B, -1)
    att = jax.nn.softmax(logit, axis=1)
    value = out[:, 1].reshape(B, -1)
    sv = jnp.tanh(jnp.einsum('ij,ij->i', att, value, precision=lax.Precision.HIGHEST))
    return logit, sv


if __name__ == "__main__":
    board_size = 16
    B, H, W = 2, board_size, board_size

    key = jax.random.PRNGKey(0)
    k1, k2 = jax.random.split(key)
    point_encoded = jax.random.normal(k1, (B, 3, H, W), jnp.float32)
    dir_encoded = jax.random.normal(k2, (B, NDIR, LTS + 2, H, W), jnp.float32)

    # Deterministic weights as in CoreModelSimple01.__init__ : [2, 9] -> [2, 9, 5]
    logit_par = [18.17, 6.13, 1.98, 0.45, -0.02, 0.89, 2.49, 8.43, 23.64]
    value_par = [-1.37, -0.11, -0.07, -0.05, 0.0, 0.04, 0.07, 0.27, 3.05]
    weight_kernel = jnp.tile(
        jnp.array([logit_par, value_par], jnp.float32)[:, :, None], (1, 1, WIN))

    logit, state_value = jax.jit(core_model_forward)(point_encoded, dir_encoded, weight_kernel)
    jax.block_until_ready((logit, state_value))

    ref_logit, ref_sv = reference_forward(point_encoded, dir_encoded, weight_kernel)
    assert logit.shape == (B, H * W) and state_value.shape == (B,)
    np.testing.assert_allclose(np.asarray(logit), np.asarray(ref_logit), rtol=1e-4, atol=1e-2)
    np.testing.assert_allclose(np.asarray(state_value), np.asarray(ref_sv), rtol=1e-4, atol=2e-3)

    # Second check: distinct per-tap weights (catches tap-ordering bugs) and a batch size
    # that does not fill the (sublane-aligned) batch block (exercises the padded path).
    B2 = 3
    k3, k4, k5 = jax.random.split(jax.random.PRNGKey(1), 3)
    point2 = jax.random.normal(k3, (B2, 3, H, W), jnp.float32)
    dir2 = jax.random.normal(k4, (B2, NDIR, LTS + 2, H, W), jnp.float32)
    wk2 = weight_kernel * (1.0 + 0.25 * jax.random.normal(k5, (2, LTS, WIN), jnp.float32))
    logit2, sv2 = core_model_forward(point2, dir2, wk2, batch_block=2)
    jax.block_until_ready((logit2, sv2))
    ref_logit2, ref_sv2 = reference_forward(point2, dir2, wk2)
    np.testing.assert_allclose(np.asarray(logit2), np.asarray(ref_logit2), rtol=1e-4, atol=1e-2)
    np.testing.assert_allclose(np.asarray(sv2), np.asarray(ref_sv2), rtol=1e-4, atol=2e-3)

    print("KERNEL_OK")
</pallas_src>

<mosaic_0001>
module attributes {stable_mosaic.version = 11 : i64} {
  func.func @_core_kernel(%arg0: i32, %arg1: memref<90xf32, #tpu.memory_space<smem>>, %arg2: memref<4x9x8x256xf32, #tpu.memory_space<vmem>>, %arg3: memref<8x256xf32, #tpu.memory_space<vmem>>, %arg4: memref<8x256xf32, #tpu.memory_space<vmem>>, %arg5: memref<8x1xf32, #tpu.memory_space<vmem>>) attributes {dimension_semantics = [#tpu.dimension_semantics<parallel>], iteration_bounds = array<i64: 1>, scalar_prefetch = 0 : i64, scratch_operands = 0 : i64, tpu.core_type = #tpu.core_type<tc>, window_params = [{transform_indices = @transform_0, window_bounds = array<i64: 90>}, {transform_indices = @transform_1, window_bounds = array<i64: 4, 9, 8, 256>}, {transform_indices = @transform_2, window_bounds = array<i64: 8, 256>}, {transform_indices = @transform_3, window_bounds = array<i64: 8, 256>}, {transform_indices = @transform_4, window_bounds = array<i64: 8, 1>}]} {
    %c0 = arith.constant 0 : index
    %0 = memref.load %arg1[%c0] : memref<90xf32, #tpu.memory_space<smem>>
    %c1 = arith.constant 1 : index
    %1 = memref.load %arg1[%c1] : memref<90xf32, #tpu.memory_space<smem>>
    %c2 = arith.constant 2 : index
    %2 = memref.load %arg1[%c2] : memref<90xf32, #tpu.memory_space<smem>>
    %c3 = arith.constant 3 : index
    %3 = memref.load %arg1[%c3] : memref<90xf32, #tpu.memory_space<smem>>
    %c4 = arith.constant 4 : index
    %4 = memref.load %arg1[%c4] : memref<90xf32, #tpu.memory_space<smem>>
    %c5 = arith.constant 5 : index
    %5 = memref.load %arg1[%c5] : memref<90xf32, #tpu.memory_space<smem>>
    %c6 = arith.constant 6 : index
    %6 = memref.load %arg1[%c6] : memref<90xf32, #tpu.memory_space<smem>>
    %c7 = arith.constant 7 : index
    %7 = memref.load %arg1[%c7] : memref<90xf32, #tpu.memory_space<smem>>
    %c8 = arith.constant 8 : index
    %8 = memref.load %arg1[%c8] : memref<90xf32, #tpu.memory_space<smem>>
    %c9 = arith.constant 9 : index
    %9 = memref.load %arg1[%c9] : memref<90xf32, #tpu.memory_space<smem>>
    %c10 = arith.constant 10 : index
    %10 = memref.load %arg1[%c10] : memref<90xf32, #tpu.memory_space<smem>>
    %c11 = arith.constant 11 : index
    %11 = memref.load %arg1[%c11] : memref<90xf32, #tpu.memory_space<smem>>
    %c12 = arith.constant 12 : index
    %12 = memref.load %arg1[%c12] : memref<90xf32, #tpu.memory_space<smem>>
    %c13 = arith.constant 13 : index
    %13 = memref.load %arg1[%c13] : memref<90xf32, #tpu.memory_space<smem>>
    %c14 = arith.constant 14 : index
    %14 = memref.load %arg1[%c14] : memref<90xf32, #tpu.memory_space<smem>>
    %c15 = arith.constant 15 : index
    %15 = memref.load %arg1[%c15] : memref<90xf32, #tpu.memory_space<smem>>
    %c16 = arith.constant 16 : index
    %16 = memref.load %arg1[%c16] : memref<90xf32, #tpu.memory_space<smem>>
    %c17 = arith.constant 17 : index
    %17 = memref.load %arg1[%c17] : memref<90xf32, #tpu.memory_space<smem>>
    %c18 = arith.constant 18 : index
    %18 = memref.load %arg1[%c18] : memref<90xf32, #tpu.memory_space<smem>>
    %c19 = arith.constant 19 : index
    %19 = memref.load %arg1[%c19] : memref<90xf32, #tpu.memory_space<smem>>
    %c20 = arith.constant 20 : index
    %20 = memref.load %arg1[%c20] : memref<90xf32, #tpu.memory_space<smem>>
    %c21 = arith.constant 21 : index
    %21 = memref.load %arg1[%c21] : memref<90xf32, #tpu.memory_space<smem>>
    %c22 = arith.constant 22 : index
    %22 = memref.load %arg1[%c22] : memref<90xf32, #tpu.memory_space<smem>>
    %c23 = arith.constant 23 : index
    %23 = memref.load %arg1[%c23] : memref<90xf32, #tpu.memory_space<smem>>
    %c24 = arith.constant 24 : index
    %24 = memref.load %arg1[%c24] : memref<90xf32, #tpu.memory_space<smem>>
    %c25 = arith.constant 25 : index
    %25 = memref.load %arg1[%c25] : memref<90xf32, #tpu.memory_space<smem>>
    %c26 = arith.constant 26 : index
    %26 = memref.load %arg1[%c26] : memref<90xf32, #tpu.memory_space<smem>>
    %c27 = arith.constant 27 : index
    %27 = memref.load %arg1[%c27] : memref<90xf32, #tpu.memory_space<smem>>
    %c28 = arith.constant 28 : index
    %28 = memref.load %arg1[%c28] : memref<90xf32, #tpu.memory_space<smem>>
    %c29 = arith.constant 29 : index
    %29 = memref.load %arg1[%c29] : memref<90xf32, #tpu.memory_space<smem>>
    %c30 = arith.constant 30 : index
    %30 = memref.load %arg1[%c30] : memref<90xf32, #tpu.memory_space<smem>>
    %c31 = arith.constant 31 : index
    %31 = memref.load %arg1[%c31] : memref<90xf32, #tpu.memory_space<smem>>
    %c32 = arith.constant 32 : index
    %32 = memref.load %arg1[%c32] : memref<90xf32, #tpu.memory_space<smem>>
    %c33 = arith.constant 33 : index
    %33 = memref.load %arg1[%c33] : memref<90xf32, #tpu.memory_space<smem>>
    %c34 = arith.constant 34 : index
    %34 = memref.load %arg1[%c34] : memref<90xf32, #tpu.memory_space<smem>>
    %c35 = arith.constant 35 : index
    %35 = memref.load %arg1[%c35] : memref<90xf32, #tpu.memory_space<smem>>
    %c36 = arith.constant 36 : index
    %36 = memref.load %arg1[%c36] : memref<90xf32, #tpu.memory_space<smem>>
    %c37 = arith.constant 37 : index
    %37 = memref.load %arg1[%c37] : memref<90xf32, #tpu.memory_space<smem>>
    %c38 = arith.constant 38 : index
    %38 = memref.load %arg1[%c38] : memref<90xf32, #tpu.memory_space<smem>>
    %c39 = arith.constant 39 : index
    %39 = memref.load %arg1[%c39] : memref<90xf32, #tpu.memory_space<smem>>
    %c40 = arith.constant 40 : index
    %40 = memref.load %arg1[%c40] : memref<90xf32, #tpu.memory_space<smem>>
    %c41 = arith.constant 41 : index
    %41 = memref.load %arg1[%c41] : memref<90xf32, #tpu.memory_space<smem>>
    %c42 = arith.constant 42 : index
    %42 = memref.load %arg1[%c42] : memref<90xf32, #tpu.memory_space<smem>>
    %c43 = arith.constant 43 : index
    %43 = memref.load %arg1[%c43] : memref<90xf32, #tpu.memory_space<smem>>
    %c44 = arith.constant 44 : index
    %44 = memref.load %arg1[%c44] : memref<90xf32, #tpu.memory_space<smem>>
    %c45 = arith.constant 45 : index
    %45 = memref.load %arg1[%c45] : memref<90xf32, #tpu.memory_space<smem>>
    %c46 = arith.constant 46 : index
    %46 = memref.load %arg1[%c46] : memref<90xf32, #tpu.memory_space<smem>>
    %c47 = arith.constant 47 : index
    %47 = memref.load %arg1[%c47] : memref<90xf32, #tpu.memory_space<smem>>
    %c48 = arith.constant 48 : index
    %48 = memref.load %arg1[%c48] : memref<90xf32, #tpu.memory_space<smem>>
    %c49 = arith.constant 49 : index
    %49 = memref.load %arg1[%c49] : memref<90xf32, #tpu.memory_space<smem>>
    %c50 = arith.constant 50 : index
    %50 = memref.load %arg1[%c50] : memref<90xf32, #tpu.memory_space<smem>>
    %c51 = arith.constant 51 : index
    %51 = memref.load %arg1[%c51] : memref<90xf32, #tpu.memory_space<smem>>
    %c52 = arith.constant 52 : index
    %52 = memref.load %arg1[%c52] : memref<90xf32, #tpu.memory_space<smem>>
    %c53 = arith.constant 53 : index
    %53 = memref.load %arg1[%c53] : memref<90xf32, #tpu.memory_space<smem>>
    %c54 = arith.constant 54 : index
    %54 = memref.load %arg1[%c54] : memref<90xf32, #tpu.memory_space<smem>>
    %c55 = arith.constant 55 : index
    %55 = memref.load %arg1[%c55] : memref<90xf32, #tpu.memory_space<smem>>
    %c56 = arith.constant 56 : index
    %56 = memref.load %arg1[%c56] : memref<90xf32, #tpu.memory_space<smem>>
    %c57 = arith.constant 57 : index
    %57 = memref.load %arg1[%c57] : memref<90xf32, #tpu.memory_space<smem>>
    %c58 = arith.constant 58 : index
    %58 = memref.load %arg1[%c58] : memref<90xf32, #tpu.memory_space<smem>>
    %c59 = arith.constant 59 : index
    %59 = memref.load %arg1[%c59] : memref<90xf32, #tpu.memory_space<smem>>
    %c60 = arith.constant 60 : index
    %60 = memref.load %arg1[%c60] : memref<90xf32, #tpu.memory_space<smem>>
    %c61 = arith.constant 61 : index
    %61 = memref.load %arg1[%c61] : memref<90xf32, #tpu.memory_space<smem>>
    %c62 = arith.constant 62 : index
    %62 = memref.load %arg1[%c62] : memref<90xf32, #tpu.memory_space<smem>>
    %c63 = arith.constant 63 : index
    %63 = memref.load %arg1[%c63] : memref<90xf32, #tpu.memory_space<smem>>
    %c64 = arith.constant 64 : index
    %64 = memref.load %arg1[%c64] : memref<90xf32, #tpu.memory_space<smem>>
    %c65 = arith.constant 65 : index
    %65 = memref.load %arg1[%c65] : memref<90xf32, #tpu.memory_space<smem>>
    %c66 = arith.constant 66 : index
    %66 = memref.load %arg1[%c66] : memref<90xf32, #tpu.memory_space<smem>>
    %c67 = arith.constant 67 : index
    %67 = memref.load %arg1[%c67] : memref<90xf32, #tpu.memory_space<smem>>
    %c68 = arith.constant 68 : index
    %68 = memref.load %arg1[%c68] : memref<90xf32, #tpu.memory_space<smem>>
    %c69 = arith.constant 69 : index
    %69 = memref.load %arg1[%c69] : memref<90xf32, #tpu.memory_space<smem>>
    %c70 = arith.constant 70 : index
    %70 = memref.load %arg1[%c70] : memref<90xf32, #tpu.memory_space<smem>>
    %c71 = arith.constant 71 : index
    %71 = memref.load %arg1[%c71] : memref<90xf32, #tpu.memory_space<smem>>
    %c72 = arith.constant 72 : index
    %72 = memref.load %arg1[%c72] : memref<90xf32, #tpu.memory_space<smem>>
    %c73 = arith.constant 73 : index
    %73 = memref.load %arg1[%c73] : memref<90xf32, #tpu.memory_space<smem>>
    %c74 = arith.constant 74 : index
    %74 = memref.load %arg1[%c74] : memref<90xf32, #tpu.memory_space<smem>>
    %c75 = arith.constant 75 : index
    %75 = memref.load %arg1[%c75] : memref<90xf32, #tpu.memory_space<smem>>
    %c76 = arith.constant 76 : index
    %76 = memref.load %arg1[%c76] : memref<90xf32, #tpu.memory_space<smem>>
    %c77 = arith.constant 77 : index
    %77 = memref.load %arg1[%c77] : memref<90xf32, #tpu.memory_space<smem>>
    %c78 = arith.constant 78 : index
    %78 = memref.load %arg1[%c78] : memref<90xf32, #tpu.memory_space<smem>>
    %c79 = arith.constant 79 : index
    %79 = memref.load %arg1[%c79] : memref<90xf32, #tpu.memory_space<smem>>
    %c80 = arith.constant 80 : index
    %80 = memref.load %arg1[%c80] : memref<90xf32, #tpu.memory_space<smem>>
    %c81 = arith.constant 81 : index
    %81 = memref.load %arg1[%c81] : memref<90xf32, #tpu.memory_space<smem>>
    %c82 = arith.constant 82 : index
    %82 = memref.load %arg1[%c82] : memref<90xf32, #tpu.memory_space<smem>>
    %c83 = arith.constant 83 : index
    %83 = memref.load %arg1[%c83] : memref<90xf32, #tpu.memory_space<smem>>
    %c84 = arith.constant 84 : index
    %84 = memref.load %arg1[%c84] : memref<90xf32, #tpu.memory_space<smem>>
    %c85 = arith.constant 85 : index
    %85 = memref.load %arg1[%c85] : memref<90xf32, #tpu.memory_space<smem>>
    %c86 = arith.constant 86 : index
    %86 = memref.load %arg1[%c86] : memref<90xf32, #tpu.memory_space<smem>>
    %c87 = arith.constant 87 : index
    %87 = memref.load %arg1[%c87] : memref<90xf32, #tpu.memory_space<smem>>
    %c88 = arith.constant 88 : index
    %88 = memref.load %arg1[%c88] : memref<90xf32, #tpu.memory_space<smem>>
    %c89 = arith.constant 89 : index
    %89 = memref.load %arg1[%c89] : memref<90xf32, #tpu.memory_space<smem>>
    %90 = tpu.iota {dimensions = array<i32: 1>} : vector<8x256xi32>
    %c15_i32 = arith.constant 15 : i32
    %91 = vector.broadcast %c15_i32 : i32 to vector<8x256xi32>
    %92 = arith.andi %90, %91 : vector<8x256xi32>
    %cst = arith.constant 0.000000e+00 : f32
    %93 = vector.broadcast %cst : f32 to vector<8x256xf32>
    %cst_0 = arith.constant 0.000000e+00 : f32
    %94 = vector.broadcast %cst_0 : f32 to vector<8x256xf32>
    %c2_i32 = arith.constant 2 : i32
    %95 = vector.broadcast %c2_i32 : i32 to vector<8x256xi32>
    %96 = arith.cmpi sge, %92, %95 : vector<8x256xi32>
    %c1_i32 = arith.constant 1 : i32
    %97 = vector.broadcast %c1_i32 : i32 to vector<8x256xi32>
    %98 = arith.cmpi sge, %92, %97 : vector<8x256xi32>
    %c15_i32_1 = arith.constant 15 : i32
    %99 = vector.broadcast %c15_i32_1 : i32 to vector<8x256xi32>
    %100 = arith.cmpi slt, %92, %99 : vector<8x256xi32>
    %c14_i32 = arith.constant 14 : i32
    %101 = vector.broadcast %c14_i32 : i32 to vector<8x256xi32>
    %102 = arith.cmpi slt, %92, %101 : vector<8x256xi32>
    %c0_2 = arith.constant 0 : index
    %c0_3 = arith.constant 0 : index
    %c0_4 = arith.constant 0 : index
    %c0_5 = arith.constant 0 : index
    %103 = vector.load %arg2[%c0_2, %c0_3, %c0_4, %c0_5] : memref<4x9x8x256xf32, #tpu.memory_space<vmem>>, vector<1x1x8x256xf32>
    %104 = vector.shape_cast %103 : vector<1x1x8x256xf32> to vector<8x256xf32>
    %c2_i32_6 = arith.constant 2 : i32
    %105 = tpu.dynamic_rotate %104 by %c2_i32_6 dim 1 : vector<8x256xf32>, i32 -> vector<8x256xf32>
    %cst_7 = arith.constant 0.000000e+00 : f32
    %106 = vector.broadcast %cst_7 : f32 to vector<8x256xf32>
    %107 = arith.select %96, %105, %106 : vector<8x256xi1>, vector<8x256xf32>
    %108 = arith.addf %104, %107 : vector<8x256xf32>
    %c1_i32_8 = arith.constant 1 : i32
    %109 = tpu.dynamic_rotate %104 by %c1_i32_8 dim 1 : vector<8x256xf32>, i32 -> vector<8x256xf32>
    %cst_9 = arith.constant 0.000000e+00 : f32
    %110 = vector.broadcast %cst_9 : f32 to vector<8x256xf32>
    %111 = arith.select %98, %109, %110 : vector<8x256xi1>, vector<8x256xf32>
    %112 = arith.addf %108, %111 : vector<8x256xf32>
    %c255_i32 = arith.constant 255 : i32
    %113 = tpu.dynamic_rotate %104 by %c255_i32 dim 1 : vector<8x256xf32>, i32 -> vector<8x256xf32>
    %cst_10 = arith.constant 0.000000e+00 : f32
    %114 = vector.broadcast %cst_10 : f32 to vector<8x256xf32>
    %115 = arith.select %100, %113, %114 : vector<8x256xi1>, vector<8x256xf32>
    %116 = arith.addf %112, %115 : vector<8x256xf32>
    %c254_i32 = arith.constant 254 : i32
    %117 = tpu.dynamic_rotate %104 by %c254_i32 dim 1 : vector<8x256xf32>, i32 -> vector<8x256xf32>
    %cst_11 = arith.constant 0.000000e+00 : f32
    %118 = vector.broadcast %cst_11 : f32 to vector<8x256xf32>
    %119 = arith.select %102, %117, %118 : vector<8x256xi1>, vector<8x256xf32>
    %120 = arith.addf %116, %119 : vector<8x256xf32>
    %c0_12 = arith.constant 0 : index
    %c1_13 = arith.constant 1 : index
    %c0_14 = arith.constant 0 : index
    %c0_15 = arith.constant 0 : index
    %121 = vector.load %arg2[%c0_12, %c1_13, %c0_14, %c0_15] : memref<4x9x8x256xf32, #tpu.memory_space<vmem>>, vector<1x1x8x256xf32>
    %122 = vector.shape_cast %121 : vector<1x1x8x256xf32> to vector<8x256xf32>
    %c2_i32_16 = arith.constant 2 : i32
    %123 = tpu.dynamic_rotate %122 by %c2_i32_16 dim 1 : vector<8x256xf32>, i32 -> vector<8x256xf32>
    %cst_17 = arith.constant 0.000000e+00 : f32
    %124 = vector.broadcast %cst_17 : f32 to vector<8x256xf32>
    %125 = arith.select %96, %123, %124 : vector<8x256xi1>, vector<8x256xf32>
    %126 = arith.addf %122, %125 : vector<8x256xf32>
    %c1_i32_18 = arith.constant 1 : i32
    %127 = tpu.dynamic_rotate %122 by %c1_i32_18 dim 1 : vector<8x256xf32>, i32 -> vector<8x256xf32>
    %cst_19 = arith.constant 0.000000e+00 : f32
    %128 = vector.broadcast %cst_19 : f32 to vector<8x256xf32>
    %129 = arith.select %98, %127, %128 : vector<8x256xi1>, vector<8x256xf32>
    %130 = arith.addf %126, %129 : vector<8x256xf32>
    %c255_i32_20 = arith.constant 255 : i32
    %131 = tpu.dynamic_rotate %122 by %c255_i32_20 dim 1 : vector<8x256xf32>, i32 -> vector<8x256xf32>
    %cst_21 = arith.constant 0.000000e+00 : f32
    %132 = vector.broadcast %cst_21 : f32 to vector<8x256xf32>
    %133 = arith.select %100, %131, %132 : vector<8x256xi1>, vector<8x256xf32>
    %134 = arith.addf %130, %133 : vector<8x256xf32>
    %c254_i32_22 = arith.constant 254 : i32
    %135 = tpu.dynamic_rotate %122 by %c254_i32_22 dim 1 : vector<8x256xf32>, i32 -> vector<8x256xf32>
    %cst_23 = arith.constant 0.000000e+00 : f32
    %136 = vector.broadcast %cst_23 : f32 to vector<8x256xf32>
    %137 = arith.select %102, %135, %136 : vector<8x256xi1>, vector<8x256xf32>
    %138 = arith.addf %134, %137 : vector<8x256xf32>
    %c0_24 = arith.constant 0 : index
    %c2_25 = arith.constant 2 : index
    %c0_26 = arith.constant 0 : index
    %c0_27 = arith.constant 0 : index
    %139 = vector.load %arg2[%c0_24, %c2_25, %c0_26, %c0_27] : memref<4x9x8x256xf32, #tpu.memory_space<vmem>>, vector<1x1x8x256xf32>
    %140 = vector.shape_cast %139 : vector<1x1x8x256xf32> to vector<8x256xf32>
    %c2_i32_28 = arith.constant 2 : i32
    %141 = tpu.dynamic_rotate %140 by %c2_i32_28 dim 1 : vector<8x256xf32>, i32 -> vector<8x256xf32>
    %cst_29 = arith.constant 0.000000e+00 : f32
    %142 = vector.broadcast %cst_29 : f32 to vector<8x256xf32>
    %143 = arith.select %96, %141, %142 : vector<8x256xi1>, vector<8x256xf32>
    %144 = arith.addf %140, %143 : vector<8x256xf32>
    %c1_i32_30 = arith.constant 1 : i32
    %145 = tpu.dynamic_rotate %140 by %c1_i32_30 dim 1 : vector<8x256xf32>, i32 -> vector<8x256xf32>
    %cst_31 = arith.constant 0.000000e+00 : f32
    %146 = vector.broadcast %cst_31 : f32 to vector<8x256xf32>
    %147 = arith.select %98, %145, %146 : vector<8x256xi1>, vector<8x256xf32>
    %148 = arith.addf %144, %147 : vector<8x256xf32>
    %c255_i32_32 = arith.constant 255 : i32
    %149 = tpu.dynamic_rotate %140 by %c255_i32_32 dim 1 : vector<8x256xf32>, i32 -> vector<8x256xf32>
    %cst_33 = arith.constant 0.000000e+00 : f32
    %150 = vector.broadcast %cst_33 : f32 to vector<8x256xf32>
    %151 = arith.select %100, %149, %150 : vector<8x256xi1>, vector<8x256xf32>
    %152 = arith.addf %148, %151 : vector<8x256xf32>
    %c254_i32_34 = arith.constant 254 : i32
    %153 = tpu.dynamic_rotate %140 by %c254_i32_34 dim 1 : vector<8x256xf32>, i32 -> vector<8x256xf32>
    %cst_35 = arith.constant 0.000000e+00 : f32
    %154 = vector.broadcast %cst_35 : f32 to vector<8x256xf32>
    %155 = arith.select %102, %153, %154 : vector<8x256xi1>, vector<8x256xf32>
    %156 = arith.addf %152, %155 : vector<8x256xf32>
    %c0_36 = arith.constant 0 : index
    %c3_37 = arith.constant 3 : index
    %c0_38 = arith.constant 0 : index
    %c0_39 = arith.constant 0 : index
    %157 = vector.load %arg2[%c0_36, %c3_37, %c0_38, %c0_39] : memref<4x9x8x256xf32, #tpu.memory_space<vmem>>, vector<1x1x8x256xf32>
    %158 = vector.shape_cast %157 : vector<1x1x8x256xf32> to vector<8x256xf32>
    %c2_i32_40 = arith.constant 2 : i32
    %159 = tpu.dynamic_rotate %158 by %c2_i32_40 dim 1 : vector<8x256xf32>, i32 -> vector<8x256xf32>
    %cst_41 = arith.constant 0.000000e+00 : f32
    %160 = vector.broadcast %cst_41 : f32 to vector<8x256xf32>
    %161 = arith.select %96, %159, %160 : vector<8x256xi1>, vector<8x256xf32>
    %162 = arith.addf %158, %161 : vector<8x256xf32>
    %c1_i32_42 = arith.constant 1 : i32
    %163 = tpu.dynamic_rotate %158 by %c1_i32_42 dim 1 : vector<8x256xf32>, i32 -> vector<8x256xf32>
    %cst_43 = arith.constant 0.000000e+00 : f32
    %164 = vector.broadcast %cst_43 : f32 to vector<8x256xf32>
    %165 = arith.select %98, %163, %164 : vector<8x256xi1>, vector<8x256xf32>
    %166 = arith.addf %162, %165 : vector<8x256xf32>
    %c255_i32_44 = arith.constant 255 : i32
    %167 = tpu.dynamic_rotate %158 by %c255_i32_44 dim 1 : vector<8x256xf32>, i32 -> vector<8x256xf32>
    %cst_45 = arith.constant 0.000000e+00 : f32
    %168 = vector.broadcast %cst_45 : f32 to vector<8x256xf32>
    %169 = arith.select %100, %167, %168 : vector<8x256xi1>, vector<8x256xf32>
    %170 = arith.addf %166, %169 : vector<8x256xf32>
    %c254_i32_46 = arith.constant 254 : i32
    %171 = tpu.dynamic_rotate %158 by %c254_i32_46 dim 1 : vector<8x256xf32>, i32 -> vector<8x256xf32>
    %cst_47 = arith.constant 0.000000e+00 : f32
    %172 = vector.broadcast %cst_47 : f32 to vector<8x256xf32>
    %173 = arith.select %102, %171, %172 : vector<8x256xi1>, vector<8x256xf32>
    %174 = arith.addf %170, %173 : vector<8x256xf32>
    %c0_48 = arith.constant 0 : index
    %c4_49 = arith.constant 4 : index
    %c0_50 = arith.constant 0 : index
    %c0_51 = arith.constant 0 : index
    %175 = vector.load %arg2[%c0_48, %c4_49, %c0_50, %c0_51] : memref<4x9x8x256xf32, #tpu.memory_space<vmem>>, vector<1x1x8x256xf32>
    %176 = vector.shape_cast %175 : vector<1x1x8x256xf32> to vector<8x256xf32>
    %c2_i32_52 = arith.constant 2 : i32
    %177 = tpu.dynamic_rotate %176 by %c2_i32_52 dim 1 : vector<8x256xf32>, i32 -> vector<8x256xf32>
    %cst_53 = arith.constant 0.000000e+00 : f32
    %178 = vector.broadcast %cst_53 : f32 to vector<8x256xf32>
    %179 = arith.select %96, %177, %178 : vector<8x256xi1>, vector<8x256xf32>
    %180 = arith.addf %176, %179 : vector<8x256xf32>
    %c1_i32_54 = arith.constant 1 : i32
    %181 = tpu.dynamic_rotate %176 by %c1_i32_54 dim 1 : vector<8x256xf32>, i32 -> vector<8x256xf32>
    %cst_55 = arith.constant 0.000000e+00 : f32
    %182 = vector.broadcast %cst_55 : f32 to vector<8x256xf32>
    %183 = arith.select %98, %181, %182 : vector<8x256xi1>, vector<8x256xf32>
    %184 = arith.addf %180, %183 : vector<8x256xf32>
    %c255_i32_56 = arith.constant 255 : i32
    %185 = tpu.dynamic_rotate %176 by %c255_i32_56 dim 1 : vector<8x256xf32>, i32 -> vector<8x256xf32>
    %cst_57 = arith.constant 0.000000e+00 : f32
    %186 = vector.broadcast %cst_57 : f32 to vector<8x256xf32>
    %187 = arith.select %100, %185, %186 : vector<8x256xi1>, vector<8x256xf32>
    %188 = arith.addf %184, %187 : vector<8x256xf32>
    %c254_i32_58 = arith.constant 254 : i32
    %189 = tpu.dynamic_rotate %176 by %c254_i32_58 dim 1 : vector<8x256xf32>, i32 -> vector<8x256xf32>
    %cst_59 = arith.constant 0.000000e+00 : f32
    %190 = vector.broadcast %cst_59 : f32 to vector<8x256xf32>
    %191 = arith.select %102, %189, %190 : vector<8x256xi1>, vector<8x256xf32>
    %192 = arith.addf %188, %191 : vector<8x256xf32>
    %c0_60 = arith.constant 0 : index
    %c5_61 = arith.constant 5 : index
    %c0_62 = arith.constant 0 : index
    %c0_63 = arith.constant 0 : index
    %193 = vector.load %arg2[%c0_60, %c5_61, %c0_62, %c0_63] : memref<4x9x8x256xf32, #tpu.memory_space<vmem>>, vector<1x1x8x256xf32>
    %194 = vector.shape_cast %193 : vector<1x1x8x256xf32> to vector<8x256xf32>
    %c2_i32_64 = arith.constant 2 : i32
    %195 = tpu.dynamic_rotate %194 by %c2_i32_64 dim 1 : vector<8x256xf32>, i32 -> vector<8x256xf32>
    %cst_65 = arith.constant 0.000000e+00 : f32
    %196 = vector.broadcast %cst_65 : f32 to vector<8x256xf32>
    %197 = arith.select %96, %195, %196 : vector<8x256xi1>, vector<8x256xf32>
    %198 = arith.addf %194, %197 : vector<8x256xf32>
    %c1_i32_66 = arith.constant 1 : i32
    %199 = tpu.dynamic_rotate %194 by %c1_i32_66 dim 1 : vector<8x256xf32>, i32 -> vector<8x256xf32>
    %cst_67 = arith.constant 0.000000e+00 : f32
    %200 = vector.broadcast %cst_67 : f32 to vector<8x256xf32>
    %201 = arith.select %98, %199, %200 : vector<8x256xi1>, vector<8x256xf32>
    %202 = arith.addf %198, %201 : vector<8x256xf32>
    %c255_i32_68 = arith.constant 255 : i32
    %203 = tpu.dynamic_rotate %194 by %c255_i32_68 dim 1 : vector<8x256xf32>, i32 -> vector<8x256xf32>
    %cst_69 = arith.constant 0.000000e+00 : f32
    %204 = vector.broadcast %cst_69 : f32 to vector<8x256xf32>
    %205 = arith.select %100, %203, %204 : vector<8x256xi1>, vector<8x256xf32>
    %206 = arith.addf %202, %205 : vector<8x256xf32>
    %c254_i32_70 = arith.constant 254 : i32
    %207 = tpu.dynamic_rotate %194 by %c254_i32_70 dim 1 : vector<8x256xf32>, i32 -> vector<8x256xf32>
    %cst_71 = arith.constant 0.000000e+00 : f32
    %208 = vector.broadcast %cst_71 : f32 to vector<8x256xf32>
    %209 = arith.select %102, %207, %208 : vector<8x256xi1>, vector<8x256xf32>
    %210 = arith.addf %206, %209 : vector<8x256xf32>
    %c0_72 = arith.constant 0 : index
    %c6_73 = arith.constant 6 : index
    %c0_74 = arith.constant 0 : index
    %c0_75 = arith.constant 0 : index
    %211 = vector.load %arg2[%c0_72, %c6_73, %c0_74, %c0_75] : memref<4x9x8x256xf32, #tpu.memory_space<vmem>>, vector<1x1x8x256xf32>
    %212 = vector.shape_cast %211 : vector<1x1x8x256xf32> to vector<8x256xf32>
    %c2_i32_76 = arith.constant 2 : i32
    %213 = tpu.dynamic_rotate %212 by %c2_i32_76 dim 1 : vector<8x256xf32>, i32 -> vector<8x256xf32>
    %cst_77 = arith.constant 0.000000e+00 : f32
    %214 = vector.broadcast %cst_77 : f32 to vector<8x256xf32>
    %215 = arith.select %96, %213, %214 : vector<8x256xi1>, vector<8x256xf32>
    %216 = arith.addf %212, %215 : vector<8x256xf32>
    %c1_i32_78 = arith.constant 1 : i32
    %217 = tpu.dynamic_rotate %212 by %c1_i32_78 dim 1 : vector<8x256xf32>, i32 -> vector<8x256xf32>
    %cst_79 = arith.constant 0.000000e+00 : f32
    %218 = vector.broadcast %cst_79 : f32 to vector<8x256xf32>
    %219 = arith.select %98, %217, %218 : vector<8x256xi1>, vector<8x256xf32>
    %220 = arith.addf %216, %219 : vector<8x256xf32>
    %c255_i32_80 = arith.constant 255 : i32
    %221 = tpu.dynamic_rotate %212 by %c255_i32_80 dim 1 : vector<8x256xf32>, i32 -> vector<8x256xf32>
    %cst_81 = arith.constant 0.000000e+00 : f32
    %222 = vector.broadcast %cst_81 : f32 to vector<8x256xf32>
    %223 = arith.select %100, %221, %222 : vector<8x256xi1>, vector<8x256xf32>
    %224 = arith.addf %220, %223 : vector<8x256xf32>
    %c254_i32_82 = arith.constant 254 : i32
    %225 = tpu.dynamic_rotate %212 by %c254_i32_82 dim 1 : vector<8x256xf32>, i32 -> vector<8x256xf32>
    %cst_83 = arith.constant 0.000000e+00 : f32
    %226 = vector.broadcast %cst_83 : f32 to vector<8x256xf32>
    %227 = arith.select %102, %225, %226 : vector<8x256xi1>, vector<8x256xf32>
    %228 = arith.addf %224, %227 : vector<8x256xf32>
    %c0_84 = arith.constant 0 : index
    %c7_85 = arith.constant 7 : index
    %c0_86 = arith.constant 0 : index
    %c0_87 = arith.constant 0 : index
    %229 = vector.load %arg2[%c0_84, %c7_85, %c0_86, %c0_87] : memref<4x9x8x256xf32, #tpu.memory_space<vmem>>, vector<1x1x8x256xf32>
    %230 = vector.shape_cast %229 : vector<1x1x8x256xf32> to vector<8x256xf32>
    %c2_i32_88 = arith.constant 2 : i32
    %231 = tpu.dynamic_rotate %230 by %c2_i32_88 dim 1 : vector<8x256xf32>, i32 -> vector<8x256xf32>
    %cst_89 = arith.constant 0.000000e+00 : f32
    %232 = vector.broadcast %cst_89 : f32 to vector<8x256xf32>
    %233 = arith.select %96, %231, %232 : vector<8x256xi1>, vector<8x256xf32>
    %234 = arith.addf %230, %233 : vector<8x256xf32>
    %c1_i32_90 = arith.constant 1 : i32
    %235 = tpu.dynamic_rotate %230 by %c1_i32_90 dim 1 : vector<8x256xf32>, i32 -> vector<8x256xf32>
    %cst_91 = arith.constant 0.000000e+00 : f32
    %236 = vector.broadcast %cst_91 : f32 to vector<8x256xf32>
    %237 = arith.select %98, %235, %236 : vector<8x256xi1>, vector<8x256xf32>
    %238 = arith.addf %234, %237 : vector<8x256xf32>
    %c255_i32_92 = arith.constant 255 : i32
    %239 = tpu.dynamic_rotate %230 by %c255_i32_92 dim 1 : vector<8x256xf32>, i32 -> vector<8x256xf32>
    %cst_93 = arith.constant 0.000000e+00 : f32
    %240 = vector.broadcast %cst_93 : f32 to vector<8x256xf32>
    %241 = arith.select %100, %239, %240 : vector<8x256xi1>, vector<8x256xf32>
    %242 = arith.addf %238, %241 : vector<8x256xf32>
    %c254_i32_94 = arith.constant 254 : i32
    %243 = tpu.dynamic_rotate %230 by %c254_i32_94 dim 1 : vector<8x256xf32>, i32 -> vector<8x256xf32>
    %cst_95 = arith.constant 0.000000e+00 : f32
    %244 = vector.broadcast %cst_95 : f32 to vector<8x256xf32>
    %245 = arith.select %102, %243, %244 : vector<8x256xi1>, vector<8x256xf32>
    %246 = arith.addf %242, %245 : vector<8x256xf32>
    %c0_96 = arith.constant 0 : index
    %c8_97 = arith.constant 8 : index
    %c0_98 = arith.constant 0 : index
    %c0_99 = arith.constant 0 : index
    %247 = vector.load %arg2[%c0_96, %c8_97, %c0_98, %c0_99] : memref<4x9x8x256xf32, #tpu.memory_space<vmem>>, vector<1x1x8x256xf32>
    %248 = vector.shape_cast %247 : vector<1x1x8x256xf32> to vector<8x256xf32>
    %c2_i32_100 = arith.constant 2 : i32
    %249 = tpu.dynamic_rotate %248 by %c2_i32_100 dim 1 : vector<8x256xf32>, i32 -> vector<8x256xf32>
    %cst_101 = arith.constant 0.000000e+00 : f32
    %250 = vector.broadcast %cst_101 : f32 to vector<8x256xf32>
    %251 = arith.select %96, %249, %250 : vector<8x256xi1>, vector<8x256xf32>
    %252 = arith.addf %248, %251 : vector<8x256xf32>
    %c1_i32_102 = arith.constant 1 : i32
    %253 = tpu.dynamic_rotate %248 by %c1_i32_102 dim 1 : vector<8x256xf32>, i32 -> vector<8x256xf32>
    %cst_103 = arith.constant 0.000000e+00 : f32
    %254 = vector.broadcast %cst_103 : f32 to vector<8x256xf32>
    %255 = arith.select %98, %253, %254 : vector<8x256xi1>, vector<8x256xf32>
    %256 = arith.addf %252, %255 : vector<8x256xf32>
    %c255_i32_104 = arith.constant 255 : i32
    %257 = tpu.dynamic_rotate %248 by %c255_i32_104 dim 1 : vector<8x256xf32>, i32 -> vector<8x256xf32>
    %cst_105 = arith.constant 0.000000e+00 : f32
    %258 = vector.broadcast %cst_105 : f32 to vector<8x256xf32>
    %259 = arith.select %100, %257, %258 : vector<8x256xi1>, vector<8x256xf32>
    %260 = arith.addf %256, %259 : vector<8x256xf32>
    %c254_i32_106 = arith.constant 254 : i32
    %261 = tpu.dynamic_rotate %248 by %c254_i32_106 dim 1 : vector<8x256xf32>, i32 -> vector<8x256xf32>
    %cst_107 = arith.constant 0.000000e+00 : f32
    %262 = vector.broadcast %cst_107 : f32 to vector<8x256xf32>
    %263 = arith.select %102, %261, %262 : vector<8x256xi1>, vector<8x256xf32>
    %264 = arith.addf %260, %263 : vector<8x256xf32>
    %265 = vector.broadcast %0 : f32 to vector<8x256xf32>
    %266 = arith.mulf %120, %265 : vector<8x256xf32>
    %267 = vector.broadcast %45 : f32 to vector<8x256xf32>
    %268 = arith.mulf %120, %267 : vector<8x256xf32>
    %269 = vector.broadcast %5 : f32 to vector<8x256xf32>
    %270 = arith.mulf %138, %269 : vector<8x256xf32>
    %271 = arith.addf %266, %270 : vector<8x256xf32>
    %272 = vector.broadcast %50 : f32 to vector<8x256xf32>
    %273 = arith.mulf %138, %272 : vector<8x256xf32>
    %274 = arith.addf %268, %273 : vector<8x256xf32>
    %275 = vector.broadcast %10 : f32 to vector<8x256xf32>
    %276 = arith.mulf %156, %275 : vector<8x256xf32>
    %277 = arith.addf %271, %276 : vector<8x256xf32>
    %278 = vector.broadcast %55 : f32 to vector<8x256xf32>
    %279 = arith.mulf %156, %278 : vector<8x256xf32>
    %280 = arith.addf %274, %279 : vector<8x256xf32>
    %281 = vector.broadcast %15 : f32 to vector<8x256xf32>
    %282 = arith.mulf %174, %281 : vector<8x256xf32>
    %283 = arith.addf %277, %282 : vector<8x256xf32>
    %284 = vector.broadcast %60 : f32 to vector<8x256xf32>
    %285 = arith.mulf %174, %284 : vector<8x256xf32>
    %286 = arith.addf %280, %285 : vector<8x256xf32>
    %287 = vector.broadcast %20 : f32 to vector<8x256xf32>
    %288 = arith.mulf %192, %287 : vector<8x256xf32>
    %289 = arith.addf %283, %288 : vector<8x256xf32>
    %290 = vector.broadcast %65 : f32 to vector<8x256xf32>
    %291 = arith.mulf %192, %290 : vector<8x256xf32>
    %292 = arith.addf %286, %291 : vector<8x256xf32>
    %293 = vector.broadcast %25 : f32 to vector<8x256xf32>
    %294 = arith.mulf %210, %293 : vector<8x256xf32>
    %295 = arith.addf %289, %294 : vector<8x256xf32>
    %296 = vector.broadcast %70 : f32 to vector<8x256xf32>
    %297 = arith.mulf %210, %296 : vector<8x256xf32>
    %298 = arith.addf %292, %297 : vector<8x256xf32>
    %299 = vector.broadcast %30 : f32 to vector<8x256xf32>
    %300 = arith.mulf %228, %299 : vector<8x256xf32>
    %301 = arith.addf %295, %300 : vector<8x256xf32>
    %302 = vector.broadcast %75 : f32 to vector<8x256xf32>
    %303 = arith.mulf %228, %302 : vector<8x256xf32>
    %304 = arith.addf %298, %303 : vector<8x256xf32>
    %305 = vector.broadcast %35 : f32 to vector<8x256xf32>
    %306 = arith.mulf %246, %305 : vector<8x256xf32>
    %307 = arith.addf %301, %306 : vector<8x256xf32>
    %308 = vector.broadcast %80 : f32 to vector<8x256xf32>
    %309 = arith.mulf %246, %308 : vector<8x256xf32>
    %310 = arith.addf %304, %309 : vector<8x256xf32>
    %311 = vector.broadcast %40 : f32 to vector<8x256xf32>
    %312 = arith.mulf %264, %311 : vector<8x256xf32>
    %313 = arith.addf %307, %312 : vector<8x256xf32>
    %314 = vector.broadcast %85 : f32 to vector<8x256xf32>
    %315 = arith.mulf %264, %314 : vector<8x256xf32>
    %316 = arith.addf %310, %315 : vector<8x256xf32>
    %c2_i32_108 = arith.constant 2 : i32
    %317 = tpu.dynamic_rotate %313 by %c2_i32_108 dim 1 : vector<8x256xf32>, i32 -> vector<8x256xf32>
    %cst_109 = arith.constant 0.000000e+00 : f32
    %318 = vector.broadcast %cst_109 : f32 to vector<8x256xf32>
    %319 = arith.select %96, %317, %318 : vector<8x256xi1>, vector<8x256xf32>
    %320 = arith.addf %93, %319 : vector<8x256xf32>
    %c2_i32_110 = arith.constant 2 : i32
    %321 = tpu.dynamic_rotate %316 by %c2_i32_110 dim 1 : vector<8x256xf32>, i32 -> vector<8x256xf32>
    %cst_111 = arith.constant 0.000000e+00 : f32
    %322 = vector.broadcast %cst_111 : f32 to vector<8x256xf32>
    %323 = arith.select %96, %321, %322 : vector<8x256xi1>, vector<8x256xf32>
    %324 = arith.addf %94, %323 : vector<8x256xf32>
    %325 = vector.broadcast %1 : f32 to vector<8x256xf32>
    %326 = arith.mulf %120, %325 : vector<8x256xf32>
    %327 = vector.broadcast %46 : f32 to vector<8x256xf32>
    %328 = arith.mulf %120, %327 : vector<8x256xf32>
    %329 = vector.broadcast %6 : f32 to vector<8x256xf32>
    %330 = arith.mulf %138, %329 : vector<8x256xf32>
    %331 = arith.addf %326, %330 : vector<8x256xf32>
    %332 = vector.broadcast %51 : f32 to vector<8x256xf32>
    %333 = arith.mulf %138, %332 : vector<8x256xf32>
    %334 = arith.addf %328, %333 : vector<8x256xf32>
    %335 = vector.broadcast %11 : f32 to vector<8x256xf32>
    %336 = arith.mulf %156, %335 : vector<8x256xf32>
    %337 = arith.addf %331, %336 : vector<8x256xf32>
    %338 = vector.broadcast %56 : f32 to vector<8x256xf32>
    %339 = arith.mulf %156, %338 : vector<8x256xf32>
    %340 = arith.addf %334, %339 : vector<8x256xf32>
    %341 = vector.broadcast %16 : f32 to vector<8x256xf32>
    %342 = arith.mulf %174, %341 : vector<8x256xf32>
    %343 = arith.addf %337, %342 : vector<8x256xf32>
    %344 = vector.broadcast %61 : f32 to vector<8x256xf32>
    %345 = arith.mulf %174, %344 : vector<8x256xf32>
    %346 = arith.addf %340, %345 : vector<8x256xf32>
    %347 = vector.broadcast %21 : f32 to vector<8x256xf32>
    %348 = arith.mulf %192, %347 : vector<8x256xf32>
    %349 = arith.addf %343, %348 : vector<8x256xf32>
    %350 = vector.broadcast %66 : f32 to vector<8x256xf32>
    %351 = arith.mulf %192, %350 : vector<8x256xf32>
    %352 = arith.addf %346, %351 : vector<8x256xf32>
    %353 = vector.broadcast %26 : f32 to vector<8x256xf32>
    %354 = arith.mulf %210, %353 : vector<8x256xf32>
    %355 = arith.addf %349, %354 : vector<8x256xf32>
    %356 = vector.broadcast %71 : f32 to vector<8x256xf32>
    %357 = arith.mulf %210, %356 : vector<8x256xf32>
    %358 = arith.addf %352, %357 : vector<8x256xf32>
    %359 = vector.broadcast %31 : f32 to vector<8x256xf32>
    %360 = arith.mulf %228, %359 : vector<8x256xf32>
    %361 = arith.addf %355, %360 : vector<8x256xf32>
    %362 = vector.broadcast %76 : f32 to vector<8x256xf32>
    %363 = arith.mulf %228, %362 : vector<8x256xf32>
    %364 = arith.addf %358, %363 : vector<8x256xf32>
    %365 = vector.broadcast %36 : f32 to vector<8x256xf32>
    %366 = arith.mulf %246, %365 : vector<8x256xf32>
    %367 = arith.addf %361, %366 : vector<8x256xf32>
    %368 = vector.broadcast %81 : f32 to vector<8x256xf32>
    %369 = arith.mulf %246, %368 : vector<8x256xf32>
    %370 = arith.addf %364, %369 : vector<8x256xf32>
    %371 = vector.broadcast %41 : f32 to vector<8x256xf32>
    %372 = arith.mulf %264, %371 : vector<8x256xf32>
    %373 = arith.addf %367, %372 : vector<8x256xf32>
    %374 = vector.broadcast %86 : f32 to vector<8x256xf32>
    %375 = arith.mulf %264, %374 : vector<8x256xf32>
    %376 = arith.addf %370, %375 : vector<8x256xf32>
    %c1_i32_112 = arith.constant 1 : i32
    %377 = tpu.dynamic_rotate %373 by %c1_i32_112 dim 1 : vector<8x256xf32>, i32 -> vector<8x256xf32>
    %cst_113 = arith.constant 0.000000e+00 : f32
    %378 = vector.broadcast %cst_113 : f32 to vector<8x256xf32>
    %379 = arith.select %98, %377, %378 : vector<8x256xi1>, vector<8x256xf32>
    %380 = arith.addf %320, %379 : vector<8x256xf32>
    %c1_i32_114 = arith.constant 1 : i32
    %381 = tpu.dynamic_rotate %376 by %c1_i32_114 dim 1 : vector<8x256xf32>, i32 -> vector<8x256xf32>
    %cst_115 = arith.constant 0.000000e+00 : f32
    %382 = vector.broadcast %cst_115 : f32 to vector<8x256xf32>
    %383 = arith.select %98, %381, %382 : vector<8x256xi1>, vector<8x256xf32>
    %384 = arith.addf %324, %383 : vector<8x256xf32>
    %385 = vector.broadcast %2 : f32 to vector<8x256xf32>
    %386 = arith.mulf %120, %385 : vector<8x256xf32>
    %387 = vector.broadcast %47 : f32 to vector<8x256xf32>
    %388 = arith.mulf %120, %387 : vector<8x256xf32>
    %389 = vector.broadcast %7 : f32 to vector<8x256xf32>
    %390 = arith.mulf %138, %389 : vector<8x256xf32>
    %391 = arith.addf %386, %390 : vector<8x256xf32>
    %392 = vector.broadcast %52 : f32 to vector<8x256xf32>
    %393 = arith.mulf %138, %392 : vector<8x256xf32>
    %394 = arith.addf %388, %393 : vector<8x256xf32>
    %395 = vector.broadcast %12 : f32 to vector<8x256xf32>
    %396 = arith.mulf %156, %395 : vector<8x256xf32>
    %397 = arith.addf %391, %396 : vector<8x256xf32>
    %398 = vector.broadcast %57 : f32 to vector<8x256xf32>
    %399 = arith.mulf %156, %398 : vector<8x256xf32>
    %400 = arith.addf %394, %399 : vector<8x256xf32>
    %401 = vector.broadcast %17 : f32 to vector<8x256xf32>
    %402 = arith.mulf %174, %401 : vector<8x256xf32>
    %403 = arith.addf %397, %402 : vector<8x256xf32>
    %404 = vector.broadcast %62 : f32 to vector<8x256xf32>
    %405 = arith.mulf %174, %404 : vector<8x256xf32>
    %406 = arith.addf %400, %405 : vector<8x256xf32>
    %407 = vector.broadcast %22 : f32 to vector<8x256xf32>
    %408 = arith.mulf %192, %407 : vector<8x256xf32>
    %409 = arith.addf %403, %408 : vector<8x256xf32>
    %410 = vector.broadcast %67 : f32 to vector<8x256xf32>
    %411 = arith.mulf %192, %410 : vector<8x256xf32>
    %412 = arith.addf %406, %411 : vector<8x256xf32>
    %413 = vector.broadcast %27 : f32 to vector<8x256xf32>
    %414 = arith.mulf %210, %413 : vector<8x256xf32>
    %415 = arith.addf %409, %414 : vector<8x256xf32>
    %416 = vector.broadcast %72 : f32 to vector<8x256xf32>
    %417 = arith.mulf %210, %416 : vector<8x256xf32>
    %418 = arith.addf %412, %417 : vector<8x256xf32>
    %419 = vector.broadcast %32 : f32 to vector<8x256xf32>
    %420 = arith.mulf %228, %419 : vector<8x256xf32>
    %421 = arith.addf %415, %420 : vector<8x256xf32>
    %422 = vector.broadcast %77 : f32 to vector<8x256xf32>
    %423 = arith.mulf %228, %422 : vector<8x256xf32>
    %424 = arith.addf %418, %423 : vector<8x256xf32>
    %425 = vector.broadcast %37 : f32 to vector<8x256xf32>
    %426 = arith.mulf %246, %425 : vector<8x256xf32>
    %427 = arith.addf %421, %426 : vector<8x256xf32>
    %428 = vector.broadcast %82 : f32 to vector<8x256xf32>
    %429 = arith.mulf %246, %428 : vector<8x256xf32>
    %430 = arith.addf %424, %429 : vector<8x256xf32>
    %431 = vector.broadcast %42 : f32 to vector<8x256xf32>
    %432 = arith.mulf %264, %431 : vector<8x256xf32>
    %433 = arith.addf %427, %432 : vector<8x256xf32>
    %434 = vector.broadcast %87 : f32 to vector<8x256xf32>
    %435 = arith.mulf %264, %434 : vector<8x256xf32>
    %436 = arith.addf %430, %435 : vector<8x256xf32>
    %437 = arith.addf %380, %433 : vector<8x256xf32>
    %438 = arith.addf %384, %436 : vector<8x256xf32>
    %439 = vector.broadcast %3 : f32 to vector<8x256xf32>
    %440 = arith.mulf %120, %439 : vector<8x256xf32>
    %441 = vector.broadcast %48 : f32 to vector<8x256xf32>
    %442 = arith.mulf %120, %441 : vector<8x256xf32>
    %443 = vector.broadcast %8 : f32 to vector<8x256xf32>
    %444 = arith.mulf %138, %443 : vector<8x256xf32>
    %445 = arith.addf %440, %444 : vector<8x256xf32>
    %446 = vector.broadcast %53 : f32 to vector<8x256xf32>
    %447 = arith.mulf %138, %446 : vector<8x256xf32>
    %448 = arith.addf %442, %447 : vector<8x256xf32>
    %449 = vector.broadcast %13 : f32 to vector<8x256xf32>
    %450 = arith.mulf %156, %449 : vector<8x256xf32>
    %451 = arith.addf %445, %450 : vector<8x256xf32>
    %452 = vector.broadcast %58 : f32 to vector<8x256xf32>
    %453 = arith.mulf %156, %452 : vector<8x256xf32>
    %454 = arith.addf %448, %453 : vector<8x256xf32>
    %455 = vector.broadcast %18 : f32 to vector<8x256xf32>
    %456 = arith.mulf %174, %455 : vector<8x256xf32>
    %457 = arith.addf %451, %456 : vector<8x256xf32>
    %458 = vector.broadcast %63 : f32 to vector<8x256xf32>
    %459 = arith.mulf %174, %458 : vector<8x256xf32>
    %460 = arith.addf %454, %459 : vector<8x256xf32>
    %461 = vector.broadcast %23 : f32 to vector<8x256xf32>
    %462 = arith.mulf %192, %461 : vector<8x256xf32>
    %463 = arith.addf %457, %462 : vector<8x256xf32>
    %464 = vector.broadcast %68 : f32 to vector<8x256xf32>
    %465 = arith.mulf %192, %464 : vector<8x256xf32>
    %466 = arith.addf %460, %465 : vector<8x256xf32>
    %467 = vector.broadcast %28 : f32 to vector<8x256xf32>
    %468 = arith.mulf %210, %467 : vector<8x256xf32>
    %469 = arith.addf %463, %468 : vector<8x256xf32>
    %470 = vector.broadcast %73 : f32 to vector<8x256xf32>
    %471 = arith.mulf %210, %470 : vector<8x256xf32>
    %472 = arith.addf %466, %471 : vector<8x256xf32>
    %473 = vector.broadcast %33 : f32 to vector<8x256xf32>
    %474 = arith.mulf %228, %473 : vector<8x256xf32>
    %475 = arith.addf %469, %474 : vector<8x256xf32>
    %476 = vector.broadcast %78 : f32 to vector<8x256xf32>
    %477 = arith.mulf %228, %476 : vector<8x256xf32>
    %478 = arith.addf %472, %477 : vector<8x256xf32>
    %479 = vector.broadcast %38 : f32 to vector<8x256xf32>
    %480 = arith.mulf %246, %479 : vector<8x256xf32>
    %481 = arith.addf %475, %480 : vector<8x256xf32>
    %482 = vector.broadcast %83 : f32 to vector<8x256xf32>
    %483 = arith.mulf %246, %482 : vector<8x256xf32>
    %484 = arith.addf %478, %483 : vector<8x256xf32>
    %485 = vector.broadcast %43 : f32 to vector<8x256xf32>
    %486 = arith.mulf %264, %485 : vector<8x256xf32>
    %487 = arith.addf %481, %486 : vector<8x256xf32>
    %488 = vector.broadcast %88 : f32 to vector<8x256xf32>
    %489 = arith.mulf %264, %488 : vector<8x256xf32>
    %490 = arith.addf %484, %489 : vector<8x256xf32>
    %c255_i32_116 = arith.constant 255 : i32
    %491 = tpu.dynamic_rotate %487 by %c255_i32_116 dim 1 : vector<8x256xf32>, i32 -> vector<8x256xf32>
    %cst_117 = arith.constant 0.000000e+00 : f32
    %492 = vector.broadcast %cst_117 : f32 to vector<8x256xf32>
    %493 = arith.select %100, %491, %492 : vector<8x256xi1>, vector<8x256xf32>
    %494 = arith.addf %437, %493 : vector<8x256xf32>
    %c255_i32_118 = arith.constant 255 : i32
    %495 = tpu.dynamic_rotate %490 by %c255_i32_118 dim 1 : vector<8x256xf32>, i32 -> vector<8x256xf32>
    %cst_119 = arith.constant 0.000000e+00 : f32
    %496 = vector.broadcast %cst_119 : f32 to vector<8x256xf32>
    %497 = arith.select %100, %495, %496 : vector<8x256xi1>, vector<8x256xf32>
    %498 = arith.addf %438, %497 : vector<8x256xf32>
    %499 = vector.broadcast %4 : f32 to vector<8x256xf32>
    %500 = arith.mulf %120, %499 : vector<8x256xf32>
    %501 = vector.broadcast %49 : f32 to vector<8x256xf32>
    %502 = arith.mulf %120, %501 : vector<8x256xf32>
    %503 = vector.broadcast %9 : f32 to vector<8x256xf32>
    %504 = arith.mulf %138, %503 : vector<8x256xf32>
    %505 = arith.addf %500, %504 : vector<8x256xf32>
    %506 = vector.broadcast %54 : f32 to vector<8x256xf32>
    %507 = arith.mulf %138, %506 : vector<8x256xf32>
    %508 = arith.addf %502, %507 : vector<8x256xf32>
    %509 = vector.broadcast %14 : f32 to vector<8x256xf32>
    %510 = arith.mulf %156, %509 : vector<8x256xf32>
    %511 = arith.addf %505, %510 : vector<8x256xf32>
    %512 = vector.broadcast %59 : f32 to vector<8x256xf32>
    %513 = arith.mulf %156, %512 : vector<8x256xf32>
    %514 = arith.addf %508, %513 : vector<8x256xf32>
    %515 = vector.broadcast %19 : f32 to vector<8x256xf32>
    %516 = arith.mulf %174, %515 : vector<8x256xf32>
    %517 = arith.addf %511, %516 : vector<8x256xf32>
    %518 = vector.broadcast %64 : f32 to vector<8x256xf32>
    %519 = arith.mulf %174, %518 : vector<8x256xf32>
    %520 = arith.addf %514, %519 : vector<8x256xf32>
    %521 = vector.broadcast %24 : f32 to vector<8x256xf32>
    %522 = arith.mulf %192, %521 : vector<8x256xf32>
    %523 = arith.addf %517, %522 : vector<8x256xf32>
    %524 = vector.broadcast %69 : f32 to vector<8x256xf32>
    %525 = arith.mulf %192, %524 : vector<8x256xf32>
    %526 = arith.addf %520, %525 : vector<8x256xf32>
    %527 = vector.broadcast %29 : f32 to vector<8x256xf32>
    %528 = arith.mulf %210, %527 : vector<8x256xf32>
    %529 = arith.addf %523, %528 : vector<8x256xf32>
    %530 = vector.broadcast %74 : f32 to vector<8x256xf32>
    %531 = arith.mulf %210, %530 : vector<8x256xf32>
    %532 = arith.addf %526, %531 : vector<8x256xf32>
    %533 = vector.broadcast %34 : f32 to vector<8x256xf32>
    %534 = arith.mulf %228, %533 : vector<8x256xf32>
    %535 = arith.addf %529, %534 : vector<8x256xf32>
    %536 = vector.broadcast %79 : f32 to vector<8x256xf32>
    %537 = arith.mulf %228, %536 : vector<8x256xf32>
    %538 = arith.addf %532, %537 : vector<8x256xf32>
    %539 = vector.broadcast %39 : f32 to vector<8x256xf32>
    %540 = arith.mulf %246, %539 : vector<8x256xf32>
    %541 = arith.addf %535, %540 : vector<8x256xf32>
    %542 = vector.broadcast %84 : f32 to vector<8x256xf32>
    %543 = arith.mulf %246, %542 : vector<8x256xf32>
    %544 = arith.addf %538, %543 : vector<8x256xf32>
    %545 = vector.broadcast %44 : f32 to vector<8x256xf32>
    %546 = arith.mulf %264, %545 : vector<8x256xf32>
    %547 = arith.addf %541, %546 : vector<8x256xf32>
    %548 = vector.broadcast %89 : f32 to vector<8x256xf32>
    %549 = arith.mulf %264, %548 : vector<8x256xf32>
    %550 = arith.addf %544, %549 : vector<8x256xf32>
    %c254_i32_120 = arith.constant 254 : i32
    %551 = tpu.dynamic_rotate %547 by %c254_i32_120 dim 1 : vector<8x256xf32>, i32 -> vector<8x256xf32>
    %cst_121 = arith.constant 0.000000e+00 : f32
    %552 = vector.broadcast %cst_121 : f32 to vector<8x256xf32>
    %553 = arith.select %102, %551, %552 : vector<8x256xi1>, vector<8x256xf32>
    %554 = arith.addf %494, %553 : vector<8x256xf32>
    %c254_i32_122 = arith.constant 254 : i32
    %555 = tpu.dynamic_rotate %550 by %c254_i32_122 dim 1 : vector<8x256xf32>, i32 -> vector<8x256xf32>
    %cst_123 = arith.constant 0.000000e+00 : f32
    %556 = vector.broadcast %cst_123 : f32 to vector<8x256xf32>
    %557 = arith.select %102, %555, %556 : vector<8x256xi1>, vector<8x256xf32>
    %558 = arith.addf %498, %557 : vector<8x256xf32>
    %c32_i32 = arith.constant 32 : i32
    %559 = vector.broadcast %c32_i32 : i32 to vector<8x256xi32>
    %560 = arith.cmpi sge, %90, %559 : vector<8x256xi32>
    %c16_i32 = arith.constant 16 : i32
    %561 = vector.broadcast %c16_i32 : i32 to vector<8x256xi32>
    %562 = arith.cmpi sge, %90, %561 : vector<8x256xi32>
    %c240_i32 = arith.constant 240 : i32
    %563 = vector.broadcast %c240_i32 : i32 to vector<8x256xi32>
    %564 = arith.cmpi slt, %90, %563 : vector<8x256xi32>
    %c224_i32 = arith.constant 224 : i32
    %565 = vector.broadcast %c224_i32 : i32 to vector<8x256xi32>
    %566 = arith.cmpi slt, %90, %565 : vector<8x256xi32>
    %c1_124 = arith.constant 1 : index
    %c0_125 = arith.constant 0 : index
    %c0_126 = arith.constant 0 : index
    %c0_127 = arith.constant 0 : index
    %567 = vector.load %arg2[%c1_124, %c0_125, %c0_126, %c0_127] : memref<4x9x8x256xf32, #tpu.memory_space<vmem>>, vector<1x1x8x256xf32>
    %568 = vector.shape_cast %567 : vector<1x1x8x256xf32> to vector<8x256xf32>
    %c32_i32_128 = arith.constant 32 : i32
    %569 = tpu.dynamic_rotate %568 by %c32_i32_128 dim 1 : vector<8x256xf32>, i32 -> vector<8x256xf32>
    %cst_129 = arith.constant 0.000000e+00 : f32
    %570 = vector.broadcast %cst_129 : f32 to vector<8x256xf32>
    %571 = arith.select %560, %569, %570 : vector<8x256xi1>, vector<8x256xf32>
    %572 = arith.addf %568, %571 : vector<8x256xf32>
    %c16_i32_130 = arith.constant 16 : i32
    %573 = tpu.dynamic_rotate %568 by %c16_i32_130 dim 1 : vector<8x256xf32>, i32 -> vector<8x256xf32>
    %cst_131 = arith.constant 0.000000e+00 : f32
    %574 = vector.broadcast %cst_131 : f32 to vector<8x256xf32>
    %575 = arith.select %562, %573, %574 : vector<8x256xi1>, vector<8x256xf32>
    %576 = arith.addf %572, %575 : vector<8x256xf32>
    %c240_i32_132 = arith.constant 240 : i32
    %577 = tpu.dynamic_rotate %568 by %c240_i32_132 dim 1 : vector<8x256xf32>, i32 -> vector<8x256xf32>
    %cst_133 = arith.constant 0.000000e+00 : f32
    %578 = vector.broadcast %cst_133 : f32 to vector<8x256xf32>
    %579 = arith.select %564, %577, %578 : vector<8x256xi1>, vector<8x256xf32>
    %580 = arith.addf %576, %579 : vector<8x256xf32>
    %c224_i32_134 = arith.constant 224 : i32
    %581 = tpu.dynamic_rotate %568 by %c224_i32_134 dim 1 : vector<8x256xf32>, i32 -> vector<8x256xf32>
    %cst_135 = arith.constant 0.000000e+00 : f32
    %582 = vector.broadcast %cst_135 : f32 to vector<8x256xf32>
    %583 = arith.select %566, %581, %582 : vector<8x256xi1>, vector<8x256xf32>
    %584 = arith.addf %580, %583 : vector<8x256xf32>
    %c1_136 = arith.constant 1 : index
    %c1_137 = arith.constant 1 : index
    %c0_138 = arith.constant 0 : index
    %c0_139 = arith.constant 0 : index
    %585 = vector.load %arg2[%c1_136, %c1_137, %c0_138, %c0_139] : memref<4x9x8x256xf32, #tpu.memory_space<vmem>>, vector<1x1x8x256xf32>
    %586 = vector.shape_cast %585 : vector<1x1x8x256xf32> to vector<8x256xf32>
    %c32_i32_140 = arith.constant 32 : i32
    %587 = tpu.dynamic_rotate %586 by %c32_i32_140 dim 1 : vector<8x256xf32>, i32 -> vector<8x256xf32>
    %cst_141 = arith.constant 0.000000e+00 : f32
    %588 = vector.broadcast %cst_141 : f32 to vector<8x256xf32>
    %589 = arith.select %560, %587, %588 : vector<8x256xi1>, vector<8x256xf32>
    %590 = arith.addf %586, %589 : vector<8x256xf32>
    %c16_i32_142 = arith.constant 16 : i32
    %591 = tpu.dynamic_rotate %586 by %c16_i32_142 dim 1 : vector<8x256xf32>, i32 -> vector<8x256xf32>
    %cst_143 = arith.constant 0.000000e+00 : f32
    %592 = vector.broadcast %cst_143 : f32 to vector<8x256xf32>
    %593 = arith.select %562, %591, %592 : vector<8x256xi1>, vector<8x256xf32>
    %594 = arith.addf %590, %593 : vector<8x256xf32>
    %c240_i32_144 = arith.constant 240 : i32
    %595 = tpu.dynamic_rotate %586 by %c240_i32_144 dim 1 : vector<8x256xf32>, i32 -> vector<8x256xf32>
    %cst_145 = arith.constant 0.000000e+00 : f32
    %596 = vector.broadcast %cst_145 : f32 to vector<8x256xf32>
    %597 = arith.select %564, %595, %596 : vector<8x256xi1>, vector<8x256xf32>
    %598 = arith.addf %594, %597 : vector<8x256xf32>
    %c224_i32_146 = arith.constant 224 : i32
    %599 = tpu.dynamic_rotate %586 by %c224_i32_146 dim 1 : vector<8x256xf32>, i32 -> vector<8x256xf32>
    %cst_147 = arith.constant 0.000000e+00 : f32
    %600 = vector.broadcast %cst_147 : f32 to vector<8x256xf32>
    %601 = arith.select %566, %599, %600 : vector<8x256xi1>, vector<8x256xf32>
    %602 = arith.addf %598, %601 : vector<8x256xf32>
    %c1_148 = arith.constant 1 : index
    %c2_149 = arith.constant 2 : index
    %c0_150 = arith.constant 0 : index
    %c0_151 = arith.constant 0 : index
    %603 = vector.load %arg2[%c1_148, %c2_149, %c0_150, %c0_151] : memref<4x9x8x256xf32, #tpu.memory_space<vmem>>, vector<1x1x8x256xf32>
    %604 = vector.shape_cast %603 : vector<1x1x8x256xf32> to vector<8x256xf32>
    %c32_i32_152 = arith.constant 32 : i32
    %605 = tpu.dynamic_rotate %604 by %c32_i32_152 dim 1 : vector<8x256xf32>, i32 -> vector<8x256xf32>
    %cst_153 = arith.constant 0.000000e+00 : f32
    %606 = vector.broadcast %cst_153 : f32 to vector<8x256xf32>
    %607 = arith.select %560, %605, %606 : vector<8x256xi1>, vector<8x256xf32>
    %608 = arith.addf %604, %607 : vector<8x256xf32>
    %c16_i32_154 = arith.constant 16 : i32
    %609 = tpu.dynamic_rotate %604 by %c16_i32_154 dim 1 : vector<8x256xf32>, i32 -> vector<8x256xf32>
    %cst_155 = arith.constant 0.000000e+00 : f32
    %610 = vector.broadcast %cst_155 : f32 to vector<8x256xf32>
    %611 = arith.select %562, %609, %610 : vector<8x256xi1>, vector<8x256xf32>
    %612 = arith.addf %608, %611 : vector<8x256xf32>
    %c240_i32_156 = arith.constant 240 : i32
    %613 = tpu.dynamic_rotate %604 by %c240_i32_156 dim 1 : vector<8x256xf32>, i32 -> vector<8x256xf32>
    %cst_157 = arith.constant 0.000000e+00 : f32
    %614 = vector.broadcast %cst_157 : f32 to vector<8x256xf32>
    %615 = arith.select %564, %613, %614 : vector<8x256xi1>, vector<8x256xf32>
    %616 = arith.addf %612, %615 : vector<8x256xf32>
    %c224_i32_158 = arith.constant 224 : i32
    %617 = tpu.dynamic_rotate %604 by %c224_i32_158 dim 1 : vector<8x256xf32>, i32 -> vector<8x256xf32>
    %cst_159 = arith.constant 0.000000e+00 : f32
    %618 = vector.broadcast %cst_159 : f32 to vector<8x256xf32>
    %619 = arith.select %566, %617, %618 : vector<8x256xi1>, vector<8x256xf32>
    %620 = arith.addf %616, %619 : vector<8x256xf32>
    %c1_160 = arith.constant 1 : index
    %c3_161 = arith.constant 3 : index
    %c0_162 = arith.constant 0 : index
    %c0_163 = arith.constant 0 : index
    %621 = vector.load %arg2[%c1_160, %c3_161, %c0_162, %c0_163] : memref<4x9x8x256xf32, #tpu.memory_space<vmem>>, vector<1x1x8x256xf32>
    %622 = vector.shape_cast %621 : vector<1x1x8x256xf32> to vector<8x256xf32>
    %c32_i32_164 = arith.constant 32 : i32
    %623 = tpu.dynamic_rotate %622 by %c32_i32_164 dim 1 : vector<8x256xf32>, i32 -> vector<8x256xf32>
    %cst_165 = arith.constant 0.000000e+00 : f32
    %624 = vector.broadcast %cst_165 : f32 to vector<8x256xf32>
    %625 = arith.select %560, %623, %624 : vector<8x256xi1>, vector<8x256xf32>
    %626 = arith.addf %622, %625 : vector<8x256xf32>
    %c16_i32_166 = arith.constant 16 : i32
    %627 = tpu.dynamic_rotate %622 by %c16_i32_166 dim 1 : vector<8x256xf32>, i32 -> vector<8x256xf32>
    %cst_167 = arith.constant 0.000000e+00 : f32
    %628 = vector.broadcast %cst_167 : f32 to vector<8x256xf32>
    %629 = arith.select %562, %627, %628 : vector<8x256xi1>, vector<8x256xf32>
    %630 = arith.addf %626, %629 : vector<8x256xf32>
    %c240_i32_168 = arith.constant 240 : i32
    %631 = tpu.dynamic_rotate %622 by %c240_i32_168 dim 1 : vector<8x256xf32>, i32 -> vector<8x256xf32>
    %cst_169 = arith.constant 0.000000e+00 : f32
    %632 = vector.broadcast %cst_169 : f32 to vector<8x256xf32>
    %633 = arith.select %564, %631, %632 : vector<8x256xi1>, vector<8x256xf32>
    %634 = arith.addf %630, %633 : vector<8x256xf32>
    %c224_i32_170 = arith.constant 224 : i32
    %635 = tpu.dynamic_rotate %622 by %c224_i32_170 dim 1 : vector<8x256xf32>, i32 -> vector<8x256xf32>
    %cst_171 = arith.constant 0.000000e+00 : f32
    %636 = vector.broadcast %cst_171 : f32 to vector<8x256xf32>
    %637 = arith.select %566, %635, %636 : vector<8x256xi1>, vector<8x256xf32>
    %638 = arith.addf %634, %637 : vector<8x256xf32>
    %c1_172 = arith.constant 1 : index
    %c4_173 = arith.constant 4 : index
    %c0_174 = arith.constant 0 : index
    %c0_175 = arith.constant 0 : index
    %639 = vector.load %arg2[%c1_172, %c4_173, %c0_174, %c0_175] : memref<4x9x8x256xf32, #tpu.memory_space<vmem>>, vector<1x1x8x256xf32>
    %640 = vector.shape_cast %639 : vector<1x1x8x256xf32> to vector<8x256xf32>
    %c32_i32_176 = arith.constant 32 : i32
    %641 = tpu.dynamic_rotate %640 by %c32_i32_176 dim 1 : vector<8x256xf32>, i32 -> vector<8x256xf32>
    %cst_177 = arith.constant 0.000000e+00 : f32
    %642 = vector.broadcast %cst_177 : f32 to vector<8x256xf32>
    %643 = arith.select %560, %641, %642 : vector<8x256xi1>, vector<8x256xf32>
    %644 = arith.addf %640, %643 : vector<8x256xf32>
    %c16_i32_178 = arith.constant 16 : i32
    %645 = tpu.dynamic_rotate %640 by %c16_i32_178 dim 1 : vector<8x256xf32>, i32 -> vector<8x256xf32>
    %cst_179 = arith.constant 0.000000e+00 : f32
    %646 = vector.broadcast %cst_179 : f32 to vector<8x256xf32>
    %647 = arith.select %562, %645, %646 : vector<8x256xi1>, vector<8x256xf32>
    %648 = arith.addf %644, %647 : vector<8x256xf32>
    %c240_i32_180 = arith.constant 240 : i32
    %649 = tpu.dynamic_rotate %640 by %c240_i32_180 dim 1 : vector<8x256xf32>, i32 -> vector<8x256xf32>
    %cst_181 = arith.constant 0.000000e+00 : f32
    %650 = vector.broadcast %cst_181 : f32 to vector<8x256xf32>
    %651 = arith.select %564, %649, %650 : vector<8x256xi1>, vector<8x256xf32>
    %652 = arith.addf %648, %651 : vector<8x256xf32>
    %c224_i32_182 = arith.constant 224 : i32
    %653 = tpu.dynamic_rotate %640 by %c224_i32_182 dim 1 : vector<8x256xf32>, i32 -> vector<8x256xf32>
    %cst_183 = arith.constant 0.000000e+00 : f32
    %654 = vector.broadcast %cst_183 : f32 to vector<8x256xf32>
    %655 = arith.select %566, %653, %654 : vector<8x256xi1>, vector<8x256xf32>
    %656 = arith.addf %652, %655 : vector<8x256xf32>
    %c1_184 = arith.constant 1 : index
    %c5_185 = arith.constant 5 : index
    %c0_186 = arith.constant 0 : index
    %c0_187 = arith.constant 0 : index
    %657 = vector.load %arg2[%c1_184, %c5_185, %c0_186, %c0_187] : memref<4x9x8x256xf32, #tpu.memory_space<vmem>>, vector<1x1x8x256xf32>
    %658 = vector.shape_cast %657 : vector<1x1x8x256xf32> to vector<8x256xf32>
    %c32_i32_188 = arith.constant 32 : i32
    %659 = tpu.dynamic_rotate %658 by %c32_i32_188 dim 1 : vector<8x256xf32>, i32 -> vector<8x256xf32>
    %cst_189 = arith.constant 0.000000e+00 : f32
    %660 = vector.broadcast %cst_189 : f32 to vector<8x256xf32>
    %661 = arith.select %560, %659, %660 : vector<8x256xi1>, vector<8x256xf32>
    %662 = arith.addf %658, %661 : vector<8x256xf32>
    %c16_i32_190 = arith.constant 16 : i32
    %663 = tpu.dynamic_rotate %658 by %c16_i32_190 dim 1 : vector<8x256xf32>, i32 -> vector<8x256xf32>
    %cst_191 = arith.constant 0.000000e+00 : f32
    %664 = vector.broadcast %cst_191 : f32 to vector<8x256xf32>
    %665 = arith.select %562, %663, %664 : vector<8x256xi1>, vector<8x256xf32>
    %666 = arith.addf %662, %665 : vector<8x256xf32>
    %c240_i32_192 = arith.constant 240 : i32
    %667 = tpu.dynamic_rotate %658 by %c240_i32_192 dim 1 : vector<8x256xf32>, i32 -> vector<8x256xf32>
    %cst_193 = arith.constant 0.000000e+00 : f32
    %668 = vector.broadcast %cst_193 : f32 to vector<8x256xf32>
    %669 = arith.select %564, %667, %668 : vector<8x256xi1>, vector<8x256xf32>
    %670 = arith.addf %666, %669 : vector<8x256xf32>
    %c224_i32_194 = arith.constant 224 : i32
    %671 = tpu.dynamic_rotate %658 by %c224_i32_194 dim 1 : vector<8x256xf32>, i32 -> vector<8x256xf32>
    %cst_195 = arith.constant 0.000000e+00 : f32
    %672 = vector.broadcast %cst_195 : f32 to vector<8x256xf32>
    %673 = arith.select %566, %671, %672 : vector<8x256xi1>, vector<8x256xf32>
    %674 = arith.addf %670, %673 : vector<8x256xf32>
    %c1_196 = arith.constant 1 : index
    %c6_197 = arith.constant 6 : index
    %c0_198 = arith.constant 0 : index
    %c0_199 = arith.constant 0 : index
    %675 = vector.load %arg2[%c1_196, %c6_197, %c0_198, %c0_199] : memref<4x9x8x256xf32, #tpu.memory_space<vmem>>, vector<1x1x8x256xf32>
    %676 = vector.shape_cast %675 : vector<1x1x8x256xf32> to vector<8x256xf32>
    %c32_i32_200 = arith.constant 32 : i32
    %677 = tpu.dynamic_rotate %676 by %c32_i32_200 dim 1 : vector<8x256xf32>, i32 -> vector<8x256xf32>
    %cst_201 = arith.constant 0.000000e+00 : f32
    %678 = vector.broadcast %cst_201 : f32 to vector<8x256xf32>
    %679 = arith.select %560, %677, %678 : vector<8x256xi1>, vector<8x256xf32>
    %680 = arith.addf %676, %679 : vector<8x256xf32>
    %c16_i32_202 = arith.constant 16 : i32
    %681 = tpu.dynamic_rotate %676 by %c16_i32_202 dim 1 : vector<8x256xf32>, i32 -> vector<8x256xf32>
    %cst_203 = arith.constant 0.000000e+00 : f32
    %682 = vector.broadcast %cst_203 : f32 to vector<8x256xf32>
    %683 = arith.select %562, %681, %682 : vector<8x256xi1>, vector<8x256xf32>
    %684 = arith.addf %680, %683 : vector<8x256xf32>
    %c240_i32_204 = arith.constant 240 : i32
    %685 = tpu.dynamic_rotate %676 by %c240_i32_204 dim 1 : vector<8x256xf32>, i32 -> vector<8x256xf32>
    %cst_205 = arith.constant 0.000000e+00 : f32
    %686 = vector.broadcast %cst_205 : f32 to vector<8x256xf32>
    %687 = arith.select %564, %685, %686 : vector<8x256xi1>, vector<8x256xf32>
    %688 = arith.addf %684, %687 : vector<8x256xf32>
    %c224_i32_206 = arith.constant 224 : i32
    %689 = tpu.dynamic_rotate %676 by %c224_i32_206 dim 1 : vector<8x256xf32>, i32 -> vector<8x256xf32>
    %cst_207 = arith.constant 0.000000e+00 : f32
    %690 = vector.broadcast %cst_207 : f32 to vector<8x256xf32>
    %691 = arith.select %566, %689, %690 : vector<8x256xi1>, vector<8x256xf32>
    %692 = arith.addf %688, %691 : vector<8x256xf32>
    %c1_208 = arith.constant 1 : index
    %c7_209 = arith.constant 7 : index
    %c0_210 = arith.constant 0 : index
    %c0_211 = arith.constant 0 : index
    %693 = vector.load %arg2[%c1_208, %c7_209, %c0_210, %c0_211] : memref<4x9x8x256xf32, #tpu.memory_space<vmem>>, vector<1x1x8x256xf32>
    %694 = vector.shape_cast %693 : vector<1x1x8x256xf32> to vector<8x256xf32>
    %c32_i32_212 = arith.constant 32 : i32
    %695 = tpu.dynamic_rotate %694 by %c32_i32_212 dim 1 : vector<8x256xf32>, i32 -> vector<8x256xf32>
    %cst_213 = arith.constant 0.000000e+00 : f32
    %696 = vector.broadcast %cst_213 : f32 to vector<8x256xf32>
    %697 = arith.select %560, %695, %696 : vector<8x256xi1>, vector<8x256xf32>
    %698 = arith.addf %694, %697 : vector<8x256xf32>
    %c16_i32_214 = arith.constant 16 : i32
    %699 = tpu.dynamic_rotate %694 by %c16_i32_214 dim 1 : vector<8x256xf32>, i32 -> vector<8x256xf32>
    %cst_215 = arith.constant 0.000000e+00 : f32
    %700 = vector.broadcast %cst_215 : f32 to vector<8x256xf32>
    %701 = arith.select %562, %699, %700 : vector<8x256xi1>, vector<8x256xf32>
    %702 = arith.addf %698, %701 : vector<8x256xf32>
    %c240_i32_216 = arith.constant 240 : i32
    %703 = tpu.dynamic_rotate %694 by %c240_i32_216 dim 1 : vector<8x256xf32>, i32 -> vector<8x256xf32>
    %cst_217 = arith.constant 0.000000e+00 : f32
    %704 = vector.broadcast %cst_217 : f32 to vector<8x256xf32>
    %705 = arith.select %564, %703, %704 : vector<8x256xi1>, vector<8x256xf32>
    %706 = arith.addf %702, %705 : vector<8x256xf32>
    %c224_i32_218 = arith.constant 224 : i32
    %707 = tpu.dynamic_rotate %694 by %c224_i32_218 dim 1 : vector<8x256xf32>, i32 -> vector<8x256xf32>
    %cst_219 = arith.constant 0.000000e+00 : f32
    %708 = vector.broadcast %cst_219 : f32 to vector<8x256xf32>
    %709 = arith.select %566, %707, %708 : vector<8x256xi1>, vector<8x256xf32>
    %710 = arith.addf %706, %709 : vector<8x256xf32>
    %c1_220 = arith.constant 1 : index
    %c8_221 = arith.constant 8 : index
    %c0_222 = arith.constant 0 : index
    %c0_223 = arith.constant 0 : index
    %711 = vector.load %arg2[%c1_220, %c8_221, %c0_222, %c0_223] : memref<4x9x8x256xf32, #tpu.memory_space<vmem>>, vector<1x1x8x256xf32>
    %712 = vector.shape_cast %711 : vector<1x1x8x256xf32> to vector<8x256xf32>
    %c32_i32_224 = arith.constant 32 : i32
    %713 = tpu.dynamic_rotate %712 by %c32_i32_224 dim 1 : vector<8x256xf32>, i32 -> vector<8x256xf32>
    %cst_225 = arith.constant 0.000000e+00 : f32
    %714 = vector.broadcast %cst_225 : f32 to vector<8x256xf32>
    %715 = arith.select %560, %713, %714 : vector<8x256xi1>, vector<8x256xf32>
    %716 = arith.addf %712, %715 : vector<8x256xf32>
    %c16_i32_226 = arith.constant 16 : i32
    %717 = tpu.dynamic_rotate %712 by %c16_i32_226 dim 1 : vector<8x256xf32>, i32 -> vector<8x256xf32>
    %cst_227 = arith.constant 0.000000e+00 : f32
    %718 = vector.broadcast %cst_227 : f32 to vector<8x256xf32>
    %719 = arith.select %562, %717, %718 : vector<8x256xi1>, vector<8x256xf32>
    %720 = arith.addf %716, %719 : vector<8x256xf32>
    %c240_i32_228 = arith.constant 240 : i32
    %721 = tpu.dynamic_rotate %712 by %c240_i32_228 dim 1 : vector<8x256xf32>, i32 -> vector<8x256xf32>
    %cst_229 = arith.constant 0.000000e+00 : f32
    %722 = vector.broadcast %cst_229 : f32 to vector<8x256xf32>
    %723 = arith.select %564, %721, %722 : vector<8x256xi1>, vector<8x256xf32>
    %724 = arith.addf %720, %723 : vector<8x256xf32>
    %c224_i32_230 = arith.constant 224 : i32
    %725 = tpu.dynamic_rotate %712 by %c224_i32_230 dim 1 : vector<8x256xf32>, i32 -> vector<8x256xf32>
    %cst_231 = arith.constant 0.000000e+00 : f32
    %726 = vector.broadcast %cst_231 : f32 to vector<8x256xf32>
    %727 = arith.select %566, %725, %726 : vector<8x256xi1>, vector<8x256xf32>
    %728 = arith.addf %724, %727 : vector<8x256xf32>
    %729 = vector.broadcast %0 : f32 to vector<8x256xf32>
    %730 = arith.mulf %584, %729 : vector<8x256xf32>
    %731 = vector.broadcast %45 : f32 to vector<8x256xf32>
    %732 = arith.mulf %584, %731 : vector<8x256xf32>
    %733 = vector.broadcast %5 : f32 to vector<8x256xf32>
    %734 = arith.mulf %602, %733 : vector<8x256xf32>
    %735 = arith.addf %730, %734 : vector<8x256xf32>
    %736 = vector.broadcast %50 : f32 to vector<8x256xf32>
    %737 = arith.mulf %602, %736 : vector<8x256xf32>
    %738 = arith.addf %732, %737 : vector<8x256xf32>
    %739 = vector.broadcast %10 : f32 to vector<8x256xf32>
    %740 = arith.mulf %620, %739 : vector<8x256xf32>
    %741 = arith.addf %735, %740 : vector<8x256xf32>
    %742 = vector.broadcast %55 : f32 to vector<8x256xf32>
    %743 = arith.mulf %620, %742 : vector<8x256xf32>
    %744 = arith.addf %738, %743 : vector<8x256xf32>
    %745 = vector.broadcast %15 : f32 to vector<8x256xf32>
    %746 = arith.mulf %638, %745 : vector<8x256xf32>
    %747 = arith.addf %741, %746 : vector<8x256xf32>
    %748 = vector.broadcast %60 : f32 to vector<8x256xf32>
    %749 = arith.mulf %638, %748 : vector<8x256xf32>
    %750 = arith.addf %744, %749 : vector<8x256xf32>
    %751 = vector.broadcast %20 : f32 to vector<8x256xf32>
    %752 = arith.mulf %656, %751 : vector<8x256xf32>
    %753 = arith.addf %747, %752 : vector<8x256xf32>
    %754 = vector.broadcast %65 : f32 to vector<8x256xf32>
    %755 = arith.mulf %656, %754 : vector<8x256xf32>
    %756 = arith.addf %750, %755 : vector<8x256xf32>
    %757 = vector.broadcast %25 : f32 to vector<8x256xf32>
    %758 = arith.mulf %674, %757 : vector<8x256xf32>
    %759 = arith.addf %753, %758 : vector<8x256xf32>
    %760 = vector.broadcast %70 : f32 to vector<8x256xf32>
    %761 = arith.mulf %674, %760 : vector<8x256xf32>
    %762 = arith.addf %756, %761 : vector<8x256xf32>
    %763 = vector.broadcast %30 : f32 to vector<8x256xf32>
    %764 = arith.mulf %692, %763 : vector<8x256xf32>
    %765 = arith.addf %759, %764 : vector<8x256xf32>
    %766 = vector.broadcast %75 : f32 to vector<8x256xf32>
    %767 = arith.mulf %692, %766 : vector<8x256xf32>
    %768 = arith.addf %762, %767 : vector<8x256xf32>
    %769 = vector.broadcast %35 : f32 to vector<8x256xf32>
    %770 = arith.mulf %710, %769 : vector<8x256xf32>
    %771 = arith.addf %765, %770 : vector<8x256xf32>
    %772 = vector.broadcast %80 : f32 to vector<8x256xf32>
    %773 = arith.mulf %710, %772 : vector<8x256xf32>
    %774 = arith.addf %768, %773 : vector<8x256xf32>
    %775 = vector.broadcast %40 : f32 to vector<8x256xf32>
    %776 = arith.mulf %728, %775 : vector<8x256xf32>
    %777 = arith.addf %771, %776 : vector<8x256xf32>
    %778 = vector.broadcast %85 : f32 to vector<8x256xf32>
    %779 = arith.mulf %728, %778 : vector<8x256xf32>
    %780 = arith.addf %774, %779 : vector<8x256xf32>
    %c32_i32_232 = arith.constant 32 : i32
    %781 = tpu.dynamic_rotate %777 by %c32_i32_232 dim 1 : vector<8x256xf32>, i32 -> vector<8x256xf32>
    %cst_233 = arith.constant 0.000000e+00 : f32
    %782 = vector.broadcast %cst_233 : f32 to vector<8x256xf32>
    %783 = arith.select %560, %781, %782 : vector<8x256xi1>, vector<8x256xf32>
    %784 = arith.addf %554, %783 : vector<8x256xf32>
    %c32_i32_234 = arith.constant 32 : i32
    %785 = tpu.dynamic_rotate %780 by %c32_i32_234 dim 1 : vector<8x256xf32>, i32 -> vector<8x256xf32>
    %cst_235 = arith.constant 0.000000e+00 : f32
    %786 = vector.broadcast %cst_235 : f32 to vector<8x256xf32>
    %787 = arith.select %560, %785, %786 : vector<8x256xi1>, vector<8x256xf32>
    %788 = arith.addf %558, %787 : vector<8x256xf32>
    %789 = vector.broadcast %1 : f32 to vector<8x256xf32>
    %790 = arith.mulf %584, %789 : vector<8x256xf32>
    %791 = vector.broadcast %46 : f32 to vector<8x256xf32>
    %792 = arith.mulf %584, %791 : vector<8x256xf32>
    %793 = vector.broadcast %6 : f32 to vector<8x256xf32>
    %794 = arith.mulf %602, %793 : vector<8x256xf32>
    %795 = arith.addf %790, %794 : vector<8x256xf32>
    %796 = vector.broadcast %51 : f32 to vector<8x256xf32>
    %797 = arith.mulf %602, %796 : vector<8x256xf32>
    %798 = arith.addf %792, %797 : vector<8x256xf32>
    %799 = vector.broadcast %11 : f32 to vector<8x256xf32>
    %800 = arith.mulf %620, %799 : vector<8x256xf32>
    %801 = arith.addf %795, %800 : vector<8x256xf32>
    %802 = vector.broadcast %56 : f32 to vector<8x256xf32>
    %803 = arith.mulf %620, %802 : vector<8x256xf32>
    %804 = arith.addf %798, %803 : vector<8x256xf32>
    %805 = vector.broadcast %16 : f32 to vector<8x256xf32>
    %806 = arith.mulf %638, %805 : vector<8x256xf32>
    %807 = arith.addf %801, %806 : vector<8x256xf32>
    %808 = vector.broadcast %61 : f32 to vector<8x256xf32>
    %809 = arith.mulf %638, %808 : vector<8x256xf32>
    %810 = arith.addf %804, %809 : vector<8x256xf32>
    %811 = vector.broadcast %21 : f32 to vector<8x256xf32>
    %812 = arith.mulf %656, %811 : vector<8x256xf32>
    %813 = arith.addf %807, %812 : vector<8x256xf32>
    %814 = vector.broadcast %66 : f32 to vector<8x256xf32>
    %815 = arith.mulf %656, %814 : vector<8x256xf32>
    %816 = arith.addf %810, %815 : vector<8x256xf32>
    %817 = vector.broadcast %26 : f32 to vector<8x256xf32>
    %818 = arith.mulf %674, %817 : vector<8x256xf32>
    %819 = arith.addf %813, %818 : vector<8x256xf32>
    %820 = vector.broadcast %71 : f32 to vector<8x256xf32>
    %821 = arith.mulf %674, %820 : vector<8x256xf32>
    %822 = arith.addf %816, %821 : vector<8x256xf32>
    %823 = vector.broadcast %31 : f32 to vector<8x256xf32>
    %824 = arith.mulf %692, %823 : vector<8x256xf32>
    %825 = arith.addf %819, %824 : vector<8x256xf32>
    %826 = vector.broadcast %76 : f32 to vector<8x256xf32>
    %827 = arith.mulf %692, %826 : vector<8x256xf32>
    %828 = arith.addf %822, %827 : vector<8x256xf32>
    %829 = vector.broadcast %36 : f32 to vector<8x256xf32>
    %830 = arith.mulf %710, %829 : vector<8x256xf32>
    %831 = arith.addf %825, %830 : vector<8x256xf32>
    %832 = vector.broadcast %81 : f32 to vector<8x256xf32>
    %833 = arith.mulf %710, %832 : vector<8x256xf32>
    %834 = arith.addf %828, %833 : vector<8x256xf32>
    %835 = vector.broadcast %41 : f32 to vector<8x256xf32>
    %836 = arith.mulf %728, %835 : vector<8x256xf32>
    %837 = arith.addf %831, %836 : vector<8x256xf32>
    %838 = vector.broadcast %86 : f32 to vector<8x256xf32>
    %839 = arith.mulf %728, %838 : vector<8x256xf32>
    %840 = arith.addf %834, %839 : vector<8x256xf32>
    %c16_i32_236 = arith.constant 16 : i32
    %841 = tpu.dynamic_rotate %837 by %c16_i32_236 dim 1 : vector<8x256xf32>, i32 -> vector<8x256xf32>
    %cst_237 = arith.constant 0.000000e+00 : f32
    %842 = vector.broadcast %cst_237 : f32 to vector<8x256xf32>
    %843 = arith.select %562, %841, %842 : vector<8x256xi1>, vector<8x256xf32>
    %844 = arith.addf %784, %843 : vector<8x256xf32>
    %c16_i32_238 = arith.constant 16 : i32
    %845 = tpu.dynamic_rotate %840 by %c16_i32_238 dim 1 : vector<8x256xf32>, i32 -> vector<8x256xf32>
    %cst_239 = arith.constant 0.000000e+00 : f32
    %846 = vector.broadcast %cst_239 : f32 to vector<8x256xf32>
    %847 = arith.select %562, %845, %846 : vector<8x256xi1>, vector<8x256xf32>
    %848 = arith.addf %788, %847 : vector<8x256xf32>
    %849 = vector.broadcast %2 : f32 to vector<8x256xf32>
    %850 = arith.mulf %584, %849 : vector<8x256xf32>
    %851 = vector.broadcast %47 : f32 to vector<8x256xf32>
    %852 = arith.mulf %584, %851 : vector<8x256xf32>
    %853 = vector.broadcast %7 : f32 to vector<8x256xf32>
    %854 = arith.mulf %602, %853 : vector<8x256xf32>
    %855 = arith.addf %850, %854 : vector<8x256xf32>
    %856 = vector.broadcast %52 : f32 to vector<8x256xf32>
    %857 = arith.mulf %602, %856 : vector<8x256xf32>
    %858 = arith.addf %852, %857 : vector<8x256xf32>
    %859 = vector.broadcast %12 : f32 to vector<8x256xf32>
    %860 = arith.mulf %620, %859 : vector<8x256xf32>
    %861 = arith.addf %855, %860 : vector<8x256xf32>
    %862 = vector.broadcast %57 : f32 to vector<8x256xf32>
    %863 = arith.mulf %620, %862 : vector<8x256xf32>
    %864 = arith.addf %858, %863 : vector<8x256xf32>
    %865 = vector.broadcast %17 : f32 to vector<8x256xf32>
    %866 = arith.mulf %638, %865 : vector<8x256xf32>
    %867 = arith.addf %861, %866 : vector<8x256xf32>
    %868 = vector.broadcast %62 : f32 to vector<8x256xf32>
    %869 = arith.mulf %638, %868 : vector<8x256xf32>
    %870 = arith.addf %864, %869 : vector<8x256xf32>
    %871 = vector.broadcast %22 : f32 to vector<8x256xf32>
    %872 = arith.mulf %656, %871 : vector<8x256xf32>
    %873 = arith.addf %867, %872 : vector<8x256xf32>
    %874 = vector.broadcast %67 : f32 to vector<8x256xf32>
    %875 = arith.mulf %656, %874 : vector<8x256xf32>
    %876 = arith.addf %870, %875 : vector<8x256xf32>
    %877 = vector.broadcast %27 : f32 to vector<8x256xf32>
    %878 = arith.mulf %674, %877 : vector<8x256xf32>
    %879 = arith.addf %873, %878 : vector<8x256xf32>
    %880 = vector.broadcast %72 : f32 to vector<8x256xf32>
    %881 = arith.mulf %674, %880 : vector<8x256xf32>
    %882 = arith.addf %876, %881 : vector<8x256xf32>
    %883 = vector.broadcast %32 : f32 to vector<8x256xf32>
    %884 = arith.mulf %692, %883 : vector<8x256xf32>
    %885 = arith.addf %879, %884 : vector<8x256xf32>
    %886 = vector.broadcast %77 : f32 to vector<8x256xf32>
    %887 = arith.mulf %692, %886 : vector<8x256xf32>
    %888 = arith.addf %882, %887 : vector<8x256xf32>
    %889 = vector.broadcast %37 : f32 to vector<8x256xf32>
    %890 = arith.mulf %710, %889 : vector<8x256xf32>
    %891 = arith.addf %885, %890 : vector<8x256xf32>
    %892 = vector.broadcast %82 : f32 to vector<8x256xf32>
    %893 = arith.mulf %710, %892 : vector<8x256xf32>
    %894 = arith.addf %888, %893 : vector<8x256xf32>
    %895 = vector.broadcast %42 : f32 to vector<8x256xf32>
    %896 = arith.mulf %728, %895 : vector<8x256xf32>
    %897 = arith.addf %891, %896 : vector<8x256xf32>
    %898 = vector.broadcast %87 : f32 to vector<8x256xf32>
    %899 = arith.mulf %728, %898 : vector<8x256xf32>
    %900 = arith.addf %894, %899 : vector<8x256xf32>
    %901 = arith.addf %844, %897 : vector<8x256xf32>
    %902 = arith.addf %848, %900 : vector<8x256xf32>
    %903 = vector.broadcast %3 : f32 to vector<8x256xf32>
    %904 = arith.mulf %584, %903 : vector<8x256xf32>
    %905 = vector.broadcast %48 : f32 to vector<8x256xf32>
    %906 = arith.mulf %584, %905 : vector<8x256xf32>
    %907 = vector.broadcast %8 : f32 to vector<8x256xf32>
    %908 = arith.mulf %602, %907 : vector<8x256xf32>
    %909 = arith.addf %904, %908 : vector<8x256xf32>
    %910 = vector.broadcast %53 : f32 to vector<8x256xf32>
    %911 = arith.mulf %602, %910 : vector<8x256xf32>
    %912 = arith.addf %906, %911 : vector<8x256xf32>
    %913 = vector.broadcast %13 : f32 to vector<8x256xf32>
    %914 = arith.mulf %620, %913 : vector<8x256xf32>
    %915 = arith.addf %909, %914 : vector<8x256xf32>
    %916 = vector.broadcast %58 : f32 to vector<8x256xf32>
    %917 = arith.mulf %620, %916 : vector<8x256xf32>
    %918 = arith.addf %912, %917 : vector<8x256xf32>
    %919 = vector.broadcast %18 : f32 to vector<8x256xf32>
    %920 = arith.mulf %638, %919 : vector<8x256xf32>
    %921 = arith.addf %915, %920 : vector<8x256xf32>
    %922 = vector.broadcast %63 : f32 to vector<8x256xf32>
    %923 = arith.mulf %638, %922 : vector<8x256xf32>
    %924 = arith.addf %918, %923 : vector<8x256xf32>
    %925 = vector.broadcast %23 : f32 to vector<8x256xf32>
    %926 = arith.mulf %656, %925 : vector<8x256xf32>
    %927 = arith.addf %921, %926 : vector<8x256xf32>
    %928 = vector.broadcast %68 : f32 to vector<8x256xf32>
    %929 = arith.mulf %656, %928 : vector<8x256xf32>
    %930 = arith.addf %924, %929 : vector<8x256xf32>
    %931 = vector.broadcast %28 : f32 to vector<8x256xf32>
    %932 = arith.mulf %674, %931 : vector<8x256xf32>
    %933 = arith.addf %927, %932 : vector<8x256xf32>
    %934 = vector.broadcast %73 : f32 to vector<8x256xf32>
    %935 = arith.mulf %674, %934 : vector<8x256xf32>
    %936 = arith.addf %930, %935 : vector<8x256xf32>
    %937 = vector.broadcast %33 : f32 to vector<8x256xf32>
    %938 = arith.mulf %692, %937 : vector<8x256xf32>
    %939 = arith.addf %933, %938 : vector<8x256xf32>
    %940 = vector.broadcast %78 : f32 to vector<8x256xf32>
    %941 = arith.mulf %692, %940 : vector<8x256xf32>
    %942 = arith.addf %936, %941 : vector<8x256xf32>
    %943 = vector.broadcast %38 : f32 to vector<8x256xf32>
    %944 = arith.mulf %710, %943 : vector<8x256xf32>
    %945 = arith.addf %939, %944 : vector<8x256xf32>
    %946 = vector.broadcast %83 : f32 to vector<8x256xf32>
    %947 = arith.mulf %710, %946 : vector<8x256xf32>
    %948 = arith.addf %942, %947 : vector<8x256xf32>
    %949 = vector.broadcast %43 : f32 to vector<8x256xf32>
    %950 = arith.mulf %728, %949 : vector<8x256xf32>
    %951 = arith.addf %945, %950 : vector<8x256xf32>
    %952 = vector.broadcast %88 : f32 to vector<8x256xf32>
    %953 = arith.mulf %728, %952 : vector<8x256xf32>
    %954 = arith.addf %948, %953 : vector<8x256xf32>
    %c240_i32_240 = arith.constant 240 : i32
    %955 = tpu.dynamic_rotate %951 by %c240_i32_240 dim 1 : vector<8x256xf32>, i32 -> vector<8x256xf32>
    %cst_241 = arith.constant 0.000000e+00 : f32
    %956 = vector.broadcast %cst_241 : f32 to vector<8x256xf32>
    %957 = arith.select %564, %955, %956 : vector<8x256xi1>, vector<8x256xf32>
    %958 = arith.addf %901, %957 : vector<8x256xf32>
    %c240_i32_242 = arith.constant 240 : i32
    %959 = tpu.dynamic_rotate %954 by %c240_i32_242 dim 1 : vector<8x256xf32>, i32 -> vector<8x256xf32>
    %cst_243 = arith.constant 0.000000e+00 : f32
    %960 = vector.broadcast %cst_243 : f32 to vector<8x256xf32>
    %961 = arith.select %564, %959, %960 : vector<8x256xi1>, vector<8x256xf32>
    %962 = arith.addf %902, %961 : vector<8x256xf32>
    %963 = vector.broadcast %4 : f32 to vector<8x256xf32>
    %964 = arith.mulf %584, %963 : vector<8x256xf32>
    %965 = vector.broadcast %49 : f32 to vector<8x256xf32>
    %966 = arith.mulf %584, %965 : vector<8x256xf32>
    %967 = vector.broadcast %9 : f32 to vector<8x256xf32>
    %968 = arith.mulf %602, %967 : vector<8x256xf32>
    %969 = arith.addf %964, %968 : vector<8x256xf32>
    %970 = vector.broadcast %54 : f32 to vector<8x256xf32>
    %971 = arith.mulf %602, %970 : vector<8x256xf32>
    %972 = arith.addf %966, %971 : vector<8x256xf32>
    %973 = vector.broadcast %14 : f32 to vector<8x256xf32>
    %974 = arith.mulf %620, %973 : vector<8x256xf32>
    %975 = arith.addf %969, %974 : vector<8x256xf32>
    %976 = vector.broadcast %59 : f32 to vector<8x256xf32>
    %977 = arith.mulf %620, %976 : vector<8x256xf32>
    %978 = arith.addf %972, %977 : vector<8x256xf32>
    %979 = vector.broadcast %19 : f32 to vector<8x256xf32>
    %980 = arith.mulf %638, %979 : vector<8x256xf32>
    %981 = arith.addf %975, %980 : vector<8x256xf32>
    %982 = vector.broadcast %64 : f32 to vector<8x256xf32>
    %983 = arith.mulf %638, %982 : vector<8x256xf32>
    %984 = arith.addf %978, %983 : vector<8x256xf32>
    %985 = vector.broadcast %24 : f32 to vector<8x256xf32>
    %986 = arith.mulf %656, %985 : vector<8x256xf32>
    %987 = arith.addf %981, %986 : vector<8x256xf32>
    %988 = vector.broadcast %69 : f32 to vector<8x256xf32>
    %989 = arith.mulf %656, %988 : vector<8x256xf32>
    %990 = arith.addf %984, %989 : vector<8x256xf32>
    %991 = vector.broadcast %29 : f32 to vector<8x256xf32>
    %992 = arith.mulf %674, %991 : vector<8x256xf32>
    %993 = arith.addf %987, %992 : vector<8x256xf32>
    %994 = vector.broadcast %74 : f32 to vector<8x256xf32>
    %995 = arith.mulf %674, %994 : vector<8x256xf32>
    %996 = arith.addf %990, %995 : vector<8x256xf32>
    %997 = vector.broadcast %34 : f32 to vector<8x256xf32>
    %998 = arith.mulf %692, %997 : vector<8x256xf32>
    %999 = arith.addf %993, %998 : vector<8x256xf32>
    %1000 = vector.broadcast %79 : f32 to vector<8x256xf32>
    %1001 = arith.mulf %692, %1000 : vector<8x256xf32>
    %1002 = arith.addf %996, %1001 : vector<8x256xf32>
    %1003 = vector.broadcast %39 : f32 to vector<8x256xf32>
    %1004 = arith.mulf %710, %1003 : vector<8x256xf32>
    %1005 = arith.addf %999, %1004 : vector<8x256xf32>
    %1006 = vector.broadcast %84 : f32 to vector<8x256xf32>
    %1007 = arith.mulf %710, %1006 : vector<8x256xf32>
    %1008 = arith.addf %1002, %1007 : vector<8x256xf32>
    %1009 = vector.broadcast %44 : f32 to vector<8x256xf32>
    %1010 = arith.mulf %728, %1009 : vector<8x256xf32>
    %1011 = arith.addf %1005, %1010 : vector<8x256xf32>
    %1012 = vector.broadcast %89 : f32 to vector<8x256xf32>
    %1013 = arith.mulf %728, %1012 : vector<8x256xf32>
    %1014 = arith.addf %1008, %1013 : vector<8x256xf32>
    %c224_i32_244 = arith.constant 224 : i32
    %1015 = tpu.dynamic_rotate %1011 by %c224_i32_244 dim 1 : vector<8x256xf32>, i32 -> vector<8x256xf32>
    %cst_245 = arith.constant 0.000000e+00 : f32
    %1016 = vector.broadcast %cst_245 : f32 to vector<8x256xf32>
    %1017 = arith.select %566, %1015, %1016 : vector<8x256xi1>, vector<8x256xf32>
    %1018 = arith.addf %958, %1017 : vector<8x256xf32>
    %c224_i32_246 = arith.constant 224 : i32
    %1019 = tpu.dynamic_rotate %1014 by %c224_i32_246 dim 1 : vector<8x256xf32>, i32 -> vector<8x256xf32>
    %cst_247 = arith.constant 0.000000e+00 : f32
    %1020 = vector.broadcast %cst_247 : f32 to vector<8x256xf32>
    %1021 = arith.select %566, %1019, %1020 : vector<8x256xi1>, vector<8x256xf32>
    %1022 = arith.addf %962, %1021 : vector<8x256xf32>
    %c32_i32_248 = arith.constant 32 : i32
    %1023 = vector.broadcast %c32_i32_248 : i32 to vector<8x256xi32>
    %1024 = arith.cmpi sge, %90, %1023 : vector<8x256xi32>
    %c2_i32_249 = arith.constant 2 : i32
    %1025 = vector.broadcast %c2_i32_249 : i32 to vector<8x256xi32>
    %1026 = arith.cmpi sge, %92, %1025 : vector<8x256xi32>
    %1027 = arith.andi %1024, %1026 : vector<8x256xi1>
    %c16_i32_250 = arith.constant 16 : i32
    %1028 = vector.broadcast %c16_i32_250 : i32 to vector<8x256xi32>
    %1029 = arith.cmpi sge, %90, %1028 : vector<8x256xi32>
    %c1_i32_251 = arith.constant 1 : i32
    %1030 = vector.broadcast %c1_i32_251 : i32 to vector<8x256xi32>
    %1031 = arith.cmpi sge, %92, %1030 : vector<8x256xi32>
    %1032 = arith.andi %1029, %1031 : vector<8x256xi1>
    %c240_i32_252 = arith.constant 240 : i32
    %1033 = vector.broadcast %c240_i32_252 : i32 to vector<8x256xi32>
    %1034 = arith.cmpi slt, %90, %1033 : vector<8x256xi32>
    %c15_i32_253 = arith.constant 15 : i32
    %1035 = vector.broadcast %c15_i32_253 : i32 to vector<8x256xi32>
    %1036 = arith.cmpi slt, %92, %1035 : vector<8x256xi32>
    %1037 = arith.andi %1034, %1036 : vector<8x256xi1>
    %c224_i32_254 = arith.constant 224 : i32
    %1038 = vector.broadcast %c224_i32_254 : i32 to vector<8x256xi32>
    %1039 = arith.cmpi slt, %90, %1038 : vector<8x256xi32>
    %c14_i32_255 = arith.constant 14 : i32
    %1040 = vector.broadcast %c14_i32_255 : i32 to vector<8x256xi32>
    %1041 = arith.cmpi slt, %92, %1040 : vector<8x256xi32>
    %1042 = arith.andi %1039, %1041 : vector<8x256xi1>
    %c2_256 = arith.constant 2 : index
    %c0_257 = arith.constant 0 : index
    %c0_258 = arith.constant 0 : index
    %c0_259 = arith.constant 0 : index
    %1043 = vector.load %arg2[%c2_256, %c0_257, %c0_258, %c0_259] : memref<4x9x8x256xf32, #tpu.memory_space<vmem>>, vector<1x1x8x256xf32>
    %1044 = vector.shape_cast %1043 : vector<1x1x8x256xf32> to vector<8x256xf32>
    %c34_i32 = arith.constant 34 : i32
    %1045 = tpu.dynamic_rotate %1044 by %c34_i32 dim 1 : vector<8x256xf32>, i32 -> vector<8x256xf32>
    %cst_260 = arith.constant 0.000000e+00 : f32
    %1046 = vector.broadcast %cst_260 : f32 to vector<8x256xf32>
    %1047 = arith.select %1027, %1045, %1046 : vector<8x256xi1>, vector<8x256xf32>
    %1048 = arith.addf %1044, %1047 : vector<8x256xf32>
    %c17_i32 = arith.constant 17 : i32
    %1049 = tpu.dynamic_rotate %1044 by %c17_i32 dim 1 : vector<8x256xf32>, i32 -> vector<8x256xf32>
    %cst_261 = arith.constant 0.000000e+00 : f32
    %1050 = vector.broadcast %cst_261 : f32 to vector<8x256xf32>
    %1051 = arith.select %1032, %1049, %1050 : vector<8x256xi1>, vector<8x256xf32>
    %1052 = arith.addf %1048, %1051 : vector<8x256xf32>
    %c239_i32 = arith.constant 239 : i32
    %1053 = tpu.dynamic_rotate %1044 by %c239_i32 dim 1 : vector<8x256xf32>, i32 -> vector<8x256xf32>
    %cst_262 = arith.constant 0.000000e+00 : f32
    %1054 = vector.broadcast %cst_262 : f32 to vector<8x256xf32>
    %1055 = arith.select %1037, %1053, %1054 : vector<8x256xi1>, vector<8x256xf32>
    %1056 = arith.addf %1052, %1055 : vector<8x256xf32>
    %c222_i32 = arith.constant 222 : i32
    %1057 = tpu.dynamic_rotate %1044 by %c222_i32 dim 1 : vector<8x256xf32>, i32 -> vector<8x256xf32>
    %cst_263 = arith.constant 0.000000e+00 : f32
    %1058 = vector.broadcast %cst_263 : f32 to vector<8x256xf32>
    %1059 = arith.select %1042, %1057, %1058 : vector<8x256xi1>, vector<8x256xf32>
    %1060 = arith.addf %1056, %1059 : vector<8x256xf32>
    %c2_264 = arith.constant 2 : index
    %c1_265 = arith.constant 1 : index
    %c0_266 = arith.constant 0 : index
    %c0_267 = arith.constant 0 : index
    %1061 = vector.load %arg2[%c2_264, %c1_265, %c0_266, %c0_267] : memref<4x9x8x256xf32, #tpu.memory_space<vmem>>, vector<1x1x8x256xf32>
    %1062 = vector.shape_cast %1061 : vector<1x1x8x256xf32> to vector<8x256xf32>
    %c34_i32_268 = arith.constant 34 : i32
    %1063 = tpu.dynamic_rotate %1062 by %c34_i32_268 dim 1 : vector<8x256xf32>, i32 -> vector<8x256xf32>
    %cst_269 = arith.constant 0.000000e+00 : f32
    %1064 = vector.broadcast %cst_269 : f32 to vector<8x256xf32>
    %1065 = arith.select %1027, %1063, %1064 : vector<8x256xi1>, vector<8x256xf32>
    %1066 = arith.addf %1062, %1065 : vector<8x256xf32>
    %c17_i32_270 = arith.constant 17 : i32
    %1067 = tpu.dynamic_rotate %1062 by %c17_i32_270 dim 1 : vector<8x256xf32>, i32 -> vector<8x256xf32>
    %cst_271 = arith.constant 0.000000e+00 : f32
    %1068 = vector.broadcast %cst_271 : f32 to vector<8x256xf32>
    %1069 = arith.select %1032, %1067, %1068 : vector<8x256xi1>, vector<8x256xf32>
    %1070 = arith.addf %1066, %1069 : vector<8x256xf32>
    %c239_i32_272 = arith.constant 239 : i32
    %1071 = tpu.dynamic_rotate %1062 by %c239_i32_272 dim 1 : vector<8x256xf32>, i32 -> vector<8x256xf32>
    %cst_273 = arith.constant 0.000000e+00 : f32
    %1072 = vector.broadcast %cst_273 : f32 to vector<8x256xf32>
    %1073 = arith.select %1037, %1071, %1072 : vector<8x256xi1>, vector<8x256xf32>
    %1074 = arith.addf %1070, %1073 : vector<8x256xf32>
    %c222_i32_274 = arith.constant 222 : i32
    %1075 = tpu.dynamic_rotate %1062 by %c222_i32_274 dim 1 : vector<8x256xf32>, i32 -> vector<8x256xf32>
    %cst_275 = arith.constant 0.000000e+00 : f32
    %1076 = vector.broadcast %cst_275 : f32 to vector<8x256xf32>
    %1077 = arith.select %1042, %1075, %1076 : vector<8x256xi1>, vector<8x256xf32>
    %1078 = arith.addf %1074, %1077 : vector<8x256xf32>
    %c2_276 = arith.constant 2 : index
    %c2_277 = arith.constant 2 : index
    %c0_278 = arith.constant 0 : index
    %c0_279 = arith.constant 0 : index
    %1079 = vector.load %arg2[%c2_276, %c2_277, %c0_278, %c0_279] : memref<4x9x8x256xf32, #tpu.memory_space<vmem>>, vector<1x1x8x256xf32>
    %1080 = vector.shape_cast %1079 : vector<1x1x8x256xf32> to vector<8x256xf32>
    %c34_i32_280 = arith.constant 34 : i32
    %1081 = tpu.dynamic_rotate %1080 by %c34_i32_280 dim 1 : vector<8x256xf32>, i32 -> vector<8x256xf32>
    %cst_281 = arith.constant 0.000000e+00 : f32
    %1082 = vector.broadcast %cst_281 : f32 to vector<8x256xf32>
    %1083 = arith.select %1027, %1081, %1082 : vector<8x256xi1>, vector<8x256xf32>
    %1084 = arith.addf %1080, %1083 : vector<8x256xf32>
    %c17_i32_282 = arith.constant 17 : i32
    %1085 = tpu.dynamic_rotate %1080 by %c17_i32_282 dim 1 : vector<8x256xf32>, i32 -> vector<8x256xf32>
    %cst_283 = arith.constant 0.000000e+00 : f32
    %1086 = vector.broadcast %cst_283 : f32 to vector<8x256xf32>
    %1087 = arith.select %1032, %1085, %1086 : vector<8x256xi1>, vector<8x256xf32>
    %1088 = arith.addf %1084, %1087 : vector<8x256xf32>
    %c239_i32_284 = arith.constant 239 : i32
    %1089 = tpu.dynamic_rotate %1080 by %c239_i32_284 dim 1 : vector<8x256xf32>, i32 -> vector<8x256xf32>
    %cst_285 = arith.constant 0.000000e+00 : f32
    %1090 = vector.broadcast %cst_285 : f32 to vector<8x256xf32>
    %1091 = arith.select %1037, %1089, %1090 : vector<8x256xi1>, vector<8x256xf32>
    %1092 = arith.addf %1088, %1091 : vector<8x256xf32>
    %c222_i32_286 = arith.constant 222 : i32
    %1093 = tpu.dynamic_rotate %1080 by %c222_i32_286 dim 1 : vector<8x256xf32>, i32 -> vector<8x256xf32>
    %cst_287 = arith.constant 0.000000e+00 : f32
    %1094 = vector.broadcast %cst_287 : f32 to vector<8x256xf32>
    %1095 = arith.select %1042, %1093, %1094 : vector<8x256xi1>, vector<8x256xf32>
    %1096 = arith.addf %1092, %1095 : vector<8x256xf32>
    %c2_288 = arith.constant 2 : index
    %c3_289 = arith.constant 3 : index
    %c0_290 = arith.constant 0 : index
    %c0_291 = arith.constant 0 : index
    %1097 = vector.load %arg2[%c2_288, %c3_289, %c0_290, %c0_291] : memref<4x9x8x256xf32, #tpu.memory_space<vmem>>, vector<1x1x8x256xf32>
    %1098 = vector.shape_cast %1097 : vector<1x1x8x256xf32> to vector<8x256xf32>
    %c34_i32_292 = arith.constant 34 : i32
    %1099 = tpu.dynamic_rotate %1098 by %c34_i32_292 dim 1 : vector<8x256xf32>, i32 -> vector<8x256xf32>
    %cst_293 = arith.constant 0.000000e+00 : f32
    %1100 = vector.broadcast %cst_293 : f32 to vector<8x256xf32>
    %1101 = arith.select %1027, %1099, %1100 : vector<8x256xi1>, vector<8x256xf32>
    %1102 = arith.addf %1098, %1101 : vector<8x256xf32>
    %c17_i32_294 = arith.constant 17 : i32
    %1103 = tpu.dynamic_rotate %1098 by %c17_i32_294 dim 1 : vector<8x256xf32>, i32 -> vector<8x256xf32>
    %cst_295 = arith.constant 0.000000e+00 : f32
    %1104 = vector.broadcast %cst_295 : f32 to vector<8x256xf32>
    %1105 = arith.select %1032, %1103, %1104 : vector<8x256xi1>, vector<8x256xf32>
    %1106 = arith.addf %1102, %1105 : vector<8x256xf32>
    %c239_i32_296 = arith.constant 239 : i32
    %1107 = tpu.dynamic_rotate %1098 by %c239_i32_296 dim 1 : vector<8x256xf32>, i32 -> vector<8x256xf32>
    %cst_297 = arith.constant 0.000000e+00 : f32
    %1108 = vector.broadcast %cst_297 : f32 to vector<8x256xf32>
    %1109 = arith.select %1037, %1107, %1108 : vector<8x256xi1>, vector<8x256xf32>
    %1110 = arith.addf %1106, %1109 : vector<8x256xf32>
    %c222_i32_298 = arith.constant 222 : i32
    %1111 = tpu.dynamic_rotate %1098 by %c222_i32_298 dim 1 : vector<8x256xf32>, i32 -> vector<8x256xf32>
    %cst_299 = arith.constant 0.000000e+00 : f32
    %1112 = vector.broadcast %cst_299 : f32 to vector<8x256xf32>
    %1113 = arith.select %1042, %1111, %1112 : vector<8x256xi1>, vector<8x256xf32>
    %1114 = arith.addf %1110, %1113 : vector<8x256xf32>
    %c2_300 = arith.constant 2 : index
    %c4_301 = arith.constant 4 : index
    %c0_302 = arith.constant 0 : index
    %c0_303 = arith.constant 0 : index
    %1115 = vector.load %arg2[%c2_300, %c4_301, %c0_302, %c0_303] : memref<4x9x8x256xf32, #tpu.memory_space<vmem>>, vector<1x1x8x256xf32>
    %1116 = vector.shape_cast %1115 : vector<1x1x8x256xf32> to vector<8x256xf32>
    %c34_i32_304 = arith.constant 34 : i32
    %1117 = tpu.dynamic_rotate %1116 by %c34_i32_304 dim 1 : vector<8x256xf32>, i32 -> vector<8x256xf32>
    %cst_305 = arith.constant 0.000000e+00 : f32
    %1118 = vector.broadcast %cst_305 : f32 to vector<8x256xf32>
    %1119 = arith.select %1027, %1117, %1118 : vector<8x256xi1>, vector<8x256xf32>
    %1120 = arith.addf %1116, %1119 : vector<8x256xf32>
    %c17_i32_306 = arith.constant 17 : i32
    %1121 = tpu.dynamic_rotate %1116 by %c17_i32_306 dim 1 : vector<8x256xf32>, i32 -> vector<8x256xf32>
    %cst_307 = arith.constant 0.000000e+00 : f32
    %1122 = vector.broadcast %cst_307 : f32 to vector<8x256xf32>
    %1123 = arith.select %1032, %1121, %1122 : vector<8x256xi1>, vector<8x256xf32>
    %1124 = arith.addf %1120, %1123 : vector<8x256xf32>
    %c239_i32_308 = arith.constant 239 : i32
    %1125 = tpu.dynamic_rotate %1116 by %c239_i32_308 dim 1 : vector<8x256xf32>, i32 -> vector<8x256xf32>
    %cst_309 = arith.constant 0.000000e+00 : f32
    %1126 = vector.broadcast %cst_309 : f32 to vector<8x256xf32>
    %1127 = arith.select %1037, %1125, %1126 : vector<8x256xi1>, vector<8x256xf32>
    %1128 = arith.addf %1124, %1127 : vector<8x256xf32>
    %c222_i32_310 = arith.constant 222 : i32
    %1129 = tpu.dynamic_rotate %1116 by %c222_i32_310 dim 1 : vector<8x256xf32>, i32 -> vector<8x256xf32>
    %cst_311 = arith.constant 0.000000e+00 : f32
    %1130 = vector.broadcast %cst_311 : f32 to vector<8x256xf32>
    %1131 = arith.select %1042, %1129, %1130 : vector<8x256xi1>, vector<8x256xf32>
    %1132 = arith.addf %1128, %1131 : vector<8x256xf32>
    %c2_312 = arith.constant 2 : index
    %c5_313 = arith.constant 5 : index
    %c0_314 = arith.constant 0 : index
    %c0_315 = arith.constant 0 : index
    %1133 = vector.load %arg2[%c2_312, %c5_313, %c0_314, %c0_315] : memref<4x9x8x256xf32, #tpu.memory_space<vmem>>, vector<1x1x8x256xf32>
    %1134 = vector.shape_cast %1133 : vector<1x1x8x256xf32> to vector<8x256xf32>
    %c34_i32_316 = arith.constant 34 : i32
    %1135 = tpu.dynamic_rotate %1134 by %c34_i32_316 dim 1 : vector<8x256xf32>, i32 -> vector<8x256xf32>
    %cst_317 = arith.constant 0.000000e+00 : f32
    %1136 = vector.broadcast %cst_317 : f32 to vector<8x256xf32>
    %1137 = arith.select %1027, %1135, %1136 : vector<8x256xi1>, vector<8x256xf32>
    %1138 = arith.addf %1134, %1137 : vector<8x256xf32>
    %c17_i32_318 = arith.constant 17 : i32
    %1139 = tpu.dynamic_rotate %1134 by %c17_i32_318 dim 1 : vector<8x256xf32>, i32 -> vector<8x256xf32>
    %cst_319 = arith.constant 0.000000e+00 : f32
    %1140 = vector.broadcast %cst_319 : f32 to vector<8x256xf32>
    %1141 = arith.select %1032, %1139, %1140 : vector<8x256xi1>, vector<8x256xf32>
    %1142 = arith.addf %1138, %1141 : vector<8x256xf32>
    %c239_i32_320 = arith.constant 239 : i32
    %1143 = tpu.dynamic_rotate %1134 by %c239_i32_320 dim 1 : vector<8x256xf32>, i32 -> vector<8x256xf32>
    %cst_321 = arith.constant 0.000000e+00 : f32
    %1144 = vector.broadcast %cst_321 : f32 to vector<8x256xf32>
    %1145 = arith.select %1037, %1143, %1144 : vector<8x256xi1>, vector<8x256xf32>
    %1146 = arith.addf %1142, %1145 : vector<8x256xf32>
    %c222_i32_322 = arith.constant 222 : i32
    %1147 = tpu.dynamic_rotate %1134 by %c222_i32_322 dim 1 : vector<8x256xf32>, i32 -> vector<8x256xf32>
    %cst_323 = arith.constant 0.000000e+00 : f32
    %1148 = vector.broadcast %cst_323 : f32 to vector<8x256xf32>
    %1149 = arith.select %1042, %1147, %1148 : vector<8x256xi1>, vector<8x256xf32>
    %1150 = arith.addf %1146, %1149 : vector<8x256xf32>
    %c2_324 = arith.constant 2 : index
    %c6_325 = arith.constant 6 : index
    %c0_326 = arith.constant 0 : index
    %c0_327 = arith.constant 0 : index
    %1151 = vector.load %arg2[%c2_324, %c6_325, %c0_326, %c0_327] : memref<4x9x8x256xf32, #tpu.memory_space<vmem>>, vector<1x1x8x256xf32>
    %1152 = vector.shape_cast %1151 : vector<1x1x8x256xf32> to vector<8x256xf32>
    %c34_i32_328 = arith.constant 34 : i32
    %1153 = tpu.dynamic_rotate %1152 by %c34_i32_328 dim 1 : vector<8x256xf32>, i32 -> vector<8x256xf32>
    %cst_329 = arith.constant 0.000000e+00 : f32
    %1154 = vector.broadcast %cst_329 : f32 to vector<8x256xf32>
    %1155 = arith.select %1027, %1153, %1154 : vector<8x256xi1>, vector<8x256xf32>
    %1156 = arith.addf %1152, %1155 : vector<8x256xf32>
    %c17_i32_330 = arith.constant 17 : i32
    %1157 = tpu.dynamic_rotate %1152 by %c17_i32_330 dim 1 : vector<8x256xf32>, i32 -> vector<8x256xf32>
    %cst_331 = arith.constant 0.000000e+00 : f32
    %1158 = vector.broadcast %cst_331 : f32 to vector<8x256xf32>
    %1159 = arith.select %1032, %1157, %1158 : vector<8x256xi1>, vector<8x256xf32>
    %1160 = arith.addf %1156, %1159 : vector<8x256xf32>
    %c239_i32_332 = arith.constant 239 : i32
    %1161 = tpu.dynamic_rotate %1152 by %c239_i32_332 dim 1 : vector<8x256xf32>, i32 -> vector<8x256xf32>
    %cst_333 = arith.constant 0.000000e+00 : f32
    %1162 = vector.broadcast %cst_333 : f32 to vector<8x256xf32>
    %1163 = arith.select %1037, %1161, %1162 : vector<8x256xi1>, vector<8x256xf32>
    %1164 = arith.addf %1160, %1163 : vector<8x256xf32>
    %c222_i32_334 = arith.constant 222 : i32
    %1165 = tpu.dynamic_rotate %1152 by %c222_i32_334 dim 1 : vector<8x256xf32>, i32 -> vector<8x256xf32>
    %cst_335 = arith.constant 0.000000e+00 : f32
    %1166 = vector.broadcast %cst_335 : f32 to vector<8x256xf32>
    %1167 = arith.select %1042, %1165, %1166 : vector<8x256xi1>, vector<8x256xf32>
    %1168 = arith.addf %1164, %1167 : vector<8x256xf32>
    %c2_336 = arith.constant 2 : index
    %c7_337 = arith.constant 7 : index
    %c0_338 = arith.constant 0 : index
    %c0_339 = arith.constant 0 : index
    %1169 = vector.load %arg2[%c2_336, %c7_337, %c0_338, %c0_339] : memref<4x9x8x256xf32, #tpu.memory_space<vmem>>, vector<1x1x8x256xf32>
    %1170 = vector.shape_cast %1169 : vector<1x1x8x256xf32> to vector<8x256xf32>
    %c34_i32_340 = arith.constant 34 : i32
    %1171 = tpu.dynamic_rotate %1170 by %c34_i32_340 dim 1 : vector<8x256xf32>, i32 -> vector<8x256xf32>
    %cst_341 = arith.constant 0.000000e+00 : f32
    %1172 = vector.broadcast %cst_341 : f32 to vector<8x256xf32>
    %1173 = arith.select %1027, %1171, %1172 : vector<8x256xi1>, vector<8x256xf32>
    %1174 = arith.addf %1170, %1173 : vector<8x256xf32>
    %c17_i32_342 = arith.constant 17 : i32
    %1175 = tpu.dynamic_rotate %1170 by %c17_i32_342 dim 1 : vector<8x256xf32>, i32 -> vector<8x256xf32>
    %cst_343 = arith.constant 0.000000e+00 : f32
    %1176 = vector.broadcast %cst_343 : f32 to vector<8x256xf32>
    %1177 = arith.select %1032, %1175, %1176 : vector<8x256xi1>, vector<8x256xf32>
    %1178 = arith.addf %1174, %1177 : vector<8x256xf32>
    %c239_i32_344 = arith.constant 239 : i32
    %1179 = tpu.dynamic_rotate %1170 by %c239_i32_344 dim 1 : vector<8x256xf32>, i32 -> vector<8x256xf32>
    %cst_345 = arith.constant 0.000000e+00 : f32
    %1180 = vector.broadcast %cst_345 : f32 to vector<8x256xf32>
    %1181 = arith.select %1037, %1179, %1180 : vector<8x256xi1>, vector<8x256xf32>
    %1182 = arith.addf %1178, %1181 : vector<8x256xf32>
    %c222_i32_346 = arith.constant 222 : i32
    %1183 = tpu.dynamic_rotate %1170 by %c222_i32_346 dim 1 : vector<8x256xf32>, i32 -> vector<8x256xf32>
    %cst_347 = arith.constant 0.000000e+00 : f32
    %1184 = vector.broadcast %cst_347 : f32 to vector<8x256xf32>
    %1185 = arith.select %1042, %1183, %1184 : vector<8x256xi1>, vector<8x256xf32>
    %1186 = arith.addf %1182, %1185 : vector<8x256xf32>
    %c2_348 = arith.constant 2 : index
    %c8_349 = arith.constant 8 : index
    %c0_350 = arith.constant 0 : index
    %c0_351 = arith.constant 0 : index
    %1187 = vector.load %arg2[%c2_348, %c8_349, %c0_350, %c0_351] : memref<4x9x8x256xf32, #tpu.memory_space<vmem>>, vector<1x1x8x256xf32>
    %1188 = vector.shape_cast %1187 : vector<1x1x8x256xf32> to vector<8x256xf32>
    %c34_i32_352 = arith.constant 34 : i32
    %1189 = tpu.dynamic_rotate %1188 by %c34_i32_352 dim 1 : vector<8x256xf32>, i32 -> vector<8x256xf32>
    %cst_353 = arith.constant 0.000000e+00 : f32
    %1190 = vector.broadcast %cst_353 : f32 to vector<8x256xf32>
    %1191 = arith.select %1027, %1189, %1190 : vector<8x256xi1>, vector<8x256xf32>
    %1192 = arith.addf %1188, %1191 : vector<8x256xf32>
    %c17_i32_354 = arith.constant 17 : i32
    %1193 = tpu.dynamic_rotate %1188 by %c17_i32_354 dim 1 : vector<8x256xf32>, i32 -> vector<8x256xf32>
    %cst_355 = arith.constant 0.000000e+00 : f32
    %1194 = vector.broadcast %cst_355 : f32 to vector<8x256xf32>
    %1195 = arith.select %1032, %1193, %1194 : vector<8x256xi1>, vector<8x256xf32>
    %1196 = arith.addf %1192, %1195 : vector<8x256xf32>
    %c239_i32_356 = arith.constant 239 : i32
    %1197 = tpu.dynamic_rotate %1188 by %c239_i32_356 dim 1 : vector<8x256xf32>, i32 -> vector<8x256xf32>
    %cst_357 = arith.constant 0.000000e+00 : f32
    %1198 = vector.broadcast %cst_357 : f32 to vector<8x256xf32>
    %1199 = arith.select %1037, %1197, %1198 : vector<8x256xi1>, vector<8x256xf32>
    %1200 = arith.addf %1196, %1199 : vector<8x256xf32>
    %c222_i32_358 = arith.constant 222 : i32
    %1201 = tpu.dynamic_rotate %1188 by %c222_i32_358 dim 1 : vector<8x256xf32>, i32 -> vector<8x256xf32>
    %cst_359 = arith.constant 0.000000e+00 : f32
    %1202 = vector.broadcast %cst_359 : f32 to vector<8x256xf32>
    %1203 = arith.select %1042, %1201, %1202 : vector<8x256xi1>, vector<8x256xf32>
    %1204 = arith.addf %1200, %1203 : vector<8x256xf32>
    %1205 = vector.broadcast %0 : f32 to vector<8x256xf32>
    %1206 = arith.mulf %1060, %1205 : vector<8x256xf32>
    %1207 = vector.broadcast %45 : f32 to vector<8x256xf32>
    %1208 = arith.mulf %1060, %1207 : vector<8x256xf32>
    %1209 = vector.broadcast %5 : f32 to vector<8x256xf32>
    %1210 = arith.mulf %1078, %1209 : vector<8x256xf32>
    %1211 = arith.addf %1206, %1210 : vector<8x256xf32>
    %1212 = vector.broadcast %50 : f32 to vector<8x256xf32>
    %1213 = arith.mulf %1078, %1212 : vector<8x256xf32>
    %1214 = arith.addf %1208, %1213 : vector<8x256xf32>
    %1215 = vector.broadcast %10 : f32 to vector<8x256xf32>
    %1216 = arith.mulf %1096, %1215 : vector<8x256xf32>
    %1217 = arith.addf %1211, %1216 : vector<8x256xf32>
    %1218 = vector.broadcast %55 : f32 to vector<8x256xf32>
    %1219 = arith.mulf %1096, %1218 : vector<8x256xf32>
    %1220 = arith.addf %1214, %1219 : vector<8x256xf32>
    %1221 = vector.broadcast %15 : f32 to vector<8x256xf32>
    %1222 = arith.mulf %1114, %1221 : vector<8x256xf32>
    %1223 = arith.addf %1217, %1222 : vector<8x256xf32>
    %1224 = vector.broadcast %60 : f32 to vector<8x256xf32>
    %1225 = arith.mulf %1114, %1224 : vector<8x256xf32>
    %1226 = arith.addf %1220, %1225 : vector<8x256xf32>
    %1227 = vector.broadcast %20 : f32 to vector<8x256xf32>
    %1228 = arith.mulf %1132, %1227 : vector<8x256xf32>
    %1229 = arith.addf %1223, %1228 : vector<8x256xf32>
    %1230 = vector.broadcast %65 : f32 to vector<8x256xf32>
    %1231 = arith.mulf %1132, %1230 : vector<8x256xf32>
    %1232 = arith.addf %1226, %1231 : vector<8x256xf32>
    %1233 = vector.broadcast %25 : f32 to vector<8x256xf32>
    %1234 = arith.mulf %1150, %1233 : vector<8x256xf32>
    %1235 = arith.addf %1229, %1234 : vector<8x256xf32>
    %1236 = vector.broadcast %70 : f32 to vector<8x256xf32>
    %1237 = arith.mulf %1150, %1236 : vector<8x256xf32>
    %1238 = arith.addf %1232, %1237 : vector<8x256xf32>
    %1239 = vector.broadcast %30 : f32 to vector<8x256xf32>
    %1240 = arith.mulf %1168, %1239 : vector<8x256xf32>
    %1241 = arith.addf %1235, %1240 : vector<8x256xf32>
    %1242 = vector.broadcast %75 : f32 to vector<8x256xf32>
    %1243 = arith.mulf %1168, %1242 : vector<8x256xf32>
    %1244 = arith.addf %1238, %1243 : vector<8x256xf32>
    %1245 = vector.broadcast %35 : f32 to vector<8x256xf32>
    %1246 = arith.mulf %1186, %1245 : vector<8x256xf32>
    %1247 = arith.addf %1241, %1246 : vector<8x256xf32>
    %1248 = vector.broadcast %80 : f32 to vector<8x256xf32>
    %1249 = arith.mulf %1186, %1248 : vector<8x256xf32>
    %1250 = arith.addf %1244, %1249 : vector<8x256xf32>
    %1251 = vector.broadcast %40 : f32 to vector<8x256xf32>
    %1252 = arith.mulf %1204, %1251 : vector<8x256xf32>
    %1253 = arith.addf %1247, %1252 : vector<8x256xf32>
    %1254 = vector.broadcast %85 : f32 to vector<8x256xf32>
    %1255 = arith.mulf %1204, %1254 : vector<8x256xf32>
    %1256 = arith.addf %1250, %1255 : vector<8x256xf32>
    %c34_i32_360 = arith.constant 34 : i32
    %1257 = tpu.dynamic_rotate %1253 by %c34_i32_360 dim 1 : vector<8x256xf32>, i32 -> vector<8x256xf32>
    %cst_361 = arith.constant 0.000000e+00 : f32
    %1258 = vector.broadcast %cst_361 : f32 to vector<8x256xf32>
    %1259 = arith.select %1027, %1257, %1258 : vector<8x256xi1>, vector<8x256xf32>
    %1260 = arith.addf %1018, %1259 : vector<8x256xf32>
    %c34_i32_362 = arith.constant 34 : i32
    %1261 = tpu.dynamic_rotate %1256 by %c34_i32_362 dim 1 : vector<8x256xf32>, i32 -> vector<8x256xf32>
    %cst_363 = arith.constant 0.000000e+00 : f32
    %1262 = vector.broadcast %cst_363 : f32 to vector<8x256xf32>
    %1263 = arith.select %1027, %1261, %1262 : vector<8x256xi1>, vector<8x256xf32>
    %1264 = arith.addf %1022, %1263 : vector<8x256xf32>
    %1265 = vector.broadcast %1 : f32 to vector<8x256xf32>
    %1266 = arith.mulf %1060, %1265 : vector<8x256xf32>
    %1267 = vector.broadcast %46 : f32 to vector<8x256xf32>
    %1268 = arith.mulf %1060, %1267 : vector<8x256xf32>
    %1269 = vector.broadcast %6 : f32 to vector<8x256xf32>
    %1270 = arith.mulf %1078, %1269 : vector<8x256xf32>
    %1271 = arith.addf %1266, %1270 : vector<8x256xf32>
    %1272 = vector.broadcast %51 : f32 to vector<8x256xf32>
    %1273 = arith.mulf %1078, %1272 : vector<8x256xf32>
    %1274 = arith.addf %1268, %1273 : vector<8x256xf32>
    %1275 = vector.broadcast %11 : f32 to vector<8x256xf32>
    %1276 = arith.mulf %1096, %1275 : vector<8x256xf32>
    %1277 = arith.addf %1271, %1276 : vector<8x256xf32>
    %1278 = vector.broadcast %56 : f32 to vector<8x256xf32>
    %1279 = arith.mulf %1096, %1278 : vector<8x256xf32>
    %1280 = arith.addf %1274, %1279 : vector<8x256xf32>
    %1281 = vector.broadcast %16 : f32 to vector<8x256xf32>
    %1282 = arith.mulf %1114, %1281 : vector<8x256xf32>
    %1283 = arith.addf %1277, %1282 : vector<8x256xf32>
    %1284 = vector.broadcast %61 : f32 to vector<8x256xf32>
    %1285 = arith.mulf %1114, %1284 : vector<8x256xf32>
    %1286 = arith.addf %1280, %1285 : vector<8x256xf32>
    %1287 = vector.broadcast %21 : f32 to vector<8x256xf32>
    %1288 = arith.mulf %1132, %1287 : vector<8x256xf32>
    %1289 = arith.addf %1283, %1288 : vector<8x256xf32>
    %1290 = vector.broadcast %66 : f32 to vector<8x256xf32>
    %1291 = arith.mulf %1132, %1290 : vector<8x256xf32>
    %1292 = arith.addf %1286, %1291 : vector<8x256xf32>
    %1293 = vector.broadcast %26 : f32 to vector<8x256xf32>
    %1294 = arith.mulf %1150, %1293 : vector<8x256xf32>
    %1295 = arith.addf %1289, %1294 : vector<8x256xf32>
    %1296 = vector.broadcast %71 : f32 to vector<8x256xf32>
    %1297 = arith.mulf %1150, %1296 : vector<8x256xf32>
    %1298 = arith.addf %1292, %1297 : vector<8x256xf32>
    %1299 = vector.broadcast %31 : f32 to vector<8x256xf32>
    %1300 = arith.mulf %1168, %1299 : vector<8x256xf32>
    %1301 = arith.addf %1295, %1300 : vector<8x256xf32>
    %1302 = vector.broadcast %76 : f32 to vector<8x256xf32>
    %1303 = arith.mulf %1168, %1302 : vector<8x256xf32>
    %1304 = arith.addf %1298, %1303 : vector<8x256xf32>
    %1305 = vector.broadcast %36 : f32 to vector<8x256xf32>
    %1306 = arith.mulf %1186, %1305 : vector<8x256xf32>
    %1307 = arith.addf %1301, %1306 : vector<8x256xf32>
    %1308 = vector.broadcast %81 : f32 to vector<8x256xf32>
    %1309 = arith.mulf %1186, %1308 : vector<8x256xf32>
    %1310 = arith.addf %1304, %1309 : vector<8x256xf32>
    %1311 = vector.broadcast %41 : f32 to vector<8x256xf32>
    %1312 = arith.mulf %1204, %1311 : vector<8x256xf32>
    %1313 = arith.addf %1307, %1312 : vector<8x256xf32>
    %1314 = vector.broadcast %86 : f32 to vector<8x256xf32>
    %1315 = arith.mulf %1204, %1314 : vector<8x256xf32>
    %1316 = arith.addf %1310, %1315 : vector<8x256xf32>
    %c17_i32_364 = arith.constant 17 : i32
    %1317 = tpu.dynamic_rotate %1313 by %c17_i32_364 dim 1 : vector<8x256xf32>, i32 -> vector<8x256xf32>
    %cst_365 = arith.constant 0.000000e+00 : f32
    %1318 = vector.broadcast %cst_365 : f32 to vector<8x256xf32>
    %1319 = arith.select %1032, %1317, %1318 : vector<8x256xi1>, vector<8x256xf32>
    %1320 = arith.addf %1260, %1319 : vector<8x256xf32>
    %c17_i32_366 = arith.constant 17 : i32
    %1321 = tpu.dynamic_rotate %1316 by %c17_i32_366 dim 1 : vector<8x256xf32>, i32 -> vector<8x256xf32>
    %cst_367 = arith.constant 0.000000e+00 : f32
    %1322 = vector.broadcast %cst_367 : f32 to vector<8x256xf32>
    %1323 = arith.select %1032, %1321, %1322 : vector<8x256xi1>, vector<8x256xf32>
    %1324 = arith.addf %1264, %1323 : vector<8x256xf32>
    %1325 = vector.broadcast %2 : f32 to vector<8x256xf32>
    %1326 = arith.mulf %1060, %1325 : vector<8x256xf32>
    %1327 = vector.broadcast %47 : f32 to vector<8x256xf32>
    %1328 = arith.mulf %1060, %1327 : vector<8x256xf32>
    %1329 = vector.broadcast %7 : f32 to vector<8x256xf32>
    %1330 = arith.mulf %1078, %1329 : vector<8x256xf32>
    %1331 = arith.addf %1326, %1330 : vector<8x256xf32>
    %1332 = vector.broadcast %52 : f32 to vector<8x256xf32>
    %1333 = arith.mulf %1078, %1332 : vector<8x256xf32>
    %1334 = arith.addf %1328, %1333 : vector<8x256xf32>
    %1335 = vector.broadcast %12 : f32 to vector<8x256xf32>
    %1336 = arith.mulf %1096, %1335 : vector<8x256xf32>
    %1337 = arith.addf %1331, %1336 : vector<8x256xf32>
    %1338 = vector.broadcast %57 : f32 to vector<8x256xf32>
    %1339 = arith.mulf %1096, %1338 : vector<8x256xf32>
    %1340 = arith.addf %1334, %1339 : vector<8x256xf32>
    %1341 = vector.broadcast %17 : f32 to vector<8x256xf32>
    %1342 = arith.mulf %1114, %1341 : vector<8x256xf32>
    %1343 = arith.addf %1337, %1342 : vector<8x256xf32>
    %1344 = vector.broadcast %62 : f32 to vector<8x256xf32>
    %1345 = arith.mulf %1114, %1344 : vector<8x256xf32>
    %1346 = arith.addf %1340, %1345 : vector<8x256xf32>
    %1347 = vector.broadcast %22 : f32 to vector<8x256xf32>
    %1348 = arith.mulf %1132, %1347 : vector<8x256xf32>
    %1349 = arith.addf %1343, %1348 : vector<8x256xf32>
    %1350 = vector.broadcast %67 : f32 to vector<8x256xf32>
    %1351 = arith.mulf %1132, %1350 : vector<8x256xf32>
    %1352 = arith.addf %1346, %1351 : vector<8x256xf32>
    %1353 = vector.broadcast %27 : f32 to vector<8x256xf32>
    %1354 = arith.mulf %1150, %1353 : vector<8x256xf32>
    %1355 = arith.addf %1349, %1354 : vector<8x256xf32>
    %1356 = vector.broadcast %72 : f32 to vector<8x256xf32>
    %1357 = arith.mulf %1150, %1356 : vector<8x256xf32>
    %1358 = arith.addf %1352, %1357 : vector<8x256xf32>
    %1359 = vector.broadcast %32 : f32 to vector<8x256xf32>
    %1360 = arith.mulf %1168, %1359 : vector<8x256xf32>
    %1361 = arith.addf %1355, %1360 : vector<8x256xf32>
    %1362 = vector.broadcast %77 : f32 to vector<8x256xf32>
    %1363 = arith.mulf %1168, %1362 : vector<8x256xf32>
    %1364 = arith.addf %1358, %1363 : vector<8x256xf32>
    %1365 = vector.broadcast %37 : f32 to vector<8x256xf32>
    %1366 = arith.mulf %1186, %1365 : vector<8x256xf32>
    %1367 = arith.addf %1361, %1366 : vector<8x256xf32>
    %1368 = vector.broadcast %82 : f32 to vector<8x256xf32>
    %1369 = arith.mulf %1186, %1368 : vector<8x256xf32>
    %1370 = arith.addf %1364, %1369 : vector<8x256xf32>
    %1371 = vector.broadcast %42 : f32 to vector<8x256xf32>
    %1372 = arith.mulf %1204, %1371 : vector<8x256xf32>
    %1373 = arith.addf %1367, %1372 : vector<8x256xf32>
    %1374 = vector.broadcast %87 : f32 to vector<8x256xf32>
    %1375 = arith.mulf %1204, %1374 : vector<8x256xf32>
    %1376 = arith.addf %1370, %1375 : vector<8x256xf32>
    %1377 = arith.addf %1320, %1373 : vector<8x256xf32>
    %1378 = arith.addf %1324, %1376 : vector<8x256xf32>
    %1379 = vector.broadcast %3 : f32 to vector<8x256xf32>
    %1380 = arith.mulf %1060, %1379 : vector<8x256xf32>
    %1381 = vector.broadcast %48 : f32 to vector<8x256xf32>
    %1382 = arith.mulf %1060, %1381 : vector<8x256xf32>
    %1383 = vector.broadcast %8 : f32 to vector<8x256xf32>
    %1384 = arith.mulf %1078, %1383 : vector<8x256xf32>
    %1385 = arith.addf %1380, %1384 : vector<8x256xf32>
    %1386 = vector.broadcast %53 : f32 to vector<8x256xf32>
    %1387 = arith.mulf %1078, %1386 : vector<8x256xf32>
    %1388 = arith.addf %1382, %1387 : vector<8x256xf32>
    %1389 = vector.broadcast %13 : f32 to vector<8x256xf32>
    %1390 = arith.mulf %1096, %1389 : vector<8x256xf32>
    %1391 = arith.addf %1385, %1390 : vector<8x256xf32>
    %1392 = vector.broadcast %58 : f32 to vector<8x256xf32>
    %1393 = arith.mulf %1096, %1392 : vector<8x256xf32>
    %1394 = arith.addf %1388, %1393 : vector<8x256xf32>
    %1395 = vector.broadcast %18 : f32 to vector<8x256xf32>
    %1396 = arith.mulf %1114, %1395 : vector<8x256xf32>
    %1397 = arith.addf %1391, %1396 : vector<8x256xf32>
    %1398 = vector.broadcast %63 : f32 to vector<8x256xf32>
    %1399 = arith.mulf %1114, %1398 : vector<8x256xf32>
    %1400 = arith.addf %1394, %1399 : vector<8x256xf32>
    %1401 = vector.broadcast %23 : f32 to vector<8x256xf32>
    %1402 = arith.mulf %1132, %1401 : vector<8x256xf32>
    %1403 = arith.addf %1397, %1402 : vector<8x256xf32>
    %1404 = vector.broadcast %68 : f32 to vector<8x256xf32>
    %1405 = arith.mulf %1132, %1404 : vector<8x256xf32>
    %1406 = arith.addf %1400, %1405 : vector<8x256xf32>
    %1407 = vector.broadcast %28 : f32 to vector<8x256xf32>
    %1408 = arith.mulf %1150, %1407 : vector<8x256xf32>
    %1409 = arith.addf %1403, %1408 : vector<8x256xf32>
    %1410 = vector.broadcast %73 : f32 to vector<8x256xf32>
    %1411 = arith.mulf %1150, %1410 : vector<8x256xf32>
    %1412 = arith.addf %1406, %1411 : vector<8x256xf32>
    %1413 = vector.broadcast %33 : f32 to vector<8x256xf32>
    %1414 = arith.mulf %1168, %1413 : vector<8x256xf32>
    %1415 = arith.addf %1409, %1414 : vector<8x256xf32>
    %1416 = vector.broadcast %78 : f32 to vector<8x256xf32>
    %1417 = arith.mulf %1168, %1416 : vector<8x256xf32>
    %1418 = arith.addf %1412, %1417 : vector<8x256xf32>
    %1419 = vector.broadcast %38 : f32 to vector<8x256xf32>
    %1420 = arith.mulf %1186, %1419 : vector<8x256xf32>
    %1421 = arith.addf %1415, %1420 : vector<8x256xf32>
    %1422 = vector.broadcast %83 : f32 to vector<8x256xf32>
    %1423 = arith.mulf %1186, %1422 : vector<8x256xf32>
    %1424 = arith.addf %1418, %1423 : vector<8x256xf32>
    %1425 = vector.broadcast %43 : f32 to vector<8x256xf32>
    %1426 = arith.mulf %1204, %1425 : vector<8x256xf32>
    %1427 = arith.addf %1421, %1426 : vector<8x256xf32>
    %1428 = vector.broadcast %88 : f32 to vector<8x256xf32>
    %1429 = arith.mulf %1204, %1428 : vector<8x256xf32>
    %1430 = arith.addf %1424, %1429 : vector<8x256xf32>
    %c239_i32_368 = arith.constant 239 : i32
    %1431 = tpu.dynamic_rotate %1427 by %c239_i32_368 dim 1 : vector<8x256xf32>, i32 -> vector<8x256xf32>
    %cst_369 = arith.constant 0.000000e+00 : f32
    %1432 = vector.broadcast %cst_369 : f32 to vector<8x256xf32>
    %1433 = arith.select %1037, %1431, %1432 : vector<8x256xi1>, vector<8x256xf32>
    %1434 = arith.addf %1377, %1433 : vector<8x256xf32>
    %c239_i32_370 = arith.constant 239 : i32
    %1435 = tpu.dynamic_rotate %1430 by %c239_i32_370 dim 1 : vector<8x256xf32>, i32 -> vector<8x256xf32>
    %cst_371 = arith.constant 0.000000e+00 : f32
    %1436 = vector.broadcast %cst_371 : f32 to vector<8x256xf32>
    %1437 = arith.select %1037, %1435, %1436 : vector<8x256xi1>, vector<8x256xf32>
    %1438 = arith.addf %1378, %1437 : vector<8x256xf32>
    %1439 = vector.broadcast %4 : f32 to vector<8x256xf32>
    %1440 = arith.mulf %1060, %1439 : vector<8x256xf32>
    %1441 = vector.broadcast %49 : f32 to vector<8x256xf32>
    %1442 = arith.mulf %1060, %1441 : vector<8x256xf32>
    %1443 = vector.broadcast %9 : f32 to vector<8x256xf32>
    %1444 = arith.mulf %1078, %1443 : vector<8x256xf32>
    %1445 = arith.addf %1440, %1444 : vector<8x256xf32>
    %1446 = vector.broadcast %54 : f32 to vector<8x256xf32>
    %1447 = arith.mulf %1078, %1446 : vector<8x256xf32>
    %1448 = arith.addf %1442, %1447 : vector<8x256xf32>
    %1449 = vector.broadcast %14 : f32 to vector<8x256xf32>
    %1450 = arith.mulf %1096, %1449 : vector<8x256xf32>
    %1451 = arith.addf %1445, %1450 : vector<8x256xf32>
    %1452 = vector.broadcast %59 : f32 to vector<8x256xf32>
    %1453 = arith.mulf %1096, %1452 : vector<8x256xf32>
    %1454 = arith.addf %1448, %1453 : vector<8x256xf32>
    %1455 = vector.broadcast %19 : f32 to vector<8x256xf32>
    %1456 = arith.mulf %1114, %1455 : vector<8x256xf32>
    %1457 = arith.addf %1451, %1456 : vector<8x256xf32>
    %1458 = vector.broadcast %64 : f32 to vector<8x256xf32>
    %1459 = arith.mulf %1114, %1458 : vector<8x256xf32>
    %1460 = arith.addf %1454, %1459 : vector<8x256xf32>
    %1461 = vector.broadcast %24 : f32 to vector<8x256xf32>
    %1462 = arith.mulf %1132, %1461 : vector<8x256xf32>
    %1463 = arith.addf %1457, %1462 : vector<8x256xf32>
    %1464 = vector.broadcast %69 : f32 to vector<8x256xf32>
    %1465 = arith.mulf %1132, %1464 : vector<8x256xf32>
    %1466 = arith.addf %1460, %1465 : vector<8x256xf32>
    %1467 = vector.broadcast %29 : f32 to vector<8x256xf32>
    %1468 = arith.mulf %1150, %1467 : vector<8x256xf32>
    %1469 = arith.addf %1463, %1468 : vector<8x256xf32>
    %1470 = vector.broadcast %74 : f32 to vector<8x256xf32>
    %1471 = arith.mulf %1150, %1470 : vector<8x256xf32>
    %1472 = arith.addf %1466, %1471 : vector<8x256xf32>
    %1473 = vector.broadcast %34 : f32 to vector<8x256xf32>
    %1474 = arith.mulf %1168, %1473 : vector<8x256xf32>
    %1475 = arith.addf %1469, %1474 : vector<8x256xf32>
    %1476 = vector.broadcast %79 : f32 to vector<8x256xf32>
    %1477 = arith.mulf %1168, %1476 : vector<8x256xf32>
    %1478 = arith.addf %1472, %1477 : vector<8x256xf32>
    %1479 = vector.broadcast %39 : f32 to vector<8x256xf32>
    %1480 = arith.mulf %1186, %1479 : vector<8x256xf32>
    %1481 = arith.addf %1475, %1480 : vector<8x256xf32>
    %1482 = vector.broadcast %84 : f32 to vector<8x256xf32>
    %1483 = arith.mulf %1186, %1482 : vector<8x256xf32>
    %1484 = arith.addf %1478, %1483 : vector<8x256xf32>
    %1485 = vector.broadcast %44 : f32 to vector<8x256xf32>
    %1486 = arith.mulf %1204, %1485 : vector<8x256xf32>
    %1487 = arith.addf %1481, %1486 : vector<8x256xf32>
    %1488 = vector.broadcast %89 : f32 to vector<8x256xf32>
    %1489 = arith.mulf %1204, %1488 : vector<8x256xf32>
    %1490 = arith.addf %1484, %1489 : vector<8x256xf32>
    %c222_i32_372 = arith.constant 222 : i32
    %1491 = tpu.dynamic_rotate %1487 by %c222_i32_372 dim 1 : vector<8x256xf32>, i32 -> vector<8x256xf32>
    %cst_373 = arith.constant 0.000000e+00 : f32
    %1492 = vector.broadcast %cst_373 : f32 to vector<8x256xf32>
    %1493 = arith.select %1042, %1491, %1492 : vector<8x256xi1>, vector<8x256xf32>
    %1494 = arith.addf %1434, %1493 : vector<8x256xf32>
    %c222_i32_374 = arith.constant 222 : i32
    %1495 = tpu.dynamic_rotate %1490 by %c222_i32_374 dim 1 : vector<8x256xf32>, i32 -> vector<8x256xf32>
    %cst_375 = arith.constant 0.000000e+00 : f32
    %1496 = vector.broadcast %cst_375 : f32 to vector<8x256xf32>
    %1497 = arith.select %1042, %1495, %1496 : vector<8x256xi1>, vector<8x256xf32>
    %1498 = arith.addf %1438, %1497 : vector<8x256xf32>
    %c32_i32_376 = arith.constant 32 : i32
    %1499 = vector.broadcast %c32_i32_376 : i32 to vector<8x256xi32>
    %1500 = arith.cmpi sge, %90, %1499 : vector<8x256xi32>
    %c14_i32_377 = arith.constant 14 : i32
    %1501 = vector.broadcast %c14_i32_377 : i32 to vector<8x256xi32>
    %1502 = arith.cmpi slt, %92, %1501 : vector<8x256xi32>
    %1503 = arith.andi %1500, %1502 : vector<8x256xi1>
    %c16_i32_378 = arith.constant 16 : i32
    %1504 = vector.broadcast %c16_i32_378 : i32 to vector<8x256xi32>
    %1505 = arith.cmpi sge, %90, %1504 : vector<8x256xi32>
    %c15_i32_379 = arith.constant 15 : i32
    %1506 = vector.broadcast %c15_i32_379 : i32 to vector<8x256xi32>
    %1507 = arith.cmpi slt, %92, %1506 : vector<8x256xi32>
    %1508 = arith.andi %1505, %1507 : vector<8x256xi1>
    %c240_i32_380 = arith.constant 240 : i32
    %1509 = vector.broadcast %c240_i32_380 : i32 to vector<8x256xi32>
    %1510 = arith.cmpi slt, %90, %1509 : vector<8x256xi32>
    %c1_i32_381 = arith.constant 1 : i32
    %1511 = vector.broadcast %c1_i32_381 : i32 to vector<8x256xi32>
    %1512 = arith.cmpi sge, %92, %1511 : vector<8x256xi32>
    %1513 = arith.andi %1510, %1512 : vector<8x256xi1>
    %c224_i32_382 = arith.constant 224 : i32
    %1514 = vector.broadcast %c224_i32_382 : i32 to vector<8x256xi32>
    %1515 = arith.cmpi slt, %90, %1514 : vector<8x256xi32>
    %c2_i32_383 = arith.constant 2 : i32
    %1516 = vector.broadcast %c2_i32_383 : i32 to vector<8x256xi32>
    %1517 = arith.cmpi sge, %92, %1516 : vector<8x256xi32>
    %1518 = arith.andi %1515, %1517 : vector<8x256xi1>
    %c3_384 = arith.constant 3 : index
    %c0_385 = arith.constant 0 : index
    %c0_386 = arith.constant 0 : index
    %c0_387 = arith.constant 0 : index
    %1519 = vector.load %arg2[%c3_384, %c0_385, %c0_386, %c0_387] : memref<4x9x8x256xf32, #tpu.memory_space<vmem>>, vector<1x1x8x256xf32>
    %1520 = vector.shape_cast %1519 : vector<1x1x8x256xf32> to vector<8x256xf32>
    %c30_i32 = arith.constant 30 : i32
    %1521 = tpu.dynamic_rotate %1520 by %c30_i32 dim 1 : vector<8x256xf32>, i32 -> vector<8x256xf32>
    %cst_388 = arith.constant 0.000000e+00 : f32
    %1522 = vector.broadcast %cst_388 : f32 to vector<8x256xf32>
    %1523 = arith.select %1503, %1521, %1522 : vector<8x256xi1>, vector<8x256xf32>
    %1524 = arith.addf %1520, %1523 : vector<8x256xf32>
    %c15_i32_389 = arith.constant 15 : i32
    %1525 = tpu.dynamic_rotate %1520 by %c15_i32_389 dim 1 : vector<8x256xf32>, i32 -> vector<8x256xf32>
    %cst_390 = arith.constant 0.000000e+00 : f32
    %1526 = vector.broadcast %cst_390 : f32 to vector<8x256xf32>
    %1527 = arith.select %1508, %1525, %1526 : vector<8x256xi1>, vector<8x256xf32>
    %1528 = arith.addf %1524, %1527 : vector<8x256xf32>
    %c241_i32 = arith.constant 241 : i32
    %1529 = tpu.dynamic_rotate %1520 by %c241_i32 dim 1 : vector<8x256xf32>, i32 -> vector<8x256xf32>
    %cst_391 = arith.constant 0.000000e+00 : f32
    %1530 = vector.broadcast %cst_391 : f32 to vector<8x256xf32>
    %1531 = arith.select %1513, %1529, %1530 : vector<8x256xi1>, vector<8x256xf32>
    %1532 = arith.addf %1528, %1531 : vector<8x256xf32>
    %c226_i32 = arith.constant 226 : i32
    %1533 = tpu.dynamic_rotate %1520 by %c226_i32 dim 1 : vector<8x256xf32>, i32 -> vector<8x256xf32>
    %cst_392 = arith.constant 0.000000e+00 : f32
    %1534 = vector.broadcast %cst_392 : f32 to vector<8x256xf32>
    %1535 = arith.select %1518, %1533, %1534 : vector<8x256xi1>, vector<8x256xf32>
    %1536 = arith.addf %1532, %1535 : vector<8x256xf32>
    %c3_393 = arith.constant 3 : index
    %c1_394 = arith.constant 1 : index
    %c0_395 = arith.constant 0 : index
    %c0_396 = arith.constant 0 : index
    %1537 = vector.load %arg2[%c3_393, %c1_394, %c0_395, %c0_396] : memref<4x9x8x256xf32, #tpu.memory_space<vmem>>, vector<1x1x8x256xf32>
    %1538 = vector.shape_cast %1537 : vector<1x1x8x256xf32> to vector<8x256xf32>
    %c30_i32_397 = arith.constant 30 : i32
    %1539 = tpu.dynamic_rotate %1538 by %c30_i32_397 dim 1 : vector<8x256xf32>, i32 -> vector<8x256xf32>
    %cst_398 = arith.constant 0.000000e+00 : f32
    %1540 = vector.broadcast %cst_398 : f32 to vector<8x256xf32>
    %1541 = arith.select %1503, %1539, %1540 : vector<8x256xi1>, vector<8x256xf32>
    %1542 = arith.addf %1538, %1541 : vector<8x256xf32>
    %c15_i32_399 = arith.constant 15 : i32
    %1543 = tpu.dynamic_rotate %1538 by %c15_i32_399 dim 1 : vector<8x256xf32>, i32 -> vector<8x256xf32>
    %cst_400 = arith.constant 0.000000e+00 : f32
    %1544 = vector.broadcast %cst_400 : f32 to vector<8x256xf32>
    %1545 = arith.select %1508, %1543, %1544 : vector<8x256xi1>, vector<8x256xf32>
    %1546 = arith.addf %1542, %1545 : vector<8x256xf32>
    %c241_i32_401 = arith.constant 241 : i32
    %1547 = tpu.dynamic_rotate %1538 by %c241_i32_401 dim 1 : vector<8x256xf32>, i32 -> vector<8x256xf32>
    %cst_402 = arith.constant 0.000000e+00 : f32
    %1548 = vector.broadcast %cst_402 : f32 to vector<8x256xf32>
    %1549 = arith.select %1513, %1547, %1548 : vector<8x256xi1>, vector<8x256xf32>
    %1550 = arith.addf %1546, %1549 : vector<8x256xf32>
    %c226_i32_403 = arith.constant 226 : i32
    %1551 = tpu.dynamic_rotate %1538 by %c226_i32_403 dim 1 : vector<8x256xf32>, i32 -> vector<8x256xf32>
    %cst_404 = arith.constant 0.000000e+00 : f32
    %1552 = vector.broadcast %cst_404 : f32 to vector<8x256xf32>
    %1553 = arith.select %1518, %1551, %1552 : vector<8x256xi1>, vector<8x256xf32>
    %1554 = arith.addf %1550, %1553 : vector<8x256xf32>
    %c3_405 = arith.constant 3 : index
    %c2_406 = arith.constant 2 : index
    %c0_407 = arith.constant 0 : index
    %c0_408 = arith.constant 0 : index
    %1555 = vector.load %arg2[%c3_405, %c2_406, %c0_407, %c0_408] : memref<4x9x8x256xf32, #tpu.memory_space<vmem>>, vector<1x1x8x256xf32>
    %1556 = vector.shape_cast %1555 : vector<1x1x8x256xf32> to vector<8x256xf32>
    %c30_i32_409 = arith.constant 30 : i32
    %1557 = tpu.dynamic_rotate %1556 by %c30_i32_409 dim 1 : vector<8x256xf32>, i32 -> vector<8x256xf32>
    %cst_410 = arith.constant 0.000000e+00 : f32
    %1558 = vector.broadcast %cst_410 : f32 to vector<8x256xf32>
    %1559 = arith.select %1503, %1557, %1558 : vector<8x256xi1>, vector<8x256xf32>
    %1560 = arith.addf %1556, %1559 : vector<8x256xf32>
    %c15_i32_411 = arith.constant 15 : i32
    %1561 = tpu.dynamic_rotate %1556 by %c15_i32_411 dim 1 : vector<8x256xf32>, i32 -> vector<8x256xf32>
    %cst_412 = arith.constant 0.000000e+00 : f32
    %1562 = vector.broadcast %cst_412 : f32 to vector<8x256xf32>
    %1563 = arith.select %1508, %1561, %1562 : vector<8x256xi1>, vector<8x256xf32>
    %1564 = arith.addf %1560, %1563 : vector<8x256xf32>
    %c241_i32_413 = arith.constant 241 : i32
    %1565 = tpu.dynamic_rotate %1556 by %c241_i32_413 dim 1 : vector<8x256xf32>, i32 -> vector<8x256xf32>
    %cst_414 = arith.constant 0.000000e+00 : f32
    %1566 = vector.broadcast %cst_414 : f32 to vector<8x256xf32>
    %1567 = arith.select %1513, %1565, %1566 : vector<8x256xi1>, vector<8x256xf32>
    %1568 = arith.addf %1564, %1567 : vector<8x256xf32>
    %c226_i32_415 = arith.constant 226 : i32
    %1569 = tpu.dynamic_rotate %1556 by %c226_i32_415 dim 1 : vector<8x256xf32>, i32 -> vector<8x256xf32>
    %cst_416 = arith.constant 0.000000e+00 : f32
    %1570 = vector.broadcast %cst_416 : f32 to vector<8x256xf32>
    %1571 = arith.select %1518, %1569, %1570 : vector<8x256xi1>, vector<8x256xf32>
    %1572 = arith.addf %1568, %1571 : vector<8x256xf32>
    %c3_417 = arith.constant 3 : index
    %c3_418 = arith.constant 3 : index
    %c0_419 = arith.constant 0 : index
    %c0_420 = arith.constant 0 : index
    %1573 = vector.load %arg2[%c3_417, %c3_418, %c0_419, %c0_420] : memref<4x9x8x256xf32, #tpu.memory_space<vmem>>, vector<1x1x8x256xf32>
    %1574 = vector.shape_cast %1573 : vector<1x1x8x256xf32> to vector<8x256xf32>
    %c30_i32_421 = arith.constant 30 : i32
    %1575 = tpu.dynamic_rotate %1574 by %c30_i32_421 dim 1 : vector<8x256xf32>, i32 -> vector<8x256xf32>
    %cst_422 = arith.constant 0.000000e+00 : f32
    %1576 = vector.broadcast %cst_422 : f32 to vector<8x256xf32>
    %1577 = arith.select %1503, %1575, %1576 : vector<8x256xi1>, vector<8x256xf32>
    %1578 = arith.addf %1574, %1577 : vector<8x256xf32>
    %c15_i32_423 = arith.constant 15 : i32
    %1579 = tpu.dynamic_rotate %1574 by %c15_i32_423 dim 1 : vector<8x256xf32>, i32 -> vector<8x256xf32>
    %cst_424 = arith.constant 0.000000e+00 : f32
    %1580 = vector.broadcast %cst_424 : f32 to vector<8x256xf32>
    %1581 = arith.select %1508, %1579, %1580 : vector<8x256xi1>, vector<8x256xf32>
    %1582 = arith.addf %1578, %1581 : vector<8x256xf32>
    %c241_i32_425 = arith.constant 241 : i32
    %1583 = tpu.dynamic_rotate %1574 by %c241_i32_425 dim 1 : vector<8x256xf32>, i32 -> vector<8x256xf32>
    %cst_426 = arith.constant 0.000000e+00 : f32
    %1584 = vector.broadcast %cst_426 : f32 to vector<8x256xf32>
    %1585 = arith.select %1513, %1583, %1584 : vector<8x256xi1>, vector<8x256xf32>
    %1586 = arith.addf %1582, %1585 : vector<8x256xf32>
    %c226_i32_427 = arith.constant 226 : i32
    %1587 = tpu.dynamic_rotate %1574 by %c226_i32_427 dim 1 : vector<8x256xf32>, i32 -> vector<8x256xf32>
    %cst_428 = arith.constant 0.000000e+00 : f32
    %1588 = vector.broadcast %cst_428 : f32 to vector<8x256xf32>
    %1589 = arith.select %1518, %1587, %1588 : vector<8x256xi1>, vector<8x256xf32>
    %1590 = arith.addf %1586, %1589 : vector<8x256xf32>
    %c3_429 = arith.constant 3 : index
    %c4_430 = arith.constant 4 : index
    %c0_431 = arith.constant 0 : index
    %c0_432 = arith.constant 0 : index
    %1591 = vector.load %arg2[%c3_429, %c4_430, %c0_431, %c0_432] : memref<4x9x8x256xf32, #tpu.memory_space<vmem>>, vector<1x1x8x256xf32>
    %1592 = vector.shape_cast %1591 : vector<1x1x8x256xf32> to vector<8x256xf32>
    %c30_i32_433 = arith.constant 30 : i32
    %1593 = tpu.dynamic_rotate %1592 by %c30_i32_433 dim 1 : vector<8x256xf32>, i32 -> vector<8x256xf32>
    %cst_434 = arith.constant 0.000000e+00 : f32
    %1594 = vector.broadcast %cst_434 : f32 to vector<8x256xf32>
    %1595 = arith.select %1503, %1593, %1594 : vector<8x256xi1>, vector<8x256xf32>
    %1596 = arith.addf %1592, %1595 : vector<8x256xf32>
    %c15_i32_435 = arith.constant 15 : i32
    %1597 = tpu.dynamic_rotate %1592 by %c15_i32_435 dim 1 : vector<8x256xf32>, i32 -> vector<8x256xf32>
    %cst_436 = arith.constant 0.000000e+00 : f32
    %1598 = vector.broadcast %cst_436 : f32 to vector<8x256xf32>
    %1599 = arith.select %1508, %1597, %1598 : vector<8x256xi1>, vector<8x256xf32>
    %1600 = arith.addf %1596, %1599 : vector<8x256xf32>
    %c241_i32_437 = arith.constant 241 : i32
    %1601 = tpu.dynamic_rotate %1592 by %c241_i32_437 dim 1 : vector<8x256xf32>, i32 -> vector<8x256xf32>
    %cst_438 = arith.constant 0.000000e+00 : f32
    %1602 = vector.broadcast %cst_438 : f32 to vector<8x256xf32>
    %1603 = arith.select %1513, %1601, %1602 : vector<8x256xi1>, vector<8x256xf32>
    %1604 = arith.addf %1600, %1603 : vector<8x256xf32>
    %c226_i32_439 = arith.constant 226 : i32
    %1605 = tpu.dynamic_rotate %1592 by %c226_i32_439 dim 1 : vector<8x256xf32>, i32 -> vector<8x256xf32>
    %cst_440 = arith.constant 0.000000e+00 : f32
    %1606 = vector.broadcast %cst_440 : f32 to vector<8x256xf32>
    %1607 = arith.select %1518, %1605, %1606 : vector<8x256xi1>, vector<8x256xf32>
    %1608 = arith.addf %1604, %1607 : vector<8x256xf32>
    %c3_441 = arith.constant 3 : index
    %c5_442 = arith.constant 5 : index
    %c0_443 = arith.constant 0 : index
    %c0_444 = arith.constant 0 : index
    %1609 = vector.load %arg2[%c3_441, %c5_442, %c0_443, %c0_444] : memref<4x9x8x256xf32, #tpu.memory_space<vmem>>, vector<1x1x8x256xf32>
    %1610 = vector.shape_cast %1609 : vector<1x1x8x256xf32> to vector<8x256xf32>
    %c30_i32_445 = arith.constant 30 : i32
    %1611 = tpu.dynamic_rotate %1610 by %c30_i32_445 dim 1 : vector<8x256xf32>, i32 -> vector<8x256xf32>
    %cst_446 = arith.constant 0.000000e+00 : f32
    %1612 = vector.broadcast %cst_446 : f32 to vector<8x256xf32>
    %1613 = arith.select %1503, %1611, %1612 : vector<8x256xi1>, vector<8x256xf32>
    %1614 = arith.addf %1610, %1613 : vector<8x256xf32>
    %c15_i32_447 = arith.constant 15 : i32
    %1615 = tpu.dynamic_rotate %1610 by %c15_i32_447 dim 1 : vector<8x256xf32>, i32 -> vector<8x256xf32>
    %cst_448 = arith.constant 0.000000e+00 : f32
    %1616 = vector.broadcast %cst_448 : f32 to vector<8x256xf32>
    %1617 = arith.select %1508, %1615, %1616 : vector<8x256xi1>, vector<8x256xf32>
    %1618 = arith.addf %1614, %1617 : vector<8x256xf32>
    %c241_i32_449 = arith.constant 241 : i32
    %1619 = tpu.dynamic_rotate %1610 by %c241_i32_449 dim 1 : vector<8x256xf32>, i32 -> vector<8x256xf32>
    %cst_450 = arith.constant 0.000000e+00 : f32
    %1620 = vector.broadcast %cst_450 : f32 to vector<8x256xf32>
    %1621 = arith.select %1513, %1619, %1620 : vector<8x256xi1>, vector<8x256xf32>
    %1622 = arith.addf %1618, %1621 : vector<8x256xf32>
    %c226_i32_451 = arith.constant 226 : i32
    %1623 = tpu.dynamic_rotate %1610 by %c226_i32_451 dim 1 : vector<8x256xf32>, i32 -> vector<8x256xf32>
    %cst_452 = arith.constant 0.000000e+00 : f32
    %1624 = vector.broadcast %cst_452 : f32 to vector<8x256xf32>
    %1625 = arith.select %1518, %1623, %1624 : vector<8x256xi1>, vector<8x256xf32>
    %1626 = arith.addf %1622, %1625 : vector<8x256xf32>
    %c3_453 = arith.constant 3 : index
    %c6_454 = arith.constant 6 : index
    %c0_455 = arith.constant 0 : index
    %c0_456 = arith.constant 0 : index
    %1627 = vector.load %arg2[%c3_453, %c6_454, %c0_455, %c0_456] : memref<4x9x8x256xf32, #tpu.memory_space<vmem>>, vector<1x1x8x256xf32>
    %1628 = vector.shape_cast %1627 : vector<1x1x8x256xf32> to vector<8x256xf32>
    %c30_i32_457 = arith.constant 30 : i32
    %1629 = tpu.dynamic_rotate %1628 by %c30_i32_457 dim 1 : vector<8x256xf32>, i32 -> vector<8x256xf32>
    %cst_458 = arith.constant 0.000000e+00 : f32
    %1630 = vector.broadcast %cst_458 : f32 to vector<8x256xf32>
    %1631 = arith.select %1503, %1629, %1630 : vector<8x256xi1>, vector<8x256xf32>
    %1632 = arith.addf %1628, %1631 : vector<8x256xf32>
    %c15_i32_459 = arith.constant 15 : i32
    %1633 = tpu.dynamic_rotate %1628 by %c15_i32_459 dim 1 : vector<8x256xf32>, i32 -> vector<8x256xf32>
    %cst_460 = arith.constant 0.000000e+00 : f32
    %1634 = vector.broadcast %cst_460 : f32 to vector<8x256xf32>
    %1635 = arith.select %1508, %1633, %1634 : vector<8x256xi1>, vector<8x256xf32>
    %1636 = arith.addf %1632, %1635 : vector<8x256xf32>
    %c241_i32_461 = arith.constant 241 : i32
    %1637 = tpu.dynamic_rotate %1628 by %c241_i32_461 dim 1 : vector<8x256xf32>, i32 -> vector<8x256xf32>
    %cst_462 = arith.constant 0.000000e+00 : f32
    %1638 = vector.broadcast %cst_462 : f32 to vector<8x256xf32>
    %1639 = arith.select %1513, %1637, %1638 : vector<8x256xi1>, vector<8x256xf32>
    %1640 = arith.addf %1636, %1639 : vector<8x256xf32>
    %c226_i32_463 = arith.constant 226 : i32
    %1641 = tpu.dynamic_rotate %1628 by %c226_i32_463 dim 1 : vector<8x256xf32>, i32 -> vector<8x256xf32>
    %cst_464 = arith.constant 0.000000e+00 : f32
    %1642 = vector.broadcast %cst_464 : f32 to vector<8x256xf32>
    %1643 = arith.select %1518, %1641, %1642 : vector<8x256xi1>, vector<8x256xf32>
    %1644 = arith.addf %1640, %1643 : vector<8x256xf32>
    %c3_465 = arith.constant 3 : index
    %c7_466 = arith.constant 7 : index
    %c0_467 = arith.constant 0 : index
    %c0_468 = arith.constant 0 : index
    %1645 = vector.load %arg2[%c3_465, %c7_466, %c0_467, %c0_468] : memref<4x9x8x256xf32, #tpu.memory_space<vmem>>, vector<1x1x8x256xf32>
    %1646 = vector.shape_cast %1645 : vector<1x1x8x256xf32> to vector<8x256xf32>
    %c30_i32_469 = arith.constant 30 : i32
    %1647 = tpu.dynamic_rotate %1646 by %c30_i32_469 dim 1 : vector<8x256xf32>, i32 -> vector<8x256xf32>
    %cst_470 = arith.constant 0.000000e+00 : f32
    %1648 = vector.broadcast %cst_470 : f32 to vector<8x256xf32>
    %1649 = arith.select %1503, %1647, %1648 : vector<8x256xi1>, vector<8x256xf32>
    %1650 = arith.addf %1646, %1649 : vector<8x256xf32>
    %c15_i32_471 = arith.constant 15 : i32
    %1651 = tpu.dynamic_rotate %1646 by %c15_i32_471 dim 1 : vector<8x256xf32>, i32 -> vector<8x256xf32>
    %cst_472 = arith.constant 0.000000e+00 : f32
    %1652 = vector.broadcast %cst_472 : f32 to vector<8x256xf32>
    %1653 = arith.select %1508, %1651, %1652 : vector<8x256xi1>, vector<8x256xf32>
    %1654 = arith.addf %1650, %1653 : vector<8x256xf32>
    %c241_i32_473 = arith.constant 241 : i32
    %1655 = tpu.dynamic_rotate %1646 by %c241_i32_473 dim 1 : vector<8x256xf32>, i32 -> vector<8x256xf32>
    %cst_474 = arith.constant 0.000000e+00 : f32
    %1656 = vector.broadcast %cst_474 : f32 to vector<8x256xf32>
    %1657 = arith.select %1513, %1655, %1656 : vector<8x256xi1>, vector<8x256xf32>
    %1658 = arith.addf %1654, %1657 : vector<8x256xf32>
    %c226_i32_475 = arith.constant 226 : i32
    %1659 = tpu.dynamic_rotate %1646 by %c226_i32_475 dim 1 : vector<8x256xf32>, i32 -> vector<8x256xf32>
    %cst_476 = arith.constant 0.000000e+00 : f32
    %1660 = vector.broadcast %cst_476 : f32 to vector<8x256xf32>
    %1661 = arith.select %1518, %1659, %1660 : vector<8x256xi1>, vector<8x256xf32>
    %1662 = arith.addf %1658, %1661 : vector<8x256xf32>
    %c3_477 = arith.constant 3 : index
    %c8_478 = arith.constant 8 : index
    %c0_479 = arith.constant 0 : index
    %c0_480 = arith.constant 0 : index
    %1663 = vector.load %arg2[%c3_477, %c8_478, %c0_479, %c0_480] : memref<4x9x8x256xf32, #tpu.memory_space<vmem>>, vector<1x1x8x256xf32>
    %1664 = vector.shape_cast %1663 : vector<1x1x8x256xf32> to vector<8x256xf32>
    %c30_i32_481 = arith.constant 30 : i32
    %1665 = tpu.dynamic_rotate %1664 by %c30_i32_481 dim 1 : vector<8x256xf32>, i32 -> vector<8x256xf32>
    %cst_482 = arith.constant 0.000000e+00 : f32
    %1666 = vector.broadcast %cst_482 : f32 to vector<8x256xf32>
    %1667 = arith.select %1503, %1665, %1666 : vector<8x256xi1>, vector<8x256xf32>
    %1668 = arith.addf %1664, %1667 : vector<8x256xf32>
    %c15_i32_483 = arith.constant 15 : i32
    %1669 = tpu.dynamic_rotate %1664 by %c15_i32_483 dim 1 : vector<8x256xf32>, i32 -> vector<8x256xf32>
    %cst_484 = arith.constant 0.000000e+00 : f32
    %1670 = vector.broadcast %cst_484 : f32 to vector<8x256xf32>
    %1671 = arith.select %1508, %1669, %1670 : vector<8x256xi1>, vector<8x256xf32>
    %1672 = arith.addf %1668, %1671 : vector<8x256xf32>
    %c241_i32_485 = arith.constant 241 : i32
    %1673 = tpu.dynamic_rotate %1664 by %c241_i32_485 dim 1 : vector<8x256xf32>, i32 -> vector<8x256xf32>
    %cst_486 = arith.constant 0.000000e+00 : f32
    %1674 = vector.broadcast %cst_486 : f32 to vector<8x256xf32>
    %1675 = arith.select %1513, %1673, %1674 : vector<8x256xi1>, vector<8x256xf32>
    %1676 = arith.addf %1672, %1675 : vector<8x256xf32>
    %c226_i32_487 = arith.constant 226 : i32
    %1677 = tpu.dynamic_rotate %1664 by %c226_i32_487 dim 1 : vector<8x256xf32>, i32 -> vector<8x256xf32>
    %cst_488 = arith.constant 0.000000e+00 : f32
    %1678 = vector.broadcast %cst_488 : f32 to vector<8x256xf32>
    %1679 = arith.select %1518, %1677, %1678 : vector<8x256xi1>, vector<8x256xf32>
    %1680 = arith.addf %1676, %1679 : vector<8x256xf32>
    %1681 = vector.broadcast %0 : f32 to vector<8x256xf32>
    %1682 = arith.mulf %1536, %1681 : vector<8x256xf32>
    %1683 = vector.broadcast %45 : f32 to vector<8x256xf32>
    %1684 = arith.mulf %1536, %1683 : vector<8x256xf32>
    %1685 = vector.broadcast %5 : f32 to vector<8x256xf32>
    %1686 = arith.mulf %1554, %1685 : vector<8x256xf32>
    %1687 = arith.addf %1682, %1686 : vector<8x256xf32>
    %1688 = vector.broadcast %50 : f32 to vector<8x256xf32>
    %1689 = arith.mulf %1554, %1688 : vector<8x256xf32>
    %1690 = arith.addf %1684, %1689 : vector<8x256xf32>
    %1691 = vector.broadcast %10 : f32 to vector<8x256xf32>
    %1692 = arith.mulf %1572, %1691 : vector<8x256xf32>
    %1693 = arith.addf %1687, %1692 : vector<8x256xf32>
    %1694 = vector.broadcast %55 : f32 to vector<8x256xf32>
    %1695 = arith.mulf %1572, %1694 : vector<8x256xf32>
    %1696 = arith.addf %1690, %1695 : vector<8x256xf32>
    %1697 = vector.broadcast %15 : f32 to vector<8x256xf32>
    %1698 = arith.mulf %1590, %1697 : vector<8x256xf32>
    %1699 = arith.addf %1693, %1698 : vector<8x256xf32>
    %1700 = vector.broadcast %60 : f32 to vector<8x256xf32>
    %1701 = arith.mulf %1590, %1700 : vector<8x256xf32>
    %1702 = arith.addf %1696, %1701 : vector<8x256xf32>
    %1703 = vector.broadcast %20 : f32 to vector<8x256xf32>
    %1704 = arith.mulf %1608, %1703 : vector<8x256xf32>
    %1705 = arith.addf %1699, %1704 : vector<8x256xf32>
    %1706 = vector.broadcast %65 : f32 to vector<8x256xf32>
    %1707 = arith.mulf %1608, %1706 : vector<8x256xf32>
    %1708 = arith.addf %1702, %1707 : vector<8x256xf32>
    %1709 = vector.broadcast %25 : f32 to vector<8x256xf32>
    %1710 = arith.mulf %1626, %1709 : vector<8x256xf32>
    %1711 = arith.addf %1705, %1710 : vector<8x256xf32>
    %1712 = vector.broadcast %70 : f32 to vector<8x256xf32>
    %1713 = arith.mulf %1626, %1712 : vector<8x256xf32>
    %1714 = arith.addf %1708, %1713 : vector<8x256xf32>
    %1715 = vector.broadcast %30 : f32 to vector<8x256xf32>
    %1716 = arith.mulf %1644, %1715 : vector<8x256xf32>
    %1717 = arith.addf %1711, %1716 : vector<8x256xf32>
    %1718 = vector.broadcast %75 : f32 to vector<8x256xf32>
    %1719 = arith.mulf %1644, %1718 : vector<8x256xf32>
    %1720 = arith.addf %1714, %1719 : vector<8x256xf32>
    %1721 = vector.broadcast %35 : f32 to vector<8x256xf32>
    %1722 = arith.mulf %1662, %1721 : vector<8x256xf32>
    %1723 = arith.addf %1717, %1722 : vector<8x256xf32>
    %1724 = vector.broadcast %80 : f32 to vector<8x256xf32>
    %1725 = arith.mulf %1662, %1724 : vector<8x256xf32>
    %1726 = arith.addf %1720, %1725 : vector<8x256xf32>
    %1727 = vector.broadcast %40 : f32 to vector<8x256xf32>
    %1728 = arith.mulf %1680, %1727 : vector<8x256xf32>
    %1729 = arith.addf %1723, %1728 : vector<8x256xf32>
    %1730 = vector.broadcast %85 : f32 to vector<8x256xf32>
    %1731 = arith.mulf %1680, %1730 : vector<8x256xf32>
    %1732 = arith.addf %1726, %1731 : vector<8x256xf32>
    %c30_i32_489 = arith.constant 30 : i32
    %1733 = tpu.dynamic_rotate %1729 by %c30_i32_489 dim 1 : vector<8x256xf32>, i32 -> vector<8x256xf32>
    %cst_490 = arith.constant 0.000000e+00 : f32
    %1734 = vector.broadcast %cst_490 : f32 to vector<8x256xf32>
    %1735 = arith.select %1503, %1733, %1734 : vector<8x256xi1>, vector<8x256xf32>
    %1736 = arith.addf %1494, %1735 : vector<8x256xf32>
    %c30_i32_491 = arith.constant 30 : i32
    %1737 = tpu.dynamic_rotate %1732 by %c30_i32_491 dim 1 : vector<8x256xf32>, i32 -> vector<8x256xf32>
    %cst_492 = arith.constant 0.000000e+00 : f32
    %1738 = vector.broadcast %cst_492 : f32 to vector<8x256xf32>
    %1739 = arith.select %1503, %1737, %1738 : vector<8x256xi1>, vector<8x256xf32>
    %1740 = arith.addf %1498, %1739 : vector<8x256xf32>
    %1741 = vector.broadcast %1 : f32 to vector<8x256xf32>
    %1742 = arith.mulf %1536, %1741 : vector<8x256xf32>
    %1743 = vector.broadcast %46 : f32 to vector<8x256xf32>
    %1744 = arith.mulf %1536, %1743 : vector<8x256xf32>
    %1745 = vector.broadcast %6 : f32 to vector<8x256xf32>
    %1746 = arith.mulf %1554, %1745 : vector<8x256xf32>
    %1747 = arith.addf %1742, %1746 : vector<8x256xf32>
    %1748 = vector.broadcast %51 : f32 to vector<8x256xf32>
    %1749 = arith.mulf %1554, %1748 : vector<8x256xf32>
    %1750 = arith.addf %1744, %1749 : vector<8x256xf32>
    %1751 = vector.broadcast %11 : f32 to vector<8x256xf32>
    %1752 = arith.mulf %1572, %1751 : vector<8x256xf32>
    %1753 = arith.addf %1747, %1752 : vector<8x256xf32>
    %1754 = vector.broadcast %56 : f32 to vector<8x256xf32>
    %1755 = arith.mulf %1572, %1754 : vector<8x256xf32>
    %1756 = arith.addf %1750, %1755 : vector<8x256xf32>
    %1757 = vector.broadcast %16 : f32 to vector<8x256xf32>
    %1758 = arith.mulf %1590, %1757 : vector<8x256xf32>
    %1759 = arith.addf %1753, %1758 : vector<8x256xf32>
    %1760 = vector.broadcast %61 : f32 to vector<8x256xf32>
    %1761 = arith.mulf %1590, %1760 : vector<8x256xf32>
    %1762 = arith.addf %1756, %1761 : vector<8x256xf32>
    %1763 = vector.broadcast %21 : f32 to vector<8x256xf32>
    %1764 = arith.mulf %1608, %1763 : vector<8x256xf32>
    %1765 = arith.addf %1759, %1764 : vector<8x256xf32>
    %1766 = vector.broadcast %66 : f32 to vector<8x256xf32>
    %1767 = arith.mulf %1608, %1766 : vector<8x256xf32>
    %1768 = arith.addf %1762, %1767 : vector<8x256xf32>
    %1769 = vector.broadcast %26 : f32 to vector<8x256xf32>
    %1770 = arith.mulf %1626, %1769 : vector<8x256xf32>
    %1771 = arith.addf %1765, %1770 : vector<8x256xf32>
    %1772 = vector.broadcast %71 : f32 to vector<8x256xf32>
    %1773 = arith.mulf %1626, %1772 : vector<8x256xf32>
    %1774 = arith.addf %1768, %1773 : vector<8x256xf32>
    %1775 = vector.broadcast %31 : f32 to vector<8x256xf32>
    %1776 = arith.mulf %1644, %1775 : vector<8x256xf32>
    %1777 = arith.addf %1771, %1776 : vector<8x256xf32>
    %1778 = vector.broadcast %76 : f32 to vector<8x256xf32>
    %1779 = arith.mulf %1644, %1778 : vector<8x256xf32>
    %1780 = arith.addf %1774, %1779 : vector<8x256xf32>
    %1781 = vector.broadcast %36 : f32 to vector<8x256xf32>
    %1782 = arith.mulf %1662, %1781 : vector<8x256xf32>
    %1783 = arith.addf %1777, %1782 : vector<8x256xf32>
    %1784 = vector.broadcast %81 : f32 to vector<8x256xf32>
    %1785 = arith.mulf %1662, %1784 : vector<8x256xf32>
    %1786 = arith.addf %1780, %1785 : vector<8x256xf32>
    %1787 = vector.broadcast %41 : f32 to vector<8x256xf32>
    %1788 = arith.mulf %1680, %1787 : vector<8x256xf32>
    %1789 = arith.addf %1783, %1788 : vector<8x256xf32>
    %1790 = vector.broadcast %86 : f32 to vector<8x256xf32>
    %1791 = arith.mulf %1680, %1790 : vector<8x256xf32>
    %1792 = arith.addf %1786, %1791 : vector<8x256xf32>
    %c15_i32_493 = arith.constant 15 : i32
    %1793 = tpu.dynamic_rotate %1789 by %c15_i32_493 dim 1 : vector<8x256xf32>, i32 -> vector<8x256xf32>
    %cst_494 = arith.constant 0.000000e+00 : f32
    %1794 = vector.broadcast %cst_494 : f32 to vector<8x256xf32>
    %1795 = arith.select %1508, %1793, %1794 : vector<8x256xi1>, vector<8x256xf32>
    %1796 = arith.addf %1736, %1795 : vector<8x256xf32>
    %c15_i32_495 = arith.constant 15 : i32
    %1797 = tpu.dynamic_rotate %1792 by %c15_i32_495 dim 1 : vector<8x256xf32>, i32 -> vector<8x256xf32>
    %cst_496 = arith.constant 0.000000e+00 : f32
    %1798 = vector.broadcast %cst_496 : f32 to vector<8x256xf32>
    %1799 = arith.select %1508, %1797, %1798 : vector<8x256xi1>, vector<8x256xf32>
    %1800 = arith.addf %1740, %1799 : vector<8x256xf32>
    %1801 = vector.broadcast %2 : f32 to vector<8x256xf32>
    %1802 = arith.mulf %1536, %1801 : vector<8x256xf32>
    %1803 = vector.broadcast %47 : f32 to vector<8x256xf32>
    %1804 = arith.mulf %1536, %1803 : vector<8x256xf32>
    %1805 = vector.broadcast %7 : f32 to vector<8x256xf32>
    %1806 = arith.mulf %1554, %1805 : vector<8x256xf32>
    %1807 = arith.addf %1802, %1806 : vector<8x256xf32>
    %1808 = vector.broadcast %52 : f32 to vector<8x256xf32>
    %1809 = arith.mulf %1554, %1808 : vector<8x256xf32>
    %1810 = arith.addf %1804, %1809 : vector<8x256xf32>
    %1811 = vector.broadcast %12 : f32 to vector<8x256xf32>
    %1812 = arith.mulf %1572, %1811 : vector<8x256xf32>
    %1813 = arith.addf %1807, %1812 : vector<8x256xf32>
    %1814 = vector.broadcast %57 : f32 to vector<8x256xf32>
    %1815 = arith.mulf %1572, %1814 : vector<8x256xf32>
    %1816 = arith.addf %1810, %1815 : vector<8x256xf32>
    %1817 = vector.broadcast %17 : f32 to vector<8x256xf32>
    %1818 = arith.mulf %1590, %1817 : vector<8x256xf32>
    %1819 = arith.addf %1813, %1818 : vector<8x256xf32>
    %1820 = vector.broadcast %62 : f32 to vector<8x256xf32>
    %1821 = arith.mulf %1590, %1820 : vector<8x256xf32>
    %1822 = arith.addf %1816, %1821 : vector<8x256xf32>
    %1823 = vector.broadcast %22 : f32 to vector<8x256xf32>
    %1824 = arith.mulf %1608, %1823 : vector<8x256xf32>
    %1825 = arith.addf %1819, %1824 : vector<8x256xf32>
    %1826 = vector.broadcast %67 : f32 to vector<8x256xf32>
    %1827 = arith.mulf %1608, %1826 : vector<8x256xf32>
    %1828 = arith.addf %1822, %1827 : vector<8x256xf32>
    %1829 = vector.broadcast %27 : f32 to vector<8x256xf32>
    %1830 = arith.mulf %1626, %1829 : vector<8x256xf32>
    %1831 = arith.addf %1825, %1830 : vector<8x256xf32>
    %1832 = vector.broadcast %72 : f32 to vector<8x256xf32>
    %1833 = arith.mulf %1626, %1832 : vector<8x256xf32>
    %1834 = arith.addf %1828, %1833 : vector<8x256xf32>
    %1835 = vector.broadcast %32 : f32 to vector<8x256xf32>
    %1836 = arith.mulf %1644, %1835 : vector<8x256xf32>
    %1837 = arith.addf %1831, %1836 : vector<8x256xf32>
    %1838 = vector.broadcast %77 : f32 to vector<8x256xf32>
    %1839 = arith.mulf %1644, %1838 : vector<8x256xf32>
    %1840 = arith.addf %1834, %1839 : vector<8x256xf32>
    %1841 = vector.broadcast %37 : f32 to vector<8x256xf32>
    %1842 = arith.mulf %1662, %1841 : vector<8x256xf32>
    %1843 = arith.addf %1837, %1842 : vector<8x256xf32>
    %1844 = vector.broadcast %82 : f32 to vector<8x256xf32>
    %1845 = arith.mulf %1662, %1844 : vector<8x256xf32>
    %1846 = arith.addf %1840, %1845 : vector<8x256xf32>
    %1847 = vector.broadcast %42 : f32 to vector<8x256xf32>
    %1848 = arith.mulf %1680, %1847 : vector<8x256xf32>
    %1849 = arith.addf %1843, %1848 : vector<8x256xf32>
    %1850 = vector.broadcast %87 : f32 to vector<8x256xf32>
    %1851 = arith.mulf %1680, %1850 : vector<8x256xf32>
    %1852 = arith.addf %1846, %1851 : vector<8x256xf32>
    %1853 = arith.addf %1796, %1849 : vector<8x256xf32>
    %1854 = arith.addf %1800, %1852 : vector<8x256xf32>
    %1855 = vector.broadcast %3 : f32 to vector<8x256xf32>
    %1856 = arith.mulf %1536, %1855 : vector<8x256xf32>
    %1857 = vector.broadcast %48 : f32 to vector<8x256xf32>
    %1858 = arith.mulf %1536, %1857 : vector<8x256xf32>
    %1859 = vector.broadcast %8 : f32 to vector<8x256xf32>
    %1860 = arith.mulf %1554, %1859 : vector<8x256xf32>
    %1861 = arith.addf %1856, %1860 : vector<8x256xf32>
    %1862 = vector.broadcast %53 : f32 to vector<8x256xf32>
    %1863 = arith.mulf %1554, %1862 : vector<8x256xf32>
    %1864 = arith.addf %1858, %1863 : vector<8x256xf32>
    %1865 = vector.broadcast %13 : f32 to vector<8x256xf32>
    %1866 = arith.mulf %1572, %1865 : vector<8x256xf32>
    %1867 = arith.addf %1861, %1866 : vector<8x256xf32>
    %1868 = vector.broadcast %58 : f32 to vector<8x256xf32>
    %1869 = arith.mulf %1572, %1868 : vector<8x256xf32>
    %1870 = arith.addf %1864, %1869 : vector<8x256xf32>
    %1871 = vector.broadcast %18 : f32 to vector<8x256xf32>
    %1872 = arith.mulf %1590, %1871 : vector<8x256xf32>
    %1873 = arith.addf %1867, %1872 : vector<8x256xf32>
    %1874 = vector.broadcast %63 : f32 to vector<8x256xf32>
    %1875 = arith.mulf %1590, %1874 : vector<8x256xf32>
    %1876 = arith.addf %1870, %1875 : vector<8x256xf32>
    %1877 = vector.broadcast %23 : f32 to vector<8x256xf32>
    %1878 = arith.mulf %1608, %1877 : vector<8x256xf32>
    %1879 = arith.addf %1873, %1878 : vector<8x256xf32>
    %1880 = vector.broadcast %68 : f32 to vector<8x256xf32>
    %1881 = arith.mulf %1608, %1880 : vector<8x256xf32>
    %1882 = arith.addf %1876, %1881 : vector<8x256xf32>
    %1883 = vector.broadcast %28 : f32 to vector<8x256xf32>
    %1884 = arith.mulf %1626, %1883 : vector<8x256xf32>
    %1885 = arith.addf %1879, %1884 : vector<8x256xf32>
    %1886 = vector.broadcast %73 : f32 to vector<8x256xf32>
    %1887 = arith.mulf %1626, %1886 : vector<8x256xf32>
    %1888 = arith.addf %1882, %1887 : vector<8x256xf32>
    %1889 = vector.broadcast %33 : f32 to vector<8x256xf32>
    %1890 = arith.mulf %1644, %1889 : vector<8x256xf32>
    %1891 = arith.addf %1885, %1890 : vector<8x256xf32>
    %1892 = vector.broadcast %78 : f32 to vector<8x256xf32>
    %1893 = arith.mulf %1644, %1892 : vector<8x256xf32>
    %1894 = arith.addf %1888, %1893 : vector<8x256xf32>
    %1895 = vector.broadcast %38 : f32 to vector<8x256xf32>
    %1896 = arith.mulf %1662, %1895 : vector<8x256xf32>
    %1897 = arith.addf %1891, %1896 : vector<8x256xf32>
    %1898 = vector.broadcast %83 : f32 to vector<8x256xf32>
    %1899 = arith.mulf %1662, %1898 : vector<8x256xf32>
    %1900 = arith.addf %1894, %1899 : vector<8x256xf32>
    %1901 = vector.broadcast %43 : f32 to vector<8x256xf32>
    %1902 = arith.mulf %1680, %1901 : vector<8x256xf32>
    %1903 = arith.addf %1897, %1902 : vector<8x256xf32>
    %1904 = vector.broadcast %88 : f32 to vector<8x256xf32>
    %1905 = arith.mulf %1680, %1904 : vector<8x256xf32>
    %1906 = arith.addf %1900, %1905 : vector<8x256xf32>
    %c241_i32_497 = arith.constant 241 : i32
    %1907 = tpu.dynamic_rotate %1903 by %c241_i32_497 dim 1 : vector<8x256xf32>, i32 -> vector<8x256xf32>
    %cst_498 = arith.constant 0.000000e+00 : f32
    %1908 = vector.broadcast %cst_498 : f32 to vector<8x256xf32>
    %1909 = arith.select %1513, %1907, %1908 : vector<8x256xi1>, vector<8x256xf32>
    %1910 = arith.addf %1853, %1909 : vector<8x256xf32>
    %c241_i32_499 = arith.constant 241 : i32
    %1911 = tpu.dynamic_rotate %1906 by %c241_i32_499 dim 1 : vector<8x256xf32>, i32 -> vector<8x256xf32>
    %cst_500 = arith.constant 0.000000e+00 : f32
    %1912 = vector.broadcast %cst_500 : f32 to vector<8x256xf32>
    %1913 = arith.select %1513, %1911, %1912 : vector<8x256xi1>, vector<8x256xf32>
    %1914 = arith.addf %1854, %1913 : vector<8x256xf32>
    %1915 = vector.broadcast %4 : f32 to vector<8x256xf32>
    %1916 = arith.mulf %1536, %1915 : vector<8x256xf32>
    %1917 = vector.broadcast %49 : f32 to vector<8x256xf32>
    %1918 = arith.mulf %1536, %1917 : vector<8x256xf32>
    %1919 = vector.broadcast %9 : f32 to vector<8x256xf32>
    %1920 = arith.mulf %1554, %1919 : vector<8x256xf32>
    %1921 = arith.addf %1916, %1920 : vector<8x256xf32>
    %1922 = vector.broadcast %54 : f32 to vector<8x256xf32>
    %1923 = arith.mulf %1554, %1922 : vector<8x256xf32>
    %1924 = arith.addf %1918, %1923 : vector<8x256xf32>
    %1925 = vector.broadcast %14 : f32 to vector<8x256xf32>
    %1926 = arith.mulf %1572, %1925 : vector<8x256xf32>
    %1927 = arith.addf %1921, %1926 : vector<8x256xf32>
    %1928 = vector.broadcast %59 : f32 to vector<8x256xf32>
    %1929 = arith.mulf %1572, %1928 : vector<8x256xf32>
    %1930 = arith.addf %1924, %1929 : vector<8x256xf32>
    %1931 = vector.broadcast %19 : f32 to vector<8x256xf32>
    %1932 = arith.mulf %1590, %1931 : vector<8x256xf32>
    %1933 = arith.addf %1927, %1932 : vector<8x256xf32>
    %1934 = vector.broadcast %64 : f32 to vector<8x256xf32>
    %1935 = arith.mulf %1590, %1934 : vector<8x256xf32>
    %1936 = arith.addf %1930, %1935 : vector<8x256xf32>
    %1937 = vector.broadcast %24 : f32 to vector<8x256xf32>
    %1938 = arith.mulf %1608, %1937 : vector<8x256xf32>
    %1939 = arith.addf %1933, %1938 : vector<8x256xf32>
    %1940 = vector.broadcast %69 : f32 to vector<8x256xf32>
    %1941 = arith.mulf %1608, %1940 : vector<8x256xf32>
    %1942 = arith.addf %1936, %1941 : vector<8x256xf32>
    %1943 = vector.broadcast %29 : f32 to vector<8x256xf32>
    %1944 = arith.mulf %1626, %1943 : vector<8x256xf32>
    %1945 = arith.addf %1939, %1944 : vector<8x256xf32>
    %1946 = vector.broadcast %74 : f32 to vector<8x256xf32>
    %1947 = arith.mulf %1626, %1946 : vector<8x256xf32>
    %1948 = arith.addf %1942, %1947 : vector<8x256xf32>
    %1949 = vector.broadcast %34 : f32 to vector<8x256xf32>
    %1950 = arith.mulf %1644, %1949 : vector<8x256xf32>
    %1951 = arith.addf %1945, %1950 : vector<8x256xf32>
    %1952 = vector.broadcast %79 : f32 to vector<8x256xf32>
    %1953 = arith.mulf %1644, %1952 : vector<8x256xf32>
    %1954 = arith.addf %1948, %1953 : vector<8x256xf32>
    %1955 = vector.broadcast %39 : f32 to vector<8x256xf32>
    %1956 = arith.mulf %1662, %1955 : vector<8x256xf32>
    %1957 = arith.addf %1951, %1956 : vector<8x256xf32>
    %1958 = vector.broadcast %84 : f32 to vector<8x256xf32>
    %1959 = arith.mulf %1662, %1958 : vector<8x256xf32>
    %1960 = arith.addf %1954, %1959 : vector<8x256xf32>
    %1961 = vector.broadcast %44 : f32 to vector<8x256xf32>
    %1962 = arith.mulf %1680, %1961 : vector<8x256xf32>
    %1963 = arith.addf %1957, %1962 : vector<8x256xf32>
    %1964 = vector.broadcast %89 : f32 to vector<8x256xf32>
    %1965 = arith.mulf %1680, %1964 : vector<8x256xf32>
    %1966 = arith.addf %1960, %1965 : vector<8x256xf32>
    %c226_i32_501 = arith.constant 226 : i32
    %1967 = tpu.dynamic_rotate %1963 by %c226_i32_501 dim 1 : vector<8x256xf32>, i32 -> vector<8x256xf32>
    %cst_502 = arith.constant 0.000000e+00 : f32
    %1968 = vector.broadcast %cst_502 : f32 to vector<8x256xf32>
    %1969 = arith.select %1518, %1967, %1968 : vector<8x256xi1>, vector<8x256xf32>
    %1970 = arith.addf %1910, %1969 : vector<8x256xf32>
    %c226_i32_503 = arith.constant 226 : i32
    %1971 = tpu.dynamic_rotate %1966 by %c226_i32_503 dim 1 : vector<8x256xf32>, i32 -> vector<8x256xf32>
    %cst_504 = arith.constant 0.000000e+00 : f32
    %1972 = vector.broadcast %cst_504 : f32 to vector<8x256xf32>
    %1973 = arith.select %1518, %1971, %1972 : vector<8x256xi1>, vector<8x256xf32>
    %1974 = arith.addf %1914, %1973 : vector<8x256xf32>
    %c0_505 = arith.constant 0 : index
    %c0_506 = arith.constant 0 : index
    %1975 = vector.load %arg3[%c0_505, %c0_506] : memref<8x256xf32, #tpu.memory_space<vmem>>, vector<8x256xf32>
    %cst_507 = arith.constant 1.000000e+00 : f32
    %1976 = vector.broadcast %cst_507 : f32 to vector<8x256xf32>
    %1977 = arith.subf %1975, %1976 : vector<8x256xf32>
    %cst_508 = arith.constant 1.000000e+02 : f32
    %1978 = vector.broadcast %cst_508 : f32 to vector<8x256xf32>
    %1979 = arith.mulf %1978, %1977 : vector<8x256xf32>
    %1980 = arith.addf %1970, %1979 : vector<8x256xf32>
    %c0_509 = arith.constant 0 : index
    %c0_510 = arith.constant 0 : index
    %1981 = vector.load %arg4[%c0_509, %c0_510] : memref<8x256xf32, #tpu.memory_space<vmem>>, vector<8x256xf32>
    tpu.vector_store %arg4[%c0_509, %c0_510], %1980 {strides = array<i32>} : memref<8x256xf32, #tpu.memory_space<vmem>>, vector<8x256xf32>,
    %cst_511 = arith.constant dense<0xFF800000> : vector<8xf32>
    %1982 = vector.multi_reduction <maximumf>, %1980, %cst_511 [1] : vector<8x256xf32> to vector<8xf32>
    %1983 = vector.shape_cast %1982 : vector<8xf32> to vector<8x1xf32>
    %1984 = vector.broadcast %1983 : vector<8x1xf32> to vector<8x256xf32>
    %1985 = arith.subf %1980, %1984 : vector<8x256xf32>
    %1986 = math.exp %1985 : vector<8x256xf32>
    %1987 = arith.mulf %1986, %1974 : vector<8x256xf32>
    %cst_512 = arith.constant dense<0.000000e+00> : vector<8xf32>
    %1988 = vector.multi_reduction <add>, %1987, %cst_512 [1] : vector<8x256xf32> to vector<8xf32>
    %1989 = vector.shape_cast %1988 : vector<8xf32> to vector<8x1xf32>
    %cst_513 = arith.constant dense<0.000000e+00> : vector<8xf32>
    %1990 = vector.multi_reduction <add>, %1986, %cst_513 [1] : vector<8x256xf32> to vector<8xf32>
    %1991 = vector.shape_cast %1990 : vector<8xf32> to vector<8x1xf32>
    %1992 = arith.divf %1989, %1991 : vector<8x1xf32>
    %1993 = math.tanh %1992 : vector<8x1xf32>
    %c0_514 = arith.constant 0 : index
    %c0_515 = arith.constant 0 : index
    %1994 = vector.load %arg5[%c0_514, %c0_515] : memref<8x1xf32, #tpu.memory_space<vmem>>, vector<8x1xf32>
    tpu.vector_store %arg5[%c0_514, %c0_515], %1993 {strides = array<i32>} : memref<8x1xf32, #tpu.memory_space<vmem>>, vector<8x1xf32>,
    return
  }
  func.func @transform_0(%arg0: i32) -> i32 {
    %c0_i32 = arith.constant 0 : i32
    %c0_i32_0 = arith.constant 0 : i32
    return %c0_i32 : i32
  }
  func.func @transform_1(%arg0: i32) -> (i32, i32, i32, i32) {
    %c0_i32 = arith.constant 0 : i32
    %c0_i32_0 = arith.constant 0 : i32
    %c0_i32_1 = arith.constant 0 : i32
    %c0_i32_2 = arith.constant 0 : i32
    return %c0_i32, %c0_i32_0, %arg0, %c0_i32_1 : i32, i32, i32, i32
  }
  func.func @transform_2(%arg0: i32) -> (i32, i32) {
    %c0_i32 = arith.constant 0 : i32
    %c0_i32_0 = arith.constant 0 : i32
    return %arg0, %c0_i32 : i32, i32
  }
  func.func @transform_3(%arg0: i32) -> (i32, i32) {
    %c0_i32 = arith.constant 0 : i32
    %c0_i32_0 = arith.constant 0 : i32
    return %arg0, %c0_i32 : i32, i32
  }
  func.func @transform_4(%arg0: i32) -> (i32, i32) {
    %c0_i32 = arith.constant 0 : i32
    %c0_i32_0 = arith.constant 0 : i32
    return %arg0, %c0_i32 : i32, i32
  }
}

</mosaic_0001>

<bundles_post_ra>
// kernel: squeeze.1
= control target key start
LH: loop header
LB: loop body
LE: loop exit
PB: predicated region body
PF: predicated region fallthrough
CT: control target
= control target key end

     0   :  { %s8_s6 = smov 3  ;;  %s11_s7 = smov 12  ;;  %vm13_vm0 = vcmask 1043458   ;;  %vm3_vm1 = vcmask 130048   ;;  %vm17_vm2 = vcmask 1048448   ;;  %vm31_vm3 = vcmask 917248   ;;  %s216_s0 = inlined_call_operand.vmem [shape: f32[2,1,16,16], index: 0, kind: input, shape index: {}]   ;;  %s217_s1 = inlined_call_operand.vmem [shape: f32[2,256], index: 1, kind: output, shape index: {}]  }
   0x1   :  { %v119_v0 = vld [vmem:[%s216_s0 + $0x7] ss:$16 sm:%s8_s6]   ;;  %v120_v1 = vld [vmem:[%s216_s0 - $0x11] ss:$16 sm:%s11_s7]   ;;  %s36_s12 = smov 3  ;;  %s39_s15 = smov 12 }
   0x2   :  { %v14_v2 = vsel %vm13_vm0, %v120_v1, %v119_v0  ;;  %v123_v3 = vld [vmem:[%s216_s0 + $0x5] ss:$16 sm:%s36_s12]   ;;  %s141_s16 = smov 112   ;;  %v124_v4 = vld [vmem:[%s216_s0 - $0x13] ss:$16 sm:%s39_s15]   ;;  %s22_s19 = smov 3 }
   0x3   :  { %15 = vrot.lane.b32.xlu0 %v14_v2, %s141_s16  ;;  %s25_s20 = smov 12  ;;  %v42_v5 = vsel %vm13_vm0, %v124_v4, %v123_v3  ;;  %v121_v6 = vld [vmem:[%s216_s0 + $0x6] ss:$16 sm:%s22_s19]   ;;  %s50_s25 = smov 3  ;;  %vm45_vm4 = vcmask 786048   ;;  %vm59_vm5 = vcmask 654848  }
   0x4   :  { %v122_v7 = vld [vmem:[%s216_s0 - $0x12] ss:$16 sm:%s25_s20]   ;;  %s142_s26 = smov 80   ;;  %v125_v9 = vld [vmem:[%s216_s0 + $0x4] ss:$16 sm:%s50_s25]   ;;  %s53_s29 = smov 12 }
   0x5   :  { %43 = vrot.lane.b32.xlu1 %v42_v5, %s142_s26  ;;  %v28_v8 = vsel %vm13_vm0, %v122_v7, %v121_v6  ;;  %v126_v10 = vld [vmem:[%s216_s0 - $0x14] ss:$16 sm:%s53_s29]   ;;  %s64_s3 = smov 3  ;;  %s67_s4 = smov 12  ;;  %vm73_vm6 = vcmask 523648   ;;  %vm87_vm7 = vcmask 392448  }
   0x6   :  { %s143_s5 = smov 96   ;;  %v56_v11 = vsel %vm13_vm0, %v126_v10, %v125_v9  ;;  %v127_v12 = vld [vmem:[%s216_s0 + $0x3] ss:$16 sm:%s64_s3]   ;;  %s78_s8 = smov 3  ;;  %v128_v13 = vld [vmem:[%s216_s0 - $0x15] ss:$16 sm:%s67_s4]  }
   0x7   :  { %29 = vrot.lane.b32.xlu0 %v28_v8, %s143_s5  ;;  %v129_v14 = vld [vmem:[%s216_s0 + $0x2] ss:$16 sm:%s78_s8]   ;;  %s81_s13 = smov 12  ;;  %s144_s14 = smov 64   ;;  %v70_v15 = vsel %vm13_vm0, %v128_v13, %v127_v12  ;;  %vm101_vm8 = vcmask 261248  }
   0x8   :  { %v130_v16 = vld [vmem:[%s216_s0 - $0x16] ss:$16 sm:%s81_s13]   ;;  %s92_s17 = smov 3  ;;  %s95_s18 = smov 12 }
   0x9   :  { %57 = vrot.lane.b32.xlu1 %v56_v11, %s144_s14  ;;  %v84_v17 = vsel %vm13_vm0, %v130_v16, %v129_v14  ;;  %v131_v18 = vld [vmem:[%s216_s0 + $0x1] ss:$16 sm:%s92_s17]   ;;  %s145_s23 = smov 48   ;;  %v2_v20 = vld [vmem:[%s216_s0] ss:$8 sm:$0xf]  }
   0xa   :  { %v132_v19 = vld [vmem:[%s216_s0 - $0x17] ss:$16 sm:%s95_s18]   ;;  %4 = vst.msk [vmem:[#allocation0] ss:$8 sm:$0x3] %vm3_vm1, %v2_v20   ;;  %s146_s0 = smov 32  }
   0xb   :  { %71 = vrot.lane.b32.xlu0 %v70_v15, %s145_s23  ;;  %v98_v21 = vsel %vm13_vm0, %v132_v19, %v131_v18  ;;  %6 = vst.msk [vmem:[#allocation0 - $0xf] ss:$8 sm:$0xc] %vm3_vm1, %v2_v20   ;;  %s147_s26 = smov 16  }
   0xd   :  { %85 = vrot.lane.b32.xlu1 %v84_v17, %s146_s0 }
   0xf   :  { %99 = vrot.lane.b32.xlu0 %v98_v21, %s147_s26 }
  0x75   :  { %v16_v22 = vpop.permute.xlu0 %15  }
  0x76   :  { %18 = vst.msk [vmem:[#allocation0] sm:$0x3] %vm17_vm2, %v16_v22   ;;  %20 = vst.msk [vmem:[#allocation0 + $0x6] sm:$0xc] %vm17_vm2, %v16_v22  }
  0x77   :  { %v44_v23 = vpop.permute.xlu1 %43  }
  0x79   :  { %v30_v24 = vpop.permute.xlu0 %29  }
  0x7a   :  { %32 = vst.msk [vmem:[#allocation0] sm:$0x3] %vm31_vm3, %v30_v24   ;;  %34 = vst.msk [vmem:[#allocation0 + $0x6] sm:$0xc] %vm31_vm3, %v30_v24  }
  0x7b   :  { %46 = vst.msk [vmem:[#allocation0] sm:$0x3] %vm45_vm4, %v44_v23   ;;  %48 = vst.msk [vmem:[#allocation0 + $0x6] sm:$0xc] %vm45_vm4, %v44_v23   ;;  %v58_v25 = vpop.permute.xlu1 %57  }
  0x7c   :  { %60 = vst.msk [vmem:[#allocation0] sm:$0x3] %vm59_vm5, %v58_v25   ;;  %62 = vst.msk [vmem:[#allocation0 + $0x6] sm:$0xc] %vm59_vm5, %v58_v25  }
  0x7d   :  { %v72_v26 = vpop.permute.xlu0 %71  }
  0x7e   :  { %74 = vst.msk [vmem:[#allocation0] sm:$0x3] %vm73_vm6, %v72_v26   ;;  %76 = vst.msk [vmem:[#allocation0 + $0x6] sm:$0xc] %vm73_vm6, %v72_v26  }
  0x7f   :  { %v86_v27 = vpop.permute.xlu1 %85  }
  0x80   :  { %88 = vst.msk [vmem:[#allocation0] sm:$0x3] %vm87_vm7, %v86_v27   ;;  %90 = vst.msk [vmem:[#allocation0 + $0x6] sm:$0xc] %vm87_vm7, %v86_v27  }
  0x81   :  { %v100_v28 = vpop.permute.xlu0 %99  }
  0x82   :  { %102 = vst.msk [vmem:[#allocation0] sm:$0x3] %vm101_vm8, %v100_v28   ;;  %104 = vst.msk [vmem:[#allocation0 + $0x6] sm:$0xc] %vm101_vm8, %v100_v28  }
  0x89   :  { %v109_v29 = vld [vmem:[#allocation0] sm:$0x3]  ;;  %v114_v30 = vld [vmem:[#allocation0 + $0x8] sm:$0x3] }
  0x8a   :  { %112 = vst [vmem:[%s217_s1] sm:$0x3] %v109_v29  ;;  %133 = vst [vmem:[%s217_s1 + $0x2] sm:$0x3] %v114_v30 }

// kernel: core_model_forward.1
= control target key start
LH: loop header
LB: loop body
LE: loop exit
PB: predicated region body
PF: predicated region fallthrough
CT: control target
= control target key end

     0   :  { %s9925_s0 = inlined_call_operand.vmem [shape: f32[90], index: 0, kind: input, shape index: {}]   ;;  %s9926_s1 = inlined_call_operand.vmem [shape: f32[4,9,8,256], index: 1, kind: input, shape index: {}]   ;;  %s9927_s2 = inlined_call_operand.vmem [shape: f32[8,256], index: 2, kind: input, shape index: {}]   ;;  %s9928_s3 = inlined_call_operand.vmem [shape: f32[8,256], index: 3, kind: output, shape index: {0}]   ;;  %s9929_s4 = inlined_call_operand.vmem [shape: f32[8,1], index: 4, kind: output, shape index: {1}]  }
   0x1   :  { %10398 = sst [smem:[#allocation167_spill]] %s9926_s1 }
   0x2   :  { %10399 = sst [smem:[#allocation168_spill]] %s9927_s2 }
   0x3   :  { %10400 = sst [smem:[#allocation169_spill]] %s9928_s3 }
   0x4   :  { %10401 = sst [smem:[#allocation170_spill]] %s9929_s4 }
   0x5   :  { %10 = vsyncpa [#allocation3], 0  ;;  %s17_s17 = sshll.u32 %s9925_s0, 4  ;;  %s18_s17 = int_to_ptr.vmem [resolvable:$true] %s17_s17 }
   0x6   :  { %s3766_s18 = scalar_lea.vmem %s18_s17, 16  ;;  %p3771_p1 = scmp.lt.s32.totalorder %s18_s17, %s18_s17 }
   0x7   :  { %p3767_p0 = scmp.ne.s32.totalorder %s18_s17, %s3766_s18  ;;  %p3772_p2 = scmp.lt.s32.totalorder %s3766_s18, %s3766_s18 }
   0x9   :  { %p3773_p3 = por %p3772_p2, %p3771_p1 }
   0xb   :  { %p3774_p4 = pnand %p3773_p3, %p3767_p0 }
   0xd   :  { %3777 = shalt.err (!%p3774_p4)
}
   0xe   :  { %s3780_s19 = smov [#allocation2]  }
   0xf   :  { %20 = dma.vmem_to_smem %s18_s17, 16, %s3780_s19, [#allocation3]  }
  0x10   :  { %3778 = dma.done.wait [#allocation3], 16  }
  0x11   :  { %3779 = vsyncadd [#allocation3], 4294967280 }
  0x12   :  { %28 = sfence }
  0x13   :  { %v3828_v0 = vld [vmem:[%s9926_s1] sm:$0xff]  ;;  %s9930_s22 = smov 1   ;;  %s9932_s0 = smov 2   ;;  %v3837_v1 = vld [vmem:[%s9926_s1 + $0x8] sm:$0xff]  ;;  %v3854_v2 = vld [vmem:[%s9926_s1 + $0x18] sm:$0xff]  ;;  %v119_v18 = vlaneseq }
  0x14   :  { %145 = vrot.lane.b32.xlu1 %v3828_v0, %s9930_s22  ;;  %134 = vrot.lane.b32.xlu0 %v3828_v0, %s9932_s0  ;;  %s9935_s25 = smov 127   ;;  %s9938_s26 = smov 126   ;;  %v3859_v3 = vld [vmem:[%s9926_s1 + $0x10] sm:$0xff]  ;;  %v3880_v4 = vld [vmem:[%s9926_s1 + $0x28] sm:$0xff] }
  0x15   :  { %v3885_v5 = vld [vmem:[%s9926_s1 + $0x20] sm:$0xff]  ;;  %v3906_v6 = vld [vmem:[%s9926_s1 + $0x38] sm:$0xff]  ;;  %v3911_v7 = vld [vmem:[%s9926_s1 + $0x30] sm:$0xff]  ;;  %s3947_s17 = sld [smem:[#allocation2]]  ;;  %s10419_s3 = smov 1   ;;  %v4103_v21 = vand.u32 127, %v119_v18 }
  0x16   :  { %v3932_v8 = vld [vmem:[%s9926_s1 + $0x48] sm:$0xff]  ;;  %v3937_v9 = vld [vmem:[%s9926_s1 + $0x40] sm:$0xff]  ;;  %s3949_s18 = sld [smem:[#allocation2 + $0x2d]]  ;;  %v3644_v10 = vld [vmem:[%s9926_s1 + $0x58] sm:$0xff] }
  0x17   :  { %10402 = vst [vmem:[#allocation5_spill] sm:$0xff] %v3932_v8  ;;  %10403 = vst [vmem:[#allocation6_spill] sm:$0xff] %v3937_v9  ;;  %s3951_s19 = sld [smem:[#allocation2 + $0x1]]  ;;  %v3643_v11 = vld [vmem:[%s9926_s1 + $0x50] sm:$0xff]  ;;  %v3646_v12 = vld [vmem:[%s9926_s1 + $0x68] sm:$0xff]  ;;  %v4145_v31 = vadd.s32 128, %v4103_v21 }
  0x18   :  { %147 = vrot.lane.b32.xlu1 %v3837_v1, %s9930_s22  ;;  %136 = vrot.lane.b32.xlu0 %v3837_v1, %s9932_s0  ;;  %s3957_s20 = sld [smem:[#allocation2 + $0x2e]]  ;;  %v3645_v13 = vld [vmem:[%s9926_s1 + $0x60] sm:$0xff]  ;;  %v3648_v14 = vld [vmem:[%s9926_s1 + $0x78] sm:$0xff]  ;;  %v4148_v32 = vand.u32 15, %v4103_v21  ;;  %vm138_vm0 = vcmp.lt.s32.totalorder %v4103_v21, 2  ;;  %vm149_vm1 = vcmp.lt.s32.totalorder %v4103_v21, 1 }
  0x19   :  { %s3959_s21 = sld [smem:[#allocation2 + $0x3]]  ;;  %v3647_v15 = vld [vmem:[%s9926_s1 + $0x70] sm:$0xff]  ;;  %v4123_v25 = vld [vmem:[%s9926_s1 + $0x88] sm:$0xff]  ;;  %v4128_v26 = vld [vmem:[%s9926_s1 + $0x80] sm:$0xff]  ;;  %10444 = vst [vmem:[#allocation43_spill] sm:$0xff] %v4145_v31  ;;  %v4207_v49 = vand.u32 15, %v4145_v31 }
  0x1a   :  { %s3961_s23 = sld [smem:[#allocation2 + $0x30]]  ;;  %10445 = vst [vmem:[#allocation44_spill] sm:$0xff] %v4148_v32  ;;  %vm10243_vm2 = vcmp.ge.s32.totalorder %v4148_v32, 2  ;;  %vm10244_vm4 = vcmp.ge.s32.totalorder %v4148_v32, 1  ;;  %vm160_vm6 = vcmp.lt.s32.totalorder %v4103_v21, 127  ;;  %vm171_vm7 = vcmp.lt.s32.totalorder %v4103_v21, 126 }
  0x1b   :  { %s3963_s24 = sld [smem:[#allocation2 + $0x4]]  ;;  %v4116_v24 = vstv %s3947_s17  ;;  %10468 = vst [vmem:[#allocation59_spill] sm:$0xff] %v4207_v49  ;;  %vm10354_vm3 = vcmp.ge.s32.totalorder %v4207_v49, 2  ;;  %vm10353_vm5 = vcmp.ge.s32.totalorder %v4207_v49, 1  ;;  %vm10120_vm8 = vcmp.lt.s32.totalorder %v4148_v32, 15 }
  0x1c   :  { %158 = vrot.lane.b32.xlu1 %v3837_v1, %s9935_s25  ;;  %156 = vrot.lane.b32.xlu0 %v3828_v0, %s9935_s25  ;;  %s3969_s27 = sld [smem:[#allocation2 + $0x31]]  ;;  %10439 = vst [vmem:[#allocation38_spill] sm:$0xff] %v4116_v24  ;;  %v4131_v27 = vstv %s3949_s18  ;;  %vm10112_vm9 = vcmp.lt.s32.totalorder %v4148_v32, 14  ;;  %vm10115_vm10 = vcmp.lt.s32.totalorder %v4207_v49, 15  ;;  %vm10114_vm11 = vcmp.lt.s32.totalorder %v4207_v49, 14 }
  0x1d   :  { %s3977_s6 = sld [smem:[#allocation2 + $0x5]]  ;;  %10440 = vst [vmem:[#allocation39_spill] sm:$0xff] %v4131_v27  ;;  %v4134_v28 = vstv %s3951_s19  ;;  %vm1051_vm12 = vcmp.lt.s32.totalorder %v4103_v21, 32  ;;  %vm10246_vm13 = vcmp.ge.s32.totalorder %v4103_v21, 32  ;;  %vm1062_vm14 = vcmp.lt.s32.totalorder %v4103_v21, 16 }
  0x1e   :  { %s3979_s7 = sld [smem:[#allocation2 + $0x32]]  ;;  %10441 = vst [vmem:[#allocation40_spill] sm:$0xff] %v4134_v28  ;;  %v4137_v29 = vstv %s3957_s20  ;;  %vm10245_vm15 = vcmp.ge.s32.totalorder %v4103_v21, 16 }
  0x1f   :  { %s3981_s8 = sld [smem:[#allocation2 + $0x6]]  ;;  %10442 = vst [vmem:[#allocation41_spill] sm:$0xff] %v4137_v29  ;;  %v4142_v30 = vstv %s3959_s21 }
  0x20   :  { %169 = vrot.lane.b32.xlu1 %v3837_v1, %s9938_s26  ;;  %167 = vrot.lane.b32.xlu0 %v3828_v0, %s9938_s26  ;;  %s3985_s9 = sld [smem:[#allocation2 + $0x33]]  ;;  %10443 = vst [vmem:[#allocation42_spill] sm:$0xff] %v4142_v30  ;;  %v4155_v33 = vstv %s3961_s23 }
  0x21   :  { %s3987_s10 = sld [smem:[#allocation2 + $0x8]]  ;;  %10446 = vst [vmem:[#allocation45_spill] sm:$0xff] %v4155_v33  ;;  %v4158_v34 = vstv %s3963_s24 }
  0x22   :  { %s3989_s11 = sld [smem:[#allocation2 + $0x2]]  ;;  %10448 = vst [vmem:[#allocation46_spill] sm:$0xff] %v4158_v34  ;;  %v4172_v38 = vstv %s3969_s27 }
  0x23   :  { %s3991_s12 = sld [smem:[#allocation2 + $0x2f]]  ;;  %v4161_v35 = vstv %s3977_s6  ;;  %10453 = vst [vmem:[#allocation50_spill] sm:$0xff] %v4172_v38 }
  0x24   :  { %183 = vrot.lane.b32.xlu1 %v3854_v2, %s9932_s0  ;;  %181 = vrot.lane.b32.xlu0 %v3859_v3, %s9932_s0  ;;  %s3995_s13 = sld [smem:[#allocation2 + $0x35]]  ;;  %10449 = vst [vmem:[#allocation47_spill] sm:$0xff] %v4161_v35  ;;  %v4164_v36 = vstv %s3979_s7 }
  0x25   :  { %s3997_s14 = sld [smem:[#allocation2 + $0x9]]  ;;  %10451 = vst [vmem:[#allocation48_spill] sm:$0xff] %v4164_v36  ;;  %v4167_v37 = vstv %s3981_s8 }
  0x26   :  { %s3999_s15 = sld [smem:[#allocation2 + $0x36]]  ;;  %10452 = vst [vmem:[#allocation49_spill] sm:$0xff] %v4167_v37  ;;  %v4179_v41 = vstv %s3985_s9 }
  0x27   :  { %s4001_s16 = sld [smem:[#allocation2 + $0x7]]  ;;  %10455 = vst [vmem:[#allocation51_spill] sm:$0xff] %v4179_v41  ;;  %v4182_v42 = vstv %s3987_s10 }
  0x28   :  { %193 = vrot.lane.b32.xlu1 %v3854_v2, %s9930_s22  ;;  %191 = vrot.lane.b32.xlu0 %v3859_v3, %s9930_s22  ;;  %s4005_s28 = sld [smem:[#allocation2 + $0x34]]  ;;  %10457 = vst [vmem:[#allocation52_spill] sm:$0xff] %v4182_v42  ;;  %v4187_v43 = vstv %s3989_s11 }
  0x29   :  { %s4007_s29 = sld [smem:[#allocation2 + $0xa]]  ;;  %10459 = vst [vmem:[#allocation53_spill] sm:$0xff] %v4187_v43  ;;  %v4190_v44 = vstv %s3991_s12 }
  0x2a   :  { %s4009_s30 = sld [smem:[#allocation2 + $0x37]]  ;;  %10461 = vst [vmem:[#allocation54_spill] sm:$0xff] %v4190_v44  ;;  %v4193_v45 = vstv %s3995_s13 }
  0x2b   :  { %s4011_s5 = sld [smem:[#allocation2 + $0xb]]  ;;  %10463 = vst [vmem:[#allocation55_spill] sm:$0xff] %v4193_v45  ;;  %v4196_v46 = vstv %s3997_s14 }
  0x2c   :  { %203 = vrot.lane.b32.xlu1 %v3854_v2, %s9935_s25  ;;  %201 = vrot.lane.b32.xlu0 %v3859_v3, %s9935_s25  ;;  %10404 = sst [smem:[#allocation7_spill]] %s3999_s15  ;;  %10465 = vst [vmem:[#allocation56_spill] sm:$0xff] %v4196_v46 }
  0x2d   :  { %10405 = sst [smem:[#allocation8_spill]] %s4001_s16  ;;  %s10429_s16 = smov 126  }
  0x2e   :  { %10406 = sst [smem:[#allocation9_spill]] %s4005_s28 }
  0x2f   :  { %10407 = sst [smem:[#allocation10_spill]] %s4007_s29  ;;  %s10424_s29 = smov 127  }
  0x30   :  { %213 = vrot.lane.b32.xlu1 %v3854_v2, %s9938_s26  ;;  %211 = vrot.lane.b32.xlu0 %v3859_v3, %s9938_s26  ;;  %10408 = sst [smem:[#allocation11_spill]] %s4009_s30 }
  0x31   :  { %10409 = sst [smem:[#allocation12_spill]] %s4011_s5  ;;  %s10414_s5 = smov 2  }
  0x32   :  { %s4023_s2 = sld [smem:[#allocation2 + $0xd]] }
  0x33   :  { %s4025_s28 = sld [smem:[#allocation2 + $0x3a]] }
  0x34   :  { %226 = vrot.lane.b32.xlu1 %v3880_v4, %s9932_s0  ;;  %224 = vrot.lane.b32.xlu0 %v3885_v5, %s9932_s0  ;;  %s4027_s30 = sld [smem:[#allocation2 + $0xe]] }
  0x35   :  { %s4035_s4 = sld [smem:[#allocation2 + $0x39]] }
  0x36   :  { %s4087_s15 = sld [smem:[#allocation2 + $0x18]] }
  0x37   :  { %s4139_s17 = sld [smem:[#allocation2 + $0x1c]] }
  0x38   :  { %236 = vrot.lane.b32.xlu1 %v3880_v4, %s9930_s22  ;;  %234 = vrot.lane.b32.xlu0 %v3885_v5, %s9930_s22  ;;  %10411 = sst [smem:[#allocation14_spill]] %s4023_s2 }
  0x39   :  { %10412 = sst [smem:[#allocation15_spill]] %s4025_s28 }
  0x3a   :  { %10413 = sst [smem:[#allocation16_spill]] %s4027_s30 }
  0x3b   :  { %10417 = sst [smem:[#allocation19_spill]] %s4035_s4 }
  0x3c   :  { %246 = vrot.lane.b32.xlu1 %v3880_v4, %s9935_s25  ;;  %244 = vrot.lane.b32.xlu0 %v3885_v5, %s9935_s25  ;;  %s4043_s28 = sld [smem:[#allocation2 + $0x10]] }
  0x3d   :  { %s4045_s30 = sld [smem:[#allocation2 + $0x3d]] }
  0x3e   :  { %s4047_s2 = sld [smem:[#allocation2 + $0x12]] }
  0x3f   :  { %s4053_s4 = sld [smem:[#allocation2 + $0x13]] }
  0x40   :  { %256 = vrot.lane.b32.xlu1 %v3880_v4, %s9938_s26  ;;  %254 = vrot.lane.b32.xlu0 %v3885_v5, %s9938_s26  ;;  %10433 = sst [smem:[#allocation32_spill]] %s4087_s15 }
  0x41   :  { %s4101_s15 = sld [smem:[#allocation2 + $0x19]] }
  0x42   :  { %10421 = sst [smem:[#allocation22_spill]] %s4043_s28 }
  0x43   :  { %10422 = sst [smem:[#allocation23_spill]] %s4045_s30 }
  0x44   :  { %269 = vrot.lane.b32.xlu1 %v3906_v6, %s9932_s0  ;;  %267 = vrot.lane.b32.xlu0 %v3911_v7, %s9932_s0  ;;  %10423 = sst [smem:[#allocation24_spill]] %s4047_s2 }
  0x45   :  { %10426 = sst [smem:[#allocation26_spill]] %s4053_s4 }
  0x46   :  { %s4061_s28 = sld [smem:[#allocation2 + $0x3e]] }
  0x47   :  { %s4071_s4 = sld [smem:[#allocation2 + $0x41]] }
  0x48   :  { %279 = vrot.lane.b32.xlu1 %v3906_v6, %s9930_s22  ;;  %277 = vrot.lane.b32.xlu0 %v3911_v7, %s9930_s22  ;;  %s4085_s2 = sld [smem:[#allocation2 + $0x44]] }
  0x49   :  { %s4091_s30 = sld [smem:[#allocation2 + $0x45]] }
  0x4a   :  { %10437 = sst [smem:[#allocation36_spill]] %s4101_s15 }
  0x4b   :  { %s4152_s18 = sld [smem:[#allocation2 + $0x49]] }
  0x4c   :  { %289 = vrot.lane.b32.xlu1 %v3906_v6, %s9935_s25  ;;  %287 = vrot.lane.b32.xlu0 %v3911_v7, %s9935_s25  ;;  %10430 = sst [smem:[#allocation29_spill]] %s4061_s28 }
  0x4d   :  { %s4079_s28 = sld [smem:[#allocation2 + $0x17]] }
  0x4e   :  { %10432 = sst [smem:[#allocation31_spill]] %s4085_s2 }
  0x4f   :  { %10434 = sst [smem:[#allocation33_spill]] %s4091_s30 }
  0x50   :  { %299 = vrot.lane.b32.xlu1 %v3906_v6, %s9938_s26  ;;  %297 = vrot.lane.b32.xlu0 %v3911_v7, %s9938_s26  ;;  %s4099_s2 = sld [smem:[#allocation2 + $0x43]] }
  0x51   :  { %s4107_s30 = sld [smem:[#allocation2 + $0x46]] }
  0x52   :  { %s10447_s19 = sld [smem:[#allocation7_spill]] }
  0x53   :  { %10431 = sst [smem:[#allocation30_spill]] %s4079_s28 }
  0x54   :  { %312 = vrot.lane.b32.xlu1 %v3932_v8, %s9932_s0  ;;  %310 = vrot.lane.b32.xlu0 %v3937_v9, %s9932_s0  ;;  %s10450_s20 = sld [smem:[#allocation8_spill]] }
  0x55   :  { %s4169_s21 = sld [smem:[#allocation2 + $0x1d]] }
  0x56   :  { %10436 = sst [smem:[#allocation35_spill]] %s4099_s2 }
  0x57   :  { %10438 = sst [smem:[#allocation37_spill]] %s4107_s30 }
  0x58   :  { %322 = vrot.lane.b32.xlu1 %v3932_v8, %s9930_s22  ;;  %320 = vrot.lane.b32.xlu0 %v3937_v9, %s9930_s22  ;;  %s4118_s2 = sld [smem:[#allocation2 + $0x47]]  ;;  %v4199_v47 = vstv %s10447_s19 }
  0x59   :  { %s10454_s23 = sld [smem:[#allocation10_spill]]  ;;  %10466 = vst [vmem:[#allocation57_spill] sm:$0xff] %v4199_v47 }
  0x5a   :  { %s10456_s24 = sld [smem:[#allocation9_spill]]  ;;  %v4204_v48 = vstv %s10450_s20 }
  0x5b   :  { %s4184_s6 = sld [smem:[#allocation2 + $0x4a]]  ;;  %10467 = vst [vmem:[#allocation58_spill] sm:$0xff] %v4204_v48 }
  0x5c   :  { %332 = vrot.lane.b32.xlu1 %v3932_v8, %s9935_s25  ;;  %330 = vrot.lane.b32.xlu0 %v3937_v9, %s9935_s25  ;;  %s10458_s7 = sld [smem:[#allocation11_spill]] }
  0x5d   :  { %s10460_s8 = sld [smem:[#allocation12_spill]] }
  0x5e   :  { %s10464_s28 = sld [smem:[#allocation14_spill]] }
  0x5f   :  { %s4201_s9 = sld [smem:[#allocation2 + $0x1b]]  ;;  %v4217_v50 = vstv %s10454_s23 }
  0x60   :  { %342 = vrot.lane.b32.xlu1 %v3932_v8, %s9938_s26  ;;  %340 = vrot.lane.b32.xlu0 %v3937_v9, %s9938_s26  ;;  %s10469_s10 = sld [smem:[#allocation15_spill]]  ;;  %10474 = vst [vmem:[#allocation60_spill] sm:$0xff] %v4217_v50  ;;  %v4220_v51 = vstv %s10456_s24 }
  0x61   :  { %s10470_s11 = sld [smem:[#allocation16_spill]]  ;;  %10476 = vst [vmem:[#allocation61_spill] sm:$0xff] %v4220_v51 }
  0x62   :  { %s4214_s14 = sld [smem:[#allocation2 + $0x1e]]  ;;  %v4225_v52 = vstv %s10458_s7 }
  0x63   :  { %s10477_s30 = sld [smem:[#allocation22_spill]]  ;;  %10478 = vst [vmem:[#allocation62_spill] sm:$0xff] %v4225_v52  ;;  %v4228_v53 = vstv %s10460_s8 }
  0x64   :  { %355 = vrot.lane.b32.xlu1 %v3644_v10, %s9932_s0  ;;  %353 = vrot.lane.b32.xlu0 %v3643_v11, %s9932_s0  ;;  %s4037_s0 = sld [smem:[#allocation2 + $0xf]]  ;;  %10480 = vst [vmem:[#allocation63_spill] sm:$0xff] %v4228_v53  ;;  %v4234_v55 = vstv %s10464_s28 }
  0x65   :  { %s4222_s19 = sld [smem:[#allocation2 + $0x4b]]  ;;  %10482 = vst [vmem:[#allocation65_spill] sm:$0xff] %v4234_v55 }
  0x66   :  { %s10479_s20 = sld [smem:[#allocation23_spill]]  ;;  %v4244_v58 = vstv %s10469_s10 }
  0x67   :  { %s10483_s23 = sld [smem:[#allocation24_spill]]  ;;  %10485 = vst [vmem:[#allocation66_spill] sm:$0xff] %v4244_v58  ;;  %v4247_v59 = vstv %s10470_s11 }
  0x68   :  { %365 = vrot.lane.b32.xlu1 %v3644_v10, %s9930_s22  ;;  %363 = vrot.lane.b32.xlu0 %v3643_v11, %s9930_s22  ;;  %s4015_s22 = sld [smem:[#allocation2 + $0x38]]  ;;  %10486 = vst [vmem:[#allocation67_spill] sm:$0xff] %v4247_v59 }
  0x69   :  { %s4241_s24 = sld [smem:[#allocation2 + $0x1f]] }
  0x6a   :  { %10418 = sst [smem:[#allocation20_spill]] %s4037_s0 }
  0x6b   :  { %s4055_s0 = sld [smem:[#allocation2 + $0x40]] }
  0x6c   :  { %375 = vrot.lane.b32.xlu1 %v3644_v10, %s9935_s25  ;;  %373 = vrot.lane.b32.xlu0 %v3643_v11, %s9935_s25  ;;  %s4041_s25 = sld [smem:[#allocation2 + $0x3c]] }
  0x6d   :  { %s10490_s7 = sld [smem:[#allocation26_spill]] }
  0x6e   :  { %10410 = sst [smem:[#allocation13_spill]] %s4015_s22 }
  0x6f   :  { %s4033_s22 = sld [smem:[#allocation2 + $0xc]] }
  0x70   :  { %385 = vrot.lane.b32.xlu1 %v3644_v10, %s9938_s26  ;;  %383 = vrot.lane.b32.xlu0 %v3643_v11, %s9938_s26  ;;  %s4031_s26 = sld [smem:[#allocation2 + $0x3b]]  ;;  %v4262_v10 = vstv %s10477_s30  ;;  %v4267_v11 = vstv %s10479_s20 }
  0x71   :  { %10427 = sst [smem:[#allocation27_spill]] %s4055_s0  ;;  %10493 = vst [vmem:[#allocation72_spill] sm:$0xff] %v4262_v10  ;;  %10496 = vst [vmem:[#allocation73_spill] sm:$0xff] %v4267_v11  ;;  %v4309_v10 = vstv %s4071_s4 }
  0x72   :  { %10420 = sst [smem:[#allocation21_spill]] %s4041_s25  ;;  %10510 = vst [vmem:[#allocation81_spill] sm:$0xff] %v4309_v10 }
  0x73   :  { %s4073_s0 = sld [smem:[#allocation2 + $0x15]] }
  0x74   :  { %398 = vrot.lane.b32.xlu1 %v3646_v12, %s10414_s5  ;;  %396 = vrot.lane.b32.xlu0 %v3645_v13, %s10414_s5  ;;  %s4093_s25 = sld [smem:[#allocation2 + $0x16]] }
  0x75   :  { %10416 = sst [smem:[#allocation18_spill]] %s4033_s22 }
  0x76   :  { %10415 = sst [smem:[#allocation17_spill]] %s4031_s26 }
  0x77   :  { %s4051_s22 = sld [smem:[#allocation2 + $0x3f]] }
  0x78   :  { %408 = vrot.lane.b32.xlu1 %v3646_v12, %s10419_s3  ;;  %406 = vrot.lane.b32.xlu0 %v3645_v13, %s10419_s3  ;;  %s4057_s26 = sld [smem:[#allocation2 + $0x11]] }
  0x79   :  { %s10462_s27 = sld [smem:[#allocation13_spill]] }
  0x7a   :  { %10435 = sst [smem:[#allocation34_spill]] %s4093_s25 }
  0x7b   :  { %s4109_s25 = sld [smem:[#allocation2 + $0x1a]] }
  0x7c   :  { %418 = vrot.lane.b32.xlu1 %v3646_v12, %s10424_s29  ;;  %416 = vrot.lane.b32.xlu0 %v3645_v13, %s10424_s29  ;;  %s10471_s12 = sld [smem:[#allocation17_spill]] }
  0x7d   :  { %10425 = sst [smem:[#allocation25_spill]] %s4051_s22 }
  0x7e   :  { %10428 = sst [smem:[#allocation28_spill]] %s4057_s26 }
  0x7f   :  { %s4069_s22 = sld [smem:[#allocation2 + $0x14]]  ;;  %v4231_v54 = vstv %s10462_s27 }
  0x80   :  { %428 = vrot.lane.b32.xlu1 %v3646_v12, %s10429_s16  ;;  %426 = vrot.lane.b32.xlu0 %v3645_v13, %s10429_s16  ;;  %s4077_s26 = sld [smem:[#allocation2 + $0x42]]  ;;  %10481 = vst [vmem:[#allocation64_spill] sm:$0xff] %v4231_v54  ;;  %v4278_v12 = vstv %s10483_s23 }
  0x81   :  { %s10472_s13 = sld [smem:[#allocation18_spill]]  ;;  %10497 = vst [vmem:[#allocation74_spill] sm:$0xff] %v4278_v12 }
  0x82   :  { %s10475_s15 = sld [smem:[#allocation21_spill]]  ;;  %v4250_v60 = vstv %s10471_s12 }
  0x83   :  { %10487 = vst [vmem:[#allocation68_spill] sm:$0xff] %v4250_v60  ;;  %s10492_s8 = sld [smem:[#allocation27_spill]]  ;;  %v4374_v60 = vstv %s4169_s21 }
  0x84   :  { %441 = vrot.lane.b32.xlu1 %v3648_v14, %s10414_s5  ;;  %439 = vrot.lane.b32.xlu0 %v3647_v15, %s10414_s5  ;;  %s10494_s27 = sld [smem:[#allocation28_spill]]  ;;  %10529 = vst [vmem:[#allocation96_spill] sm:$0xff] %v4374_v60 }
  0x85   :  { %s4264_s28 = sld [smem:[#allocation2 + $0x4c]]  ;;  %v4306_v11 = vstv %s4069_s22 }
  0x86   :  { %v4081_v16 = vpop.permute.xlu1 %145  ;;  %v4083_v17 = vpop.permute.xlu0 %134  ;;  %s10495_s1 = sld [smem:[#allocation19_spill]]  ;;  %10508 = vst [vmem:[#allocation80_spill] sm:$0xff] %v4306_v11 }
  0x87   :  { %v4253_v61 = vstv %s10472_s13  ;;  %s4275_s10 = sld [smem:[#allocation2 + $0x21]] }
  0x88   :  { %451 = vrot.lane.b32.xlu1 %v3648_v14, %s10419_s3  ;;  %449 = vrot.lane.b32.xlu0 %v3647_v15, %s10419_s3  ;;  %10488 = vst [vmem:[#allocation69_spill] sm:$0xff] %v4253_v61  ;;  %v4259_v63 = vstv %s10475_s15  ;;  %s10499_s11 = sld [smem:[#allocation30_spill]] }
  0x89   :  { %10491 = vst [vmem:[#allocation71_spill] sm:$0xff] %v4259_v63  ;;  %s10500_s12 = sld [smem:[#allocation31_spill]] }
  0x8a   :  { %v4095_v19 = vpop.permute.xlu1 %147  ;;  %v4097_v20 = vpop.permute.xlu0 %136  ;;  %s10501_s13 = sld [smem:[#allocation32_spill]]  ;;  %v4295_v18 = vstv %s10494_s27 }
  0x8b   :  { %s10503_s15 = sld [smem:[#allocation33_spill]]  ;;  %10505 = vst [vmem:[#allocation78_spill] sm:$0xff] %v4295_v18  ;;  %v4421_v60 = vstv %s4264_s28 }
  0x8c   :  { %461 = vrot.lane.b32.xlu1 %v3648_v14, %s10424_s29  ;;  %459 = vrot.lane.b32.xlu0 %v3647_v15, %s10424_s29  ;;  %s10473_s29 = sld [smem:[#allocation20_spill]]  ;;  %v4298_v31 = vstv %s10495_s1  ;;  %10536 = vst [vmem:[#allocation103_spill] sm:$0xff] %v4421_v60 }
  0x8d   :  { %10506 = vst [vmem:[#allocation79_spill] sm:$0xff] %v4298_v31  ;;  %s10509_s30 = sld [smem:[#allocation29_spill]] }
  0x8e   :  { %v4111_v22 = vpop.permute.xlu1 %158  ;;  %v4113_v23 = vpop.permute.xlu0 %156  ;;  %s10512_s20 = sld [smem:[#allocation36_spill]]  ;;  %v4320_v63 = vstv %s10499_s11 }
  0x8f   :  { %s10514_s23 = sld [smem:[#allocation37_spill]]  ;;  %10515 = vst [vmem:[#allocation84_spill] sm:$0xff] %v4320_v63  ;;  %v140_v63 = vsel %vm138_vm0, %v4097_v20, %v4083_v17 }
  0x90   :  { %471 = vrot.lane.b32.xlu1 %v3648_v14, %s10429_s16  ;;  %469 = vrot.lane.b32.xlu0 %v3647_v15, %s10429_s16  ;;  %v4289_v14 = vstv %s10490_s7  ;;  %v4292_v15 = vstv %s10492_s8  ;;  %s4317_s1 = sld [smem:[#allocation2 + $0x22]] }
  0x91   :  { %10502 = vst [vmem:[#allocation76_spill] sm:$0xff] %v4289_v14  ;;  %10504 = vst [vmem:[#allocation77_spill] sm:$0xff] %v4292_v15  ;;  %v4312_v14 = vstv %s4073_s0  ;;  %v4315_v15 = vstv %s4077_s26  ;;  %v4326_v8 = vstv %s10501_s13  ;;  %s4328_s22 = sld [smem:[#allocation2 + $0x4f]]  ;;  %v4331_v11 = vstv %s10503_s15  ;;  %s10519_s26 = smov 127  }
  0x92   :  { %v4174_v39 = vpop.permute.xlu1 %169  ;;  %v4176_v40 = vpop.permute.xlu0 %167  ;;  %v4256_v62 = vstv %s10473_s29  ;;  %s4286_s29 = sld [smem:[#allocation2 + $0x4e]]  ;;  %10511 = vst [vmem:[#allocation82_spill] sm:$0xff] %v4312_v14  ;;  %10513 = vst [vmem:[#allocation83_spill] sm:$0xff] %v4315_v15  ;;  %v139_v15 = vsel %vm138_vm0, %v4083_v17, %v4097_v20  ;;  %v4360_v20 = vstv %s4109_s25  ;;  %v4363_v14 = vstv %s4118_s2 }
  0x93   :  { %10489 = vst [vmem:[#allocation70_spill] sm:$0xff] %v4256_v62  ;;  %v4323_v62 = vstv %s10500_s12  ;;  %10517 = vst [vmem:[#allocation86_spill] sm:$0xff] %v4326_v8  ;;  %v4350_v8 = vstv %s10509_s30  ;;  %s10523_s4 = sld [smem:[#allocation35_spill]]  ;;  %s3788_s12 = smov 96  }
  0x94   :  { %484 = vrot.lane.b32.xlu1 %v4123_v25, %s10414_s5  ;;  %482 = vrot.lane.b32.xlu0 %v4128_v26, %s10414_s5  ;;  %s10484_s5 = sld [smem:[#allocation25_spill]]  ;;  %10516 = vst [vmem:[#allocation85_spill] sm:$0xff] %v4323_v62  ;;  %10518 = vst [vmem:[#allocation87_spill] sm:$0xff] %v4331_v11  ;;  %v4354_v62 = vstv %s10512_s20  ;;  %s3795_s20 = smov 113  }
  0x95   :  { %10521 = vst [vmem:[#allocation89_spill] sm:$0xff] %v4350_v8  ;;  %10522 = vst [vmem:[#allocation90_spill] sm:$0xff] %v4354_v62  ;;  %v4357_v17 = vstv %s10514_s23  ;;  %s4365_s0 = sld [smem:[#allocation2 + $0x48]]  ;;  %v4371_v8 = vstv %s4152_s18  ;;  %v4377_v62 = vstv %s4184_s6 }
  0x96   :  { %v4237_v56 = vpop.permute.xlu1 %183  ;;  %v4239_v57 = vpop.permute.xlu0 %181  ;;  %10524 = vst [vmem:[#allocation91_spill] sm:$0xff] %v4357_v17  ;;  %10525 = vst [vmem:[#allocation92_spill] sm:$0xff] %v4360_v20  ;;  %s4379_s7 = sld [smem:[#allocation2 + $0x20]]  ;;  %v142_v20 = vsel %vm10354_vm3, %v139_v15, 0.0  ;;  %v4386_v17 = vstv %s4201_s9  ;;  %v4405_v15 = vstv %s4222_s19 }
  0x97   :  { %10526 = vst [vmem:[#allocation93_spill] sm:$0xff] %v4363_v14  ;;  %10528 = vst [vmem:[#allocation95_spill] sm:$0xff] %v4371_v8  ;;  %v141_v14 = vsel %vm10243_vm2, %v140_v63, 0.0  ;;  %s4388_s2 = sld [smem:[#allocation2 + $0x4d]]  ;;  %v4402_v63 = vstv %s4214_s14 }
  0x98   :  { %494 = vrot.lane.b32.xlu1 %v4123_v25, %s10419_s3  ;;  %492 = vrot.lane.b32.xlu0 %v4128_v26, %s10419_s3  ;;  %10530 = vst [vmem:[#allocation97_spill] sm:$0xff] %v4377_v62  ;;  %10531 = vst [vmem:[#allocation98_spill] sm:$0xff] %v4386_v17  ;;  %s4399_s25 = sld [smem:[#allocation2 + $0x23]]  ;;  %v150_v62 = vsel %vm149_vm1, %v4081_v16, %v4095_v19  ;;  %v4431_v59 = vstv %s4286_s29 }
  0x99   :  { %10533 = vst [vmem:[#allocation100_spill] sm:$0xff] %v4402_v63  ;;  %10534 = vst [vmem:[#allocation101_spill] sm:$0xff] %v4405_v15  ;;  %v143_v15 = vadd.f32 %v141_v14, %v3828_v0  ;;  %v144_v63 = vadd.f32 %v142_v20, %v3837_v1  ;;  %s4425_s18 = sld [smem:[#allocation2 + $0x24]]  ;;  %v186_v0 = vsel %vm138_vm0, %v4237_v56, %v4239_v57  ;;  %v4444_v1 = vstv %s4317_s1  ;;  %s3796_s1 = smov 98  }
  0x9a   :  { %v4281_v13 = vstv %s10484_s5  ;;  %v4303_v12 = vpop.permute.xlu0 %191  ;;  %s10507_s5 = sld [smem:[#allocation34_spill]]  ;;  %10538 = vst [vmem:[#allocation105_spill] sm:$0xff] %v4431_v59  ;;  %10539 = vst [vmem:[#allocation106_spill] sm:$0xff] %v4444_v1  ;;  %v153_v20 = vsel %vm10353_vm5, %v150_v62, 0.0  ;;  %v161_v59 = vsel %vm160_vm6, %v4113_v23, %v4111_v22  ;;  %v173_v62 = vsel %vm171_vm7, %v4174_v39, %v4176_v40 }
  0x9b   :  { %10498 = vst [vmem:[#allocation75_spill] sm:$0xff] %v4281_v13  ;;  %v4301_v13 = vpop.permute.xlu1 %193  ;;  %s4441_s21 = sld [smem:[#allocation2 + $0x51]]  ;;  %v187_v1 = vsel %vm10243_vm2, %v186_v0, 0.0  ;;  %v163_v60 = vsel %vm10120_vm8, %v161_v59, 0.0 }
  0x9c   :  { %504 = vrot.lane.b32.xlu1 %v4123_v25, %s10519_s26  ;;  %502 = vrot.lane.b32.xlu0 %v4128_v26, %s10519_s26  ;;  %s4461_s6 = sld [smem:[#allocation2 + $0x26]] }
  0x9d   :  { %s4479_s9 = sld [smem:[#allocation2 + $0x53]] }
  0x9e   :  { %v202_v9 = vpop.permute.xlu0 %201  ;;  %s4489_s14 = sld [smem:[#allocation2 + $0x27]] }
  0x9f   :  { %v204_v10 = vpop.permute.xlu1 %203  ;;  %s4499_s19 = sld [smem:[#allocation2 + $0x25]] }
  0xa0   :  { %v4347_v11 = vstv %s10507_s5  ;;  %514 = vrot.lane.b32.xlu1 %v4123_v25, %s10429_s16  ;;  %512 = vrot.lane.b32.xlu0 %v4128_v26, %s10429_s16  ;;  %v151_v25 = vsel %vm149_vm1, %v4095_v19, %v4081_v16  ;;  %v4418_v26 = vstv %s4241_s24  ;;  %v185_v16 = vsel %vm138_vm0, %v4239_v57, %v4237_v56  ;;  %s4509_s24 = sld [smem:[#allocation2 + $0x28]] }
  0xa1   :  { %10520 = vst [vmem:[#allocation88_spill] sm:$0xff] %v4347_v11  ;;  %v4368_v11 = vstv %s4139_s17  ;;  %s4415_s17 = sld [smem:[#allocation2 + $0x50]]  ;;  %10535 = vst [vmem:[#allocation102_spill] sm:$0xff] %v4418_v26  ;;  %v4447_v19 = vstv %s4328_s22  ;;  %v152_v14 = vsel %vm10244_vm4, %v151_v25, 0.0  ;;  %v162_v56 = vsel %vm160_vm6, %v4111_v22, %v4113_v23  ;;  %s3789_s22 = smov 34  }
  0xa2   :  { %10527 = vst [vmem:[#allocation94_spill] sm:$0xff] %v4368_v11  ;;  %v4391_v11 = vstv %s10523_s4  ;;  %v212_v17 = vpop.permute.xlu0 %211  ;;  %10540 = vst [vmem:[#allocation107_spill] sm:$0xff] %v4447_v19  ;;  %v172_v57 = vsel %vm171_vm7, %v4176_v40, %v4174_v39  ;;  %v195_v25 = vsel %vm149_vm1, %v4303_v12, %v4301_v13  ;;  %v196_v22 = vsel %vm149_vm1, %v4301_v13, %v4303_v12  ;;  %s4517_s8 = sld [smem:[#allocation2 + $0x55]]  ;;  %s3790_s4 = smov 17  }
  0xa3   :  { %10532 = vst [vmem:[#allocation99_spill] sm:$0xff] %v4391_v11  ;;  %v214_v8 = vpop.permute.xlu1 %213  ;;  %v4428_v11 = vstv %s4275_s10  ;;  %v154_v23 = vadd.f32 %v152_v14, %v143_v15  ;;  %v155_v19 = vadd.f32 %v153_v20, %v144_v63  ;;  %v188_v39 = vsel %vm10354_vm3, %v185_v16, 0.0  ;;  %s4523_s27 = sld [smem:[#allocation2 + $0x29]] }
  0xa4   :  { %10537 = vst [vmem:[#allocation104_spill] sm:$0xff] %v4428_v11  ;;  %v164_v12 = vsel %vm10115_vm10, %v162_v56, 0.0  ;;  %v205_v13 = vsel %vm160_vm6, %v202_v9, %v204_v10  ;;  %v206_v63 = vsel %vm160_vm6, %v204_v10, %v202_v9  ;;  %v174_v15 = vsel %vm10112_vm9, %v172_v57, 0.0  ;;  %s4539_s28 = sld [smem:[#allocation2 + $0x56]] }
  0xa5   :  { %v175_v16 = vsel %vm10114_vm11, %v173_v62, 0.0  ;;  %v197_v59 = vsel %vm10244_vm4, %v196_v22, 0.0  ;;  %v198_v0 = vsel %vm10353_vm5, %v195_v25, 0.0  ;;  %v189_v9 = vadd.f32 %v3859_v3, %v187_v1  ;;  %s4652_s10 = sld [smem:[#allocation2 + $0x2a]] }
  0xa6   :  { %v4487_v11 = vpop.permute.xlu0 %224  ;;  %v190_v10 = vadd.f32 %v3854_v2, %v188_v39  ;;  %v215_v14 = vsel %vm171_vm7, %v212_v17, %v214_v8  ;;  %v216_v20 = vsel %vm171_vm7, %v214_v8, %v212_v17  ;;  %v165_v56 = vadd.f32 %v163_v60, %v154_v23  ;;  %s4666_s11 = sld [smem:[#allocation2 + $0x52]] }
  0xa7   :  { %v4485_v40 = vpop.permute.xlu1 %226  ;;  %v166_v57 = vadd.f32 %v164_v12, %v155_v19  ;;  %v207_v62 = vsel %vm10120_vm8, %v205_v13, 0.0  ;;  %v208_v25 = vsel %vm10115_vm10, %v206_v63, 0.0  ;;  %v199_v1 = vadd.f32 %v197_v59, %v189_v9  ;;  %s10578_s29 = sld [smem:[#allocation167_spill]] }
  0xa8   :  { %v200_v8 = vadd.f32 %v198_v0, %v190_v10  ;;  %v4526_v17 = vstv %s4379_s7  ;;  %v4529_v60 = vstv %s4365_s0  ;;  %v4531_v19 = vadd.f32 %v174_v15, %v165_v56 }
  0xa9   :  { %10541 = vst [vmem:[#allocation108_spill] sm:$0xff] %v4526_v17  ;;  %10542 = vst [vmem:[#allocation109_spill] sm:$0xff] %v4529_v60  ;;  %v4533_v22 = vadd.f32 %v175_v16, %v166_v57  ;;  %v217_v23 = vsel %vm10112_vm9, %v215_v14, 0.0  ;;  %v218_v39 = vsel %vm10114_vm11, %v216_v20, 0.0  ;;  %v209_v12 = vadd.f32 %v207_v62, %v199_v1 }
  0xaa   :  { %v235_v2 = vpop.permute.xlu0 %234  ;;  %v210_v13 = vadd.f32 %v208_v25, %v200_v8  ;;  %v4542_v63 = vstv %s4399_s25  ;;  %v4545_v15 = vstv %s4415_s17  ;;  %v4548_v0 = vstv %s4425_s18 }
  0xab   :  { %v237_v3 = vpop.permute.xlu1 %236  ;;  %10543 = vst [vmem:[#allocation110_spill] sm:$0xff] %v4542_v63  ;;  %10544 = vst [vmem:[#allocation111_spill] sm:$0xff] %v4545_v15  ;;  %v4551_v9 = vstv %s4441_s21  ;;  %v4554_v10 = vstv %s4461_s6  ;;  %v4557_v14 = vstv %s4479_s9  ;;  %v4559_v20 = vadd.f32 %v217_v23, %v209_v12  ;;  %s5455_s21 = sld [smem:[#allocation2 + $0x57]]  ;;  %s10609_s9 = smov 2  }
  0xac   :  { %10545 = vst [vmem:[#allocation112_spill] sm:$0xff] %v4548_v0  ;;  %10546 = vst [vmem:[#allocation113_spill] sm:$0xff] %v4551_v9  ;;  %v4561_v56 = vadd.f32 %v218_v39, %v210_v13  ;;  %v4564_v57 = vstv %s4489_s14  ;;  %v4567_v62 = vstv %s4499_s19  ;;  %v4571_v25 = vmul.f32 %v4116_v24, %v4533_v22  ;;  %s5481_s6 = sld [smem:[#allocation2 + $0x2b]] }
  0xad   :  { %10547 = vst [vmem:[#allocation114_spill] sm:$0xff] %v4554_v10  ;;  %10548 = vst [vmem:[#allocation115_spill] sm:$0xff] %v4557_v14  ;;  %v4574_v1 = vstv %s4509_s24  ;;  %v4578_v8 = vmul.f32 %v4116_v24, %v4531_v19  ;;  %v4581_v10 = vstv %s4388_s2  ;;  %v4585_v23 = vmul.f32 %v4131_v27, %v4533_v22  ;;  %s5501_s14 = sld [smem:[#allocation2 + $0x58]]  ;;  %s3793_s2 = smov 30  }
  0xae   :  { %v245_v59 = vpop.permute.xlu0 %244  ;;  %10549 = vst [vmem:[#allocation116_spill] sm:$0xff] %v4564_v57  ;;  %10550 = vst [vmem:[#allocation117_spill] sm:$0xff] %v4567_v62  ;;  %v4588_v39 = vstv %s4517_s8  ;;  %v4592_v12 = vmul.f32 %v4131_v27, %v4531_v19  ;;  %v4596_v13 = vmul.f32 %v4134_v28, %v4533_v22  ;;  %v4599_v14 = vstv %s4523_s27  ;;  %s5529_s19 = sld [smem:[#allocation2 + $0x2c]] }
  0xaf   :  { %v247_v16 = vpop.permute.xlu1 %246  ;;  %10551 = vst [vmem:[#allocation118_spill] sm:$0xff] %v4574_v1  ;;  %10552 = vst [vmem:[#allocation119_spill] sm:$0xff] %v4581_v10  ;;  %v4603_v9 = vmul.f32 %v4134_v28, %v4531_v19  ;;  %v735_v0 = vmul.f32 %v4187_v43, %v4531_v19  ;;  %v228_v27 = vsel %vm138_vm0, %v4487_v11, %v4485_v40  ;;  %v4715_v55 = vstv %s4652_s10  ;;  %s5558_s24 = sld [smem:[#allocation2 + $0x54]]  ;;  %s3785_s10 = smov 32  }
  0xb0   :  { %10553 = vst [vmem:[#allocation120_spill] sm:$0xff] %v4588_v39  ;;  %10554 = vst [vmem:[#allocation121_spill] sm:$0xff] %v4599_v14  ;;  %v736_v39 = vmul.f32 %v4187_v43, %v4533_v22  ;;  %v229_v14 = vsel %vm138_vm0, %v4485_v40, %v4487_v11  ;;  %v741_v28 = vmul.f32 %v4204_v48, %v4559_v20  ;;  %v4624_v43 = vstv %s4539_s28  ;;  %s5577_s8 = sld [smem:[#allocation2 + $0x59]] }
  0xb1   :  { %v742_v1 = vmul.f32 %v4204_v48, %v4561_v56  ;;  %v633_v15 = vmul.f32 %v4137_v29, %v4533_v22  ;;  %10555 = vst [vmem:[#allocation122_spill] sm:$0xff] %v4624_v43  ;;  %v632_v62 = vmul.f32 %v4137_v29, %v4531_v19  ;;  %v4630_v63 = vmul.f32 %v4142_v30, %v4533_v22 }
  0xb2   :  { %v255_v24 = vpop.permute.xlu0 %254  ;;  %v238_v11 = vsel %vm149_vm1, %v235_v2, %v237_v3  ;;  %v239_v40 = vsel %vm149_vm1, %v237_v3, %v235_v2  ;;  %v4636_v10 = vadd.f32 %v741_v28, %v735_v0  ;;  %v230_v43 = vsel %vm10243_vm2, %v229_v14, 0.0  ;;  %10557 = vst [vmem:[#allocation124_spill] sm:$0xff] %v4715_v55  ;;  %v10605_v32 = vld [vmem:[#allocation111_spill] sm:$0xff] }
  0xb3   :  { %v257_v57 = vpop.permute.xlu1 %256  ;;  %v4638_v48 = vadd.f32 %v742_v1, %v736_v39  ;;  %v231_v29 = vsel %vm10354_vm3, %v228_v27, 0.0  ;;  %v4646_v60 = vmul.f32 %v4142_v30, %v4531_v19  ;;  %v4650_v18 = vmul.f32 %v4155_v33, %v4533_v22 }
  0xb4   :  { %v248_v28 = vsel %vm160_vm6, %v245_v59, %v247_v16  ;;  %v249_v3 = vsel %vm160_vm6, %v247_v16, %v245_v59  ;;  %v4660_v27 = vmul.f32 %v4155_v33, %v4531_v19  ;;  %v4664_v2 = vmul.f32 %v4158_v34, %v4533_v22 }
  0xb5   :  { %v240_v0 = vsel %vm10244_vm4, %v239_v40, 0.0  ;;  %v241_v14 = vsel %vm10353_vm5, %v238_v11, 0.0  ;;  %v4674_v1 = vmul.f32 %v4158_v34, %v4531_v19  ;;  %v4678_v16 = vmul.f32 %v4172_v38, %v4533_v22 }
  0xb6   :  { %v268_v17 = vpop.permute.xlu0 %267  ;;  %v232_v59 = vadd.f32 %v3885_v5, %v230_v43  ;;  %v233_v39 = vadd.f32 %v3880_v4, %v231_v29  ;;  %v258_v33 = vsel %vm171_vm7, %v255_v24, %v257_v57  ;;  %v259_v40 = vsel %vm171_vm7, %v257_v57, %v255_v24 }
  0xb7   :  { %v270_v26 = vpop.permute.xlu1 %269  ;;  %10556 = vst [vmem:[#allocation123_spill] sm:$0xff] %v4678_v16  ;;  %v250_v11 = vsel %vm10120_vm8, %v248_v28, 0.0  ;;  %v251_v34 = vsel %vm10115_vm10, %v249_v3, 0.0  ;;  %v530_v58 = vmul.f32 %v4161_v35, %v4561_v56  ;;  %v529_v4 = vmul.f32 %v4161_v35, %v4559_v20 }
  0xb8   :  { %v242_v5 = vadd.f32 %v240_v0, %v232_v59  ;;  %v243_v29 = vadd.f32 %v241_v14, %v233_v39  ;;  %v535_v24 = vmul.f32 %v4164_v36, %v4561_v56  ;;  %v534_v43 = vmul.f32 %v4164_v36, %v4559_v20 }
  0xb9   :  { %v260_v57 = vsel %vm10112_vm9, %v258_v33, 0.0  ;;  %v261_v28 = vsel %vm10114_vm11, %v259_v40, 0.0  ;;  %v636_v3 = vmul.f32 %v4167_v37, %v4561_v56  ;;  %v635_v0 = vmul.f32 %v4167_v37, %v4559_v20 }
  0xba   :  { %v278_v31 = vpop.permute.xlu0 %277  ;;  %v252_v14 = vadd.f32 %v250_v11, %v242_v5  ;;  %v253_v59 = vadd.f32 %v251_v34, %v243_v29  ;;  %v641_v39 = vmul.f32 %v4179_v41, %v4561_v56  ;;  %v640_v36 = vmul.f32 %v4179_v41, %v4559_v20 }
  0xbb   :  { %v280_v30 = vpop.permute.xlu1 %279  ;;  %v4712_v40 = vmul.f32 %v4172_v38, %v4531_v19  ;;  %v738_v16 = vmul.f32 %v4190_v44, %v4531_v19  ;;  %v739_v34 = vmul.f32 %v4190_v44, %v4533_v22  ;;  %v4726_v29 = vadd.f32 %v530_v58, %v4571_v25 }
  0xbc   :  { %v4721_v11 = vadd.f32 %v260_v57, %v252_v14  ;;  %v4723_v5 = vadd.f32 %v261_v28, %v253_v59  ;;  %v4729_v41 = vstv %s4666_s11  ;;  %v4732_v38 = vadd.f32 %v529_v4, %v4578_v8  ;;  %s3786_s11 = smov 16  }
  0xbd   :  { %10558 = vst [vmem:[#allocation125_spill] sm:$0xff] %v4729_v41  ;;  %v4735_v37 = vadd.f32 %v535_v24, %v4585_v23  ;;  %v4738_v19 = vadd.f32 %v534_v43, %v4592_v12  ;;  %v832_v22 = vmul.f32 %v4182_v42, %v4561_v56  ;;  %v4743_v57 = vadd.f32 %v636_v3, %v4596_v13 }
  0xbe   :  { %v288_v33 = vpop.permute.xlu0 %287  ;;  %v4746_v58 = vadd.f32 %v635_v0, %v4603_v9  ;;  %v4748_v25 = vadd.f32 %v641_v39, %v633_v15  ;;  %v4750_v28 = vadd.f32 %v640_v36, %v632_v62  ;;  %v831_v23 = vmul.f32 %v4182_v42, %v4559_v20 }
  0xbf   :  { %v290_v35 = vpop.permute.xlu1 %289  ;;  %v837_v12 = vmul.f32 %v4193_v45, %v4561_v56  ;;  %v746_v24 = vmul.f32 %v4220_v51, %v4559_v20  ;;  %v747_v13 = vmul.f32 %v4220_v51, %v4561_v56  ;;  %v271_v15 = vsel %vm138_vm0, %v268_v17, %v270_v26 }
  0xc0   :  { %v272_v36 = vsel %vm138_vm0, %v270_v26, %v268_v17  ;;  %v751_v9 = vmul.f32 %v4253_v61, %v4721_v11  ;;  %v752_v62 = vmul.f32 %v4253_v61, %v4723_v5  ;;  %v4769_v43 = vadd.f32 %v832_v22, %v4630_v63 }
  0xc1   :  { %v836_v3 = vmul.f32 %v4193_v45, %v4559_v20  ;;  %v938_v0 = vmul.f32 %v4196_v46, %v4561_v56  ;;  %v937_v14 = vmul.f32 %v4196_v46, %v4559_v20  ;;  %v281_v26 = vsel %vm149_vm1, %v278_v31, %v280_v30 }
  0xc2   :  { %v298_v4 = vpop.permute.xlu0 %297  ;;  %v282_v17 = vsel %vm149_vm1, %v280_v30, %v278_v31  ;;  %v4782_v59 = vadd.f32 %v751_v9, %v4636_v10  ;;  %v4785_v63 = vadd.f32 %v752_v62, %v4638_v48  ;;  %v273_v39 = vsel %vm10243_vm2, %v272_v36, 0.0 }
  0xc3   :  { %v300_v8 = vpop.permute.xlu1 %299  ;;  %v274_v22 = vsel %vm10354_vm3, %v271_v15, 0.0  ;;  %v4791_v42 = vadd.f32 %v746_v24, %v738_v16  ;;  %v4793_v61 = vadd.f32 %v747_v13, %v739_v34  ;;  %v291_v30 = vsel %vm160_vm6, %v288_v33, %v290_v35 }
  0xc4   :  { %v292_v31 = vsel %vm160_vm6, %v290_v35, %v288_v33  ;;  %v4800_v48 = vadd.f32 %v831_v23, %v4646_v60  ;;  %v4803_v10 = vadd.f32 %v837_v12, %v4650_v18  ;;  %v283_v15 = vsel %vm10244_vm4, %v282_v17, 0.0 }
  0xc5   :  { %v284_v16 = vsel %vm10353_vm5, %v281_v26, 0.0  ;;  %v943_v34 = vmul.f32 %v4199_v47, %v4561_v56  ;;  %v942_v24 = vmul.f32 %v4199_v47, %v4559_v20  ;;  %v275_v35 = vadd.f32 %v3911_v7, %v273_v39 }
  0xc6   :  { %v311_v46 = vpop.permute.xlu0 %310  ;;  %v276_v60 = vadd.f32 %v3906_v6, %v274_v22  ;;  %v301_v18 = vsel %vm171_vm7, %v298_v4, %v300_v8  ;;  %v302_v33 = vsel %vm171_vm7, %v300_v8, %v298_v4  ;;  %v293_v23 = vsel %vm10120_vm8, %v291_v30, 0.0 }
  0xc7   :  { %v313_v45 = vpop.permute.xlu1 %312  ;;  %v294_v12 = vsel %vm10115_vm10, %v292_v31, 0.0  ;;  %v540_v20 = vmul.f32 %v4217_v50, %v4723_v5  ;;  %v539_v6 = vmul.f32 %v4217_v50, %v4721_v11  ;;  %v285_v7 = vadd.f32 %v283_v15, %v275_v35 }
  0xc8   :  { %v286_v36 = vadd.f32 %v284_v16, %v276_v60  ;;  %v545_v9 = vmul.f32 %v4225_v52, %v4723_v5  ;;  %v544_v8 = vmul.f32 %v4225_v52, %v4721_v11  ;;  %v303_v4 = vsel %vm10112_vm9, %v301_v18, 0.0 }
  0xc9   :  { %v304_v62 = vsel %vm10114_vm11, %v302_v33, 0.0  ;;  %v646_v26 = vmul.f32 %v4228_v53, %v4723_v5  ;;  %v645_v17 = vmul.f32 %v4228_v53, %v4721_v11  ;;  %v295_v39 = vadd.f32 %v293_v23, %v285_v7  ;;  %v10559_v33 = vld [vmem:[#allocation123_spill] sm:$0xff] }
  0xca   :  { %v321_v13 = vpop.permute.xlu0 %320  ;;  %v296_v22 = vadd.f32 %v294_v12, %v286_v36  ;;  %v651_v30 = vmul.f32 %v4231_v54, %v4723_v5  ;;  %v650_v31 = vmul.f32 %v4231_v54, %v4721_v11  ;;  %v4844_v35 = vadd.f32 %v836_v3, %v4660_v27  ;;  %v10560_v3 = vld [vmem:[#allocation65_spill] sm:$0xff] }
  0xcb   :  { %v323_v56 = vpop.permute.xlu1 %322  ;;  %v4847_v60 = vadd.f32 %v938_v0, %v4664_v2  ;;  %v4850_v18 = vadd.f32 %v937_v14, %v4674_v1  ;;  %v4853_v23 = vadd.f32 %v943_v34, %v10559_v33  ;;  %v4855_v12 = vadd.f32 %v303_v4, %v295_v39 }
  0xcc   :  { %v4857_v7 = vadd.f32 %v304_v62, %v296_v22  ;;  %v4860_v36 = vadd.f32 %v540_v20, %v4726_v29  ;;  %v4863_v54 = vadd.f32 %v942_v24, %v4712_v40  ;;  %v4866_v27 = vadd.f32 %v539_v6, %v4732_v38  ;;  %v10561_v24 = vld [vmem:[#allocation66_spill] sm:$0xff] }
  0xcd   :  { %v4869_v2 = vadd.f32 %v545_v9, %v4735_v37  ;;  %v4872_v1 = vadd.f32 %v544_v8, %v4738_v19  ;;  %v842_v0 = vmul.f32 %v10560_v3, %v4723_v5  ;;  %v4877_v14 = vadd.f32 %v646_v26, %v4743_v57  ;;  %v10562_v57 = vld [vmem:[#allocation79_spill] sm:$0xff]  ;;  %v10563_v9 = vld [vmem:[#allocation78_spill] sm:$0xff] }
  0xce   :  { %v331_v16 = vpop.permute.xlu0 %330  ;;  %v4880_v29 = vadd.f32 %v645_v17, %v4746_v58  ;;  %v4883_v40 = vadd.f32 %v651_v30, %v4748_v25  ;;  %v4886_v38 = vadd.f32 %v650_v31, %v4750_v28  ;;  %v841_v19 = vmul.f32 %v10560_v3, %v4721_v11  ;;  %v10564_v17 = vld [vmem:[#allocation67_spill] sm:$0xff] }
  0xcf   :  { %v333_v15 = vpop.permute.xlu1 %332  ;;  %v847_v20 = vmul.f32 %v10561_v24, %v4723_v5  ;;  %v756_v6 = vmul.f32 %v10562_v57, %v4721_v11  ;;  %v757_v58 = vmul.f32 %v10562_v57, %v4723_v5  ;;  %v314_v25 = vsel %vm138_vm0, %v311_v46, %v313_v45 }
  0xd0   :  { %v315_v28 = vsel %vm138_vm0, %v313_v45, %v311_v46  ;;  %v761_v8 = vmul.f32 %v10563_v9, %v4855_v12  ;;  %v762_v4 = vmul.f32 %v10563_v9, %v4857_v7  ;;  %v4905_v62 = vadd.f32 %v842_v0, %v4769_v43 }
  0xd1   :  { %v846_v26 = vmul.f32 %v10561_v24, %v4721_v11  ;;  %v948_v39 = vmul.f32 %v10564_v17, %v4723_v5  ;;  %v947_v22 = vmul.f32 %v10564_v17, %v4721_v11  ;;  %v324_v45 = vsel %vm149_vm1, %v321_v13, %v323_v56 }
  0xd2   :  { %v341_v34 = vpop.permute.xlu0 %340  ;;  %v325_v46 = vsel %vm149_vm1, %v323_v56, %v321_v13  ;;  %v4918_v30 = vadd.f32 %v761_v8, %v4782_v59  ;;  %v4921_v43 = vadd.f32 %v762_v4, %v4785_v63  ;;  %v316_v31 = vsel %vm10243_vm2, %v315_v28, 0.0  ;;  %v10566_v28 = vld [vmem:[#allocation6_spill] sm:$0xff] }
  0xd3   :  { %v343_v37 = vpop.permute.xlu1 %342  ;;  %v317_v33 = vsel %vm10354_vm3, %v314_v25, 0.0  ;;  %v4928_v24 = vadd.f32 %v756_v6, %v4791_v42  ;;  %v4931_v3 = vadd.f32 %v757_v58, %v4793_v61  ;;  %v334_v59 = vsel %vm160_vm6, %v331_v16, %v333_v15  ;;  %v10565_v61 = vld [vmem:[#allocation68_spill] sm:$0xff] }
  0xd4   :  { %v335_v63 = vsel %vm160_vm6, %v333_v15, %v331_v16  ;;  %v4938_v56 = vadd.f32 %v841_v19, %v4800_v48  ;;  %v4941_v13 = vadd.f32 %v847_v20, %v4803_v10  ;;  %v326_v25 = vsel %vm10244_vm4, %v325_v46, 0.0  ;;  %v10567_v16 = vld [vmem:[#allocation5_spill] sm:$0xff] }
  0xd5   :  { %v327_v42 = vsel %vm10353_vm5, %v324_v45, 0.0  ;;  %v953_v6 = vmul.f32 %v10565_v61, %v4723_v5  ;;  %v952_v58 = vmul.f32 %v10565_v61, %v4721_v11  ;;  %v318_v15 = vadd.f32 %v10566_v28, %v316_v31  ;;  %v10568_v11 = vld [vmem:[#allocation70_spill] sm:$0xff]  ;;  %v10569_v28 = vld [vmem:[#allocation71_spill] sm:$0xff] }
  0xd6   :  { %v354_v17 = vpop.permute.xlu0 %353  ;;  %v319_v48 = vadd.f32 %v10567_v16, %v317_v33  ;;  %v344_v10 = vsel %vm171_vm7, %v341_v34, %v343_v37  ;;  %v345_v19 = vsel %vm171_vm7, %v343_v37, %v341_v34  ;;  %v336_v20 = vsel %vm10120_vm8, %v334_v59, 0.0 }
  0xd7   :  { %v356_v0 = vpop.permute.xlu1 %355  ;;  %v337_v8 = vsel %vm10115_vm10, %v335_v63, 0.0  ;;  %v550_v45 = vmul.f32 %v10568_v11, %v4857_v7  ;;  %v549_v46 = vmul.f32 %v10568_v11, %v4855_v12  ;;  %v328_v31 = vadd.f32 %v326_v25, %v318_v15  ;;  %v10570_v63 = vld [vmem:[#allocation72_spill] sm:$0xff]  ;;  %v10571_v15 = vld [vmem:[#allocation73_spill] sm:$0xff] }
  0xd8   :  { %v329_v33 = vadd.f32 %v327_v42, %v319_v48  ;;  %v555_v16 = vmul.f32 %v10569_v28, %v4857_v7  ;;  %v554_v37 = vmul.f32 %v10569_v28, %v4855_v12  ;;  %v346_v34 = vsel %vm10112_vm9, %v344_v10, 0.0 }
  0xd9   :  { %v347_v59 = vsel %vm10114_vm11, %v345_v19, 0.0  ;;  %v656_v61 = vmul.f32 %v10570_v63, %v4857_v7  ;;  %v655_v11 = vmul.f32 %v10570_v63, %v4855_v12  ;;  %v338_v25 = vadd.f32 %v336_v20, %v328_v31 }
  0xda   :  { %v364_v4 = vpop.permute.xlu0 %363  ;;  %v339_v42 = vadd.f32 %v337_v8, %v329_v33  ;;  %v661_v48 = vmul.f32 %v10571_v15, %v4857_v7  ;;  %v660_v28 = vmul.f32 %v10571_v15, %v4855_v12  ;;  %v4982_v10 = vadd.f32 %v846_v26, %v4844_v35 }
  0xdb   :  { %v366_v5 = vpop.permute.xlu1 %365  ;;  %v4985_v19 = vadd.f32 %v948_v39, %v4847_v60  ;;  %v4988_v50 = vadd.f32 %v947_v22, %v4850_v18  ;;  %v4991_v20 = vadd.f32 %v953_v6, %v4853_v23  ;;  %v4993_v8 = vadd.f32 %v346_v34, %v338_v25  ;;  %v10572_v23 = vld [vmem:[#allocation74_spill] sm:$0xff]  ;;  %v10573_v6 = vld [vmem:[#allocation75_spill] sm:$0xff] }
  0xdc   :  { %v4995_v31 = vadd.f32 %v347_v59, %v339_v42  ;;  %v4998_v33 = vadd.f32 %v550_v45, %v4860_v36  ;;  %v5001_v15 = vadd.f32 %v952_v58, %v4863_v54  ;;  %v5004_v35 = vadd.f32 %v549_v46, %v4866_v27 }
  0xdd   :  { %v5007_v60 = vadd.f32 %v555_v16, %v4869_v2  ;;  %v5010_v18 = vadd.f32 %v554_v37, %v4872_v1  ;;  %v852_v26 = vmul.f32 %v10572_v23, %v4857_v7  ;;  %v5015_v39 = vadd.f32 %v656_v61, %v4877_v14  ;;  %v10574_v14 = vld [vmem:[#allocation89_spill] sm:$0xff]  ;;  %v10576_v37 = vld [vmem:[#allocation76_spill] sm:$0xff] }
  0xde   :  { %v374_v52 = vpop.permute.xlu0 %373  ;;  %v5018_v36 = vadd.f32 %v655_v11, %v4880_v29  ;;  %v5021_v54 = vadd.f32 %v661_v48, %v4883_v40  ;;  %v5024_v27 = vadd.f32 %v660_v28, %v4886_v38  ;;  %v851_v1 = vmul.f32 %v10572_v23, %v4855_v12  ;;  %v10575_v11 = vld [vmem:[#allocation88_spill] sm:$0xff] }
  0xdf   :  { %v376_v53 = vpop.permute.xlu1 %375  ;;  %v857_v58 = vmul.f32 %v10573_v6, %v4857_v7  ;;  %v766_v61 = vmul.f32 %v10574_v14, %v4855_v12  ;;  %v767_v29 = vmul.f32 %v10574_v14, %v4857_v7  ;;  %v357_v40 = vsel %vm138_vm0, %v354_v17, %v356_v0 }
  0xe0   :  { %v358_v38 = vsel %vm138_vm0, %v356_v0, %v354_v17  ;;  %v771_v45 = vmul.f32 %v10575_v11, %v4993_v8  ;;  %v772_v46 = vmul.f32 %v10575_v11, %v4995_v31  ;;  %v5043_v28 = vadd.f32 %v852_v26, %v4905_v62 }
  0xe1   :  { %v856_v16 = vmul.f32 %v10573_v6, %v4855_v12  ;;  %v958_v34 = vmul.f32 %v10576_v37, %v4857_v7  ;;  %v957_v59 = vmul.f32 %v10576_v37, %v4855_v12  ;;  %v367_v17 = vsel %vm149_vm1, %v364_v4, %v366_v5 }
  0xe2   :  { %v384_v22 = vpop.permute.xlu0 %383  ;;  %v368_v0 = vsel %vm149_vm1, %v366_v5, %v364_v4  ;;  %v5056_v25 = vadd.f32 %v771_v45, %v4918_v30  ;;  %v5059_v62 = vadd.f32 %v772_v46, %v4921_v43  ;;  %v359_v42 = vsel %vm10243_vm2, %v358_v38, 0.0  ;;  %v10579_v46 = vld [vmem:[#allocation80_spill] sm:$0xff] }
  0xe3   :  { %v386_v2 = vpop.permute.xlu1 %385  ;;  %v360_v48 = vsel %vm10354_vm3, %v357_v40, 0.0  ;;  %v5066_v6 = vadd.f32 %v766_v61, %v4928_v24  ;;  %v5069_v23 = vadd.f32 %v767_v29, %v4931_v3  ;;  %v377_v30 = vsel %vm160_vm6, %v374_v52, %v376_v53  ;;  %v10577_v3 = vld [vmem:[#allocation77_spill] sm:$0xff] }
  0xe4   :  { %v378_v43 = vsel %vm160_vm6, %v376_v53, %v374_v52  ;;  %v5076_v5 = vadd.f32 %v851_v1, %v4938_v56  ;;  %v5079_v4 = vadd.f32 %v857_v58, %v4941_v13  ;;  %v369_v40 = vsel %vm10244_vm4, %v368_v0, 0.0  ;;  %v3732_v52 = vld [vmem:[%s10578_s29 + $0x50] sm:$0xff]  ;;  %v3733_v56 = vld [vmem:[%s10578_s29 + $0x58] sm:$0xff] }
  0xe5   :  { %v370_v24 = vsel %vm10353_vm5, %v367_v17, 0.0  ;;  %v963_v61 = vmul.f32 %v10577_v3, %v4857_v7  ;;  %v962_v29 = vmul.f32 %v10577_v3, %v4855_v12  ;;  %v361_v53 = vadd.f32 %v3732_v52, %v359_v42  ;;  %v10580_v52 = vld [vmem:[#allocation81_spill] sm:$0xff] }
  0xe6   :  { %v397_v37 = vpop.permute.xlu0 %396  ;;  %v362_v13 = vadd.f32 %v3733_v56, %v360_v48  ;;  %v387_v1 = vsel %vm171_vm7, %v384_v22, %v386_v2  ;;  %v388_v58 = vsel %vm171_vm7, %v386_v2, %v384_v22  ;;  %v379_v7 = vsel %vm10120_vm8, %v377_v30, 0.0 }
  0xe7   :  { %v399_v26 = vpop.permute.xlu1 %398  ;;  %v380_v12 = vsel %vm10115_vm10, %v378_v43, 0.0  ;;  %v560_v17 = vmul.f32 %v10579_v46, %v4995_v31  ;;  %v559_v0 = vmul.f32 %v10579_v46, %v4993_v8  ;;  %v371_v42 = vadd.f32 %v369_v40, %v361_v53  ;;  %v10581_v43 = vld [vmem:[#allocation82_spill] sm:$0xff]  ;;  %v10582_v53 = vld [vmem:[#allocation83_spill] sm:$0xff] }
  0xe8   :  { %v372_v48 = vadd.f32 %v370_v24, %v362_v13  ;;  %v565_v56 = vmul.f32 %v10580_v52, %v4995_v31  ;;  %v564_v2 = vmul.f32 %v10580_v52, %v4993_v8  ;;  %v389_v22 = vsel %vm10112_vm9, %v387_v1, 0.0 }
  0xe9   :  { %v390_v30 = vsel %vm10114_vm11, %v388_v58, 0.0  ;;  %v666_v3 = vmul.f32 %v10581_v43, %v4995_v31  ;;  %v665_v46 = vmul.f32 %v10581_v43, %v4993_v8  ;;  %v381_v40 = vadd.f32 %v379_v7, %v371_v42 }
  0xea   :  { %v407_v45 = vpop.permute.xlu0 %406  ;;  %v382_v24 = vadd.f32 %v380_v12, %v372_v48  ;;  %v671_v13 = vmul.f32 %v10582_v53, %v4995_v31  ;;  %v670_v52 = vmul.f32 %v10582_v53, %v4993_v8  ;;  %v5124_v1 = vadd.f32 %v856_v16, %v4982_v10 }
  0xeb   :  { %v409_v38 = vpop.permute.xlu1 %408  ;;  %v5127_v58 = vadd.f32 %v958_v34, %v4985_v19  ;;  %v5130_v47 = vadd.f32 %v957_v59, %v4988_v50  ;;  %v5133_v7 = vadd.f32 %v963_v61, %v4991_v20  ;;  %v5135_v12 = vadd.f32 %v389_v22, %v381_v40  ;;  %v10583_v20 = vld [vmem:[#allocation84_spill] sm:$0xff]  ;;  %v10584_v61 = vld [vmem:[#allocation85_spill] sm:$0xff] }
  0xec   :  { %v5137_v42 = vadd.f32 %v390_v30, %v382_v24  ;;  %v5140_v48 = vadd.f32 %v560_v17, %v4998_v33  ;;  %v5143_v53 = vadd.f32 %v962_v29, %v5001_v15  ;;  %v5146_v10 = vadd.f32 %v559_v0, %v5004_v35 }
  0xed   :  { %v5149_v19 = vadd.f32 %v565_v56, %v5007_v60  ;;  %v5152_v50 = vadd.f32 %v564_v2, %v5010_v18  ;;  %v862_v16 = vmul.f32 %v10583_v20, %v4995_v31  ;;  %v5157_v34 = vadd.f32 %v666_v3, %v5015_v39  ;;  %v10585_v39 = vld [vmem:[#allocation99_spill] sm:$0xff]  ;;  %v10587_v2 = vld [vmem:[#allocation86_spill] sm:$0xff] }
  0xee   :  { %v417_v11 = vpop.permute.xlu0 %416  ;;  %v5160_v33 = vadd.f32 %v665_v46, %v5018_v36  ;;  %v5163_v15 = vadd.f32 %v671_v13, %v5021_v54  ;;  %v5166_v35 = vadd.f32 %v670_v52, %v5024_v27  ;;  %v861_v18 = vmul.f32 %v10583_v20, %v4993_v8  ;;  %v10586_v46 = vld [vmem:[#allocation98_spill] sm:$0xff] }
  0xef   :  { %v419_v63 = vpop.permute.xlu1 %418  ;;  %v867_v29 = vmul.f32 %v10584_v61, %v4995_v31  ;;  %v776_v3 = vmul.f32 %v10585_v39, %v4993_v8  ;;  %v777_v36 = vmul.f32 %v10585_v39, %v4995_v31  ;;  %v400_v54 = vsel %vm138_vm0, %v397_v37, %v399_v26 }
  0xf0   :  { %v401_v27 = vsel %vm138_vm0, %v399_v26, %v397_v37  ;;  %v781_v17 = vmul.f32 %v10586_v46, %v5135_v12  ;;  %v782_v0 = vmul.f32 %v10586_v46, %v5137_v42  ;;  %v5185_v52 = vadd.f32 %v862_v16, %v5043_v28 }
  0xf1   :  { %v866_v56 = vmul.f32 %v10584_v61, %v4993_v8  ;;  %v968_v22 = vmul.f32 %v10587_v2, %v4995_v31  ;;  %v967_v30 = vmul.f32 %v10587_v2, %v4993_v8  ;;  %v410_v37 = vsel %vm149_vm1, %v407_v45, %v409_v38 }
  0xf2   :  { %v427_v59 = vpop.permute.xlu0 %426  ;;  %v411_v26 = vsel %vm149_vm1, %v409_v38, %v407_v45  ;;  %v5198_v40 = vadd.f32 %v781_v17, %v5056_v25  ;;  %v5201_v28 = vadd.f32 %v782_v0, %v5059_v62  ;;  %v402_v24 = vsel %vm10243_vm2, %v401_v27, 0.0  ;;  %v10589_v0 = vld [vmem:[#allocation90_spill] sm:$0xff] }
  0xf3   :  { %v429_v60 = vpop.permute.xlu1 %428  ;;  %v403_v13 = vsel %vm10354_vm3, %v400_v54, 0.0  ;;  %v5208_v61 = vadd.f32 %v776_v3, %v5066_v6  ;;  %v5211_v20 = vadd.f32 %v777_v36, %v5069_v23  ;;  %v420_v25 = vsel %vm160_vm6, %v417_v11, %v419_v63  ;;  %v10588_v23 = vld [vmem:[#allocation87_spill] sm:$0xff] }
  0xf4   :  { %v421_v62 = vsel %vm160_vm6, %v419_v63, %v417_v11  ;;  %v5218_v38 = vadd.f32 %v861_v18, %v5076_v5  ;;  %v5221_v45 = vadd.f32 %v867_v29, %v5079_v4  ;;  %v412_v54 = vsel %vm10244_vm4, %v411_v26, 0.0  ;;  %v3734_v63 = vld [vmem:[%s10578_s29 + $0x60] sm:$0xff]  ;;  %v3735_v5 = vld [vmem:[%s10578_s29 + $0x68] sm:$0xff] }
  0xf5   :  { %v413_v6 = vsel %vm10353_vm5, %v410_v37, 0.0  ;;  %v973_v3 = vmul.f32 %v10588_v23, %v4995_v31  ;;  %v972_v36 = vmul.f32 %v10588_v23, %v4993_v8  ;;  %v404_v11 = vadd.f32 %v3734_v63, %v402_v24  ;;  %v10590_v63 = vld [vmem:[#allocation91_spill] sm:$0xff] }
  0xf6   :  { %v440_v2 = vpop.permute.xlu0 %439  ;;  %v405_v4 = vadd.f32 %v3735_v5, %v403_v13  ;;  %v430_v18 = vsel %vm171_vm7, %v427_v59, %v429_v60  ;;  %v431_v29 = vsel %vm171_vm7, %v429_v60, %v427_v59  ;;  %v422_v31 = vsel %vm10120_vm8, %v420_v25, 0.0 }
  0xf7   :  { %v442_v16 = vpop.permute.xlu1 %441  ;;  %v423_v8 = vsel %vm10115_vm10, %v421_v62, 0.0  ;;  %v570_v37 = vmul.f32 %v10589_v0, %v5137_v42  ;;  %v569_v26 = vmul.f32 %v10589_v0, %v5135_v12  ;;  %v414_v24 = vadd.f32 %v412_v54, %v404_v11  ;;  %v10591_v62 = vld [vmem:[#allocation92_spill] sm:$0xff]  ;;  %v10592_v11 = vld [vmem:[#allocation93_spill] sm:$0xff] }
  0xf8   :  { %v415_v13 = vadd.f32 %v413_v6, %v405_v4  ;;  %v575_v5 = vmul.f32 %v10590_v63, %v5137_v42  ;;  %v574_v60 = vmul.f32 %v10590_v63, %v5135_v12  ;;  %v432_v59 = vsel %vm10112_vm9, %v430_v18, 0.0 }
  0xf9   :  { %v433_v25 = vsel %vm10114_vm11, %v431_v29, 0.0  ;;  %v676_v23 = vmul.f32 %v10591_v62, %v5137_v42  ;;  %v675_v0 = vmul.f32 %v10591_v62, %v5135_v12  ;;  %v424_v54 = vadd.f32 %v422_v31, %v414_v24 }
  0xfa   :  { %v450_v17 = vpop.permute.xlu0 %449  ;;  %v425_v6 = vadd.f32 %v423_v8, %v415_v13  ;;  %v681_v4 = vmul.f32 %v10592_v11, %v5137_v42  ;;  %v680_v63 = vmul.f32 %v10592_v11, %v5135_v12  ;;  %v5266_v18 = vadd.f32 %v866_v56, %v5124_v1 }
  0xfb   :  { %v452_v27 = vpop.permute.xlu1 %451  ;;  %v5269_v29 = vadd.f32 %v968_v22, %v5127_v58  ;;  %v5272_v39 = vadd.f32 %v967_v30, %v5130_v47  ;;  %v5275_v31 = vadd.f32 %v973_v3, %v5133_v7  ;;  %v5277_v8 = vadd.f32 %v432_v59, %v424_v54  ;;  %v10595_v3 = vld [vmem:[#allocation95_spill] sm:$0xff] }
  0xfc   :  { %v5279_v24 = vadd.f32 %v433_v25, %v425_v6  ;;  %v5282_v13 = vadd.f32 %v570_v37, %v5140_v48  ;;  %v5285_v11 = vadd.f32 %v972_v36, %v5143_v53  ;;  %v5288_v1 = vadd.f32 %v569_v26, %v5146_v10  ;;  %v10593_v10 = vld [vmem:[#allocation94_spill] sm:$0xff] }
  0xfd   :  { %v5291_v58 = vadd.f32 %v575_v5, %v5149_v19  ;;  %v5294_v47 = vadd.f32 %v574_v60, %v5152_v50  ;;  %v5297_v7 = vadd.f32 %v676_v23, %v5157_v34  ;;  %v5300_v56 = vadd.f32 %v675_v0, %v5160_v33  ;;  %v10594_v33 = vld [vmem:[#allocation109_spill] sm:$0xff]  ;;  %v10596_v0 = vld [vmem:[#allocation108_spill] sm:$0xff] }
  0xfe   :  { %v460_v46 = vpop.permute.xlu0 %459  ;;  %v5303_v48 = vadd.f32 %v681_v4, %v5163_v15  ;;  %v5306_v53 = vadd.f32 %v680_v63, %v5166_v35  ;;  %v872_v22 = vmul.f32 %v10593_v10, %v5137_v42  ;;  %v443_v19 = vsel %vm138_vm0, %v440_v2, %v442_v16  ;;  %v10597_v5 = vld [vmem:[#allocation96_spill] sm:$0xff] }
  0xff   :  { %v462_v43 = vpop.permute.xlu1 %461  ;;  %v444_v50 = vsel %vm138_vm0, %v442_v16, %v440_v2  ;;  %v786_v23 = vmul.f32 %v10594_v33, %v5135_v12  ;;  %v787_v15 = vmul.f32 %v10594_v33, %v5137_v42  ;;  %v5320_v35 = vmul.f32 %v10593_v10, %v5135_v12 }
 0x100   :  { %v5324_v36 = vmul.f32 %v10595_v3, %v5137_v42  ;;  %v791_v37 = vmul.f32 %v10596_v0, %v5277_v8  ;;  %v792_v2 = vmul.f32 %v10596_v0, %v5279_v24  ;;  %v453_v16 = vsel %vm149_vm1, %v450_v17, %v452_v27 }
 0x101   :  { %v454_v26 = vsel %vm149_vm1, %v452_v27, %v450_v17  ;;  %v5336_v63 = vmul.f32 %v10595_v3, %v5135_v12  ;;  %v5340_v60 = vmul.f32 %v10597_v5, %v5137_v42  ;;  %v445_v59 = vsel %vm10243_vm2, %v444_v50, 0.0 }
 0x102   :  { %v470_v30 = vpop.permute.xlu0 %469  ;;  %v446_v25 = vsel %vm10354_vm3, %v443_v19, 0.0  ;;  %v5347_v54 = vadd.f32 %v791_v37, %v5198_v40  ;;  %v5350_v6 = vadd.f32 %v792_v2, %v5201_v28  ;;  %v463_v27 = vsel %vm160_vm6, %v460_v46, %v462_v43 }
 0x103   :  { %v472_v34 = vpop.permute.xlu1 %471  ;;  %v464_v17 = vsel %vm160_vm6, %v462_v43, %v460_v46  ;;  %v5357_v10 = vadd.f32 %v786_v23, %v5208_v61  ;;  %v5360_v50 = vadd.f32 %v787_v15, %v5211_v20  ;;  %v455_v40 = vsel %vm10244_vm4, %v454_v26, 0.0  ;;  %v3736_v61 = vld [vmem:[%s10578_s29 + $0x70] sm:$0xff]  ;;  %v3737_v20 = vld [vmem:[%s10578_s29 + $0x78] sm:$0xff] }
 0x104   :  { %v456_v28 = vsel %vm10353_vm5, %v453_v16, 0.0  ;;  %v473_v19 = vsel %vm171_vm7, %v470_v30, %v472_v34  ;;  %v474_v43 = vsel %vm171_vm7, %v472_v34, %v470_v30  ;;  %v447_v46 = vadd.f32 %v3736_v61, %v445_v59  ;;  %v10598_v30 = vld [vmem:[#allocation100_spill] sm:$0xff] }
 0x105   :  { %v448_v23 = vadd.f32 %v3737_v20, %v446_v25  ;;  %v465_v2 = vsel %vm10120_vm8, %v463_v27, 0.0  ;;  %v466_v34 = vsel %vm10115_vm10, %v464_v17, 0.0  ;;  %v580_v16 = vmul.f32 %v10598_v30, %v5279_v24 }
 0x106   :  { %v483_v3 = vpop.permute.xlu0 %482  ;;  %v579_v26 = vmul.f32 %v10598_v30, %v5277_v8  ;;  %v457_v59 = vadd.f32 %v455_v40, %v447_v46  ;;  %v475_v61 = vsel %vm10112_vm9, %v473_v19, 0.0  ;;  %v5401_v19 = vadd.f32 %v872_v22, %v5185_v52  ;;  %v3738_v22 = vld [vmem:[%s10578_s29 + $0x80] sm:$0xff] }
 0x107   :  { %v485_v4 = vpop.permute.xlu1 %484  ;;  %v458_v25 = vadd.f32 %v456_v28, %v448_v23 }
 0x108   :  { %v486_v15 = vsel %vm138_vm0, %v483_v3, %v485_v4  ;;  %v487_v37 = vsel %vm138_vm0, %v485_v4, %v483_v3  ;;  %v476_v3 = vsel %vm10114_vm11, %v474_v43, 0.0  ;;  %v467_v28 = vadd.f32 %v465_v2, %v457_v59 }
 0x109   :  { %v488_v27 = vsel %vm10243_vm2, %v487_v37, 0.0  ;;  %v489_v17 = vsel %vm10354_vm3, %v486_v15, 0.0  ;;  %v468_v46 = vadd.f32 %v466_v34, %v458_v25  ;;  %v5405_v43 = vmul.f32 %v10597_v5, %v5135_v12  ;;  %v10599_v37 = vld [vmem:[#allocation101_spill] sm:$0xff] }
 0x10a   :  { %v493_v20 = vpop.permute.xlu0 %492  ;;  %v585_v30 = vmul.f32 %v10599_v37, %v5279_v24  ;;  %v584_v2 = vmul.f32 %v10599_v37, %v5277_v8  ;;  %v5415_v34 = vadd.f32 %v475_v61, %v467_v28  ;;  %v490_v59 = vadd.f32 %v3738_v22, %v488_v27  ;;  %v3739_v25 = vld [vmem:[%s10578_s29 + $0x88] sm:$0xff]  ;;  %v10600_v22 = vld [vmem:[#allocation102_spill] sm:$0xff] }
 0x10b   :  { %v495_v4 = vpop.permute.xlu1 %494  ;;  %v5417_v52 = vadd.f32 %v476_v3, %v468_v46  ;;  %v582_v3 = vadd.f32 %v580_v16, %v5282_v13  ;;  %v581_v28 = vadd.f32 %v579_v26, %v5288_v1  ;;  %v685_v37 = vmul.f32 %v10600_v22, %v5277_v8 }
 0x10c   :  { %v496_v62 = vsel %vm149_vm1, %v493_v20, %v495_v4  ;;  %v497_v40 = vsel %vm149_vm1, %v495_v4, %v493_v20 }
 0x10d   :  { %v498_v23 = vsel %vm10244_vm4, %v497_v40, 0.0  ;;  %v499_v15 = vsel %vm10353_vm5, %v496_v62, 0.0  ;;  %v491_v62 = vadd.f32 %v3739_v25, %v489_v17  ;;  %v686_v25 = vmul.f32 %v10600_v22, %v5279_v24  ;;  %v10603_v22 = vld [vmem:[#allocation117_spill] sm:$0xff] }
 0x10e   :  { %v503_v20 = vpop.permute.xlu0 %502  ;;  %v500_v46 = vadd.f32 %v498_v23, %v490_v59  ;;  %v801_v0 = vmul.f32 %v10603_v22, %v5415_v34 }
 0x10f   :  { %v505_v4 = vpop.permute.xlu1 %504  ;;  %v501_v5 = vadd.f32 %v499_v15, %v491_v62  ;;  %v10602_v15 = vld [vmem:[#allocation110_spill] sm:$0xff] }
 0x110   :  { %v506_v40 = vsel %vm160_vm6, %v503_v20, %v505_v4  ;;  %v507_v61 = vsel %vm160_vm6, %v505_v4, %v503_v20  ;;  %v10601_v4 = vld [vmem:[#allocation119_spill] sm:$0xff]  ;;  %v590_v59 = vmul.f32 %v10602_v15, %v5417_v52  ;;  %v589_v62 = vmul.f32 %v10602_v15, %v5415_v34 }
 0x111   :  { %v508_v27 = vsel %vm10120_vm8, %v506_v40, 0.0  ;;  %v509_v17 = vsel %vm10115_vm10, %v507_v61, 0.0  ;;  %v796_v20 = vmul.f32 %v10601_v4, %v5277_v8  ;;  %v797_v13 = vmul.f32 %v10601_v4, %v5279_v24 }
 0x112   :  { %v510_v1 = vadd.f32 %v508_v27, %v500_v46  ;;  %v511_v16 = vadd.f32 %v509_v17, %v501_v5  ;;  %v513_v23 = vpop.permute.xlu0 %512  ;;  %v802_v5 = vmul.f32 %v10603_v22, %v5417_v52  ;;  %v10604_v17 = vld [vmem:[#allocation103_spill] sm:$0xff]  ;;  %v803_v22 = vadd.f32 %v801_v0, %v5347_v54 }
 0x113   :  { %v515_v26 = vpop.permute.xlu1 %514  ;;  %v691_v15 = vmul.f32 %v10604_v17, %v5279_v24  ;;  %v798_v49 = vadd.f32 %v796_v20, %v5357_v10  ;;  %v799_v14 = vadd.f32 %v797_v13, %v5360_v50  ;;  %v592_v9 = vadd.f32 %v590_v59, %v582_v3  ;;  %v10607_v20 = vld [vmem:[#allocation120_spill] sm:$0xff] }
 0x114   :  { %v516_v40 = vsel %vm171_vm7, %v513_v23, %v515_v26  ;;  %v517_v61 = vsel %vm171_vm7, %v515_v26, %v513_v23  ;;  %v690_v26 = vmul.f32 %v10604_v17, %v5277_v8  ;;  %v804_v33 = vadd.f32 %v802_v5, %v5350_v6  ;;  %v10608_v59 = vld [vmem:[#allocation112_spill] sm:$0xff] }
 0x115   :  { %v518_v46 = vsel %vm10112_vm9, %v516_v40, 0.0  ;;  %v519_v27 = vsel %vm10114_vm11, %v517_v61, 0.0  ;;  %v595_v40 = vmul.f32 %v10605_v32, %v5417_v52  ;;  %v594_v61 = vmul.f32 %v10605_v32, %v5415_v34  ;;  %v10665_v32 = vld [vmem:[#allocation78_spill] sm:$0xff] }
 0x116   :  { %v5465_v23 = vadd.f32 %v518_v46, %v510_v1  ;;  %v5467_v4 = vadd.f32 %v519_v27, %v511_v16  ;;  %v10606_v1 = vld [vmem:[#allocation118_spill] sm:$0xff]  ;;  %v591_v16 = vadd.f32 %v589_v62, %v581_v28  ;;  %v587_v54 = vadd.f32 %v585_v30, %v5291_v58  ;;  %v10610_v30 = vld [vmem:[#allocation104_spill] sm:$0xff] }
 0x117   :  { %v586_v6 = vadd.f32 %v584_v2, %v5294_v47  ;;  %v688_v5 = vadd.f32 %v686_v25, %v5297_v7  ;;  %v687_v10 = vadd.f32 %v685_v37, %v5300_v56  ;;  %v696_v62 = vmul.f32 %v10608_v59, %v5417_v52  ;;  %v10612_v25 = vld [vmem:[#allocation113_spill] sm:$0xff] }
 0x118   :  { %v600_v46 = vmul.f32 %v10606_v1, %v5467_v4  ;;  %v599_v0 = vmul.f32 %v10606_v1, %v5465_v23  ;;  %v605_v13 = vmul.f32 %v10607_v20, %v5467_v4  ;;  %v604_v28 = vmul.f32 %v10607_v20, %v5465_v23 }
 0x119   :  { %v695_v58 = vmul.f32 %v10608_v59, %v5415_v34  ;;  %v693_v47 = vadd.f32 %v691_v15, %v5303_v48  ;;  %v692_v7 = vadd.f32 %v690_v26, %v5306_v53  ;;  %v596_v56 = vadd.f32 %v594_v61, %v586_v6  ;;  %v10613_v61 = vld [vmem:[#allocation121_spill] sm:$0xff]  ;;  %v10614_v6 = vld [vmem:[#allocation122_spill] sm:$0xff] }
 0x11a   :  { %v602_v50 = vadd.f32 %v600_v46, %v592_v9  ;;  %v601_v3 = vadd.f32 %v599_v0, %v591_v16  ;;  %v597_v9 = vadd.f32 %v595_v40, %v587_v54  ;;  %v882_v37 = vmul.f32 %v10610_v30, %v5279_v24 }
 0x11b   :  { %v5504_v2 = vstv %s5455_s21  ;;  %v701_v27 = vmul.f32 %v10612_v25, %v5417_v52  ;;  %v881_v48 = vmul.f32 %v10610_v30, %v5277_v8  ;;  %v806_v53 = vmul.f32 %v4729_v41, %v5415_v34 }
 0x11c   :  { %610 = vrot.lane.b32.xlu1 %v602_v50, %s10609_s9  ;;  %608 = vrot.lane.b32.xlu0 %v601_v3, %s10609_s9  ;;  %10611 = vst [vmem:[#allocation123_spill] sm:$0xff] %v5504_v2  ;;  %v807_v15 = vmul.f32 %v4729_v41, %v5417_v52  ;;  %v607_v26 = vadd.f32 %v605_v13, %v597_v9  ;;  %vm10324_vm9 = vcmp.lt.s32.totalorder %v4103_v21, 112  ;;  %vm10323_vm8 = vcmp.lt.s32.totalorder %v4103_v21, 96 }
 0x11d   :  { %v606_v40 = vadd.f32 %v604_v28, %v596_v56  ;;  %v706_v46 = vmul.f32 %v10613_v61, %v5467_v4  ;;  %v705_v16 = vmul.f32 %v10613_v61, %v5465_v23  ;;  %v698_v0 = vadd.f32 %v696_v62, %v688_v5 }
 0x11e   :  { %v697_v54 = vadd.f32 %v695_v58, %v687_v10  ;;  %v711_v50 = vmul.f32 %v10614_v6, %v5467_v4  ;;  %v700_v3 = vmul.f32 %v10612_v25, %v5415_v34  ;;  %v710_v13 = vmul.f32 %v10614_v6, %v5465_v23 }
 0x11f   :  { %v5527_v28 = vstv %s5481_s6  ;;  %v811_v5 = vmul.f32 %v4715_v55, %v5465_v23  ;;  %v812_v10 = vmul.f32 %v4715_v55, %v5467_v4  ;;  %v808_v62 = vadd.f32 %v806_v53, %v798_v49  ;;  %v10620_v53 = vld [vmem:[#allocation114_spill] sm:$0xff]  ;;  %s11252_s6 = sld [smem:[#allocation169_spill]] }
 0x120   :  { %620 = vrot.lane.b32.xlu1 %v607_v26, %s10609_s9  ;;  %618 = vrot.lane.b32.xlu0 %v606_v40, %s10609_s9  ;;  %10615 = vst [vmem:[#allocation6_spill] sm:$0xff] %v5527_v28  ;;  %v809_v58 = vadd.f32 %v807_v15, %v799_v14  ;;  %v816_v9 = vmul.f32 %v5504_v2, %v5465_v23 }
 0x121   :  { %v817_v56 = vmul.f32 %v5504_v2, %v5467_v4  ;;  %v708_v26 = vadd.f32 %v706_v46, %v698_v0  ;;  %v707_v40 = vadd.f32 %v705_v16, %v697_v54  ;;  %v5539_v6 = vadd.f32 %v811_v5, %v803_v22 }
 0x122   :  { %v5541_v25 = vadd.f32 %v812_v10, %v804_v33  ;;  %v703_v30 = vadd.f32 %v701_v27, %v693_v47  ;;  %v873_v61 = vadd.f32 %v5320_v35, %v5218_v38  ;;  %v5545_v55 = vadd.f32 %v816_v9, %v808_v62  ;;  %v10622_v47 = vld [vmem:[#allocation105_spill] sm:$0xff]  ;;  %v10626_v9 = vld [vmem:[#allocation116_spill] sm:$0xff] }
 0x123   :  { %10616 = vst [vmem:[#allocation5_spill] sm:$0xff] %v5539_v6  ;;  %v5547_v49 = vadd.f32 %v817_v56, %v809_v58  ;;  %v702_v14 = vadd.f32 %v700_v3, %v692_v7  ;;  %v892_v15 = vmul.f32 %v10620_v53, %v5417_v52  ;;  %v891_v33 = vmul.f32 %v10620_v53, %v5415_v34  ;;  %v10662_v53 = vld [vmem:[#allocation45_spill] sm:$0xff] }
 0x124   :  { %10617 = vst [vmem:[#allocation126_spill] sm:$0xff] %v5541_v25  ;;  %10618 = vst [vmem:[#allocation127_spill] sm:$0xff] %v5545_v55  ;;  %716 = vrot.lane.b32.xlu1 %v708_v26, %s10419_s3  ;;  %714 = vrot.lane.b32.xlu0 %v707_v40, %s10419_s3  ;;  %v5556_v22 = vstv %s5501_s14  ;;  %v884_v38 = vadd.f32 %v882_v37, %v5401_v19  ;;  %v883_v35 = vadd.f32 %v881_v48, %v873_v61  ;;  %v10623_v19 = vld [vmem:[#allocation115_spill] sm:$0xff]  ;;  %v10627_v40 = vld [vmem:[#allocation97_spill] sm:$0xff] }
 0x125   :  { %10619 = vst [vmem:[#allocation128_spill] sm:$0xff] %v5547_v49  ;;  %10621 = vst [vmem:[#allocation129_spill] sm:$0xff] %v5556_v22  ;;  %v887_v27 = vmul.f32 %v10622_v47, %v5279_v24  ;;  %v886_v7 = vmul.f32 %v10622_v47, %v5277_v8  ;;  %v713_v46 = vadd.f32 %v711_v50, %v703_v30  ;;  %v5879_v55 = vld [vmem:[%s10578_s29 + $0x118] sm:$0xff] }
 0x126   :  { %v712_v16 = vadd.f32 %v710_v13, %v702_v14  ;;  %v902_v0 = vmul.f32 %v5527_v28, %v5467_v4  ;;  %v901_v54 = vmul.f32 %v5527_v28, %v5465_v23  ;;  %v879_v3 = vadd.f32 %v5324_v36, %v5221_v45  ;;  %10647 = vst [vmem:[#allocation149_spill] sm:$0xff] %v5879_v55  ;;  %v10661_v47 = vld [vmem:[#allocation51_spill] sm:$0xff] }
 0x127   :  { %v897_v37 = vmul.f32 %v10623_v19, %v5417_v52  ;;  %v878_v48 = vadd.f32 %v5336_v63, %v5266_v18  ;;  %v980_v61 = vadd.f32 %v5340_v60, %v5269_v29  ;;  %v894_v30 = vadd.f32 %v892_v15, %v884_v38  ;;  %v10625_v18 = vld [vmem:[#allocation106_spill] sm:$0xff] }
 0x128   :  { %726 = vrot.lane.b32.xlu1 %v713_v46, %s10419_s3  ;;  %724 = vrot.lane.b32.xlu0 %v712_v16, %s10419_s3  ;;  %v893_v50 = vadd.f32 %v891_v33, %v883_v35  ;;  %v896_v45 = vmul.f32 %v10623_v19, %v5415_v34  ;;  %v5584_v36 = vstv %s5529_s19  ;;  %v889_v13 = vadd.f32 %v887_v27, %v879_v3  ;;  %s11289_s19 = sld [smem:[#allocation170_spill]] }
 0x129   :  { %10624 = vst [vmem:[#allocation130_spill] sm:$0xff] %v5584_v36  ;;  %v888_v5 = vadd.f32 %v886_v7, %v878_v48  ;;  %v988_v63 = vmul.f32 %v10625_v18, %v5279_v24  ;;  %v987_v29 = vmul.f32 %v10625_v18, %v5277_v8  ;;  %v904_v60 = vadd.f32 %v902_v0, %v894_v30  ;;  %v10659_v18 = vld [vmem:[#allocation42_spill] sm:$0xff] }
 0x12a   :  { %v903_v10 = vadd.f32 %v901_v54, %v893_v50  ;;  %v907_v62 = vmul.f32 %v5556_v22, %v5467_v4  ;;  %v906_v58 = vmul.f32 %v5556_v22, %v5465_v23  ;;  %v998_v56 = vmul.f32 %v10626_v9, %v5417_v52  ;;  %v10660_v22 = vld [vmem:[#allocation49_spill] sm:$0xff] }
 0x12b   :  { %v979_v26 = vadd.f32 %v5405_v43, %v5272_v39  ;;  %v983_v14 = vmul.f32 %v10627_v40, %v5137_v42  ;;  %v982_v15 = vmul.f32 %v10627_v40, %v5135_v12  ;;  %v899_v33 = vadd.f32 %v897_v37, %v889_v13  ;;  %v10629_v43 = vld [vmem:[#allocation107_spill] sm:$0xff] }
 0x12c   :  { %912 = vrot.lane.b32.xlu1 %v904_v60, %s10519_s26  ;;  %910 = vrot.lane.b32.xlu0 %v903_v10, %s10519_s26  ;;  %v898_v38 = vadd.f32 %v896_v45, %v888_v5  ;;  %v997_v35 = vmul.f32 %v10626_v9, %v5415_v34  ;;  %v5607_v27 = vstv %s5558_s24  ;;  %v990_v7 = vadd.f32 %v988_v63, %v980_v61  ;;  %v5670_v10 = vld [vmem:[%s10578_s29 + $0xa0] sm:$0xff]  ;;  %s3794_s24 = smov 15  }
 0x12d   :  { %10628 = vst [vmem:[#allocation131_spill] sm:$0xff] %v5607_v27  ;;  %v989_v39 = vadd.f32 %v987_v29, %v979_v26  ;;  %v993_v42 = vmul.f32 %v10629_v43, %v5279_v24  ;;  %v992_v12 = vmul.f32 %v10629_v43, %v5277_v8  ;;  %v909_v46 = vadd.f32 %v907_v62, %v899_v33  ;;  %v5691_v62 = vld [vmem:[%s10578_s29 + $0xb8] sm:$0xff]  ;;  %v5722_v26 = vld [vmem:[%s10578_s29 + $0xc0] sm:$0xff]  ;;  %v5769_v33 = vld [vmem:[%s10578_s29 + $0xe8] sm:$0xff] }
 0x12e   :  { %v908_v16 = vadd.f32 %v906_v58, %v898_v38  ;;  %v1008_v0 = vmul.f32 %v5584_v36, %v5467_v4  ;;  %v1007_v54 = vmul.f32 %v5584_v36, %v5465_v23  ;;  %v1000_v3 = vadd.f32 %v998_v56, %v990_v7  ;;  %v5696_v58 = vld [vmem:[%s10578_s29 + $0xb0] sm:$0xff]  ;;  %v5717_v56 = vld [vmem:[%s10578_s29 + $0xc8] sm:$0xff]  ;;  %v5774_v38 = vld [vmem:[%s10578_s29 + $0xe0] sm:$0xff] }
 0x12f   :  { %v985_v37 = vadd.f32 %v983_v14, %v5275_v31  ;;  %v5619_v48 = vstv %s5577_s8  ;;  %v984_v61 = vadd.f32 %v982_v15, %v5285_v11  ;;  %v999_v8 = vadd.f32 %v997_v35, %v989_v39  ;;  %v5743_v14 = vld [vmem:[%s10578_s29 + $0xd8] sm:$0xff]  ;;  %v5748_v15 = vld [vmem:[%s10578_s29 + $0xd0] sm:$0xff]  ;;  %s3792_s8 = smov 94  }
 0x130   :  { %10630 = vst [vmem:[#allocation132_spill] sm:$0xff] %v5619_v48  ;;  %922 = vrot.lane.b32.xlu1 %v909_v46, %s10519_s26  ;;  %920 = vrot.lane.b32.xlu0 %v908_v16, %s10519_s26  ;;  %v1003_v24 = vmul.f32 %v5607_v27, %v5417_v52  ;;  %v1002_v30 = vmul.f32 %v5607_v27, %v5415_v34  ;;  %v5639_v34 = vld [vmem:[%s10578_s29 + $0x98] sm:$0xff] }
 0x131   :  { %v995_v50 = vadd.f32 %v993_v42, %v985_v37  ;;  %v994_v45 = vadd.f32 %v992_v12, %v984_v61  ;;  %v1010_v13 = vadd.f32 %v1008_v0, %v1000_v3  ;;  %v1009_v5 = vadd.f32 %v1007_v54, %v999_v8  ;;  %v5807_v16 = vld [vmem:[%s10578_s29 + $0xf8] sm:$0xff]  ;;  %v5812_v0 = vld [vmem:[%s10578_s29 + $0xf0] sm:$0xff] }
 0x132   :  { %v1013_v31 = vmul.f32 %v5619_v48, %v5467_v4  ;;  %v1012_v11 = vmul.f32 %v5619_v48, %v5465_v23  ;;  %v5644_v4 = vld [vmem:[%s10578_s29 + $0x90] sm:$0xff]  ;;  %v5665_v23 = vld [vmem:[%s10578_s29 + $0xa8] sm:$0xff] }
 0x133   :  { %v1005_v63 = vadd.f32 %v1003_v24, %v995_v50  ;;  %v1004_v29 = vadd.f32 %v1002_v30, %v994_v45  ;;  %v5849_v45 = vld [vmem:[%s10578_s29 + $0x108] sm:$0xff] }
 0x134   :  { %1018 = vrot.lane.b32.xlu1 %v1010_v13, %s10429_s16  ;;  %1016 = vrot.lane.b32.xlu0 %v1009_v5, %s10429_s16  ;;  %v5854_v13 = vld [vmem:[%s10578_s29 + $0x100] sm:$0xff] }
 0x135   :  { %v1015_v52 = vadd.f32 %v1013_v31, %v1005_v63  ;;  %v1014_v60 = vadd.f32 %v1012_v11, %v1004_v29 }
 0x138   :  { %1028 = vrot.lane.b32.xlu1 %v1015_v52, %s10429_s16  ;;  %1026 = vrot.lane.b32.xlu0 %v1014_v60, %s10429_s16  ;;  %s3787_s16 = smov 112  }
 0x13c   :  { %1049 = vrot.lane.b32.xlu1 %v5639_v34, %s3785_s10  ;;  %1047 = vrot.lane.b32.xlu0 %v5644_v4, %s3785_s10 }
 0x140   :  { %1060 = vrot.lane.b32.xlu1 %v5639_v34, %s3786_s11  ;;  %1058 = vrot.lane.b32.xlu0 %v5644_v4, %s3786_s11 }
 0x144   :  { %1071 = vrot.lane.b32.xlu1 %v5639_v34, %s3787_s16  ;;  %1069 = vrot.lane.b32.xlu0 %v5644_v4, %s3787_s16 }
 0x148   :  { %1082 = vrot.lane.b32.xlu1 %v5639_v34, %s3788_s12  ;;  %1080 = vrot.lane.b32.xlu0 %v5644_v4, %s3788_s12 }
 0x14c   :  { %1096 = vrot.lane.b32.xlu1 %v5665_v23, %s3785_s10  ;;  %1094 = vrot.lane.b32.xlu0 %v5670_v10, %s3785_s10 }
 0x150   :  { %1106 = vrot.lane.b32.xlu1 %v5665_v23, %s3786_s11  ;;  %1104 = vrot.lane.b32.xlu0 %v5670_v10, %s3786_s11 }
 0x154   :  { %1116 = vrot.lane.b32.xlu1 %v5665_v23, %s3787_s16  ;;  %1114 = vrot.lane.b32.xlu0 %v5670_v10, %s3787_s16 }
 0x158   :  { %1126 = vrot.lane.b32.xlu1 %v5665_v23, %s3788_s12  ;;  %1124 = vrot.lane.b32.xlu0 %v5670_v10, %s3788_s12 }
 0x15c   :  { %1139 = vrot.lane.b32.xlu1 %v5691_v62, %s3785_s10  ;;  %1137 = vrot.lane.b32.xlu0 %v5696_v58, %s3785_s10 }
 0x160   :  { %1149 = vrot.lane.b32.xlu1 %v5691_v62, %s3786_s11  ;;  %1147 = vrot.lane.b32.xlu0 %v5696_v58, %s3786_s11 }
 0x164   :  { %1159 = vrot.lane.b32.xlu1 %v5691_v62, %s3787_s16  ;;  %1157 = vrot.lane.b32.xlu0 %v5696_v58, %s3787_s16 }
 0x168   :  { %1169 = vrot.lane.b32.xlu1 %v5691_v62, %s3788_s12  ;;  %1167 = vrot.lane.b32.xlu0 %v5696_v58, %s3788_s12 }
 0x16c   :  { %1182 = vrot.lane.b32.xlu1 %v5717_v56, %s3785_s10  ;;  %1180 = vrot.lane.b32.xlu0 %v5722_v26, %s3785_s10 }
 0x170   :  { %1192 = vrot.lane.b32.xlu1 %v5717_v56, %s3786_s11  ;;  %1190 = vrot.lane.b32.xlu0 %v5722_v26, %s3786_s11 }
 0x174   :  { %1202 = vrot.lane.b32.xlu1 %v5717_v56, %s3787_s16  ;;  %1200 = vrot.lane.b32.xlu0 %v5722_v26, %s3787_s16 }
 0x178   :  { %1212 = vrot.lane.b32.xlu1 %v5717_v56, %s3788_s12  ;;  %1210 = vrot.lane.b32.xlu0 %v5722_v26, %s3788_s12 }
 0x17c   :  { %1225 = vrot.lane.b32.xlu1 %v5743_v14, %s3785_s10  ;;  %1223 = vrot.lane.b32.xlu0 %v5748_v15, %s3785_s10 }
 0x180   :  { %1235 = vrot.lane.b32.xlu1 %v5743_v14, %s3786_s11  ;;  %1233 = vrot.lane.b32.xlu0 %v5748_v15, %s3786_s11 }
 0x184   :  { %1245 = vrot.lane.b32.xlu1 %v5743_v14, %s3787_s16  ;;  %1243 = vrot.lane.b32.xlu0 %v5748_v15, %s3787_s16 }
 0x188   :  { %1255 = vrot.lane.b32.xlu1 %v5743_v14, %s3788_s12  ;;  %1253 = vrot.lane.b32.xlu0 %v5748_v15, %s3788_s12 }
 0x18c   :  { %1268 = vrot.lane.b32.xlu1 %v5769_v33, %s3785_s10  ;;  %1266 = vrot.lane.b32.xlu0 %v5774_v38, %s3785_s10 }
 0x18e   :  { %v5780_v35 = vpop.permute.xlu1 %610  ;;  %v5782_v7 = vpop.permute.xlu0 %608 }
 0x18f   :  { %10631 = vst [vmem:[#allocation133_spill] sm:$0xff] %v5780_v35  ;;  %10632 = vst [vmem:[#allocation134_spill] sm:$0xff] %v5782_v7 }
 0x190   :  { %1278 = vrot.lane.b32.xlu1 %v5769_v33, %s3786_s11  ;;  %1276 = vrot.lane.b32.xlu0 %v5774_v38, %s3786_s11 }
 0x192   :  { %v5788_v39 = vpop.permute.xlu1 %620  ;;  %v5790_v42 = vpop.permute.xlu0 %618 }
 0x193   :  { %10633 = vst [vmem:[#allocation135_spill] sm:$0xff] %v5788_v39  ;;  %10634 = vst [vmem:[#allocation136_spill] sm:$0xff] %v5790_v42 }
 0x194   :  { %1288 = vrot.lane.b32.xlu1 %v5769_v33, %s3787_s16  ;;  %1286 = vrot.lane.b32.xlu0 %v5774_v38, %s3787_s16 }
 0x196   :  { %v5796_v12 = vpop.permute.xlu1 %716  ;;  %v5798_v46 = vpop.permute.xlu0 %714 }
 0x197   :  { %10635 = vst [vmem:[#allocation137_spill] sm:$0xff] %v5796_v12  ;;  %10636 = vst [vmem:[#allocation138_spill] sm:$0xff] %v5798_v46 }
 0x198   :  { %1298 = vrot.lane.b32.xlu1 %v5769_v33, %s3788_s12  ;;  %1296 = vrot.lane.b32.xlu0 %v5774_v38, %s3788_s12 }
 0x19a   :  { %v5814_v54 = vpop.permute.xlu1 %726  ;;  %v5816_v3 = vpop.permute.xlu0 %724 }
 0x19b   :  { %10637 = vst [vmem:[#allocation139_spill] sm:$0xff] %v5814_v54  ;;  %10638 = vst [vmem:[#allocation140_spill] sm:$0xff] %v5816_v3  ;;  %v10649_v54 = vld [vmem:[#allocation43_spill] sm:$0xff] }
 0x19c   :  { %1311 = vrot.lane.b32.xlu1 %v5807_v16, %s3785_s10  ;;  %1309 = vrot.lane.b32.xlu0 %v5812_v0, %s3785_s10  ;;  %vm10336_vm11 = vcmp.lt.s32.totalorder %v10649_v54, 240  ;;  %vm10326_vm10 = vcmp.lt.s32.totalorder %v10649_v54, 224 }
 0x19e   :  { %v5822_v37 = vpop.permute.xlu1 %912  ;;  %v5824_v61 = vpop.permute.xlu0 %910 }
 0x19f   :  { %10639 = vst [vmem:[#allocation141_spill] sm:$0xff] %v5822_v37  ;;  %10640 = vst [vmem:[#allocation142_spill] sm:$0xff] %v5824_v61 }
 0x1a0   :  { %1321 = vrot.lane.b32.xlu1 %v5807_v16, %s3786_s11  ;;  %1319 = vrot.lane.b32.xlu0 %v5812_v0, %s3786_s11 }
 0x1a2   :  { %v5830_v8 = vpop.permute.xlu1 %922  ;;  %v5832_v24 = vpop.permute.xlu0 %920 }
 0x1a3   :  { %10641 = vst [vmem:[#allocation143_spill] sm:$0xff] %v5830_v8  ;;  %10642 = vst [vmem:[#allocation144_spill] sm:$0xff] %v5832_v24 }
 0x1a4   :  { %1331 = vrot.lane.b32.xlu1 %v5807_v16, %s3787_s16  ;;  %1329 = vrot.lane.b32.xlu0 %v5812_v0, %s3787_s16 }
 0x1a6   :  { %v5838_v30 = vpop.permute.xlu1 %1018  ;;  %v5840_v50 = vpop.permute.xlu0 %1016 }
 0x1a7   :  { %10643 = vst [vmem:[#allocation145_spill] sm:$0xff] %v5838_v30  ;;  %10644 = vst [vmem:[#allocation146_spill] sm:$0xff] %v5840_v50 }
 0x1a8   :  { %1341 = vrot.lane.b32.xlu1 %v5807_v16, %s3788_s12  ;;  %1339 = vrot.lane.b32.xlu0 %v5812_v0, %s3788_s12 }
 0x1aa   :  { %v5856_v5 = vpop.permute.xlu1 %1028  ;;  %v5858_v31 = vpop.permute.xlu0 %1026 }
 0x1ab   :  { %10645 = vst [vmem:[#allocation147_spill] sm:$0xff] %v5856_v5  ;;  %10646 = vst [vmem:[#allocation148_spill] sm:$0xff] %v5858_v31  ;;  %v5884_v5 = vld [vmem:[%s10578_s29 + $0x110] sm:$0xff] }
 0x1ac   :  { %1354 = vrot.lane.b32.xlu1 %v5849_v45, %s3785_s10  ;;  %1352 = vrot.lane.b32.xlu0 %v5854_v13, %s3785_s10  ;;  %10648 = vst [vmem:[#allocation150_spill] sm:$0xff] %v5884_v5 }
 0x1ae   :  { %v1050_v11 = vpop.permute.xlu1 %1049  ;;  %v1048_v63 = vpop.permute.xlu0 %1047 }
 0x1af   :  { %v1053_v6 = vsel %vm1051_vm12, %v1050_v11, %v1048_v63 }
 0x1b0   :  { %1364 = vrot.lane.b32.xlu1 %v5849_v45, %s3786_s11  ;;  %1362 = vrot.lane.b32.xlu0 %v5854_v13, %s3786_s11  ;;  %v1054_v39 = vsel %vm10246_vm13, %v1053_v6, 0.0  ;;  %v1052_v6 = vsel %vm1051_vm12, %v1048_v63, %v1050_v11 }
 0x1b1   :  { %v1056_v43 = vadd.f32 %v5644_v4, %v1054_v39  ;;  %v1057_v39 = vadd.f32 %v5639_v34, %v1052_v6 }
 0x1b2   :  { %v1061_v29 = vpop.permute.xlu1 %1060  ;;  %v1059_v52 = vpop.permute.xlu0 %1058 }
 0x1b3   :  { %v1064_v3 = vsel %vm1062_vm14, %v1061_v29, %v1059_v52  ;;  %v1063_v11 = vsel %vm1062_vm14, %v1059_v52, %v1061_v29 }
 0x1b4   :  { %1374 = vrot.lane.b32.xlu1 %v5849_v45, %s3787_s16  ;;  %1372 = vrot.lane.b32.xlu0 %v5854_v13, %s3787_s16 }
 0x1b6   :  { %v1072_v60 = vpop.permute.xlu1 %1071  ;;  %v1070_v49 = vpop.permute.xlu0 %1069 }
 0x1b7   :  { %v1074_v9 = vsel %vm10324_vm9, %v1070_v49, %v1072_v60 }
 0x1b8   :  { %1384 = vrot.lane.b32.xlu1 %v5849_v45, %s3788_s12  ;;  %1382 = vrot.lane.b32.xlu0 %v5854_v13, %s3788_s12 }
 0x1ba   :  { %v1083_v31 = vpop.permute.xlu1 %1082  ;;  %v1081_v24 = vpop.permute.xlu0 %1080 }
 0x1bc   :  { %1397 = vrot.lane.b32.xlu1 %v5879_v55, %s3785_s10  ;;  %1395 = vrot.lane.b32.xlu0 %v5884_v5, %s3785_s10 }
 0x1be   :  { %v1097_v8 = vpop.permute.xlu1 %1096  ;;  %v1095_v25 = vpop.permute.xlu0 %1094 }
 0x1bf   :  { %v1099_v42 = vsel %vm1051_vm12, %v1097_v8, %v1095_v25  ;;  %v1098_v35 = vsel %vm1051_vm12, %v1095_v25, %v1097_v8  ;;  %v1065_v25 = vsel %vm10245_vm15, %v1064_v3, 0.0  ;;  %v1075_v8 = vsel %vm10324_vm9, %v1072_v60, %v1070_v49 }
 0x1c0   :  { %1407 = vrot.lane.b32.xlu1 %v5879_v55, %s3786_s11  ;;  %1405 = vrot.lane.b32.xlu0 %v5884_v5, %s3786_s11  ;;  %v1100_v48 = vsel %vm10246_vm13, %v1099_v42, 0.0  ;;  %v1103_v63 = vadd.f32 %v5665_v23, %v1098_v35  ;;  %v1086_v3 = vsel %vm10323_vm8, %v1083_v31, %v1081_v24  ;;  %v1067_v52 = vadd.f32 %v1065_v25, %v1056_v43 }
 0x1c1   :  { %v1102_v40 = vadd.f32 %v5670_v10, %v1100_v48  ;;  %v1077_v23 = vsel %vm10336_vm11, %v1075_v8, 0.0  ;;  %v1088_v48 = vsel %vm10326_vm10, %v1086_v3, 0.0  ;;  %v1085_v25 = vsel %vm10323_vm8, %v1081_v24, %v1083_v31  ;;  %v10651_v31 = vld [vmem:[#allocation53_spill] sm:$0xff] }
 0x1c2   :  { %v1107_v30 = vpop.permute.xlu1 %1106  ;;  %v1105_v50 = vpop.permute.xlu0 %1104 }
 0x1c3   :  { %v1109_v7 = vsel %vm1062_vm14, %v1107_v30, %v1105_v50  ;;  %v1108_v36 = vsel %vm1062_vm14, %v1105_v50, %v1107_v30 }
 0x1c4   :  { %1417 = vrot.lane.b32.xlu1 %v5879_v55, %s3787_s16  ;;  %1415 = vrot.lane.b32.xlu0 %v5884_v5, %s3787_s16  ;;  %v1110_v42 = vsel %vm10245_vm15, %v1109_v7, 0.0  ;;  %v1113_v35 = vadd.f32 %v1108_v36, %v1103_v63  ;;  %v1068_v7 = vadd.f32 %v1063_v11, %v1057_v39  ;;  %v1078_v11 = vadd.f32 %v1074_v9, %v1067_v52  ;;  %v10650_v39 = vld [vmem:[#allocation58_spill] sm:$0xff] }
 0x1c5   :  { %v1112_v34 = vadd.f32 %v1110_v42, %v1102_v40 }
 0x1c6   :  { %v1117_v61 = vpop.permute.xlu1 %1116  ;;  %v1115_v37 = vpop.permute.xlu0 %1114  ;;  %v1079_v43 = vadd.f32 %v1077_v23, %v1068_v7  ;;  %v5966_v42 = vadd.f32 %v1085_v25, %v1078_v11 }
 0x1c7   :  { %v1119_v27 = vsel %vm10324_vm9, %v1117_v61, %v1115_v37 }
 0x1c8   :  { %1427 = vrot.lane.b32.xlu1 %v5879_v55, %s3788_s12  ;;  %1425 = vrot.lane.b32.xlu0 %v5884_v5, %s3788_s12  ;;  %v1121_v30 = vsel %vm10336_vm11, %v1119_v27, 0.0  ;;  %v1118_v27 = vsel %vm10324_vm9, %v1115_v37, %v1117_v61  ;;  %v5964_v60 = vadd.f32 %v1088_v48, %v1079_v43  ;;  %v1611_v52 = vmul.f32 %v5966_v42, %v10651_v31 }
 0x1c9   :  { %v1123_v10 = vadd.f32 %v1121_v30, %v1113_v35  ;;  %v1122_v63 = vadd.f32 %v1118_v27, %v1112_v34  ;;  %v1613_v27 = vmul.f32 %v5966_v42, %v4190_v44 }
 0x1ca   :  { %v1127_v12 = vpop.permute.xlu1 %1126  ;;  %v1125_v46 = vpop.permute.xlu0 %1124  ;;  %v1614_v30 = vmul.f32 %v5964_v60, %v4190_v44 }
 0x1cb   :  { %v1129_v4 = vsel %vm10323_vm8, %v1127_v12, %v1125_v46  ;;  %v1128_v49 = vsel %vm10323_vm8, %v1125_v46, %v1127_v12  ;;  %v1612_v12 = vmul.f32 %v5964_v60, %v10651_v31  ;;  %v10658_v31 = vld [vmem:[#allocation48_spill] sm:$0xff] }
 0x1cc   :  { %v1131_v6 = vsel %vm10326_vm10, %v1129_v4, 0.0  ;;  %v5968_v4 = vadd.f32 %v1128_v49, %v1122_v63 }
 0x1cd   :  { %v5962_v40 = vadd.f32 %v1131_v6, %v1123_v10 }
 0x1ce   :  { %v1140_v50 = vpop.permute.xlu1 %1139  ;;  %v1138_v29 = vpop.permute.xlu0 %1137  ;;  %v1615_v6 = vmul.f32 %v5968_v4, %v10650_v39  ;;  %v1527_v19 = vmul.f32 %v5968_v4, %v10660_v22  ;;  %v1531_v28 = vmul.f32 %v5968_v4, %v10661_v47 }
 0x1cf   :  { %v1616_v24 = vmul.f32 %v5962_v40, %v10650_v39  ;;  %v1142_v9 = vsel %vm1051_vm12, %v1140_v50, %v1138_v29  ;;  %v1141_v46 = vsel %vm1051_vm12, %v1138_v29, %v1140_v50  ;;  %v1620_v34 = vmul.f32 %v5962_v40, %v4220_v51 }
 0x1d0   :  { %v1619_v50 = vmul.f32 %v5968_v4, %v4220_v51  ;;  %v1143_v29 = vsel %vm10246_vm13, %v1142_v9, 0.0  ;;  %v1617_v25 = vadd.f32 %v1615_v6, %v1611_v52  ;;  %v1146_v11 = vadd.f32 %v5691_v62, %v1141_v46 }
 0x1d1   :  { %v1618_v7 = vadd.f32 %v1616_v24, %v1612_v12  ;;  %v1622_v43 = vadd.f32 %v1620_v34, %v1614_v30  ;;  %v1145_v9 = vadd.f32 %v5696_v58, %v1143_v29 }
 0x1d2   :  { %v1150_v36 = vpop.permute.xlu1 %1149  ;;  %v1148_v8 = vpop.permute.xlu0 %1147  ;;  %v1621_v24 = vadd.f32 %v1619_v50, %v1613_v27 }
 0x1d3   :  { %v1152_v3 = vsel %vm1062_vm14, %v1150_v36, %v1148_v8  ;;  %v1151_v10 = vsel %vm1062_vm14, %v1148_v8, %v1150_v36 }
 0x1d4   :  { %v1153_v49 = vsel %vm10245_vm15, %v1152_v3, 0.0  ;;  %v1156_v39 = vadd.f32 %v1151_v10, %v1146_v11 }
 0x1d5   :  { %v1155_v36 = vadd.f32 %v1153_v49, %v1145_v9 }
 0x1d6   :  { %v1160_v37 = vpop.permute.xlu1 %1159  ;;  %v1158_v61 = vpop.permute.xlu0 %1157 }
 0x1d7   :  { %v1162_v48 = vsel %vm10324_vm9, %v1160_v37, %v1158_v61  ;;  %v1161_v62 = vsel %vm10324_vm9, %v1158_v61, %v1160_v37 }
 0x1d8   :  { %v1164_v12 = vsel %vm10336_vm11, %v1162_v48, 0.0  ;;  %v1165_v34 = vadd.f32 %v1161_v62, %v1155_v36  ;;  %v10652_v48 = vld [vmem:[#allocation69_spill] sm:$0xff] }
 0x1d9   :  { %v1166_v46 = vadd.f32 %v1164_v12, %v1156_v39 }
 0x1da   :  { %v1170_v23 = vpop.permute.xlu1 %1169  ;;  %v1168_v35 = vpop.permute.xlu0 %1167 }
 0x1db   :  { %v1172_v63 = vsel %vm10323_vm8, %v1170_v23, %v1168_v35  ;;  %v1171_v52 = vsel %vm10323_vm8, %v1168_v35, %v1170_v23 }
 0x1dc   :  { %v1174_v8 = vsel %vm10326_vm10, %v1172_v63, 0.0  ;;  %v6014_v6 = vadd.f32 %v1171_v52, %v1165_v34 }
 0x1dd   :  { %v6012_v58 = vadd.f32 %v1174_v8, %v1166_v46 }
 0x1de   :  { %v1183_v51 = vpop.permute.xlu1 %1182  ;;  %v1181_v44 = vpop.permute.xlu0 %1180  ;;  %v1623_v49 = vmul.f32 %v6014_v6, %v10652_v48  ;;  %v1627_v63 = vmul.f32 %v6014_v6, %v10562_v57 }
 0x1df   :  { %v1624_v27 = vmul.f32 %v6012_v58, %v10652_v48  ;;  %v1185_v10 = vsel %vm1051_vm12, %v1183_v51, %v1181_v44  ;;  %v1184_v37 = vsel %vm1051_vm12, %v1181_v44, %v1183_v51  ;;  %v1628_v11 = vmul.f32 %v6012_v58, %v10562_v57  ;;  %v10657_v48 = vld [vmem:[#allocation47_spill] sm:$0xff] }
 0x1e0   :  { %v1186_v9 = vsel %vm10246_vm13, %v1185_v10, 0.0  ;;  %v6040_v12 = vadd.f32 %v1623_v49, %v1617_v25  ;;  %v1189_v36 = vadd.f32 %v5717_v56, %v1184_v37  ;;  %v6047_v46 = vadd.f32 %v1627_v63, %v1621_v24  ;;  %v10654_v56 = vld [vmem:[#allocation39_spill] sm:$0xff]  ;;  %v10655_v37 = vld [vmem:[#allocation40_spill] sm:$0xff] }
 0x1e1   :  { %v6024_v35 = vadd.f32 %v1624_v27, %v1618_v7  ;;  %v6038_v7 = vadd.f32 %v1628_v11, %v1622_v43  ;;  %v1188_v52 = vadd.f32 %v5722_v26, %v1186_v9  ;;  %v1437_v10 = vmul.f32 %v5966_v42, %v10654_v56  ;;  %v10656_v11 = vld [vmem:[#allocation41_spill] sm:$0xff] }
 0x1e2   :  { %v1193_v3 = vpop.permute.xlu1 %1192  ;;  %v1191_v30 = vpop.permute.xlu0 %1190  ;;  %v1525_v24 = vmul.f32 %v5966_v42, %v10656_v11  ;;  %v1438_v9 = vmul.f32 %v5964_v60, %v10654_v56  ;;  %v1526_v57 = vmul.f32 %v5964_v60, %v10656_v11  ;;  %v1683_v56 = vmul.f32 %v5966_v42, %v10659_v18 }
 0x1e3   :  { %v1195_v61 = vsel %vm1062_vm14, %v1193_v3, %v1191_v30  ;;  %v1194_v51 = vsel %vm1062_vm14, %v1191_v30, %v1193_v3  ;;  %v10653_v30 = vld [vmem:[#allocation38_spill] sm:$0xff] }
 0x1e4   :  { %v1196_v8 = vsel %vm10245_vm15, %v1195_v61, 0.0  ;;  %v1435_v25 = vmul.f32 %v5966_v42, %v10653_v30  ;;  %v1199_v27 = vadd.f32 %v1194_v51, %v1189_v36  ;;  %v1523_v61 = vmul.f32 %v5966_v42, %v10655_v37 }
 0x1e5   :  { %v1198_v49 = vadd.f32 %v1196_v8, %v1188_v52  ;;  %v1436_v63 = vmul.f32 %v5964_v60, %v10653_v30  ;;  %v1524_v36 = vmul.f32 %v5964_v60, %v10655_v37  ;;  %v1443_v30 = vmul.f32 %v5968_v4, %v10658_v31 }
 0x1e6   :  { %v1203_v50 = vpop.permute.xlu1 %1202  ;;  %v1201_v29 = vpop.permute.xlu0 %1200  ;;  %v1444_v37 = vmul.f32 %v5962_v40, %v10658_v31 }
 0x1e7   :  { %v1205_v44 = vsel %vm10324_vm9, %v1203_v50, %v1201_v29  ;;  %v6112_v20 = vadd.f32 %v1443_v30, %v1437_v10  ;;  %v6130_v30 = vadd.f32 %v1531_v28, %v1525_v24 }
 0x1e8   :  { %v1207_v34 = vsel %vm10336_vm11, %v1205_v44, 0.0  ;;  %v1204_v44 = vsel %vm10324_vm9, %v1201_v29, %v1203_v50  ;;  %v1684_v50 = vmul.f32 %v5964_v60, %v10659_v18  ;;  %v1685_v18 = vmul.f32 %v5966_v42, %v10662_v53 }
 0x1e9   :  { %v1209_v51 = vadd.f32 %v1207_v34, %v1199_v27  ;;  %v1440_v27 = vmul.f32 %v5962_v40, %v10657_v48  ;;  %v1208_v11 = vadd.f32 %v1204_v44, %v1198_v49  ;;  %v10664_v49 = vld [vmem:[#allocation50_spill] sm:$0xff] }
 0x1ea   :  { %v1213_v39 = vpop.permute.xlu1 %1212  ;;  %v1211_v23 = vpop.permute.xlu0 %1210  ;;  %v6106_v44 = vmul.f32 %v5966_v42, %v10664_v49 }
 0x1eb   :  { %v1215_v62 = vsel %vm10323_vm8, %v1213_v39, %v1211_v23  ;;  %v1214_v29 = vsel %vm10323_vm8, %v1211_v23, %v1213_v39  ;;  %v1686_v39 = vmul.f32 %v5964_v60, %v10662_v53  ;;  %v10663_v23 = vld [vmem:[#allocation46_spill] sm:$0xff]  ;;  %v6116_v53 = vmul.f32 %v5964_v60, %v10664_v49 }
 0x1ec   :  { %v1217_v26 = vsel %vm10326_vm10, %v1215_v62, 0.0  ;;  %v1439_v62 = vmul.f32 %v5968_v4, %v10657_v48  ;;  %v6108_v48 = vadd.f32 %v1214_v29, %v1208_v11  ;;  %v6118_v17 = vadd.f32 %v1440_v27, %v1436_v63  ;;  %v10666_v63 = vld [vmem:[#allocation52_spill] sm:$0xff] }
 0x1ed   :  { %v6082_v34 = vadd.f32 %v1217_v26, %v1209_v51  ;;  %v6098_v26 = vmul.f32 %v5966_v42, %v10663_v23  ;;  %v6102_v51 = vmul.f32 %v5964_v60, %v10663_v23  ;;  %v6120_v23 = vadd.f32 %v1444_v37, %v1438_v9 }
 0x1ee   :  { %v1226_v3 = vpop.permute.xlu1 %1225  ;;  %v1224_v43 = vpop.permute.xlu0 %1223  ;;  %v6110_v59 = vadd.f32 %v1439_v62, %v1435_v25  ;;  %v1528_v42 = vmul.f32 %v5962_v40, %v10660_v22  ;;  %v6128_v62 = vadd.f32 %v1527_v19, %v1523_v61  ;;  %v1532_v60 = vmul.f32 %v5962_v40, %v10661_v47  ;;  %v10667_v61 = vld [vmem:[#allocation89_spill] sm:$0xff]  ;;  %v10668_v47 = vld [vmem:[#allocation55_spill] sm:$0xff] }
 0x1ef   :  { %v1632_v11 = vmul.f32 %v6082_v34, %v10665_v32  ;;  %v1228_v25 = vsel %vm1051_vm12, %v1226_v3, %v1224_v43  ;;  %v1227_v10 = vsel %vm1051_vm12, %v1224_v43, %v1226_v3  ;;  %v1687_v9 = vmul.f32 %v5968_v4, %v10666_v63 }
 0x1f0   :  { %v1688_v29 = vmul.f32 %v5962_v40, %v10666_v63  ;;  %v1636_v24 = vmul.f32 %v6082_v34, %v10667_v61  ;;  %v1631_v3 = vmul.f32 %v6108_v48, %v10665_v32  ;;  %v1635_v43 = vmul.f32 %v6108_v48, %v10667_v61 }
 0x1f1   :  { %v6143_v28 = vadd.f32 %v1632_v11, %v6024_v35  ;;  %v1229_v22 = vsel %vm10246_vm13, %v1228_v25, 0.0  ;;  %v1530_v49 = vadd.f32 %v1528_v42, %v1524_v36  ;;  %v1691_v35 = vmul.f32 %v5968_v4, %v10668_v47 }
 0x1f2   :  { %v1236_v8 = vpop.permute.xlu1 %1235  ;;  %v1234_v52 = vpop.permute.xlu0 %1233  ;;  %v1692_v1 = vmul.f32 %v5962_v40, %v10668_v47  ;;  %v6162_v32 = vadd.f32 %v1636_v24, %v6038_v7  ;;  %v6165_v61 = vadd.f32 %v1631_v3, %v6040_v12  ;;  %v1232_v25 = vadd.f32 %v5743_v14, %v1227_v10 }
 0x1f3   :  { %v1238_v37 = vsel %vm1062_vm14, %v1236_v8, %v1234_v52  ;;  %v1237_v11 = vsel %vm1062_vm14, %v1234_v52, %v1236_v8  ;;  %v6173_v41 = vadd.f32 %v1635_v43, %v6047_v46  ;;  %v1231_v8 = vadd.f32 %v5748_v15, %v1229_v22  ;;  %v10670_v15 = vld [vmem:[#allocation57_spill] sm:$0xff] }
 0x1f4   :  { %v1239_v36 = vsel %vm10245_vm15, %v1238_v37, 0.0  ;;  %v1534_v12 = vadd.f32 %v1532_v60, %v1526_v57  ;;  %v1689_v3 = vadd.f32 %v1687_v9, %v1683_v56  ;;  %v1242_v47 = vadd.f32 %v1237_v11, %v1232_v25  ;;  %v10669_v37 = vld [vmem:[#allocation56_spill] sm:$0xff]  ;;  %v10672_v11 = vld [vmem:[#allocation62_spill] sm:$0xff]  ;;  %v10673_v25 = vld [vmem:[#allocation63_spill] sm:$0xff] }
 0x1f5   :  { %v6178_v14 = vadd.f32 %v1688_v29, %v1684_v50  ;;  %v6180_v10 = vadd.f32 %v1691_v35, %v1685_v18  ;;  %v1775_v55 = vmul.f32 %v5968_v4, %v10669_v37  ;;  %v1241_v5 = vadd.f32 %v1239_v36, %v1231_v8  ;;  %v10671_v29 = vld [vmem:[#allocation60_spill] sm:$0xff] }
 0x1f6   :  { %v1246_v31 = vpop.permute.xlu1 %1245  ;;  %v1244_v2 = vpop.permute.xlu0 %1243  ;;  %v1776_v22 = vmul.f32 %v5962_v40, %v10669_v37  ;;  %v6192_v50 = vadd.f32 %v1692_v1, %v1686_v39  ;;  %v1780_v18 = vmul.f32 %v5962_v40, %v10670_v15  ;;  %v1447_v43 = vmul.f32 %v6014_v6, %v10671_v29 }
 0x1f7   :  { %v1248_v63 = vsel %vm10324_vm9, %v1246_v31, %v1244_v2  ;;  %v1247_v57 = vsel %vm10324_vm9, %v1244_v2, %v1246_v31  ;;  %v1448_v35 = vmul.f32 %v6012_v58, %v10671_v29  ;;  %v1535_v2 = vmul.f32 %v6014_v6, %v10673_v25  ;;  %v10674_v31 = vld [vmem:[#allocation64_spill] sm:$0xff] }
 0x1f8   :  { %v1250_v7 = vsel %vm10336_vm11, %v1248_v63, 0.0  ;;  %v1779_v63 = vmul.f32 %v5968_v4, %v10670_v15  ;;  %v1451_v4 = vmul.f32 %v6014_v6, %v10672_v11  ;;  %v1452_v40 = vmul.f32 %v6012_v58, %v10672_v11 }
 0x1f9   :  { %v1252_v56 = vadd.f32 %v1250_v7, %v1242_v47  ;;  %v1539_v39 = vmul.f32 %v6014_v6, %v10674_v31  ;;  %v1251_v36 = vadd.f32 %v1247_v57, %v1241_v5  ;;  %v1777_v8 = vadd.f32 %v1775_v55, %v6098_v26 }
 0x1fa   :  { %v1256_v27 = vpop.permute.xlu1 %1255  ;;  %v1254_v19 = vpop.permute.xlu0 %1253  ;;  %v1778_v7 = vadd.f32 %v1776_v22, %v6102_v51  ;;  %v1540_v29 = vmul.f32 %v6012_v58, %v10674_v31  ;;  %v6229_v55 = vadd.f32 %v1447_v43, %v6110_v59  ;;  %v6232_v26 = vadd.f32 %v1448_v35, %v6118_v17  ;;  %v10677_v43 = vld [vmem:[#allocation66_spill] sm:$0xff] }
 0x1fb   :  { %v1258_v42 = vsel %vm10323_vm8, %v1256_v27, %v1254_v19  ;;  %v1257_v1 = vsel %vm10323_vm8, %v1254_v19, %v1256_v27  ;;  %v10675_v27 = vld [vmem:[#allocation65_spill] sm:$0xff]  ;;  %v6235_v51 = vadd.f32 %v1451_v4, %v6112_v20  ;;  %v6238_v22 = vadd.f32 %v1452_v40, %v6120_v23  ;;  %v10678_v40 = vld [vmem:[#allocation99_spill] sm:$0xff] }
 0x1fc   :  { %v1260_v46 = vsel %vm10326_vm10, %v1258_v42, 0.0  ;;  %v1536_v42 = vmul.f32 %v6012_v58, %v10673_v25  ;;  %v1695_v19 = vmul.f32 %v6014_v6, %v10675_v27  ;;  %v6226_v5 = vadd.f32 %v1257_v1, %v1251_v36 }
 0x1fd   :  { %v6206_v47 = vadd.f32 %v1260_v46, %v1252_v56  ;;  %v6221_v46 = vadd.f32 %v1779_v63, %v6106_v44  ;;  %v6224_v56 = vadd.f32 %v1780_v18, %v6116_v53  ;;  %v6241_v44 = vadd.f32 %v1535_v2, %v6128_v62  ;;  %v10676_v63 = vld [vmem:[#allocation88_spill] sm:$0xff] }
 0x1fe   :  { %v1269_v52 = vpop.permute.xlu1 %1268  ;;  %v1267_v24 = vpop.permute.xlu0 %1266  ;;  %v6244_v53 = vadd.f32 %v1539_v39, %v6130_v30  ;;  %v6250_v17 = vadd.f32 %v1536_v42, %v1530_v49  ;;  %v1696_v20 = vmul.f32 %v6012_v58, %v10675_v27  ;;  %v1699_v23 = vmul.f32 %v6014_v6, %v10677_v43 }
 0x1ff   :  { %v1640_v18 = vmul.f32 %v6206_v47, %v10676_v63  ;;  %v1271_v59 = vsel %vm1051_vm12, %v1269_v52, %v1267_v24  ;;  %v1270_v62 = vsel %vm1051_vm12, %v1267_v24, %v1269_v52  ;;  %v6260_v35 = vadd.f32 %v1540_v29, %v1534_v12 }
 0x200   :  { %v6262_v4 = vadd.f32 %v1695_v19, %v1689_v3  ;;  %v1644_v39 = vmul.f32 %v6206_v47, %v10678_v40  ;;  %v1639_v36 = vmul.f32 %v6226_v5, %v10676_v63  ;;  %v1643_v52 = vmul.f32 %v6226_v5, %v10678_v40 }
 0x201   :  { %v6265_v49 = vadd.f32 %v1640_v18, %v6143_v28  ;;  %v1272_v24 = vsel %vm10246_vm13, %v1271_v59, 0.0  ;;  %v1700_v3 = vmul.f32 %v6012_v58, %v10677_v43  ;;  %v10679_v28 = vld [vmem:[#allocation67_spill] sm:$0xff]  ;;  %v1275_v27 = vadd.f32 %v5769_v33, %v1270_v62 }
 0x202   :  { %v1279_v60 = vpop.permute.xlu1 %1278  ;;  %v1277_v9 = vpop.permute.xlu0 %1276  ;;  %v1783_v29 = vmul.f32 %v6014_v6, %v10679_v28  ;;  %v1784_v19 = vmul.f32 %v6012_v58, %v10679_v28  ;;  %v6286_v18 = vadd.f32 %v1644_v39, %v6162_v32  ;;  %v6289_v59 = vadd.f32 %v1639_v36, %v6165_v61  ;;  %v10680_v36 = vld [vmem:[#allocation68_spill] sm:$0xff] }
 0x203   :  { %v1281_v30 = vsel %vm1062_vm14, %v1279_v60, %v1277_v9  ;;  %v1280_v42 = vsel %vm1062_vm14, %v1277_v9, %v1279_v60  ;;  %v6297_v63 = vadd.f32 %v1643_v52, %v6173_v41  ;;  %v1274_v60 = vadd.f32 %v5774_v38, %v1272_v24 }
 0x204   :  { %v1282_v37 = vsel %vm10245_vm15, %v1281_v30, 0.0  ;;  %v1698_v61 = vadd.f32 %v1696_v20, %v6178_v14  ;;  %v1701_v33 = vadd.f32 %v1699_v23, %v6180_v10  ;;  %v1285_v62 = vadd.f32 %v1280_v42, %v1275_v27  ;;  %v10682_v20 = vld [vmem:[#allocation71_spill] sm:$0xff] }
 0x205   :  { %v6305_v30 = vadd.f32 %v1700_v3, %v6192_v50  ;;  %v1787_v28 = vmul.f32 %v6014_v6, %v10680_v36  ;;  %v1788_v41 = vmul.f32 %v6012_v58, %v10680_v36  ;;  %v1284_v38 = vadd.f32 %v1282_v37, %v1274_v60  ;;  %v10681_v50 = vld [vmem:[#allocation70_spill] sm:$0xff]  ;;  %v10684_v3 = vld [vmem:[#allocation73_spill] sm:$0xff] }
 0x206   :  { %v1289_v57 = vpop.permute.xlu1 %1288  ;;  %v1287_v25 = vpop.permute.xlu0 %1286  ;;  %v6313_v24 = vadd.f32 %v1783_v29, %v1777_v8  ;;  %v1455_v27 = vmul.f32 %v6108_v48, %v10681_v50  ;;  %v1459_v6 = vmul.f32 %v6108_v48, %v10682_v20  ;;  %v1456_v37 = vmul.f32 %v6082_v34, %v10681_v50 }
 0x207   :  { %v1291_v12 = vsel %vm10324_vm9, %v1289_v57, %v1287_v25  ;;  %v1290_v14 = vsel %vm10324_vm9, %v1287_v25, %v1289_v57  ;;  %v1460_v8 = vmul.f32 %v6082_v34, %v10682_v20  ;;  %v1547_v25 = vmul.f32 %v6108_v48, %v10684_v3  ;;  %v10686_v20 = vld [vmem:[#allocation75_spill] sm:$0xff] }
 0x208   :  { %v1293_v32 = vsel %vm10336_vm11, %v1291_v12, 0.0  ;;  %v6315_v12 = vadd.f32 %v1784_v19, %v1778_v7  ;;  %v10683_v7 = vld [vmem:[#allocation72_spill] sm:$0xff]  ;;  %v1548_v19 = vmul.f32 %v6082_v34, %v10684_v3  ;;  %v1294_v60 = vadd.f32 %v1290_v14, %v1284_v38 }
 0x209   :  { %v1295_v10 = vadd.f32 %v1293_v32, %v1285_v62  ;;  %v1544_v42 = vmul.f32 %v6082_v34, %v10683_v7  ;;  %v10685_v32 = vld [vmem:[#allocation74_spill] sm:$0xff]  ;;  %v1707_v36 = vmul.f32 %v6108_v48, %v10686_v20  ;;  %v6356_v3 = vadd.f32 %v1456_v37, %v6232_v26 }
 0x20a   :  { %v1299_v2 = vpop.permute.xlu1 %1298  ;;  %v1297_v1 = vpop.permute.xlu0 %1296  ;;  %v1703_v62 = vmul.f32 %v6108_v48, %v10685_v32  ;;  %v1704_v50 = vmul.f32 %v6082_v34, %v10685_v32  ;;  %v6359_v32 = vadd.f32 %v1460_v8, %v6238_v22 }
 0x20b   :  { %v1301_v40 = vsel %vm10323_vm8, %v1299_v2, %v1297_v1  ;;  %v1300_v57 = vsel %vm10323_vm8, %v1297_v1, %v1299_v2  ;;  %v6346_v2 = vadd.f32 %v1455_v27, %v6229_v55  ;;  %v6349_v1 = vadd.f32 %v1459_v6, %v6235_v51  ;;  %v10688_v6 = vld [vmem:[#allocation76_spill] sm:$0xff] }
 0x20c   :  { %v1303_v52 = vsel %vm10326_vm10, %v1301_v40, 0.0  ;;  %v1543_v40 = vmul.f32 %v6108_v48, %v10683_v7  ;;  %v6353_v38 = vadd.f32 %v1300_v57, %v1294_v60  ;;  %v6365_v51 = vadd.f32 %v1544_v42, %v6250_v17 }
 0x20d   :  { %v6333_v29 = vadd.f32 %v1303_v52, %v1295_v10  ;;  %v1789_v52 = vadd.f32 %v1787_v28, %v6221_v46  ;;  %v1790_v10 = vadd.f32 %v1788_v41, %v6224_v56  ;;  %v6368_v46 = vadd.f32 %v1547_v25, %v6244_v53  ;;  %v10687_v28 = vld [vmem:[#allocation98_spill] sm:$0xff] }
 0x20e   :  { %v1312_v9 = vpop.permute.xlu1 %1311  ;;  %v1310_v39 = vpop.permute.xlu0 %1309  ;;  %v6362_v55 = vadd.f32 %v1543_v40, %v6241_v44  ;;  %v6371_v56 = vadd.f32 %v1548_v19, %v6260_v35  ;;  %v6378_v22 = vadd.f32 %v1703_v62, %v6262_v4  ;;  %v6380_v44 = vadd.f32 %v1704_v50, %v1698_v61  ;;  %v10689_v61 = vld [vmem:[#allocation109_spill] sm:$0xff] }
 0x20f   :  { %v1648_v41 = vmul.f32 %v6333_v29, %v10687_v28  ;;  %v1314_v26 = vsel %vm1051_vm12, %v1312_v9, %v1310_v39  ;;  %v6382_v27 = vadd.f32 %v1707_v36, %v1701_v33  ;;  %v1313_v53 = vsel %vm1051_vm12, %v1310_v39, %v1312_v9 }
 0x210   :  { %v1708_v35 = vmul.f32 %v6082_v34, %v10686_v20  ;;  %v1791_v37 = vmul.f32 %v6108_v48, %v10688_v6  ;;  %v1652_v33 = vmul.f32 %v6333_v29, %v10689_v61  ;;  %v1647_v9 = vmul.f32 %v6353_v38, %v10687_v28  ;;  %v10694_v28 = vld [vmem:[#allocation83_spill] sm:$0xff] }
 0x211   :  { %v6393_v4 = vadd.f32 %v1648_v41, %v6265_v49  ;;  %v1651_v39 = vmul.f32 %v6353_v38, %v10689_v61  ;;  %v1315_v36 = vsel %vm10246_vm13, %v1314_v26, 0.0  ;;  %v1792_v25 = vmul.f32 %v6082_v34, %v10688_v6  ;;  %v10690_v49 = vld [vmem:[#allocation77_spill] sm:$0xff] }
 0x212   :  { %v1322_v23 = vpop.permute.xlu1 %1321  ;;  %v1320_v58 = vpop.permute.xlu0 %1319  ;;  %v1795_v57 = vmul.f32 %v6108_v48, %v10690_v49  ;;  %v1796_v19 = vmul.f32 %v6082_v34, %v10690_v49  ;;  %v6414_v60 = vadd.f32 %v1652_v33, %v6286_v18  ;;  %v6417_v62 = vadd.f32 %v1647_v9, %v6289_v59  ;;  %v10691_v33 = vld [vmem:[#allocation80_spill] sm:$0xff]  ;;  %v10692_v9 = vld [vmem:[#allocation81_spill] sm:$0xff] }
 0x213   :  { %v1324_v17 = vsel %vm1062_vm14, %v1322_v23, %v1320_v58  ;;  %v1323_v42 = vsel %vm1062_vm14, %v1320_v58, %v1322_v23  ;;  %v1318_v41 = vadd.f32 %v5807_v16, %v1313_v53  ;;  %v6425_v6 = vadd.f32 %v1651_v39, %v6297_v63 }
 0x214   :  { %v1325_v26 = vsel %vm10245_vm15, %v1324_v17, 0.0  ;;  %v1317_v23 = vadd.f32 %v5812_v0, %v1315_v36  ;;  %v1710_v59 = vadd.f32 %v1708_v35, %v6305_v30  ;;  %v1793_v16 = vadd.f32 %v1791_v37, %v6313_v24  ;;  %v10693_v36 = vld [vmem:[#allocation82_spill] sm:$0xff] }
 0x215   :  { %v1328_v53 = vadd.f32 %v1323_v42, %v1318_v41  ;;  %v1463_v17 = vmul.f32 %v6226_v5, %v10691_v33  ;;  %v1467_v61 = vmul.f32 %v6226_v5, %v10692_v9  ;;  %v1794_v63 = vadd.f32 %v1792_v25, %v6315_v12 }
 0x216   :  { %v1332_v14 = vpop.permute.xlu1 %1331  ;;  %v1330_v7 = vpop.permute.xlu0 %1329  ;;  %v1327_v39 = vadd.f32 %v1325_v26, %v1317_v23  ;;  %v1555_v30 = vmul.f32 %v6226_v5, %v10694_v28  ;;  %v1464_v37 = vmul.f32 %v6206_v47, %v10691_v33  ;;  %v1468_v12 = vmul.f32 %v6206_v47, %v10692_v9 }
 0x217   :  { %v1334_v50 = vsel %vm10324_vm9, %v1332_v14, %v1330_v7  ;;  %v1333_v24 = vsel %vm10324_vm9, %v1330_v7, %v1332_v14  ;;  %v1552_v41 = vmul.f32 %v6206_v47, %v10693_v36  ;;  %v1556_v26 = vmul.f32 %v6206_v47, %v10694_v28 }
 0x218   :  { %v1336_v34 = vsel %vm10336_vm11, %v1334_v50, 0.0  ;;  %v1551_v50 = vmul.f32 %v6226_v5, %v10693_v36  ;;  %v6455_v23 = vadd.f32 %v1796_v19, %v1790_v10  ;;  %v1337_v33 = vadd.f32 %v1333_v24, %v1327_v39  ;;  %v10695_v36 = vld [vmem:[#allocation84_spill] sm:$0xff]  ;;  %v10696_v10 = vld [vmem:[#allocation85_spill] sm:$0xff] }
 0x219   :  { %v1338_v35 = vadd.f32 %v1336_v34, %v1328_v53  ;;  %v6462_v34 = vadd.f32 %v1463_v17, %v6346_v2  ;;  %v6465_v53 = vadd.f32 %v1467_v61, %v6349_v1  ;;  %v1711_v9 = vmul.f32 %v6226_v5, %v10695_v36 }
 0x21a   :  { %v1342_v8 = vpop.permute.xlu1 %1341  ;;  %v1340_v40 = vpop.permute.xlu0 %1339  ;;  %v6478_v2 = vadd.f32 %v1551_v50, %v6362_v55  ;;  %v6481_v1 = vadd.f32 %v1555_v30, %v6368_v46  ;;  %v10697_v55 = vld [vmem:[#allocation86_spill] sm:$0xff]  ;;  %v10698_v50 = vld [vmem:[#allocation108_spill] sm:$0xff] }
 0x21b   :  { %v1344_v48 = vsel %vm10323_vm8, %v1342_v8, %v1340_v40  ;;  %v1343_v7 = vsel %vm10323_vm8, %v1340_v40, %v1342_v8  ;;  %v1466_v8 = vadd.f32 %v1464_v37, %v6356_v3  ;;  %v6475_v40 = vadd.f32 %v1468_v12, %v6359_v32 }
 0x21c   :  { %v1346_v0 = vsel %vm10326_vm10, %v1344_v48, 0.0  ;;  %v6453_v48 = vadd.f32 %v1795_v57, %v1789_v52  ;;  %v1712_v52 = vmul.f32 %v6206_v47, %v10695_v36  ;;  %v1715_v57 = vmul.f32 %v6226_v5, %v10696_v10 }
 0x21d   :  { %v6459_v14 = vadd.f32 %v1346_v0, %v1338_v35  ;;  %v6483_v61 = vadd.f32 %v1343_v7, %v1337_v33  ;;  %v6488_v0 = vadd.f32 %v1552_v41, %v6365_v51  ;;  %v6491_v3 = vadd.f32 %v1556_v26, %v6371_v56  ;;  %v10699_v35 = vld [vmem:[#allocation87_spill] sm:$0xff] }
 0x21e   :  { %v1355_v18 = vpop.permute.xlu1 %1354  ;;  %v1353_v58 = vpop.permute.xlu0 %1352  ;;  %v1716_v32 = vmul.f32 %v6206_v47, %v10696_v10  ;;  %v1799_v46 = vmul.f32 %v6226_v5, %v10697_v55  ;;  %v1800_v33 = vmul.f32 %v6206_v47, %v10697_v55  ;;  %v6502_v24 = vadd.f32 %v1711_v9, %v6378_v22  ;;  %v10700_v7 = vld [vmem:[#allocation119_spill] sm:$0xff] }
 0x21f   :  { %v1357_v19 = vsel %vm1051_vm12, %v1355_v18, %v1353_v58  ;;  %v1656_v30 = vmul.f32 %v6459_v14, %v10698_v50  ;;  %v6505_v51 = vadd.f32 %v1712_v52, %v6380_v44  ;;  %v6508_v56 = vadd.f32 %v1715_v57, %v6382_v27 }
 0x220   :  { %v1803_v37 = vmul.f32 %v6226_v5, %v10699_v35  ;;  %v1356_v12 = vsel %vm1051_vm12, %v1353_v58, %v1355_v18  ;;  %v1358_v41 = vsel %vm10246_vm13, %v1357_v19, 0.0  ;;  %v1804_v22 = vmul.f32 %v6206_v47, %v10699_v35  ;;  %v10705_v35 = vld [vmem:[#allocation150_spill] sm:$0xff] }
 0x221   :  { %v6521_v27 = vadd.f32 %v1656_v30, %v6393_v4  ;;  %v1660_v5 = vmul.f32 %v6459_v14, %v10700_v7  ;;  %v1655_v18 = vmul.f32 %v6483_v61, %v10698_v50  ;;  %v1659_v58 = vmul.f32 %v6483_v61, %v10700_v7 }
 0x222   :  { %v1365_v25 = vpop.permute.xlu1 %1364  ;;  %v1363_v42 = vpop.permute.xlu0 %1362  ;;  %v6531_v57 = vadd.f32 %v1716_v32, %v1710_v59  ;;  %v6533_v47 = vadd.f32 %v1799_v46, %v1793_v16  ;;  %v6535_v19 = vadd.f32 %v1800_v33, %v1794_v63  ;;  %v1360_v55 = vadd.f32 %v5854_v13, %v1358_v41  ;;  %v10702_v13 = vld [vmem:[#allocation91_spill] sm:$0xff]  ;;  %v10703_v41 = vld [vmem:[#allocation92_spill] sm:$0xff] }
 0x223   :  { %v1367_v26 = vsel %vm1062_vm14, %v1365_v25, %v1363_v42  ;;  %v1366_v4 = vsel %vm1062_vm14, %v1363_v42, %v1365_v25  ;;  %v6542_v50 = vadd.f32 %v1660_v5, %v6414_v60  ;;  %v6545_v7 = vadd.f32 %v1655_v18, %v6417_v62  ;;  %v10701_v60 = vld [vmem:[#allocation90_spill] sm:$0xff] }
 0x224   :  { %v1368_v30 = vsel %vm10245_vm15, %v1367_v26, 0.0  ;;  %v1361_v59 = vadd.f32 %v5849_v45, %v1356_v12  ;;  %v6552_v63 = vadd.f32 %v1659_v58, %v6425_v6  ;;  %v1471_v46 = vmul.f32 %v6353_v38, %v10701_v60 }
 0x225   :  { %v1472_v62 = vmul.f32 %v6333_v29, %v10701_v60  ;;  %v1475_v45 = vmul.f32 %v6353_v38, %v10702_v13  ;;  %v1370_v33 = vadd.f32 %v1368_v30, %v1360_v55  ;;  %v1559_v26 = vmul.f32 %v6353_v38, %v10703_v41 }
 0x226   :  { %v1375_v17 = vpop.permute.xlu1 %1374  ;;  %v1373_v39 = vpop.permute.xlu0 %1372  ;;  %v1371_v12 = vadd.f32 %v1366_v4, %v1361_v59  ;;  %v10704_v4 = vld [vmem:[#allocation93_spill] sm:$0xff]  ;;  %v6577_v59 = vadd.f32 %v1803_v37, %v6453_v48  ;;  %v6580_v60 = vadd.f32 %v1804_v22, %v6455_v23 }
 0x227   :  { %v1377_v52 = vsel %vm10324_vm9, %v1375_v17, %v1373_v39  ;;  %v1376_v5 = vsel %vm10324_vm9, %v1373_v39, %v1375_v17  ;;  %v1563_v30 = vmul.f32 %v6353_v38, %v10704_v4  ;;  %v1474_v36 = vadd.f32 %v1472_v62, %v1466_v8 }
 0x228   :  { %v1379_v25 = vsel %vm10336_vm11, %v1377_v52, 0.0  ;;  %v1476_v52 = vmul.f32 %v6333_v29, %v10702_v13  ;;  %v1477_v13 = vadd.f32 %v1475_v45, %v6465_v53 }
 0x229   :  { %v1381_v55 = vadd.f32 %v1379_v25, %v1371_v12  ;;  %v1380_v25 = vadd.f32 %v1376_v5, %v1370_v33  ;;  %v1565_v62 = vadd.f32 %v1563_v30, %v6481_v1 }
 0x22a   :  { %v1385_v44 = vpop.permute.xlu1 %1384  ;;  %v1383_v9 = vpop.permute.xlu0 %1382  ;;  %v1478_v22 = vadd.f32 %v1476_v52, %v6475_v40  ;;  %v1564_v40 = vmul.f32 %v6333_v29, %v10704_v4 }
 0x22b   :  { %v1387_v16 = vsel %vm10323_vm8, %v1385_v44, %v1383_v9  ;;  %v1386_v17 = vsel %vm10323_vm8, %v1383_v9, %v1385_v44  ;;  %v10706_v44 = vld [vmem:[#allocation100_spill] sm:$0xff] }
 0x22c   :  { %v1389_v18 = vsel %vm10326_vm10, %v1387_v16, 0.0  ;;  %v6597_v8 = vadd.f32 %v1386_v17, %v1380_v25  ;;  %v1479_v9 = vmul.f32 %v6483_v61, %v10706_v44  ;;  %v1480_v52 = vmul.f32 %v6459_v14, %v10706_v44 }
 0x22d   :  { %v6586_v12 = vadd.f32 %v1389_v18, %v1381_v55  ;;  %v10709_v18 = vld [vmem:[#allocation117_spill] sm:$0xff] }
 0x22e   :  { %v1398_v42 = vpop.permute.xlu1 %1397  ;;  %v1396_v32 = vpop.permute.xlu0 %1395  ;;  %v10710_v55 = vld [vmem:[#allocation101_spill] sm:$0xff]  ;;  %v1663_v44 = vmul.f32 %v6597_v8, %v10709_v18 }
 0x22f   :  { %v1400_v6 = vsel %vm1051_vm12, %v1398_v42, %v1396_v32  ;;  %v1399_v23 = vsel %vm1051_vm12, %v1396_v32, %v1398_v42  ;;  %v1483_v30 = vmul.f32 %v6483_v61, %v10710_v55 }
 0x230   :  { %v1401_v58 = vsel %vm10246_vm13, %v1400_v6, 0.0  ;;  %v1473_v6 = vadd.f32 %v1471_v46, %v6462_v34  ;;  %v1561_v34 = vadd.f32 %v1559_v26, %v6478_v2  ;;  %v10707_v2 = vld [vmem:[#allocation94_spill] sm:$0xff] }
 0x231   :  { %v1403_v10 = vadd.f32 %v10705_v35, %v1401_v58  ;;  %v1560_v35 = vmul.f32 %v6333_v29, %v10703_v41  ;;  %v6610_v45 = vmul.f32 %v6353_v38, %v10707_v2  ;;  %v1664_v58 = vmul.f32 %v6586_v12, %v10709_v18 }
 0x232   :  { %v1408_v39 = vpop.permute.xlu1 %1407  ;;  %v1406_v16 = vpop.permute.xlu0 %1405  ;;  %v6627_v17 = vmul.f32 %v6333_v29, %v10707_v2  ;;  %v1481_v25 = vadd.f32 %v1479_v9, %v1473_v6 }
 0x233   :  { %v1410_v48 = vsel %vm1062_vm14, %v1408_v39, %v1406_v16  ;;  %v1409_v46 = vsel %vm1062_vm14, %v1406_v16, %v1408_v39 }
 0x234   :  { %v1411_v37 = vsel %vm10245_vm15, %v1410_v48, 0.0  ;;  %v10711_v48 = vld [vmem:[#allocation110_spill] sm:$0xff] }
 0x235   :  { %v1413_v53 = vadd.f32 %v1411_v37, %v1403_v10  ;;  %v10708_v10 = vld [vmem:[#allocation149_spill] sm:$0xff]  ;;  %v1488_v9 = vmul.f32 %v6586_v12, %v10711_v48 }
 0x236   :  { %v1418_v42 = vpop.permute.xlu1 %1417  ;;  %v1416_v32 = vpop.permute.xlu0 %1415  ;;  %v1404_v33 = vadd.f32 %v10708_v10, %v1399_v23  ;;  %v1487_v23 = vmul.f32 %v6597_v8, %v10711_v48  ;;  %v10712_v10 = vld [vmem:[#allocation125_spill] sm:$0xff]  ;;  %v10714_v48 = vld [vmem:[#allocation111_spill] sm:$0xff] }
 0x237   :  { %v1419_v26 = vsel %vm10324_vm9, %v1416_v32, %v1418_v42  ;;  %v1420_v5 = vsel %vm10324_vm9, %v1418_v42, %v1416_v32  ;;  %v1666_v32 = vadd.f32 %v1664_v58, %v6521_v27  ;;  %v1667_v2 = vmul.f32 %v6597_v8, %v10712_v10 }
 0x238   :  { %v1422_v1 = vsel %vm10336_vm11, %v1420_v5, 0.0  ;;  %v1414_v39 = vadd.f32 %v1409_v46, %v1404_v33  ;;  %v1423_v16 = vadd.f32 %v1419_v26, %v1413_v53  ;;  %v1668_v5 = vmul.f32 %v6586_v12, %v10712_v10  ;;  %v10713_v10 = vld [vmem:[#allocation118_spill] sm:$0xff] }
 0x239   :  { %v1665_v26 = vadd.f32 %v1663_v44, %v6545_v7 }
 0x23a   :  { %v1428_v37 = vpop.permute.xlu1 %1427  ;;  %v1426_v42 = vpop.permute.xlu0 %1425  ;;  %v1424_v41 = vadd.f32 %v1422_v1, %v1414_v39  ;;  %v1670_v33 = vadd.f32 %v1668_v5, %v6542_v50  ;;  %v1482_v1 = vadd.f32 %v1480_v52, %v1474_v36  ;;  %v1484_v39 = vmul.f32 %v6459_v14, %v10710_v55  ;;  %v10717_v52 = vld [vmem:[#allocation120_spill] sm:$0xff] }
 0x23b   :  { %v1429_v6 = vsel %vm10323_vm8, %v1426_v42, %v1428_v37  ;;  %v1430_v53 = vsel %vm10323_vm8, %v1428_v37, %v1426_v42  ;;  %v1669_v37 = vadd.f32 %v1667_v2, %v6552_v63  ;;  %v1489_v42 = vadd.f32 %v1487_v23, %v1481_v25 }
 0x23c   :  { %v1432_v27 = vsel %vm10326_vm10, %v1430_v53, 0.0  ;;  %v6646_v46 = vadd.f32 %v1429_v6, %v1423_v16  ;;  %v1491_v16 = vmul.f32 %v6597_v8, %v10714_v48  ;;  %v10715_v6 = vld [vmem:[#allocation102_spill] sm:$0xff]  ;;  %v1490_v5 = vadd.f32 %v1488_v9, %v1482_v1  ;;  %v10718_v1 = vld [vmem:[#allocation112_spill] sm:$0xff] }
 0x23d   :  { %v6650_v58 = vadd.f32 %v1432_v27, %v1424_v41  ;;  %v1567_v50 = vmul.f32 %v6483_v61, %v10715_v6  ;;  %v1492_v36 = vmul.f32 %v6586_v12, %v10714_v48  ;;  %v10716_v41 = vld [vmem:[#allocation103_spill] sm:$0xff]  ;;  %v1485_v2 = vadd.f32 %v1483_v30, %v1477_v13 }
 0x23e   :  { %v1495_v18 = vmul.f32 %v6646_v46, %v10713_v10  ;;  %v1571_v63 = vmul.f32 %v6483_v61, %v10716_v41  ;;  %v1499_v25 = vmul.f32 %v6646_v46, %v10717_v52  ;;  %v1568_v23 = vmul.f32 %v6459_v14, %v10715_v6 }
 0x23f   :  { %v1496_v7 = vmul.f32 %v6650_v58, %v10713_v10  ;;  %v1486_v27 = vadd.f32 %v1484_v39, %v1478_v22  ;;  %v1500_v9 = vmul.f32 %v6650_v58, %v10717_v52  ;;  %v1575_v10 = vmul.f32 %v6597_v8, %v10718_v1 }
 0x240   :  { %v1497_v44 = vadd.f32 %v1495_v18, %v1489_v42  ;;  %v1493_v48 = vadd.f32 %v1491_v16, %v1485_v2  ;;  %v1569_v55 = vadd.f32 %v1567_v50, %v1561_v34  ;;  %v1562_v13 = vadd.f32 %v1560_v35, %v6488_v0  ;;  %v10719_v42 = vld [vmem:[#allocation121_spill] sm:$0xff]  ;;  %v10720_v34 = vld [vmem:[#allocation104_spill] sm:$0xff] }
 0x241   :  { %v1498_v53 = vadd.f32 %v1496_v7, %v1490_v5  ;;  %v1566_v18 = vadd.f32 %v1564_v40, %v6491_v3  ;;  %v1494_v30 = vadd.f32 %v1492_v36, %v1486_v27  ;;  %v1583_v22 = vmul.f32 %v6646_v46, %v10719_v42  ;;  %v10721_v50 = vld [vmem:[#allocation113_spill] sm:$0xff] }
 0x242   :  { %1503 = vrot.lane.b32.xlu0 %v1497_v44, %s3785_s10  ;;  %v1576_v39 = vmul.f32 %v6586_v12, %v10718_v1  ;;  %v1573_v5 = vadd.f32 %v1571_v63, %v1565_v62  ;;  %v1501_v7 = vadd.f32 %v1499_v25, %v1493_v48  ;;  %v1570_v52 = vadd.f32 %v1568_v23, %v1562_v13  ;;  %v10722_v44 = vld [vmem:[#allocation124_spill] sm:$0xff]  ;;  %v10723_v48 = vld [vmem:[#allocation123_spill] sm:$0xff]  ;;  %v10724_v23 = vld [vmem:[#allocation122_spill] sm:$0xff] }
 0x243   :  { %1505 = vrot.lane.b32.xlu1 %v1498_v53, %s3785_s10  ;;  %v1572_v16 = vmul.f32 %v6459_v14, %v10716_v41  ;;  %v1727_v0 = vmul.f32 %v6483_v61, %v10720_v34  ;;  %v1502_v35 = vadd.f32 %v1500_v9, %v1494_v30  ;;  %v1577_v3 = vadd.f32 %v1575_v10, %v1569_v55 }
 0x244   :  { %v1584_v40 = vmul.f32 %v6650_v58, %v10719_v42  ;;  %v1579_v36 = vmul.f32 %v6597_v8, %v10721_v50  ;;  %v1672_v62 = vmul.f32 %v6650_v58, %v10722_v44  ;;  %v1676_v63 = vmul.f32 %v6650_v58, %v10723_v48 }
 0x245   :  { %v1671_v2 = vmul.f32 %v6646_v46, %v10722_v44  ;;  %v1675_v55 = vmul.f32 %v6646_v46, %v10723_v48  ;;  %v1585_v10 = vadd.f32 %v1583_v22, %v1577_v3  ;;  %v1578_v25 = vadd.f32 %v1576_v39, %v1570_v52 }
 0x246   :  { %1513 = vrot.lane.b32.xlu0 %v1501_v7, %s3785_s10  ;;  %v1587_v53 = vmul.f32 %v6646_v46, %v10724_v23  ;;  %v1580_v27 = vmul.f32 %v6586_v12, %v10721_v50  ;;  %v6705_v9 = vadd.f32 %v1672_v62, %v1666_v32  ;;  %v6707_v13 = vadd.f32 %v1676_v63, %v1670_v33  ;;  %v10725_v33 = vld [vmem:[#allocation114_spill] sm:$0xff]  ;;  %v10728_v62 = vld [vmem:[#allocation105_spill] sm:$0xff] }
 0x247   :  { %1515 = vrot.lane.b32.xlu1 %v1502_v35, %s3785_s10  ;;  %v6709_v30 = vadd.f32 %v1671_v2, %v1665_v26  ;;  %v6711_v7 = vadd.f32 %v1675_v55, %v1669_v37  ;;  %v1586_v44 = vadd.f32 %v1584_v40, %v1578_v25  ;;  %v1574_v48 = vadd.f32 %v1572_v16, %v1566_v18  ;;  %v10726_v35 = vld [vmem:[#allocation95_spill] sm:$0xff]  ;;  %v10730_v25 = vld [vmem:[#allocation96_spill] sm:$0xff] }
 0x248   :  { %v1588_v22 = vmul.f32 %v6650_v58, %v10724_v23  ;;  %v1728_v52 = vmul.f32 %v6459_v14, %v10720_v34  ;;  %v1581_v39 = vadd.f32 %v1579_v36, %v1573_v5  ;;  %v1721_v32 = vadd.f32 %v6610_v45, %v6502_v24  ;;  %v10727_v45 = vld [vmem:[#allocation6_spill] sm:$0xff] }
 0x249   :  { %v1735_v26 = vmul.f32 %v6597_v8, %v10725_v33  ;;  %v1723_v37 = vmul.f32 %v6353_v38, %v10726_v35  ;;  %v1582_v18 = vadd.f32 %v1580_v27, %v1574_v48  ;;  %v1722_v16 = vadd.f32 %v6627_v17, %v6505_v51 }
 0x24a   :  { %1591 = vrot.lane.b32.xlu0 %v1585_v10, %s3786_s11  ;;  %v1736_v3 = vmul.f32 %v6586_v12, %v10725_v33  ;;  %v1724_v5 = vmul.f32 %v6333_v29, %v10726_v35  ;;  %v1589_v40 = vadd.f32 %v1587_v53, %v1581_v39  ;;  %v1729_v24 = vadd.f32 %v1727_v0, %v1721_v32  ;;  %v10729_v0 = vld [vmem:[#allocation115_spill] sm:$0xff] }
 0x24b   :  { %1593 = vrot.lane.b32.xlu1 %v1586_v44, %s3786_s11  ;;  %v1743_v36 = vmul.f32 %v6646_v46, %v10727_v45  ;;  %v1731_v63 = vmul.f32 %v6483_v61, %v10728_v62  ;;  %v1590_v2 = vadd.f32 %v1588_v22, %v1582_v18  ;;  %v1730_v44 = vadd.f32 %v1728_v52, %v1722_v16  ;;  %v10732_v18 = vld [vmem:[#allocation106_spill] sm:$0xff] }
 0x24c   :  { %v1744_v48 = vmul.f32 %v6650_v58, %v10727_v45  ;;  %v1732_v51 = vmul.f32 %v6459_v14, %v10728_v62  ;;  %v1737_v17 = vadd.f32 %v1735_v26, %v1729_v24  ;;  %v1725_v55 = vadd.f32 %v1723_v37, %v6508_v56  ;;  %v10731_v56 = vld [vmem:[#allocation129_spill] sm:$0xff]  ;;  %v10760_v45 = vld [vmem:[#allocation144_spill] sm:$0xff] }
 0x24d   :  { %v1739_v10 = vmul.f32 %v6597_v8, %v10729_v0  ;;  %v1807_v53 = vmul.f32 %v6353_v38, %v10730_v25  ;;  %v1738_v27 = vadd.f32 %v1736_v3, %v1730_v44  ;;  %v1726_v22 = vadd.f32 %v1724_v5, %v6531_v57  ;;  %v10734_v44 = vld [vmem:[#allocation97_spill] sm:$0xff] }
 0x24e   :  { %1601 = vrot.lane.b32.xlu0 %v1589_v40, %s3786_s11  ;;  %v1740_v52 = vmul.f32 %v6586_v12, %v10729_v0  ;;  %v1808_v39 = vmul.f32 %v6333_v29, %v10730_v25  ;;  %v1745_v32 = vadd.f32 %v1743_v36, %v1737_v17  ;;  %v1733_v26 = vadd.f32 %v1731_v63, %v1725_v55  ;;  %v10733_v63 = vld [vmem:[#allocation116_spill] sm:$0xff]  ;;  %v10756_v0 = vld [vmem:[#allocation126_spill] sm:$0xff] }
 0x24f   :  { %1603 = vrot.lane.b32.xlu1 %v1590_v2, %s3786_s11  ;;  %v1747_v37 = vmul.f32 %v6646_v46, %v10731_v56  ;;  %v1815_v16 = vmul.f32 %v6483_v61, %v10732_v18  ;;  %v1746_v40 = vadd.f32 %v1744_v48, %v1738_v27  ;;  %v1734_v24 = vadd.f32 %v1732_v51, %v1726_v22 }
 0x250   :  { %v1748_v3 = vmul.f32 %v6650_v58, %v10731_v56  ;;  %v1816_v57 = vmul.f32 %v6459_v14, %v10732_v18  ;;  %v1741_v5 = vadd.f32 %v1739_v10, %v1733_v26  ;;  %v1809_v36 = vadd.f32 %v1807_v53, %v6533_v47  ;;  %v10735_v47 = vld [vmem:[#allocation130_spill] sm:$0xff] }
 0x251   :  { %v1823_v2 = vmul.f32 %v6597_v8, %v10733_v63  ;;  %v1811_v17 = vmul.f32 %v6353_v38, %v10734_v44  ;;  %v1742_v48 = vadd.f32 %v1740_v52, %v1734_v24  ;;  %v1810_v51 = vadd.f32 %v1808_v39, %v6535_v19  ;;  %v10754_v56 = vld [vmem:[#allocation146_spill] sm:$0xff] }
 0x252   :  { %1751 = vrot.lane.b32.xlu0 %v1745_v32, %s3787_s16  ;;  %v1824_v55 = vmul.f32 %v6586_v12, %v10733_v63  ;;  %v1812_v27 = vmul.f32 %v6333_v29, %v10734_v44  ;;  %v1749_v10 = vadd.f32 %v1747_v37, %v1741_v5  ;;  %v1817_v22 = vadd.f32 %v1815_v16, %v1809_v36  ;;  %v10736_v32 = vld [vmem:[#allocation107_spill] sm:$0xff]  ;;  %v10738_v5 = vld [vmem:[#allocation132_spill] sm:$0xff] }
 0x253   :  { %1753 = vrot.lane.b32.xlu1 %v1746_v40, %s3787_s16  ;;  %v1831_v53 = vmul.f32 %v6646_v46, %v10735_v47  ;;  %v1819_v26 = vmul.f32 %v6483_v61, %v10736_v32  ;;  %v1750_v38 = vadd.f32 %v1748_v3, %v1742_v48  ;;  %v1818_v23 = vadd.f32 %v1816_v57, %v1810_v51  ;;  %v10737_v37 = vld [vmem:[#allocation131_spill] sm:$0xff]  ;;  %v6838_v51 = vld [vmem:[%s10578_s29 + $0x140] sm:$0xff] }
 0x254   :  { %v1832_v52 = vmul.f32 %v6650_v58, %v10735_v47  ;;  %v1820_v19 = vmul.f32 %v6459_v14, %v10736_v32  ;;  %v1825_v39 = vadd.f32 %v1823_v2, %v1817_v22  ;;  %v1813_v29 = vadd.f32 %v1811_v17, %v6577_v59  ;;  %v6825_v48 = vld [vmem:[%s10578_s29 + $0x138] sm:$0xff]  ;;  %v6890_v22 = vld [vmem:[%s10578_s29 + $0x160] sm:$0xff] }
 0x255   :  { %v1827_v16 = vmul.f32 %v6597_v8, %v10737_v37  ;;  %v1826_v40 = vadd.f32 %v1824_v55, %v1818_v23  ;;  %v1814_v61 = vadd.f32 %v1812_v27, %v6580_v60  ;;  %v1828_v24 = vmul.f32 %v6586_v12, %v10737_v37  ;;  %v6798_v12 = vld [vmem:[%s10578_s29 + $0x120] sm:$0xff]  ;;  %v6843_v55 = vld [vmem:[%s10578_s29 + $0x148] sm:$0xff]  ;;  %v6860_v27 = vld [vmem:[%s10578_s29 + $0x150] sm:$0xff]  ;;  %10739 = vst [vmem:[#allocation150_spill] sm:$0xff] %v6890_v22 }
 0x256   :  { %1761 = vrot.lane.b32.xlu0 %v1749_v10, %s3787_s16  ;;  %v1833_v3 = vadd.f32 %v1831_v53, %v1825_v39  ;;  %v1821_v57 = vadd.f32 %v1819_v26, %v1813_v29  ;;  %v1835_v14 = vmul.f32 %v6646_v46, %v10738_v5  ;;  %v1836_v59 = vmul.f32 %v6650_v58, %v10738_v5  ;;  %v6803_v46 = vld [vmem:[%s10578_s29 + $0x128] sm:$0xff]  ;;  %v6820_v58 = vld [vmem:[%s10578_s29 + $0x130] sm:$0xff]  ;;  %v6865_v10 = vld [vmem:[%s10578_s29 + $0x158] sm:$0xff] }
 0x257   :  { %1763 = vrot.lane.b32.xlu1 %v1750_v38, %s3787_s16  ;;  %v1834_v36 = vadd.f32 %v1832_v52, %v1826_v40  ;;  %v1822_v2 = vadd.f32 %v1820_v19, %v1814_v61  ;;  %v6895_v53 = vld [vmem:[%s10578_s29 + $0x168] sm:$0xff]  ;;  %v6916_v26 = vld [vmem:[%s10578_s29 + $0x170] sm:$0xff]  ;;  %v6921_v38 = vld [vmem:[%s10578_s29 + $0x178] sm:$0xff]  ;;  %v10785_v25 = vmov 0 }
 0x258   :  { %v1829_v8 = vadd.f32 %v1827_v16, %v1821_v57  ;;  %10740 = vst [vmem:[#allocation149_spill] sm:$0xff] %v6895_v53  ;;  %v10741_v52 = vld [vmem:[#allocation138_spill] sm:$0xff]  ;;  %v10742_v19 = vld [vmem:[#allocation137_spill] sm:$0xff] }
 0x259   :  { %v1830_v23 = vadd.f32 %v1828_v24, %v1822_v2  ;;  %v719_v39 = vsel %vm149_vm1, %v10742_v19, %v10741_v52  ;;  %v718_v29 = vsel %vm149_vm1, %v10741_v52, %v10742_v19  ;;  %v10743_v16 = vld [vmem:[#allocation134_spill] sm:$0xff]  ;;  %v10744_v40 = vld [vmem:[#allocation133_spill] sm:$0xff]  ;;  %v10749_v19 = vld [vmem:[#allocation135_spill] sm:$0xff] }
 0x25a   :  { %1839 = vrot.lane.b32.xlu0 %v1833_v3, %s3788_s12  ;;  %v1837_v60 = vadd.f32 %v1835_v14, %v1829_v8  ;;  %v613_v61 = vsel %vm138_vm0, %v10744_v40, %v10743_v16  ;;  %v612_v24 = vsel %vm138_vm0, %v10743_v16, %v10744_v40  ;;  %v10745_v3 = vld [vmem:[#allocation44_spill] sm:$0xff]  ;;  %v720_v57 = vsel %vm10244_vm4, %v719_v39, 0.0  ;;  %v10746_v14 = vld [vmem:[#allocation59_spill] sm:$0xff]  ;;  %v10755_v37 = vld [vmem:[#allocation145_spill] sm:$0xff] }
 0x25b   :  { %1841 = vrot.lane.b32.xlu1 %v1834_v36, %s3788_s12  ;;  %v1838_v17 = vadd.f32 %v1836_v59, %v1830_v23  ;;  %v721_v36 = vsel %vm10353_vm5, %v718_v29, 0.0  ;;  %v614_v2 = vsel %vm10243_vm2, %v613_v61, 0.0  ;;  %v615_v59 = vsel %vm10354_vm3, %v612_v24, 0.0  ;;  %v10747_v23 = vld [vmem:[#allocation139_spill] sm:$0xff]  ;;  %v10750_v39 = vld [vmem:[#allocation136_spill] sm:$0xff]  ;;  %v10751_v61 = vld [vmem:[#allocation141_spill] sm:$0xff] }
 0x25c   :  { %v722_v8 = vadd.f32 %v720_v57, %v614_v2  ;;  %v622_v29 = vsel %vm138_vm0, %v10750_v39, %v10749_v19  ;;  %v623_v16 = vsel %vm138_vm0, %v10749_v19, %v10750_v39  ;;  %v723_v40 = vadd.f32 %v721_v36, %v615_v59  ;;  %v10752_v24 = vld [vmem:[#allocation142_spill] sm:$0xff]  ;;  %v6990_v36 = vld [vmem:[%s10578_s29 + $0x180] sm:$0xff]  ;;  %v6999_v19 = vld [vmem:[%s10578_s29 + $0x188] sm:$0xff] }
 0x25d   :  { %v914_v57 = vsel %vm160_vm6, %v10752_v24, %v10751_v61  ;;  %v915_v2 = vsel %vm160_vm6, %v10751_v61, %v10752_v24  ;;  %v624_v39 = vsel %vm10243_vm2, %v623_v16, 0.0  ;;  %v625_v61 = vsel %vm10354_vm3, %v622_v29, 0.0  ;;  %v10753_v24 = vld [vmem:[#allocation5_spill] sm:$0xff] }
 0x25e   :  { %1849 = vrot.lane.b32.xlu0 %v1837_v60, %s3788_s12  ;;  %v10748_v60 = vld [vmem:[#allocation140_spill] sm:$0xff]  ;;  %v820_v5 = vadd.f32 %v10753_v24, %v722_v8  ;;  %v821_v50 = vadd.f32 %v10756_v0, %v723_v40  ;;  %vm10757_vm0 = vcmp.lt.s32.totalorder %v10745_v3, 15  ;;  %v1020_v29 = vsel %vm171_vm7, %v10754_v56, %v10755_v37  ;;  %v10759_v24 = vld [vmem:[#allocation143_spill] sm:$0xff] }
 0x25f   :  { %1851 = vrot.lane.b32.xlu1 %v1838_v17, %s3788_s12  ;;  %s3791_s12 = smov 111   ;;  %v728_v17 = vsel %vm149_vm1, %v10748_v60, %v10747_v23  ;;  %v729_v52 = vsel %vm149_vm1, %v10747_v23, %v10748_v60  ;;  %v916_v47 = vsel %vm10757_vm0, %v914_v57, 0.0  ;;  %vm10758_vm1 = vcmp.lt.s32.totalorder %v10746_v14, 15 }
 0x260   :  { %v730_v59 = vsel %vm10244_vm4, %v729_v52, 0.0  ;;  %v731_v23 = vsel %vm10353_vm5, %v728_v17, 0.0  ;;  %v1021_v52 = vsel %vm171_vm7, %v10755_v37, %v10754_v56  ;;  %v917_v63 = vsel %vm10758_vm1, %v915_v2, 0.0  ;;  %v7034_v56 = vld [vmem:[%s10578_s29 + $0x1b0] sm:$0xff] }
 0x261   :  { %v732_v8 = vadd.f32 %v730_v59, %v624_v39  ;;  %v733_v16 = vadd.f32 %v731_v23, %v625_v61  ;;  %v924_v0 = vsel %vm160_vm6, %v10760_v45, %v10759_v24  ;;  %v925_v40 = vsel %vm160_vm6, %v10759_v24, %v10760_v45  ;;  %v7043_v59 = vld [vmem:[%s10578_s29 + $0x1b8] sm:$0xff]  ;;  %v10763_v61 = vld [vmem:[#allocation148_spill] sm:$0xff] }
 0x262   :  { %1870 = vrot.lane.b32.xlu0 %v6798_v12, %s3789_s22  ;;  %vm10761_vm0 = vcmp.lt.s32.totalorder %v10746_v14, 14  ;;  %v918_v45 = vadd.f32 %v916_v47, %v820_v5  ;;  %v919_v23 = vadd.f32 %v917_v63, %v821_v50  ;;  %vm10762_vm6 = vcmp.lt.s32.totalorder %v10745_v3, 14  ;;  %v10764_v24 = vld [vmem:[#allocation147_spill] sm:$0xff] }
 0x263   :  { %1872 = vrot.lane.b32.xlu1 %v6803_v46, %s3789_s22  ;;  %v1023_v37 = vsel %vm10761_vm0, %v1021_v52, 0.0  ;;  %v1022_v39 = vsel %vm10762_vm6, %v1020_v29, 0.0  ;;  %v1031_v33 = vsel %vm171_vm7, %v10764_v24, %v10763_v61  ;;  %vm10765_vm1 = vcmp.lt.s32.totalorder %v10745_v3, 15  ;;  %v10767_v47 = vld [vmem:[#allocation127_spill] sm:$0xff]  ;;  %v10768_v29 = vld [vmem:[#allocation128_spill] sm:$0xff] }
 0x264   :  { %v926_v42 = vsel %vm10765_vm1, %v924_v0, 0.0  ;;  %vm10766_vm0 = vcmp.lt.s32.totalorder %v10746_v14, 15  ;;  %v1030_v50 = vsel %vm171_vm7, %v10763_v61, %v10764_v24  ;;  %v822_v5 = vadd.f32 %v10767_v47, %v732_v8  ;;  %v7072_v61 = vld [vmem:[%s10578_s29 + $0x1c0] sm:$0xff]  ;;  %vm7233_vm1 = vmand %vm10246_vm13, %vm10243_vm2 }
 0x265   :  { %v927_v1 = vsel %vm10766_vm0, %v925_v40, 0.0  ;;  %v823_v32 = vadd.f32 %v10768_v29, %v733_v16  ;;  %v1025_v0 = vadd.f32 %v1023_v37, %v919_v23  ;;  %vm10769_vm7 = vcmp.lt.s32.totalorder %v10746_v14, 14  ;;  %v7081_v37 = vld [vmem:[%s10578_s29 + $0x1c8] sm:$0xff]  ;;  %vm7249_vm0 = vmand %vm10245_vm15, %vm10244_vm4 }
 0x266   :  { %1881 = vrot.lane.b32.xlu0 %v6798_v12, %s3790_s4  ;;  %v1032_v24 = vsel %vm10762_vm6, %v1030_v50, 0.0  ;;  %v10786_v25 = vsel %vm7249_vm0, 4294967295, %v10785_v25  ;;  %vm10325_vm6 = vcmp.lt.s32.totalorder %v4103_v21, 94  ;;  %vm10788_vm2 = vcmp.lt.s32.totalorder %v10746_v14, 15 }
 0x267   :  { %1883 = vrot.lane.b32.xlu1 %v6803_v46, %s3790_s4  ;;  %v929_v23 = vadd.f32 %v927_v1, %v823_v32  ;;  %10787 = vst [vmem:[#allocation145_spill] sm:$0xff] %v10786_v25  ;;  %vm7307_vm4 = vmand %vm10336_vm11, %vm10788_vm2  ;;  %vm10793_vm2 = vcmp.lt.s32.totalorder %v10746_v14, 14 }
 0x26a   :  { %1892 = vrot.lane.b32.xlu0 %v6798_v12, %s3791_s12 }
 0x26b   :  { %1894 = vrot.lane.b32.xlu1 %v6803_v46, %s3791_s12 }
 0x26e   :  { %1917 = vrot.lane.b32.xlu0 %v6820_v58, %s3789_s22 }
 0x26f   :  { %1919 = vrot.lane.b32.xlu1 %v6825_v48, %s3789_s22 }
 0x272   :  { %1927 = vrot.lane.b32.xlu0 %v6820_v58, %s3790_s4 }
 0x273   :  { %1929 = vrot.lane.b32.xlu1 %v6825_v48, %s3790_s4 }
 0x276   :  { %1960 = vrot.lane.b32.xlu0 %v6838_v51, %s3789_s22 }
 0x277   :  { %1962 = vrot.lane.b32.xlu1 %v6843_v55, %s3789_s22 }
 0x27a   :  { %1937 = vrot.lane.b32.xlu0 %v6820_v58, %s3791_s12 }
 0x27b   :  { %1939 = vrot.lane.b32.xlu1 %v6825_v48, %s3791_s12 }
 0x27e   :  { %1970 = vrot.lane.b32.xlu0 %v6838_v51, %s3790_s4 }
 0x27f   :  { %1972 = vrot.lane.b32.xlu1 %v6843_v55, %s3790_s4 }
 0x282   :  { %2003 = vrot.lane.b32.xlu0 %v6860_v27, %s3789_s22 }
 0x283   :  { %2005 = vrot.lane.b32.xlu1 %v6865_v10, %s3789_s22 }
 0x286   :  { %1903 = vrot.lane.b32.xlu0 %v6798_v12, %s3792_s8 }
 0x287   :  { %1905 = vrot.lane.b32.xlu1 %v6803_v46, %s3792_s8 }
 0x28a   :  { %1947 = vrot.lane.b32.xlu0 %v6820_v58, %s3792_s8 }
 0x28b   :  { %1949 = vrot.lane.b32.xlu1 %v6825_v48, %s3792_s8 }
 0x28e   :  { %1980 = vrot.lane.b32.xlu0 %v6838_v51, %s3791_s12 }
 0x28f   :  { %1982 = vrot.lane.b32.xlu1 %v6843_v55, %s3791_s12 }
 0x292   :  { %2013 = vrot.lane.b32.xlu0 %v6860_v27, %s3790_s4 }
 0x293   :  { %2015 = vrot.lane.b32.xlu1 %v6865_v10, %s3790_s4 }
 0x296   :  { %2046 = vrot.lane.b32.xlu0 %v6890_v22, %s3789_s22 }
 0x297   :  { %2048 = vrot.lane.b32.xlu1 %v6895_v53, %s3789_s22 }
 0x29a   :  { %1990 = vrot.lane.b32.xlu0 %v6838_v51, %s3792_s8 }
 0x29b   :  { %1992 = vrot.lane.b32.xlu1 %v6843_v55, %s3792_s8 }
 0x29e   :  { %2023 = vrot.lane.b32.xlu0 %v6860_v27, %s3791_s12 }
 0x29f   :  { %2025 = vrot.lane.b32.xlu1 %v6865_v10, %s3791_s12 }
 0x2a2   :  { %2056 = vrot.lane.b32.xlu0 %v6890_v22, %s3790_s4 }
 0x2a3   :  { %2058 = vrot.lane.b32.xlu1 %v6895_v53, %s3790_s4 }
 0x2a6   :  { %2089 = vrot.lane.b32.xlu0 %v6916_v26, %s3789_s22 }
 0x2a7   :  { %2091 = vrot.lane.b32.xlu1 %v6921_v38, %s3789_s22 }
 0x2aa   :  { %2033 = vrot.lane.b32.xlu0 %v6860_v27, %s3792_s8 }
 0x2ab   :  { %2035 = vrot.lane.b32.xlu1 %v6865_v10, %s3792_s8 }
 0x2ae   :  { %2066 = vrot.lane.b32.xlu0 %v6890_v22, %s3791_s12 }
 0x2af   :  { %2068 = vrot.lane.b32.xlu1 %v6895_v53, %s3791_s12 }
 0x2b2   :  { %2099 = vrot.lane.b32.xlu0 %v6916_v26, %s3790_s4 }
 0x2b3   :  { %2101 = vrot.lane.b32.xlu1 %v6921_v38, %s3790_s4 }
 0x2b4   :  { %v1504_v60 = vpop.permute.xlu0 %1503 }
 0x2b5   :  { %v1506_v17 = vpop.permute.xlu1 %1505 }
 0x2b6   :  { %2132 = vrot.lane.b32.xlu0 %v6990_v36, %s3789_s22  ;;  %v1508_v57 = vsel %vm1051_vm12, %v1506_v17, %v1504_v60  ;;  %v1507_v63 = vsel %vm1051_vm12, %v1504_v60, %v1506_v17  ;;  %v1024_v60 = vadd.f32 %v1022_v39, %v918_v45  ;;  %v1033_v17 = vsel %vm10769_vm7, %v1031_v33, 0.0 }
 0x2b7   :  { %2134 = vrot.lane.b32.xlu1 %v6999_v19, %s3789_s22  ;;  %v1509_v40 = vsel %vm10246_vm13, %v1508_v57, 0.0  ;;  %v928_v57 = vadd.f32 %v926_v42, %v822_v5  ;;  %v1512_v47 = vadd.f32 %v1507_v63, %v1025_v0  ;;  %v1035_v42 = vadd.f32 %v1033_v17, %v929_v23 }
 0x2b8   :  { %v1514_v2 = vpop.permute.xlu0 %1513  ;;  %v1511_v45 = vadd.f32 %v1509_v40, %v1024_v60  ;;  %vm10338_vm7 = vcmp.lt.s32.totalorder %v4103_v21, 111 }
 0x2b9   :  { %v1516_v52 = vpop.permute.xlu1 %1515 }
 0x2ba   :  { %2693 = vrot.lane.b32.xlu0 %v7034_v56, %s3793_s2  ;;  %v1518_v8 = vsel %vm1051_vm12, %v1516_v52, %v1514_v2  ;;  %v1517_v33 = vsel %vm1051_vm12, %v1514_v2, %v1516_v52  ;;  %v1034_v2 = vadd.f32 %v1032_v24, %v928_v57  ;;  %vm10333_vm12 = vcmp.lt.s32.totalorder %v4103_v21, 34 }
 0x2bb   :  { %2695 = vrot.lane.b32.xlu1 %v7043_v59, %s3793_s2  ;;  %v1519_v1 = vsel %vm10246_vm13, %v1518_v8, 0.0  ;;  %v1522_v5 = vadd.f32 %v1517_v33, %v1035_v42  ;;  %v7147_v33 = vld [vmem:[%s10578_s29 + $0x198] sm:$0xff]  ;;  %vm10798_vm13 = vcmp.lt.s32.totalorder %v10745_v3, 14 }
 0x2bc   :  { %v1592_v16 = vpop.permute.xlu0 %1591  ;;  %v1521_v60 = vadd.f32 %v1519_v1, %v1034_v2  ;;  %v7170_v2 = vld [vmem:[%s10578_s29 + $0x1d0] sm:$0xff] }
 0x2bd   :  { %v1594_v29 = vpop.permute.xlu1 %1593 }
 0x2be   :  { %v1595_v39 = vsel %vm1062_vm14, %v1592_v16, %v1594_v29  ;;  %v1596_v62 = vsel %vm1062_vm14, %v1594_v29, %v1592_v16  ;;  %2740 = vrot.lane.b32.xlu0 %v7072_v61, %s3793_s2 }
 0x2bf   :  { %v1597_v32 = vsel %vm10245_vm15, %v1596_v62, 0.0  ;;  %v1600_v50 = vadd.f32 %v1595_v39, %v1512_v47  ;;  %2742 = vrot.lane.b32.xlu1 %v7081_v37, %s3793_s2 }
 0x2c0   :  { %v1599_v52 = vadd.f32 %v1597_v32, %v1511_v45  ;;  %v1602_v63 = vpop.permute.xlu0 %1601 }
 0x2c1   :  { %v7100_v0 = vadd.f32 %v6705_v9, %v1600_v50  ;;  %v1604_v40 = vpop.permute.xlu1 %1603 }
 0x2c2   :  { %v1605_v17 = vsel %vm1062_vm14, %v1602_v63, %v1604_v40  ;;  %v1606_v8 = vsel %vm1062_vm14, %v1604_v40, %v1602_v63  ;;  %2076 = vrot.lane.b32.xlu0 %v6890_v22, %s3792_s8  ;;  %v7109_v62 = vadd.f32 %v6709_v30, %v1599_v52  ;;  %v7175_v63 = vld [vmem:[%s10578_s29 + $0x1d8] sm:$0xff]  ;;  %vm10332_vm14 = vcmp.lt.s32.totalorder %v4103_v21, 17 }
 0x2c3   :  { %10770 = vst [vmem:[#allocation138_spill] sm:$0xff] %v7100_v0  ;;  %v1607_v16 = vsel %vm10245_vm15, %v1606_v8, 0.0  ;;  %v1610_v57 = vadd.f32 %v1605_v17, %v1522_v5  ;;  %2078 = vrot.lane.b32.xlu1 %v6895_v53, %s3792_s8  ;;  %v7272_v0 = vld [vmem:[%s10578_s29 + $0x1e8] sm:$0xff]  ;;  %vm10792_vm15 = vcmp.lt.s32.totalorder %v10745_v3, 15 }
 0x2c4   :  { %10771 = vst [vmem:[#allocation137_spill] sm:$0xff] %v7109_v62  ;;  %v1609_v9 = vadd.f32 %v1607_v16, %v1521_v60  ;;  %v7115_v23 = vpop.permute.xlu0 %1751 }
 0x2c5   :  { %10772 = vst [vmem:[#allocation134_spill] sm:$0xff] %v7115_v23  ;;  %v7118_v24 = vadd.f32 %v6707_v13, %v1610_v57  ;;  %v7120_v47 = vpop.permute.xlu1 %1753  ;;  %v7140_v13 = vld [vmem:[%s10578_s29 + $0x190] sm:$0xff] }
 0x2c6   :  { %10774 = vst [vmem:[#allocation59_spill] sm:$0xff] %v7120_v47  ;;  %2109 = vrot.lane.b32.xlu0 %v6916_v26, %s3791_s12  ;;  %v7125_v30 = vadd.f32 %v6711_v7, %v1609_v9  ;;  %v7207_v9 = vld [vmem:[%s10578_s29 + $0x1a8] sm:$0xff] }
 0x2c7   :  { %10773 = vst [vmem:[#allocation133_spill] sm:$0xff] %v7118_v24  ;;  %2111 = vrot.lane.b32.xlu1 %v6921_v38, %s3791_s12 }
 0x2c8   :  { %10775 = vst [vmem:[#allocation139_spill] sm:$0xff] %v7125_v30  ;;  %v7129_v29 = vpop.permute.xlu0 %1761 }
 0x2c9   :  { %10776 = vst [vmem:[#allocation140_spill] sm:$0xff] %v7129_v29  ;;  %v7131_v45 = vpop.permute.xlu1 %1763  ;;  %v10782_v29 = vmov 0 }
 0x2ca   :  { %10777 = vst [vmem:[#allocation135_spill] sm:$0xff] %v7131_v45  ;;  %2142 = vrot.lane.b32.xlu0 %v6990_v36, %s3790_s4  ;;  %v10783_v29 = vsel %vm7233_vm1, 4294967295, %v10782_v29 }
 0x2cb   :  { %2144 = vrot.lane.b32.xlu1 %v6999_v19, %s3790_s4  ;;  %10784 = vst [vmem:[#allocation146_spill] sm:$0xff] %v10783_v29  ;;  %v10970_v29 = vld [vmem:[#allocation105_spill] sm:$0xff] }
 0x2cc   :  { %v7142_v7 = vpop.permute.xlu0 %1839 }
 0x2cd   :  { %10778 = vst [vmem:[#allocation136_spill] sm:$0xff] %v7142_v7  ;;  %v7149_v39 = vpop.permute.xlu1 %1841 }
 0x2ce   :  { %10779 = vst [vmem:[#allocation141_spill] sm:$0xff] %v7149_v39  ;;  %2175 = vrot.lane.b32.xlu0 %v7140_v13, %s3789_s22 }
 0x2cf   :  { %2177 = vrot.lane.b32.xlu1 %v7147_v33, %s3789_s22 }
 0x2d0   :  { %v7155_v42 = vpop.permute.xlu0 %1849 }
 0x2d1   :  { %10780 = vst [vmem:[#allocation142_spill] sm:$0xff] %v7155_v42  ;;  %v7157_v1 = vpop.permute.xlu1 %1851 }
 0x2d2   :  { %10781 = vst [vmem:[#allocation5_spill] sm:$0xff] %v7157_v1  ;;  %2704 = vrot.lane.b32.xlu0 %v7034_v56, %s3794_s24 }
 0x2d3   :  { %2706 = vrot.lane.b32.xlu1 %v7043_v59, %s3794_s24 }
 0x2d4   :  { %v1871_v32 = vpop.permute.xlu0 %1870 }
 0x2d5   :  { %v1873_v50 = vpop.permute.xlu1 %1872 }
 0x2d6   :  { %2750 = vrot.lane.b32.xlu0 %v7072_v61, %s3794_s24  ;;  %v1876_v41 = vsel %vm10333_vm12, %v1873_v50, %v1871_v32  ;;  %v1875_v6 = vsel %vm10333_vm12, %v1871_v32, %v1873_v50  ;;  %v7265_v32 = vld [vmem:[%s10578_s29 + $0x1e0] sm:$0xff] }
 0x2d7   :  { %2752 = vrot.lane.b32.xlu1 %v7081_v37, %s3794_s24  ;;  %v1877_v35 = vsel %vm7233_vm1, %v1876_v41, 0.0  ;;  %v1878_v41 = vsel %vm10354_vm3, %v1875_v6, 0.0 }
 0x2d8   :  { %v1882_v52 = vpop.permute.xlu0 %1881  ;;  %v1879_v23 = vadd.f32 %v6798_v12, %v1877_v35  ;;  %v1880_v35 = vadd.f32 %v6803_v46, %v1878_v41 }
 0x2d9   :  { %v1884_v5 = vpop.permute.xlu1 %1883 }
 0x2da   :  { %2783 = vrot.lane.b32.xlu0 %v7170_v2, %s3793_s2  ;;  %v1887_v44 = vsel %vm10332_vm14, %v1884_v5, %v1882_v52  ;;  %v1886_v62 = vsel %vm10332_vm14, %v1882_v52, %v1884_v5 }
 0x2db   :  { %2785 = vrot.lane.b32.xlu1 %v7175_v63, %s3793_s2  ;;  %v1888_v39 = vsel %vm7249_vm0, %v1887_v44, 0.0  ;;  %v1889_v12 = vsel %vm10353_vm5, %v1886_v62, 0.0 }
 0x2dc   :  { %v7181_v40 = vpop.permute.xlu0 %1892  ;;  %v1890_v5 = vadd.f32 %v1888_v39, %v1879_v23 }
 0x2dd   :  { %v7183_v60 = vpop.permute.xlu1 %1894 }
 0x2de   :  { %2119 = vrot.lane.b32.xlu0 %v6916_v26, %s3792_s8  ;;  %v7200_v26 = vld [vmem:[%s10578_s29 + $0x1a0] sm:$0xff]  ;;  %v1897_v28 = vsel %vm10338_vm7, %v7181_v40, %v7183_v60  ;;  %v1898_v46 = vsel %vm10338_vm7, %v7183_v60, %v7181_v40 }
 0x2df   :  { %2121 = vrot.lane.b32.xlu1 %v6921_v38, %s3792_s8  ;;  %v1899_v62 = vsel %vm10792_vm15, %v1897_v28, 0.0  ;;  %vm7335_vm15 = vmand %vm10326_vm10, %vm10793_vm2  ;;  %vm10797_vm2 = vcmp.lt.s32.totalorder %v10745_v3, 15 }
 0x2e0   :  { %v1918_v17 = vpop.permute.xlu0 %1917 }
 0x2e1   :  { %v1920_v8 = vpop.permute.xlu1 %1919 }
 0x2e2   :  { %2152 = vrot.lane.b32.xlu0 %v6990_v36, %s3791_s12  ;;  %v1922_v50 = vsel %vm10333_vm12, %v1920_v8, %v1918_v17  ;;  %v1921_v7 = vsel %vm10333_vm12, %v1918_v17, %v1920_v8 }
 0x2e3   :  { %2154 = vrot.lane.b32.xlu1 %v6999_v19, %s3791_s12  ;;  %v1923_v6 = vsel %vm7233_vm1, %v1922_v50, 0.0  ;;  %v1924_v17 = vsel %vm10354_vm3, %v1921_v7, 0.0 }
 0x2e4   :  { %v1928_v16 = vpop.permute.xlu0 %1927  ;;  %v1926_v28 = vadd.f32 %v6825_v48, %v1924_v17  ;;  %v1891_v48 = vadd.f32 %v1889_v12, %v1880_v35 }
 0x2e5   :  { %v1930_v57 = vpop.permute.xlu1 %1929 }
 0x2e6   :  { %2185 = vrot.lane.b32.xlu0 %v7140_v13, %s3790_s4  ;;  %v1931_v44 = vsel %vm10332_vm14, %v1928_v16, %v1930_v57  ;;  %v1932_v52 = vsel %vm10332_vm14, %v1930_v57, %v1928_v16  ;;  %v10789_v16 = vmov 0  ;;  %v1925_v57 = vadd.f32 %v6820_v58, %v1923_v6 }
 0x2e7   :  { %2187 = vrot.lane.b32.xlu1 %v7147_v33, %s3790_s4  ;;  %v10790_v16 = vsel %vm7307_vm4, 4294967295, %v10789_v16  ;;  %v1933_v50 = vsel %vm7249_vm0, %v1932_v52, 0.0  ;;  %v1934_v41 = vsel %vm10353_vm5, %v1931_v44, 0.0  ;;  %v10794_v58 = vmov 0 }
 0x2e8   :  { %v7202_v38 = vpop.permute.xlu0 %1960  ;;  %10791 = vst [vmem:[#allocation126_spill] sm:$0xff] %v10790_v16  ;;  %v10795_v58 = vsel %vm7335_vm15, 4294967295, %v10794_v58  ;;  %v1935_v52 = vadd.f32 %v1933_v50, %v1925_v57  ;;  %v1936_v17 = vadd.f32 %v1934_v41, %v1926_v28 }
 0x2e9   :  { %v7209_v24 = vpop.permute.xlu1 %1962  ;;  %10796 = vst [vmem:[#allocation143_spill] sm:$0xff] %v10795_v58 }
 0x2ea   :  { %2218 = vrot.lane.b32.xlu0 %v7200_v26, %s3789_s22 }
 0x2eb   :  { %2220 = vrot.lane.b32.xlu1 %v7207_v9, %s3789_s22 }
 0x2ec   :  { %v1938_v30 = vpop.permute.xlu0 %1937 }
 0x2ed   :  { %v1940_v1 = vpop.permute.xlu1 %1939 }
 0x2ee   :  { %2715 = vrot.lane.b32.xlu0 %v7034_v56, %s3795_s20  ;;  %v1941_v23 = vsel %vm10338_vm7, %v1938_v30, %v1940_v1  ;;  %v1942_v7 = vsel %vm10338_vm7, %v1940_v1, %v1938_v30 }
 0x2ef   :  { %2717 = vrot.lane.b32.xlu1 %v7043_v59, %s3795_s20  ;;  %v1943_v6 = vsel %vm10797_vm2, %v1941_v23, 0.0  ;;  %v1944_v44 = vsel %vm7307_vm4, %v1942_v7, 0.0  ;;  %vm10799_vm2 = vmmov %vm10798_vm13  ;;  %v1964_v7 = vsel %vm10333_vm12, %v7202_v38, %v7209_v24 }
 0x2f0   :  { %v7219_v42 = vpop.permute.xlu0 %1970  ;;  %v1946_v23 = vadd.f32 %v1944_v44, %v1936_v17  ;;  %v10801_v44 = vld [vmem:[#allocation48_spill] sm:$0xff] }
 0x2f1   :  { %v7222_v45 = vpop.permute.xlu1 %1972 }
 0x2f2   :  { %2760 = vrot.lane.b32.xlu0 %v7072_v61, %s3795_s20 }
 0x2f3   :  { %2762 = vrot.lane.b32.xlu1 %v7081_v37, %s3795_s20 }
 0x2f4   :  { %v7239_v18 = vpop.permute.xlu0 %2003 }
 0x2f5   :  { %v7241_v34 = vpop.permute.xlu1 %2005 }
 0x2f6   :  { %2793 = vrot.lane.b32.xlu0 %v7170_v2, %s3794_s24 }
 0x2f7   :  { %2795 = vrot.lane.b32.xlu1 %v7175_v63, %s3794_s24 }
 0x2f8   :  { %v1904_v4 = vpop.permute.xlu0 %1903 }
 0x2f9   :  { %v1906_v47 = vpop.permute.xlu1 %1905 }
 0x2fa   :  { %2826 = vrot.lane.b32.xlu0 %v7265_v32, %s3793_s2  ;;  %v1908_v40 = vsel %vm10325_vm6, %v1904_v4, %v1906_v47  ;;  %v1909_v30 = vsel %vm10325_vm6, %v1906_v47, %v1904_v4  ;;  %v1901_v47 = vadd.f32 %v1899_v62, %v1890_v5  ;;  %v1945_v62 = vadd.f32 %v1943_v6, %v1935_v52 }
 0x2fb   :  { %2828 = vrot.lane.b32.xlu1 %v7272_v0, %s3793_s2  ;;  %v1911_v35 = vsel %vm7335_vm15, %v1909_v30, 0.0 }
 0x2fc   :  { %v1948_v8 = vpop.permute.xlu0 %1947 }
 0x2fd   :  { %v1950_v39 = vpop.permute.xlu1 %1949 }
 0x2fe   :  { %2162 = vrot.lane.b32.xlu0 %v6990_v36, %s3792_s8  ;;  %v1951_v1 = vsel %vm10325_vm6, %v1948_v8, %v1950_v39  ;;  %v1952_v60 = vsel %vm10325_vm6, %v1950_v39, %v1948_v8  ;;  %v1900_v36 = vsel %vm7307_vm4, %v1898_v46, 0.0  ;;  %v1910_v8 = vsel %vm10798_vm13, %v1908_v40, 0.0 }
 0x2ff   :  { %2164 = vrot.lane.b32.xlu1 %v6999_v19, %s3792_s8  ;;  %v1965_v19 = vsel %vm10333_vm12, %v7209_v24, %v7202_v38  ;;  %v1953_v12 = vsel %vm10799_vm2, %v1951_v1, 0.0  ;;  %v1954_v5 = vsel %vm7335_vm15, %v1952_v60, 0.0  ;;  %v1902_v46 = vadd.f32 %v1900_v36, %v1891_v48  ;;  %v10800_v48 = vld [vmem:[#allocation39_spill] sm:$0xff] }
 0x300   :  { %v1981_v4 = vpop.permute.xlu0 %1980  ;;  %v7373_v57 = vadd.f32 %v1910_v8, %v1901_v47  ;;  %v1966_v41 = vsel %vm7233_vm1, %v1965_v19, 0.0  ;;  %v7381_v28 = vadd.f32 %v1953_v12, %v1945_v62  ;;  %v7383_v30 = vadd.f32 %v1954_v5, %v1946_v23  ;;  %v10802_v8 = vld [vmem:[#allocation51_spill] sm:$0xff] }
 0x301   :  { %v1983_v39 = vpop.permute.xlu1 %1982  ;;  %v7379_v40 = vadd.f32 %v1911_v35, %v1902_v46  ;;  %v1967_v24 = vsel %vm10354_vm3, %v1964_v7, 0.0  ;;  %v1968_v38 = vadd.f32 %v6838_v51, %v1966_v41  ;;  %v10803_v35 = vld [vmem:[#allocation41_spill] sm:$0xff]  ;;  %v1974_v62 = vsel %vm10332_vm14, %v7219_v42, %v7222_v45 }
 0x302   :  { %2195 = vrot.lane.b32.xlu0 %v7140_v13, %s3791_s12  ;;  %v2260_v36 = vmul.f32 %v7373_v57, %v10800_v48  ;;  %v2266_v47 = vmul.f32 %v7381_v28, %v10801_v44  ;;  %v2267_v17 = vmul.f32 %v7383_v30, %v10801_v44  ;;  %v2354_v19 = vmul.f32 %v7381_v28, %v10802_v8 }
 0x303   :  { %2197 = vrot.lane.b32.xlu1 %v7147_v33, %s3791_s12  ;;  %v2261_v52 = vmul.f32 %v7379_v40, %v10800_v48  ;;  %v1969_v51 = vadd.f32 %v6843_v55, %v1967_v24  ;;  %v2348_v12 = vmul.f32 %v7373_v57, %v10803_v35  ;;  %v2349_v5 = vmul.f32 %v7379_v40, %v10803_v35 }
 0x304   :  { %v7375_v50 = vpop.permute.xlu0 %2013  ;;  %v2355_v46 = vmul.f32 %v7383_v30, %v10802_v8  ;;  %v1975_v55 = vsel %vm10332_vm14, %v7222_v45, %v7219_v42  ;;  %v1984_v7 = vsel %vm10338_vm7, %v1981_v4, %v1983_v39  ;;  %v1985_v41 = vsel %vm10338_vm7, %v1983_v39, %v1981_v4  ;;  %v10804_v45 = vld [vmem:[#allocation45_spill] sm:$0xff] }
 0x305   :  { %v7385_v1 = vpop.permute.xlu1 %2015  ;;  %v7429_v23 = vadd.f32 %v2267_v17, %v2261_v52  ;;  %v7435_v8 = vadd.f32 %v2354_v19, %v2348_v12  ;;  %v2508_v42 = vmul.f32 %v7373_v57, %v10804_v45  ;;  %v1976_v4 = vsel %vm7249_vm0, %v1975_v55, 0.0  ;;  %v10806_v17 = vld [vmem:[#allocation50_spill] sm:$0xff] }
 0x306   :  { %2228 = vrot.lane.b32.xlu0 %v7200_v26, %s3790_s4  ;;  %v7437_v35 = vadd.f32 %v2355_v46, %v2349_v5  ;;  %v1977_v39 = vsel %vm10353_vm5, %v1974_v62, 0.0  ;;  %v2596_v19 = vmul.f32 %v7373_v57, %v10806_v17  ;;  %v2602_v12 = vmul.f32 %v7381_v28, %v10670_v15 }
 0x307   :  { %2230 = vrot.lane.b32.xlu1 %v7207_v9, %s3790_s4  ;;  %vm10807_vm13 = vcmp.lt.s32.totalorder %v10745_v3, 15  ;;  %v1978_v54 = vadd.f32 %v1976_v4, %v1968_v38  ;;  %v1979_v53 = vadd.f32 %v1977_v39, %v1969_v51  ;;  %v2017_v4 = vsel %vm10332_vm14, %v7375_v50, %v7385_v1 }
 0x308   :  { %v7394_v60 = vpop.permute.xlu0 %2046  ;;  %v2604_v44 = vadd.f32 %v2602_v12, %v2596_v19  ;;  %v7519_v19 = vld [vmem:[%s10578_s29 + $0x1f8] sm:$0xff]  ;;  %v2603_v12 = vmul.f32 %v7383_v30, %v10670_v15 }
 0x309   :  { %v7398_v6 = vpop.permute.xlu1 %2048 }
 0x30a   :  { %2726 = vrot.lane.b32.xlu0 %v7034_v56, %s3796_s1  ;;  %v7427_v56 = vadd.f32 %v2266_v47, %v2260_v36  ;;  %v2509_v47 = vmul.f32 %v7379_v40, %v10804_v45  ;;  %v1987_v45 = vsel %vm7307_vm4, %v1985_v41, 0.0 }
 0x30b   :  { %2728 = vrot.lane.b32.xlu1 %v7043_v59, %s3796_s1  ;;  %v10805_v59 = vld [vmem:[#allocation55_spill] sm:$0xff]  ;;  %v1989_v51 = vadd.f32 %v1987_v45, %v1979_v53  ;;  %v7506_v53 = vld [vmem:[%s10578_s29 + $0x1f0] sm:$0xff] }
 0x30c   :  { %v1991_v24 = vpop.permute.xlu0 %1990  ;;  %v2514_v36 = vmul.f32 %v7381_v28, %v10805_v59  ;;  %v2515_v52 = vmul.f32 %v7383_v30, %v10805_v59 }
 0x30d   :  { %v1993_v48 = vpop.permute.xlu1 %1992 }
 0x30e   :  { %2770 = vrot.lane.b32.xlu0 %v7072_v61, %s3796_s1  ;;  %v1994_v5 = vsel %vm10325_vm6, %v1991_v24, %v1993_v48  ;;  %v1995_v46 = vsel %vm10325_vm6, %v1993_v48, %v1991_v24  ;;  %v2516_v55 = vadd.f32 %v2514_v36, %v2508_v42  ;;  %v2517_v62 = vadd.f32 %v2515_v52, %v2509_v47 }
 0x30f   :  { %2772 = vrot.lane.b32.xlu1 %v7081_v37, %s3796_s1  ;;  %v1986_v61 = vsel %vm10807_vm13, %v1984_v7, 0.0  ;;  %v2007_v48 = vsel %vm10333_vm12, %v7239_v18, %v7241_v34  ;;  %v2008_v37 = vsel %vm10333_vm12, %v7241_v34, %v7239_v18  ;;  %v1996_v7 = vsel %vm10799_vm2, %v1994_v5, 0.0 }
 0x310   :  { %v2024_v59 = vpop.permute.xlu0 %2023  ;;  %v1997_v41 = vsel %vm7335_vm15, %v1995_v46, 0.0  ;;  %v1988_v38 = vadd.f32 %v1986_v61, %v1978_v54  ;;  %v2009_v42 = vsel %vm7233_vm1, %v2008_v37, 0.0  ;;  %v2010_v34 = vsel %vm10354_vm3, %v2007_v48, 0.0 }
 0x311   :  { %v2026_v22 = vpop.permute.xlu1 %2025  ;;  %v7491_v36 = vadd.f32 %v1997_v41, %v1989_v51  ;;  %v2018_v54 = vsel %vm10332_vm14, %v7385_v1, %v7375_v50  ;;  %v2011_v45 = vadd.f32 %v6860_v27, %v2009_v42  ;;  %v2012_v52 = vadd.f32 %v6865_v10, %v2010_v34  ;;  %v10811_v42 = vld [vmem:[#allocation58_spill] sm:$0xff] }
 0x312   :  { %2803 = vrot.lane.b32.xlu0 %v7170_v2, %s3795_s20  ;;  %v7489_v18 = vadd.f32 %v1996_v7, %v1988_v38  ;;  %v2019_v46 = vsel %vm7249_vm0, %v2018_v54, 0.0  ;;  %v2597_v37 = vmul.f32 %v7379_v40, %v10806_v17  ;;  %v10810_v38 = vld [vmem:[#allocation53_spill] sm:$0xff]  ;;  %v2438_v34 = vmul.f32 %v7381_v28, %v10811_v42 }
 0x313   :  { %2805 = vrot.lane.b32.xlu1 %v7175_v63, %s3795_s20  ;;  %v2275_v10 = vmul.f32 %v7491_v36, %v10672_v11  ;;  %v2363_v1 = vmul.f32 %v7491_v36, %v10674_v31  ;;  %v2523_v48 = vmul.f32 %v7491_v36, %v10677_v43  ;;  %v2434_v51 = vmul.f32 %v7373_v57, %v10810_v38 }
 0x314   :  { %v7483_v24 = vpop.permute.xlu0 %2056  ;;  %v2274_v27 = vmul.f32 %v7489_v18, %v10672_v11  ;;  %v2362_v50 = vmul.f32 %v7489_v18, %v10674_v31  ;;  %v2522_v61 = vmul.f32 %v7489_v18, %v10677_v43  ;;  %v2027_v54 = vsel %vm10338_vm7, %v2024_v59, %v2026_v22 }
 0x315   :  { %v7493_v47 = vpop.permute.xlu1 %2058  ;;  %v2277_v41 = vadd.f32 %v2275_v10, %v7429_v23  ;;  %v2028_v43 = vsel %vm10338_vm7, %v2026_v22, %v2024_v59  ;;  %v2365_v15 = vadd.f32 %v2363_v1, %v7437_v35  ;;  %v2525_v23 = vadd.f32 %v2523_v48, %v2517_v62  ;;  %v10812_v10 = vld [vmem:[#allocation68_spill] sm:$0xff] }
 0x316   :  { %2836 = vrot.lane.b32.xlu0 %v7265_v32, %s3794_s24  ;;  %v2276_v7 = vadd.f32 %v2274_v27, %v7427_v56  ;;  %v2364_v11 = vadd.f32 %v2362_v50, %v7435_v8  ;;  %v2524_v27 = vadd.f32 %v2522_v61, %v2516_v55  ;;  %v2610_v17 = vmul.f32 %v7489_v18, %v10812_v10 }
 0x317   :  { %2838 = vrot.lane.b32.xlu1 %v7272_v0, %s3794_s24  ;;  %v2611_v22 = vmul.f32 %v7491_v36, %v10812_v10  ;;  %v2435_v8 = vmul.f32 %v7379_v40, %v10810_v38  ;;  %v2439_v35 = vmul.f32 %v7383_v30, %v10811_v42  ;;  %v2021_v48 = vadd.f32 %v2019_v46, %v2011_v45  ;;  %v10824_v42 = vld [vmem:[#allocation149_spill] sm:$0xff] }
 0x318   :  { %v7514_v39 = vpop.permute.xlu0 %2089  ;;  %v2612_v62 = vadd.f32 %v2610_v17, %v2604_v44 }
 0x319   :  { %10808 = vst [vmem:[#allocation144_spill] sm:$0xff] %v7514_v39  ;;  %v7523_v5 = vpop.permute.xlu1 %2091  ;;  %v2605_v39 = vadd.f32 %v2603_v12, %v2597_v37  ;;  %v2030_v12 = vsel %vm7307_vm4, %v2028_v43, 0.0  ;;  %v2441_v61 = vadd.f32 %v2439_v35, %v2435_v8  ;;  %v10815_v35 = vld [vmem:[#allocation69_spill] sm:$0xff] }
 0x31a   :  { %10809 = vst [vmem:[#allocation148_spill] sm:$0xff] %v7523_v5  ;;  %2869 = vrot.lane.b32.xlu0 %v7506_v53, %s3793_s2  ;;  %v2020_v5 = vsel %vm10353_vm5, %v2017_v4, 0.0  ;;  %v2029_v4 = vsel %vm10807_vm13, %v2027_v54, 0.0 }
 0x31b   :  { %2871 = vrot.lane.b32.xlu1 %v7519_v19, %s3793_s2  ;;  %v2613_v1 = vadd.f32 %v2611_v22, %v2605_v39  ;;  %v2022_v37 = vadd.f32 %v2020_v5, %v2012_v52  ;;  %v2031_v44 = vadd.f32 %v2029_v4, %v2021_v48 }
 0x31c   :  { %v2034_v31 = vpop.permute.xlu0 %2033 }
 0x31d   :  { %v2036_v56 = vpop.permute.xlu1 %2035  ;;  %v2032_v17 = vadd.f32 %v2030_v12, %v2022_v37 }
 0x31e   :  { %2205 = vrot.lane.b32.xlu0 %v7140_v13, %s3792_s8  ;;  %v2037_v59 = vsel %vm10325_vm6, %v2034_v31, %v2036_v56  ;;  %v2038_v55 = vsel %vm10325_vm6, %v2036_v56, %v2034_v31  ;;  %v2440_v13 = vadd.f32 %v2438_v34, %v2434_v51  ;;  %v10813_v51 = vld [vmem:[#allocation71_spill] sm:$0xff]  ;;  %v10814_v56 = vld [vmem:[#allocation73_spill] sm:$0xff] }
 0x31f   :  { %2207 = vrot.lane.b32.xlu1 %v7147_v33, %s3792_s8  ;;  %v2039_v31 = vsel %vm10799_vm2, %v2037_v59, 0.0  ;;  %v2040_v33 = vsel %vm7335_vm15, %v2038_v55, 0.0  ;;  %v2446_v59 = vmul.f32 %v7489_v18, %v10815_v35  ;;  %v2447_v55 = vmul.f32 %v7491_v36, %v10815_v35 }
 0x320   :  { %v7579_v50 = vpop.permute.xlu0 %2066  ;;  %v7593_v45 = vadd.f32 %v2039_v31, %v2031_v44  ;;  %v7595_v52 = vadd.f32 %v2040_v33, %v2032_v17 }
 0x321   :  { %v7581_v10 = vpop.permute.xlu1 %2068 }
 0x322   :  { %2238 = vrot.lane.b32.xlu0 %v7200_v26, %s3791_s12  ;;  %v2282_v34 = vmul.f32 %v7593_v45, %v10813_v51  ;;  %v2283_v54 = vmul.f32 %v7595_v52, %v10813_v51  ;;  %v2370_v22 = vmul.f32 %v7593_v45, %v10814_v56  ;;  %v2371_v8 = vmul.f32 %v7595_v52, %v10814_v56 }
 0x323   :  { %2240 = vrot.lane.b32.xlu1 %v7207_v9, %s3791_s12  ;;  %v2618_v56 = vmul.f32 %v7593_v45, %v10690_v49 }
 0x324   :  { %v7591_v43 = vpop.permute.xlu0 %2099  ;;  %v7627_v4 = vadd.f32 %v2282_v34, %v2276_v7  ;;  %v7629_v12 = vadd.f32 %v2283_v54, %v2277_v41  ;;  %v7633_v37 = vadd.f32 %v2370_v22, %v2364_v11  ;;  %v7635_v31 = vadd.f32 %v2371_v8, %v2365_v15  ;;  %v7673_v54 = vld [vmem:[%s10578_s29 + $0x208] sm:$0xff]  ;;  %v10818_v8 = vld [vmem:[#allocation54_spill] sm:$0xff] }
 0x325   :  { %v7597_v39 = vpop.permute.xlu1 %2101  ;;  %v2619_v7 = vmul.f32 %v7595_v52, %v10690_v49  ;;  %v2448_v41 = vadd.f32 %v2446_v59, %v2440_v13  ;;  %v2449_v11 = vadd.f32 %v2447_v55, %v2441_v61  ;;  %v2050_v15 = vsel %vm10333_vm12, %v7394_v60, %v7398_v6  ;;  %v10821_v55 = vld [vmem:[#allocation79_spill] sm:$0xff] }
 0x326   :  { %2813 = vrot.lane.b32.xlu0 %v7170_v2, %s3796_s1  ;;  %v2530_v2 = vmul.f32 %v7593_v45, %v10686_v20  ;;  %v7664_v13 = vadd.f32 %v2618_v56, %v2612_v62  ;;  %v2437_v62 = vmul.f32 %v7379_v40, %v10818_v8  ;;  %v10820_v56 = vld [vmem:[#allocation61_spill] sm:$0xff]  ;;  %v2451_v51 = vmul.f32 %v7491_v36, %v10821_v55 }
 0x327   :  { %2815 = vrot.lane.b32.xlu1 %v7175_v63, %s3796_s1  ;;  %v2531_v63 = vmul.f32 %v7595_v52, %v10686_v20  ;;  %v7666_v61 = vadd.f32 %v2619_v7, %v2613_v1  ;;  %v2443_v59 = vmul.f32 %v7383_v30, %v10820_v56  ;;  %v2450_v7 = vmul.f32 %v7489_v18, %v10821_v55 }
 0x328   :  { %v7603_v5 = vpop.permute.xlu0 %2132  ;;  %v7639_v44 = vadd.f32 %v2530_v2, %v2524_v27  ;;  %v2051_v27 = vsel %vm10333_vm12, %v7398_v6, %v7394_v60  ;;  %v10817_v60 = vld [vmem:[#allocation78_spill] sm:$0xff]  ;;  %v2436_v2 = vmul.f32 %v7373_v57, %v10818_v8  ;;  %v2053_v8 = vsel %vm10354_vm3, %v2050_v15, 0.0 }
 0x329   :  { %v7605_v46 = vpop.permute.xlu1 %2134  ;;  %v7641_v17 = vadd.f32 %v2531_v63, %v2525_v23  ;;  %v7662_v23 = vld [vmem:[%s10578_s29 + $0x200] sm:$0xff]  ;;  %v2454_v6 = vmul.f32 %v7593_v45, %v10817_v60  ;;  %v2455_v22 = vmul.f32 %v7595_v52, %v10817_v60  ;;  %v2442_v63 = vmul.f32 %v7381_v28, %v10820_v56 }
 0x32a   :  { %2846 = vrot.lane.b32.xlu0 %v7265_v32, %s3795_s20  ;;  %v2052_v60 = vsel %vm7233_vm1, %v2051_v27, 0.0  ;;  %v2060_v56 = vsel %vm10332_vm14, %v7483_v24, %v7493_v47  ;;  %v2061_v27 = vsel %vm10332_vm14, %v7493_v47, %v7483_v24  ;;  %v2445_v55 = vadd.f32 %v2443_v59, %v2437_v62 }
 0x32b   :  { %2848 = vrot.lane.b32.xlu1 %v7272_v0, %s3795_s20  ;;  %v7699_v35 = vadd.f32 %v2454_v6, %v2448_v41  ;;  %v7701_v49 = vadd.f32 %v2455_v22, %v2449_v11  ;;  %v2444_v15 = vadd.f32 %v2442_v63, %v2436_v2  ;;  %v10822_v41 = vld [vmem:[#allocation89_spill] sm:$0xff]  ;;  %v2070_v22 = vsel %vm10338_vm7, %v7579_v50, %v7581_v10  ;;  %v10823_v63 = vld [vmem:[#allocation150_spill] sm:$0xff] }
 0x32c   :  { %v7631_v48 = vpop.permute.xlu0 %2693  ;;  %v2458_v11 = vmul.f32 %v7593_v45, %v10822_v41  ;;  %v2459_v6 = vmul.f32 %v7595_v52, %v10822_v41  ;;  %v2071_v24 = vsel %vm10338_vm7, %v7581_v10, %v7579_v50  ;;  %v2453_v62 = vadd.f32 %v2451_v51, %v2445_v55 }
 0x32d   :  { %v7637_v33 = vpop.permute.xlu1 %2695  ;;  %v2452_v2 = vadd.f32 %v2450_v7, %v2444_v15  ;;  %v2054_v59 = vadd.f32 %v10823_v63, %v2052_v60  ;;  %v2055_v38 = vadd.f32 %v10824_v42, %v2053_v8  ;;  %v2062_v41 = vsel %vm7249_vm0, %v2061_v27, 0.0 }
 0x32e   :  { %2879 = vrot.lane.b32.xlu0 %v7506_v53, %s3794_s24  ;;  %v2461_v42 = vadd.f32 %v2459_v6, %v2453_v62  ;;  %v2072_v51 = vsel %vm10807_vm13, %v2070_v22, 0.0  ;;  %v2073_v60 = vsel %vm7307_vm4, %v2071_v24, 0.0  ;;  %v10829_v22 = vld [vmem:[#allocation83_spill] sm:$0xff] }
 0x32f   :  { %2881 = vrot.lane.b32.xlu1 %v7519_v19, %s3794_s24  ;;  %v2460_v50 = vadd.f32 %v2458_v11, %v2452_v2  ;;  %v10828_v11 = vld [vmem:[#allocation81_spill] sm:$0xff] }
 0x330   :  { %v7668_v34 = vpop.permute.xlu0 %2740  ;;  %v10830_v2 = vld [vmem:[#allocation85_spill] sm:$0xff] }
 0x331   :  { %10816 = vst [vmem:[#allocation147_spill] sm:$0xff] %v7668_v34  ;;  %v7683_v1 = vpop.permute.xlu1 %2742  ;;  %v2063_v34 = vsel %vm10353_vm5, %v2060_v56, 0.0 }
 0x332   :  { %10819 = vst [vmem:[#allocation127_spill] sm:$0xff] %v7683_v1  ;;  %2912 = vrot.lane.b32.xlu0 %v7662_v23, %s3793_s2  ;;  %v2065_v56 = vadd.f32 %v2063_v34, %v2055_v38 }
 0x333   :  { %2914 = vrot.lane.b32.xlu1 %v7673_v54, %s3793_s2 }
 0x334   :  { %v2077_v20 = vpop.permute.xlu0 %2076  ;;  %v2075_v27 = vadd.f32 %v2073_v60, %v2065_v56 }
 0x335   :  { %v2079_v47 = vpop.permute.xlu1 %2078 }
 0x336   :  { %2248 = vrot.lane.b32.xlu0 %v7200_v26, %s3792_s8  ;;  %v2080_v1 = vsel %vm10325_vm6, %v2077_v20, %v2079_v47  ;;  %v2081_v10 = vsel %vm10325_vm6, %v2079_v47, %v2077_v20  ;;  %v2064_v26 = vadd.f32 %v2062_v41, %v2054_v59  ;;  %v7790_v59 = vld [vmem:[%s10578_s29 + $0x210] sm:$0xff] }
 0x337   :  { %2250 = vrot.lane.b32.xlu1 %v7207_v9, %s3792_s8  ;;  %v2082_v20 = vsel %vm10799_vm2, %v2080_v1, 0.0  ;;  %v2083_v9 = vsel %vm7335_vm15, %v2081_v10, 0.0 }
 0x338   :  { %v7743_v8 = vpop.permute.xlu0 %2109  ;;  %v2074_v7 = vadd.f32 %v2072_v51, %v2064_v26  ;;  %v7759_v38 = vadd.f32 %v2083_v9, %v2075_v27  ;;  %v7803_v26 = vld [vmem:[%s10578_s29 + $0x218] sm:$0xff] }
 0x339   :  { %v7745_v55 = vpop.permute.xlu1 %2111 }
 0x33a   :  { %2856 = vrot.lane.b32.xlu0 %v7265_v32, %s3796_s1  ;;  %v7757_v41 = vadd.f32 %v2082_v20, %v2074_v7  ;;  %v2291_v6 = vmul.f32 %v7759_v38, %v10828_v11  ;;  %v2379_v47 = vmul.f32 %v7759_v38, %v10829_v22  ;;  %v2539_v63 = vmul.f32 %v7759_v38, %v10830_v2  ;;  %v10833_v7 = vld [vmem:[#allocation87_spill] sm:$0xff] }
 0x33b   :  { %2858 = vrot.lane.b32.xlu1 %v7272_v0, %s3796_s1 }
 0x33c   :  { %v7755_v15 = vpop.permute.xlu0 %2142  ;;  %v2290_v0 = vmul.f32 %v7757_v41, %v10828_v11  ;;  %v2378_v24 = vmul.f32 %v7757_v41, %v10829_v22  ;;  %v2538_v62 = vmul.f32 %v7757_v41, %v10830_v2  ;;  %v7796_v51 = vadd.f32 %v2291_v6, %v7629_v12  ;;  %v10837_v22 = vld [vmem:[#allocation59_spill] sm:$0xff] }
 0x33d   :  { %10825 = vst [vmem:[#allocation128_spill] sm:$0xff] %v7755_v15  ;;  %v7761_v34 = vpop.permute.xlu1 %2144  ;;  %v7809_v20 = vadd.f32 %v2379_v47, %v7635_v31  ;;  %v7817_v12 = vadd.f32 %v2539_v63, %v7641_v17  ;;  %v2626_v27 = vmul.f32 %v7757_v41, %v10833_v7  ;;  %v10836_v63 = vld [vmem:[#allocation134_spill] sm:$0xff] }
 0x33e   :  { %2889 = vrot.lane.b32.xlu0 %v7506_v53, %s3795_s20  ;;  %v7793_v10 = vadd.f32 %v2290_v0, %v7627_v4  ;;  %v7806_v56 = vadd.f32 %v2378_v24, %v7633_v37  ;;  %v7814_v4 = vadd.f32 %v2538_v62, %v7639_v44  ;;  %v2627_v0 = vmul.f32 %v7759_v38, %v10833_v7  ;;  %v10834_v37 = vld [vmem:[#allocation88_spill] sm:$0xff] }
 0x33f   :  { %2891 = vrot.lane.b32.xlu1 %v7519_v19, %s3795_s20  ;;  %v2462_v31 = vmul.f32 %v7757_v41, %v10834_v37  ;;  %v2463_v6 = vmul.f32 %v7759_v38, %v10834_v37  ;;  %v7832_v44 = vadd.f32 %v2626_v27, %v7664_v13  ;;  %v1756_v11 = vsel %vm10324_vm9, %v10837_v22, %v10836_v63  ;;  %v10839_v13 = vld [vmem:[#allocation99_spill] sm:$0xff] }
 0x340   :  { %v7767_v32 = vpop.permute.xlu0 %2175  ;;  %v7835_v17 = vadd.f32 %v2627_v0, %v7666_v61  ;;  %v2466_v27 = vmul.f32 %v7757_v41, %v10839_v13  ;;  %v2467_v61 = vmul.f32 %v7759_v38, %v10839_v13  ;;  %v10841_v0 = vld [vmem:[#allocation141_spill] sm:$0xff]  ;;  %v1755_v13 = vsel %vm10324_vm9, %v10836_v63, %v10837_v22 }
 0x341   :  { %10826 = vst [vmem:[#allocation150_spill] sm:$0xff] %v7767_v32  ;;  %v7769_v1 = vpop.permute.xlu1 %2177  ;;  %v7840_v47 = vadd.f32 %v2462_v31, %v7699_v35  ;;  %v7843_v62 = vadd.f32 %v2463_v6, %v7701_v49  ;;  %v10840_v35 = vld [vmem:[#allocation136_spill] sm:$0xff]  ;;  %v10847_v22 = vld [vmem:[#allocation137_spill] sm:$0xff]  ;;  %vm10889_vm9 = vcmp.ge.s32.totalorder %v4103_v21, 32 }
 0x342   :  { %10827 = vst [vmem:[#allocation149_spill] sm:$0xff] %v7769_v1  ;;  %2922 = vrot.lane.b32.xlu0 %v7662_v23, %s3794_s24  ;;  %v1844_v49 = vsel %vm10323_vm8, %v10841_v0, %v10840_v35  ;;  %v7863_v31 = vadd.f32 %v2466_v27, %v2460_v50  ;;  %v7865_v6 = vadd.f32 %v2467_v61, %v2461_v42  ;;  %v10848_v27 = vld [vmem:[#allocation138_spill] sm:$0xff] }
 0x343   :  { %2924 = vrot.lane.b32.xlu1 %v7673_v54, %s3794_s24  ;;  %v1843_v42 = vsel %vm10323_vm8, %v10840_v35, %v10841_v0  ;;  %v1759_v63 = vadd.f32 %v1755_v13, %v10847_v22  ;;  %v2113_v22 = vsel %vm10338_vm7, %v7743_v8, %v7745_v55  ;;  %vm10888_vm8 = vcmp.lt.s32.totalorder %v10745_v3, 14 }
 0x344   :  { %v7798_v60 = vpop.permute.xlu0 %2704 }
 0x345   :  { %10831 = vst [vmem:[#allocation151_spill] sm:$0xff] %v7798_v60  ;;  %v7811_v9 = vpop.permute.xlu1 %2706 }
 0x346   :  { %10832 = vst [vmem:[#allocation152_spill] sm:$0xff] %v7811_v9  ;;  %2955 = vrot.lane.b32.xlu0 %v7790_v59, %s3793_s2 }
 0x347   :  { %2957 = vrot.lane.b32.xlu1 %v7803_v26, %s3793_s2 }
 0x348   :  { %v7837_v24 = vpop.permute.xlu0 %2750 }
 0x349   :  { %10835 = vst [vmem:[#allocation153_spill] sm:$0xff] %v7837_v24  ;;  %v7849_v37 = vpop.permute.xlu1 %2752  ;;  %v10844_v24 = vld [vmem:[#allocation148_spill] sm:$0xff] }
 0x34a   :  { %10838 = vst [vmem:[#allocation134_spill] sm:$0xff] %v7849_v37  ;;  %2899 = vrot.lane.b32.xlu0 %v7506_v53, %s3796_s1  ;;  %v1758_v53 = vsel %vm10336_vm11, %v1756_v11, 0.0  ;;  %v10845_v37 = vld [vmem:[#allocation144_spill] sm:$0xff]  ;;  %v1846_v11 = vsel %vm10326_vm10, %v1844_v49, 0.0  ;;  %v7909_v49 = vadd.f32 %v1843_v42, %v1759_v63  ;;  %v10851_v42 = vld [vmem:[#allocation38_spill] sm:$0xff]  ;;  %vm10340_vm10 = vcmp.lt.s32.totalorder %v4103_v21, 113 }
 0x34b   :  { %2901 = vrot.lane.b32.xlu1 %v7519_v19, %s3796_s1  ;;  %v2093_v60 = vsel %vm10333_vm12, %v10845_v37, %v10844_v24  ;;  %v2094_v19 = vsel %vm10333_vm12, %v10844_v24, %v10845_v37  ;;  %v1760_v61 = vadd.f32 %v1758_v53, %v10848_v27  ;;  %v2103_v37 = vsel %vm10332_vm14, %v7591_v43, %v7597_v39  ;;  %v3741_v27 = vld [vmem:[%s10578_s29 + $0x178] sm:$0xff] }
 0x34c   :  { %v7873_v2 = vpop.permute.xlu0 %2783  ;;  %v2104_v24 = vsel %vm10332_vm14, %v7597_v39, %v7591_v43  ;;  %v2095_v35 = vsel %vm7233_vm1, %v2094_v19, 0.0  ;;  %v2096_v13 = vsel %vm10354_vm3, %v2093_v60, 0.0  ;;  %10849 = vst [vmem:[#allocation141_spill] sm:$0xff] %v7909_v49  ;;  %v2114_v43 = vsel %vm10338_vm7, %v7745_v55, %v7743_v8  ;;  %v3740_v8 = vld [vmem:[%s10578_s29 + $0x170] sm:$0xff] }
 0x34d   :  { %10843 = vst [vmem:[#allocation59_spill] sm:$0xff] %v7873_v2  ;;  %v7883_v50 = vpop.permute.xlu1 %2785  ;;  %v7911_v53 = vadd.f32 %v1846_v11, %v1760_v61  ;;  %v2105_v19 = vsel %vm7249_vm0, %v2104_v24, 0.0  ;;  %v2106_v60 = vsel %vm10353_vm5, %v2103_v37, 0.0  ;;  %v2259_v11 = vmul.f32 %v7379_v40, %v10851_v42 }
 0x34e   :  { %10846 = vst [vmem:[#allocation136_spill] sm:$0xff] %v7883_v50  ;;  %2932 = vrot.lane.b32.xlu0 %v7662_v23, %s3795_s20  ;;  %v2258_v63 = vmul.f32 %v7373_v57, %v10851_v42  ;;  %v2097_v55 = vadd.f32 %v3740_v8, %v2095_v35  ;;  %v2098_v61 = vadd.f32 %v3741_v27, %v2096_v13  ;;  %v2115_v35 = vsel %vm10807_vm13, %v2113_v22, 0.0  ;;  %v10855_v22 = vld [vmem:[#allocation47_spill] sm:$0xff] }
 0x34f   :  { %2934 = vrot.lane.b32.xlu1 %v7673_v54, %s3795_s20  ;;  %10850 = vst [vmem:[#allocation148_spill] sm:$0xff] %v7911_v53  ;;  %v7946_v53 = vld [vmem:[%s10578_s29 + $0x220] sm:$0xff]  ;;  %v2116_v13 = vsel %vm7307_vm4, %v2114_v43, 0.0  ;;  %v2263_v43 = vmul.f32 %v7383_v30, %v10855_v22  ;;  %v2262_v16 = vmul.f32 %v7381_v28, %v10855_v22  ;;  %vm2697_vm13 = vcmp.lt.s32.totalorder %v4103_v21, 30 }
 0x350   :  { %v2120_v0 = vpop.permute.xlu0 %2119  ;;  %v2107_v42 = vadd.f32 %v2105_v19, %v2097_v55  ;;  %v2108_v7 = vadd.f32 %v2106_v60, %v2098_v61  ;;  %v10857_v22 = vld [vmem:[#allocation52_spill] sm:$0xff] }
 0x351   :  { %v2122_v39 = vpop.permute.xlu1 %2121 }
 0x352   :  { %2965 = vrot.lane.b32.xlu0 %v7790_v59, %s3794_s24  ;;  %v2123_v37 = vsel %vm10325_vm6, %v2120_v0, %v2122_v39  ;;  %v2124_v24 = vsel %vm10325_vm6, %v2122_v39, %v2120_v0  ;;  %v7957_v0 = vld [vmem:[%s10578_s29 + $0x228] sm:$0xff]  ;;  %v10853_v39 = vld [vmem:[#allocation40_spill] sm:$0xff]  ;;  %v2117_v55 = vadd.f32 %v2115_v35, %v2107_v42  ;;  %v2118_v61 = vadd.f32 %v2116_v13, %v2108_v7  ;;  %vm8151_vm6 = vmand %vm10889_vm9, %vm10888_vm8 }
 0x353   :  { %2967 = vrot.lane.b32.xlu1 %v7803_v26, %s3794_s24  ;;  %v2347_v27 = vmul.f32 %v7379_v40, %v10853_v39  ;;  %v2346_v49 = vmul.f32 %v7373_v57, %v10853_v39  ;;  %v2126_v50 = vsel %vm7335_vm15, %v2124_v24, 0.0  ;;  %v10856_v39 = vld [vmem:[#allocation49_spill] sm:$0xff]  ;;  %v2510_v24 = vmul.f32 %v7381_v28, %v10857_v22 }
 0x354   :  { %v7952_v8 = vpop.permute.xlu0 %2152  ;;  %v2351_v19 = vmul.f32 %v7383_v30, %v10856_v39  ;;  %v2350_v60 = vmul.f32 %v7381_v28, %v10856_v39  ;;  %v10860_v39 = vld [vmem:[#allocation56_spill] sm:$0xff]  ;;  %v7997_v13 = vadd.f32 %v2126_v50, %v2118_v61  ;;  %vm10895_vm8 = vcmp.lt.s32.totalorder %v10746_v14, 14 }
 0x355   :  { %10852 = vst [vmem:[#allocation144_spill] sm:$0xff] %v7952_v8  ;;  %v7963_v2 = vpop.permute.xlu1 %2154  ;;  %v2125_v8 = vsel %vm10799_vm2, %v2123_v37, 0.0  ;;  %v2511_v37 = vmul.f32 %v7383_v30, %v10857_v22  ;;  %v2599_v7 = vmul.f32 %v7383_v30, %v10860_v39  ;;  %v2598_v42 = vmul.f32 %v7381_v28, %v10860_v39  ;;  %v10861_v22 = vld [vmem:[#allocation46_spill] sm:$0xff]  ;;  %v10862_v30 = vld [vmem:[#allocation60_spill] sm:$0xff]  ;;  %vm10897_vm9 = vmmov %vm10895_vm8 }
 0x356   :  { %10854 = vst [vmem:[#allocation137_spill] sm:$0xff] %v7963_v2  ;;  %2998 = vrot.lane.b32.xlu0 %v7946_v53, %s3793_s2  ;;  %v10859_v2 = vld [vmem:[#allocation42_spill] sm:$0xff]  ;;  %v7995_v35 = vadd.f32 %v2125_v8, %v2117_v55  ;;  %v2594_v25 = vmul.f32 %v7373_v57, %v10861_v22  ;;  %v2271_v15 = vmul.f32 %v7491_v36, %v10862_v30  ;;  %vm2708_vm2 = vcmp.lt.s32.totalorder %v4103_v21, 15 }
 0x357   :  { %3000 = vrot.lane.b32.xlu1 %v7957_v0, %s3793_s2  ;;  %v2507_v9 = vmul.f32 %v7379_v40, %v10859_v2  ;;  %v2506_v32 = vmul.f32 %v7373_v57, %v10859_v2  ;;  %v2265_v2 = vadd.f32 %v2263_v43, %v2259_v11  ;;  %v2264_v28 = vadd.f32 %v2262_v16, %v2258_v63  ;;  %v10863_v57 = vld [vmem:[#allocation63_spill] sm:$0xff] }
 0x358   :  { %v7985_v58 = vpop.permute.xlu0 %2185  ;;  %v2270_v50 = vmul.f32 %v7489_v18, %v10862_v30  ;;  %v2353_v8 = vadd.f32 %v2351_v19, %v2347_v27  ;;  %v2352_v55 = vadd.f32 %v2350_v60, %v2346_v49  ;;  %v2358_v11 = vmul.f32 %v7489_v18, %v10863_v57  ;;  %v10864_v30 = vld [vmem:[#allocation91_spill] sm:$0xff] }
 0x359   :  { %10858 = vst [vmem:[#allocation138_spill] sm:$0xff] %v7985_v58  ;;  %v7999_v1 = vpop.permute.xlu1 %2187  ;;  %v2595_v58 = vmul.f32 %v7379_v40, %v10861_v22  ;;  %v2513_v40 = vadd.f32 %v2511_v37, %v2507_v9  ;;  %v2512_v61 = vadd.f32 %v2510_v24, %v2506_v32  ;;  %v2600_v16 = vadd.f32 %v2598_v42, %v2594_v25  ;;  %v10865_v9 = vld [vmem:[#allocation93_spill] sm:$0xff]  ;;  %v10866_v27 = vld [vmem:[#allocation95_spill] sm:$0xff] }
 0x35a   :  { %2942 = vrot.lane.b32.xlu0 %v7662_v23, %s3796_s1  ;;  %v2359_v23 = vmul.f32 %v7491_v36, %v10863_v57  ;;  %v2298_v22 = vmul.f32 %v7995_v35, %v10864_v30  ;;  %v2386_v32 = vmul.f32 %v7995_v35, %v10865_v9  ;;  %v2387_v49 = vmul.f32 %v7997_v13, %v10865_v9  ;;  %v10867_v37 = vld [vmem:[#allocation65_spill] sm:$0xff] }
 0x35b   :  { %2944 = vrot.lane.b32.xlu1 %v7673_v54, %s3796_s1  ;;  %v2601_v43 = vadd.f32 %v2599_v7, %v2595_v58  ;;  %v2299_v54 = vmul.f32 %v7997_v13, %v10864_v30  ;;  %v2273_v25 = vadd.f32 %v2271_v15, %v2265_v2  ;;  %v2272_v58 = vadd.f32 %v2270_v50, %v2264_v28 }
 0x35c   :  { %v8013_v39 = vpop.permute.xlu0 %2218  ;;  %v2546_v19 = vmul.f32 %v7995_v35, %v10866_v27  ;;  %v2547_v60 = vmul.f32 %v7997_v13, %v10866_v27  ;;  %v2519_v24 = vmul.f32 %v7491_v36, %v10867_v37  ;;  %v2518_v7 = vmul.f32 %v7489_v18, %v10867_v37 }
 0x35d   :  { %v8019_v63 = vpop.permute.xlu1 %2220  ;;  %v8043_v42 = vadd.f32 %v2298_v22, %v7793_v10  ;;  %v8046_v15 = vadd.f32 %v2299_v54, %v7796_v51  ;;  %v2361_v28 = vadd.f32 %v2359_v23, %v2353_v8  ;;  %v2360_v50 = vadd.f32 %v2358_v11, %v2352_v55  ;;  %v10874_v51 = vld [vmem:[#allocation97_spill] sm:$0xff]  ;;  %v8083_v11 = vld [vmem:[%s10578_s29 + $0x230] sm:$0xff] }
 0x35e   :  { %2975 = vrot.lane.b32.xlu0 %v7790_v59, %s3795_s20  ;;  %v8051_v9 = vadd.f32 %v2386_v32, %v7806_v56  ;;  %v8054_v30 = vadd.f32 %v2387_v49, %v7809_v20  ;;  %v8059_v37 = vadd.f32 %v2546_v19, %v7814_v4  ;;  %v8062_v10 = vadd.f32 %v2547_v60, %v7817_v12  ;;  %v10875_v56 = vld [vmem:[#allocation67_spill] sm:$0xff]  ;;  %v10876_v4 = vld [vmem:[#allocation98_spill] sm:$0xff] }
 0x35f   :  { %2977 = vrot.lane.b32.xlu1 %v7803_v26, %s3795_s20  ;;  %10868 = vst [vmem:[#allocation154_spill] sm:$0xff] %v8043_v42  ;;  %10869 = vst [vmem:[#allocation155_spill] sm:$0xff] %v8046_v15  ;;  %v2634_v22 = vmul.f32 %v7995_v35, %v10874_v51  ;;  %v2635_v8 = vmul.f32 %v7997_v13, %v10874_v51  ;;  %v2607_v20 = vmul.f32 %v7491_v36, %v10875_v56  ;;  %v8096_v19 = vld [vmem:[%s10578_s29 + $0x238] sm:$0xff]  ;;  %v10879_v60 = vld [vmem:[#allocation70_spill] sm:$0xff] }
 0x360   :  { %v8048_v2 = vpop.permute.xlu0 %2715  ;;  %10870 = vst [vmem:[#allocation156_spill] sm:$0xff] %v8051_v9  ;;  %10871 = vst [vmem:[#allocation157_spill] sm:$0xff] %v8054_v30  ;;  %v2606_v55 = vmul.f32 %v7489_v18, %v10875_v56  ;;  %v2470_v23 = vmul.f32 %v7995_v35, %v10876_v4  ;;  %v2471_v12 = vmul.f32 %v7997_v13, %v10876_v4 }
 0x361   :  { %v8056_v27 = vpop.permute.xlu1 %2717  ;;  %10872 = vst [vmem:[#allocation158_spill] sm:$0xff] %v8059_v37  ;;  %10873 = vst [vmem:[#allocation159_spill] sm:$0xff] %v8062_v10  ;;  %v2521_v54 = vadd.f32 %v2519_v24, %v2513_v40  ;;  %v2520_v32 = vadd.f32 %v2518_v7, %v2512_v61  ;;  %v8086_v36 = vadd.f32 %v2634_v22, %v7832_v44  ;;  %v10882_v24 = vld [vmem:[#allocation72_spill] sm:$0xff] }
 0x362   :  { %3008 = vrot.lane.b32.xlu0 %v7946_v53, %s3794_s24  ;;  %v8089_v18 = vadd.f32 %v2635_v8, %v7835_v17  ;;  %v2279_v4 = vmul.f32 %v7595_v52, %v10879_v60  ;;  %v2278_v40 = vmul.f32 %v7593_v45, %v10879_v60  ;;  %v8103_v61 = vadd.f32 %v2470_v23, %v7840_v47  ;;  %v10883_v8 = vld [vmem:[#allocation109_spill] sm:$0xff]  ;;  %v10884_v47 = vld [vmem:[#allocation74_spill] sm:$0xff] }
 0x363   :  { %3010 = vrot.lane.b32.xlu1 %v7957_v0, %s3794_s24  ;;  %10877 = vst [vmem:[#allocation160_spill] sm:$0xff] %v8086_v36  ;;  %v8106_v44 = vadd.f32 %v2471_v12, %v7843_v62  ;;  %v2367_v7 = vmul.f32 %v7595_v52, %v10882_v24  ;;  %v2366_v22 = vmul.f32 %v7593_v45, %v10882_v24  ;;  %v10885_v24 = vld [vmem:[#allocation76_spill] sm:$0xff] }
 0x364   :  { %10878 = vst [vmem:[#allocation161_spill] sm:$0xff] %v8089_v18  ;;  %v8091_v49 = vpop.permute.xlu0 %2760  ;;  %10880 = vst [vmem:[#allocation162_spill] sm:$0xff] %v8103_v61  ;;  %v2474_v51 = vmul.f32 %v7995_v35, %v10883_v8  ;;  %v2475_v60 = vmul.f32 %v7997_v13, %v10883_v8  ;;  %v2527_v62 = vmul.f32 %v7595_v52, %v10884_v47 }
 0x365   :  { %10881 = vst [vmem:[#allocation163_spill] sm:$0xff] %v8106_v44  ;;  %v8108_v17 = vpop.permute.xlu1 %2762  ;;  %v2526_v23 = vmul.f32 %v7593_v45, %v10884_v47  ;;  %v2609_v12 = vadd.f32 %v2607_v20, %v2601_v43  ;;  %v2608_v56 = vadd.f32 %v2606_v55, %v2600_v16  ;;  %v2615_v57 = vmul.f32 %v7595_v52, %v10885_v24  ;;  %v10893_v20 = vld [vmem:[#allocation127_spill] sm:$0xff] }
 0x366   :  { %3041 = vrot.lane.b32.xlu0 %v8083_v11, %s3793_s2  ;;  %v2614_v8 = vmul.f32 %v7593_v45, %v10885_v24  ;;  %v8131_v44 = vadd.f32 %v2474_v51, %v7863_v31  ;;  %v8134_v61 = vadd.f32 %v2475_v60, %v7865_v6  ;;  %v2136_v43 = vsel %vm10333_vm12, %v7603_v5, %v7605_v46  ;;  %v10894_v55 = vld [vmem:[#allocation147_spill] sm:$0xff] }
 0x367   :  { %3043 = vrot.lane.b32.xlu1 %v8096_v19, %s3793_s2  ;;  %v2137_v16 = vsel %vm10333_vm12, %v7605_v46, %v7603_v5  ;;  %v2281_v45 = vadd.f32 %v2279_v4, %v2273_v25  ;;  %v2280_v31 = vadd.f32 %v2278_v40, %v2272_v58  ;;  %v10890_v6 = vmov 0 }
 0x368   :  { %10886 = vst [vmem:[#allocation164_spill] sm:$0xff] %v8131_v44  ;;  %10887 = vst [vmem:[#allocation165_spill] sm:$0xff] %v8134_v61  ;;  %v8145_v52 = vpop.permute.xlu0 %2793  ;;  %v10891_v6 = vsel %vm8151_vm6, 4294967295, %v10890_v6  ;;  %v2698_v51 = vsel %vm2697_vm13, %v7631_v48, %v7637_v33  ;;  %v2699_v5 = vsel %vm2697_vm13, %v7637_v33, %v7631_v48  ;;  %v2369_v25 = vadd.f32 %v2367_v7, %v2361_v28  ;;  %v3743_v44 = vld [vmem:[%s10578_s29 + $0x188] sm:$0xff] }
 0x369   :  { %10892 = vst [vmem:[#allocation166_spill] sm:$0xff] %v10891_v6  ;;  %v8163_v46 = vpop.permute.xlu1 %2795  ;;  %v2368_v58 = vadd.f32 %v2366_v22, %v2360_v50  ;;  %v2744_v4 = vsel %vm2697_vm13, %v10894_v55, %v10893_v20  ;;  %v2745_v60 = vsel %vm2697_vm13, %v10893_v20, %v10894_v55  ;;  %v2529_v40 = vadd.f32 %v2527_v62, %v2521_v54  ;;  %v10896_v54 = vld [vmem:[#allocation80_spill] sm:$0xff] }
 0x36a   :  { %2985 = vrot.lane.b32.xlu0 %v7790_v59, %s3796_s1  ;;  %v2528_v61 = vadd.f32 %v2526_v23, %v2520_v32  ;;  %v2138_v48 = vsel %vm7233_vm1, %v2137_v16, 0.0  ;;  %v2139_v33 = vsel %vm10354_vm3, %v2136_v43, 0.0  ;;  %v2617_v28 = vadd.f32 %v2615_v57, %v2609_v12  ;;  %v10899_v43 = vld [vmem:[#allocation128_spill] sm:$0xff] }
 0x36b   :  { %2987 = vrot.lane.b32.xlu1 %v7803_v26, %s3796_s1  ;;  %v2616_v50 = vadd.f32 %v2614_v8, %v2608_v56  ;;  %v2700_v7 = vsel %vm8151_vm6, %v2699_v5, 0.0  ;;  %v2701_v22 = vsel %vm10895_vm8, %v2698_v51, 0.0  ;;  %v2287_v32 = vmul.f32 %v7759_v38, %v10896_v54  ;;  %v10898_v56 = vld [vmem:[#allocation82_spill] sm:$0xff]  ;;  %v10900_v5 = vld [vmem:[#allocation84_spill] sm:$0xff] }
 0x36c   :  { %v8185_v59 = vpop.permute.xlu0 %2826  ;;  %v2286_v62 = vmul.f32 %v7757_v41, %v10896_v54  ;;  %v2746_v23 = vsel %vm8151_vm6, %v2745_v60, 0.0  ;;  %v2747_v26 = vsel %vm10897_vm9, %v2744_v4, 0.0  ;;  %v2375_v8 = vmul.f32 %v7759_v38, %v10898_v56  ;;  %v3742_v4 = vld [vmem:[%s10578_s29 + $0x180] sm:$0xff]  ;;  %v3745_v54 = vld [vmem:[%s10578_s29 + $0x1b8] sm:$0xff] }
 0x36d   :  { %v8196_v57 = vpop.permute.xlu1 %2828  ;;  %v2374_v12 = vmul.f32 %v7757_v41, %v10898_v56  ;;  %v2146_v16 = vsel %vm10332_vm14, %v10899_v43, %v7761_v34  ;;  %v2147_v51 = vsel %vm10332_vm14, %v7761_v34, %v10899_v43  ;;  %v2535_v20 = vmul.f32 %v7759_v38, %v10900_v5  ;;  %v3744_v34 = vld [vmem:[%s10578_s29 + $0x1b0] sm:$0xff] }
 0x36e   :  { %3018 = vrot.lane.b32.xlu0 %v7946_v53, %s3795_s20  ;;  %v2534_v55 = vmul.f32 %v7757_v41, %v10900_v5  ;;  %v2140_v60 = vadd.f32 %v3742_v4, %v2138_v48  ;;  %v2141_v56 = vadd.f32 %v3743_v44, %v2139_v33  ;;  %v2702_v43 = vadd.f32 %v3744_v34, %v2700_v7  ;;  %v3746_v48 = vld [vmem:[%s10578_s29 + $0x1c0] sm:$0xff]  ;;  %v3747_v44 = vld [vmem:[%s10578_s29 + $0x1c8] sm:$0xff] }
 0x36f   :  { %v2703_v5 = vadd.f32 %v3745_v54, %v2701_v22  ;;  %3020 = vrot.lane.b32.xlu1 %v7957_v0, %s3795_s20  ;;  %v2748_v4 = vadd.f32 %v3746_v48, %v2746_v23  ;;  %v2749_v33 = vadd.f32 %v3747_v44, %v2747_v26  ;;  %v8238_v7 = vadd.f32 %v2287_v32, %v2281_v45  ;;  %v10902_v23 = vld [vmem:[#allocation86_spill] sm:$0xff] }
 0x370   :  { %v8236_v24 = vpop.permute.xlu0 %2162  ;;  %v8240_v34 = vadd.f32 %v2286_v62, %v2280_v31  ;;  %v2148_v54 = vsel %vm7249_vm0, %v2147_v51, 0.0  ;;  %v2149_v47 = vsel %vm10353_vm5, %v2146_v16, 0.0  ;;  %v2623_v48 = vmul.f32 %v7759_v38, %v10902_v23  ;;  %v10903_v16 = vld [vmem:[#allocation149_spill] sm:$0xff]  ;;  %v10904_v51 = vld [vmem:[#allocation150_spill] sm:$0xff] }
 0x371   :  { %v8246_v18 = vpop.permute.xlu1 %2164  ;;  %v2622_v26 = vmul.f32 %v7757_v41, %v10902_v23  ;;  %v8254_v45 = vadd.f32 %v2375_v8, %v2369_v25  ;;  %v8256_v31 = vadd.f32 %v2374_v12, %v2368_v58  ;;  %v8258_v32 = vadd.f32 %v2535_v20, %v2529_v40  ;;  %v10911_v25 = vld [vmem:[#allocation151_spill] sm:$0xff]  ;;  %v10912_v20 = vld [vmem:[#allocation134_spill] sm:$0xff] }
 0x372   :  { %3051 = vrot.lane.b32.xlu0 %v8083_v11, %s3794_s24  ;;  %v8260_v62 = vadd.f32 %v2534_v55, %v2528_v61  ;;  %v2179_v44 = vsel %vm10333_vm12, %v10904_v51, %v10903_v16  ;;  %v2180_v41 = vsel %vm10333_vm12, %v10903_v16, %v10904_v51  ;;  %vm10905_vm8 = vcmp.lt.s32.totalorder %v10745_v3, 15  ;;  %v10910_v61 = vld [vmem:[#allocation152_spill] sm:$0xff]  ;;  %v10913_v55 = vld [vmem:[#allocation153_spill] sm:$0xff] }
 0x373   :  { %vm10906_vm9 = vcmp.ge.s32.totalorder %v4103_v21, 16  ;;  %v10907_v38 = vmov 0  ;;  %v2709_v58 = vsel %vm2708_vm2, %v10911_v25, %v10910_v61  ;;  %v2710_v40 = vsel %vm2708_vm2, %v10910_v61, %v10911_v25  ;;  %3053 = vrot.lane.b32.xlu1 %v8096_v19, %s3794_s24  ;;  %v10914_v61 = vld [vmem:[#allocation136_spill] sm:$0xff]  ;;  %v10915_v25 = vld [vmem:[#allocation59_spill] sm:$0xff] }
 0x374   :  { %vm8274_vm14 = vmand %vm10906_vm9, %vm10905_vm8  ;;  %vm10339_vm12 = vcmp.lt.s32.totalorder %v4103_v21, 98  ;;  %v2150_v8 = vadd.f32 %v2148_v54, %v2140_v60  ;;  %v2151_v12 = vadd.f32 %v2149_v47, %v2141_v56  ;;  %v2754_v16 = vsel %vm2708_vm2, %v10913_v55, %v10912_v20  ;;  %v8297_v23 = vpop.permute.xlu0 %2195 }
 0x375   :  { %v10908_v38 = vsel %vm8274_vm14, 4294967295, %v10907_v38  ;;  %v2755_v51 = vsel %vm2708_vm2, %v10912_v20, %v10913_v55  ;;  %v2787_v36 = vsel %vm2697_vm13, %v10915_v25, %v10914_v61  ;;  %v2788_v47 = vsel %vm2697_vm13, %v10914_v61, %v10915_v25  ;;  %v8307_v56 = vpop.permute.xlu1 %2197 }
 0x376   :  { %10909 = vst [vmem:[#allocation127_spill] sm:$0xff] %v10908_v38  ;;  %v8309_v60 = vadd.f32 %v2623_v48, %v2617_v28  ;;  %v8311_v54 = vadd.f32 %v2622_v26, %v2616_v50  ;;  %v2181_v20 = vsel %vm7233_vm1, %v2180_v41, 0.0  ;;  %v2182_v55 = vsel %vm10354_vm3, %v2179_v44, 0.0  ;;  %3028 = vrot.lane.b32.xlu0 %v7946_v53, %s3796_s1  ;;  %v10918_v48 = vld [vmem:[#allocation137_spill] sm:$0xff]  ;;  %v10919_v26 = vld [vmem:[#allocation144_spill] sm:$0xff] }
 0x377   :  { %v2711_v10 = vsel %vm8274_vm14, %v2710_v40, 0.0  ;;  %vm10916_vm8 = vcmp.lt.s32.totalorder %v10746_v14, 15  ;;  %v2756_v28 = vsel %vm8274_vm14, %v2755_v51, 0.0  ;;  %v2156_v44 = vsel %vm10338_vm7, %v10919_v26, %v10918_v48  ;;  %3030 = vrot.lane.b32.xlu1 %v7957_v0, %s3796_s1  ;;  %v10921_v40 = vld [vmem:[#allocation43_spill] sm:$0xff] }
 0x378   :  { %v2712_v37 = vsel %vm10916_vm8, %v2709_v58, 0.0  ;;  %vm10917_vm9 = vmmov %vm10916_vm8  ;;  %v2157_v41 = vsel %vm10338_vm7, %v10918_v48, %v10919_v26  ;;  %v2789_v53 = vsel %vm8151_vm6, %v2788_v47, 0.0  ;;  %vm10920_vm8 = vcmp.lt.s32.totalorder %v10746_v14, 14  ;;  %v8357_v61 = vpop.permute.xlu0 %2228  ;;  %v3749_v47 = vld [vmem:[%s10578_s29 + $0x198] sm:$0xff] }
 0x379   :  { %v2757_v50 = vsel %vm10917_vm9, %v2754_v16, 0.0  ;;  %v2790_v58 = vsel %vm10920_vm8, %v2787_v36, 0.0  ;;  %vm8345_vm9 = vmand %vm10336_vm11, %vm10353_vm5  ;;  %v10922_v16 = vmov 0  ;;  %v2720_v51 = vsel %vm10340_vm10, %v8048_v2, %v8056_v27  ;;  %10925 = vst [vmem:[#allocation128_spill] sm:$0xff] %v8357_v61  ;;  %v3748_v36 = vld [vmem:[%s10578_s29 + $0x190] sm:$0xff]  ;;  %v8369_v9 = vpop.permute.xlu1 %2230 }
 0x37a   :  { %v10923_v16 = vsel %vm8345_vm9, 4294967295, %v10922_v16  ;;  %v2721_v0 = vsel %vm10340_vm10, %v8056_v27, %v8048_v2  ;;  %v8362_v25 = vadd.f32 %v3748_v36, %v2181_v20  ;;  %v8367_v48 = vadd.f32 %v3749_v47, %v2182_v55  ;;  %3061 = vrot.lane.b32.xlu0 %v8083_v11, %s3795_s20  ;;  %v3750_v20 = vld [vmem:[%s10578_s29 + $0x1d0] sm:$0xff] }
 0x37b   :  { %10924 = vst [vmem:[#allocation147_spill] sm:$0xff] %v10923_v16  ;;  %v2713_v26 = vadd.f32 %v2711_v10, %v2702_v43  ;;  %v2714_v30 = vadd.f32 %v2712_v37, %v2703_v5  ;;  %v2758_v15 = vadd.f32 %v2756_v28, %v2748_v4  ;;  %v2759_v27 = vadd.f32 %v2757_v50, %v2749_v33  ;;  %v3751_v37 = vld [vmem:[%s10578_s29 + $0x1d8] sm:$0xff]  ;;  %v10998_v16 = vld [vmem:[#allocation49_spill] sm:$0xff] }
 0x37c   :  { %vm10926_vm8 = vcmp.lt.s32.totalorder %v10745_v3, 15  ;;  %v2159_v61 = vsel %vm7307_vm4, %v2157_v41, 0.0  ;;  %v2791_v55 = vadd.f32 %v3750_v20, %v2789_v53  ;;  %v2792_v10 = vadd.f32 %v3751_v37, %v2790_v58  ;;  %3063 = vrot.lane.b32.xlu1 %v8096_v19, %s3795_s20  ;;  %v2727_v50 = vpop.permute.xlu0 %2726 }
 0x37d   :  { %v2158_v2 = vsel %vm10926_vm8, %v2156_v44, 0.0  ;;  %vm10928_vm11 = vcmp.ge.s32.totalorder %v10745_v3, 1  ;;  %v2723_v43 = vsel %vm8345_vm9, %v2721_v0, 0.0  ;;  %v2764_v4 = vsel %vm10340_vm10, %v8091_v49, %v8108_v17  ;;  %v10933_v44 = vld [vmem:[#allocation90_spill] sm:$0xff] }
 0x37e   :  { %v2722_v5 = vsel %vm10928_vm11, %v2720_v51, 0.0  ;;  %v2765_v33 = vsel %vm10340_vm10, %v8108_v17, %v8091_v49  ;;  %vm10929_vm11 = vcmp.lt.s32.totalorder %v10921_v40, 224  ;;  %v10930_v28 = vmov 0  ;;  %v2729_v49 = vpop.permute.xlu1 %2728  ;;  %v10934_v17 = vld [vmem:[#allocation92_spill] sm:$0xff]  ;;  %3071 = vrot.lane.b32.xlu0 %v8083_v11, %s3796_s1 }
 0x37f   :  { %vm8401_vm8 = vmand %vm10929_vm11, %vm10354_vm3  ;;  %v2295_v41 = vmul.f32 %v7997_v13, %v10933_v44  ;;  %v2294_v53 = vmul.f32 %v7995_v35, %v10933_v44  ;;  %v8409_v58 = vadd.f32 %v2158_v2, %v2150_v8  ;;  %v8411_v51 = vadd.f32 %v2159_v61, %v2151_v12 }
 0x380   :  { %v10931_v28 = vsel %vm8401_vm8, 4294967295, %v10930_v28  ;;  %v2383_v0 = vmul.f32 %v7997_v13, %v10934_v17  ;;  %v2382_v36 = vmul.f32 %v7995_v35, %v10934_v17  ;;  %v2724_v47 = vadd.f32 %v2722_v5, %v2713_v26  ;;  %3073 = vrot.lane.b32.xlu1 %v8096_v19, %s3796_s1 }
 0x381   :  { %10932 = vst [vmem:[#allocation149_spill] sm:$0xff] %v10931_v28  ;;  %v2725_v20 = vadd.f32 %v2723_v43, %v2714_v30  ;;  %v2731_v37 = vsel %vm10339_vm12, %v2727_v50, %v2729_v49  ;;  %v2732_v40 = vsel %vm10339_vm12, %v2729_v49, %v2727_v50  ;;  %vm10935_vm11 = vcmp.ge.s32.totalorder %v10745_v3, 1  ;;  %v2771_v43 = vpop.permute.xlu0 %2770  ;;  %v11170_v28 = vld [vmem:[#allocation64_spill] sm:$0xff] }
 0x382   :  { %v2766_v8 = vsel %vm10935_vm11, %v2764_v4, 0.0  ;;  %v2767_v12 = vsel %vm8345_vm9, %v2765_v33, 0.0  ;;  %vm10936_vm7 = vcmp.ge.s32.totalorder %v10745_v3, 2  ;;  %v2734_v30 = vsel %vm8401_vm8, %v2732_v40, 0.0  ;;  %v2773_v4 = vpop.permute.xlu1 %2772 }
 0x383   :  { %v2733_v61 = vsel %vm10936_vm7, %v2731_v37, 0.0  ;;  %v2797_v11 = vsel %vm2708_vm2, %v8145_v52, %v8163_v46  ;;  %v2798_v26 = vsel %vm2708_vm2, %v8163_v46, %v8145_v52  ;;  %v8443_v5 = vadd.f32 %v2734_v30, %v2725_v20 }
 0x384   :  { %v8441_v2 = vadd.f32 %v2733_v61, %v2724_v47  ;;  %v8446_v40 = vadd.f32 %v2295_v41, %v8238_v7  ;;  %v8449_v19 = vadd.f32 %v2294_v53, %v8240_v34  ;;  %v8452_v33 = vadd.f32 %v2383_v0, %v8254_v45 }
 0x385   :  { %10938 = vst [vmem:[#allocation152_spill] sm:$0xff] %v8443_v5  ;;  %v8455_v50 = vadd.f32 %v2382_v36, %v8256_v31  ;;  %v2768_v49 = vadd.f32 %v2766_v8, %v2758_v15  ;;  %v2769_v52 = vadd.f32 %v2767_v12, %v2759_v27  ;;  %v2774_v46 = vsel %vm10339_vm12, %v2771_v43, %v2773_v4  ;;  %v2804_v0 = vpop.permute.xlu0 %2803  ;;  %v10942_v36 = vld [vmem:[#allocation138_spill] sm:$0xff] }
 0x386   :  { %10937 = vst [vmem:[#allocation150_spill] sm:$0xff] %v8441_v2  ;;  %v2775_v47 = vsel %vm10339_vm12, %v2773_v4, %v2771_v43  ;;  %v2799_v7 = vsel %vm8274_vm14, %v2798_v26, 0.0  ;;  %vm10939_vm7 = vcmp.lt.s32.totalorder %v10746_v14, 15  ;;  %vm10940_vm11 = vcmp.ge.s32.totalorder %v10745_v3, 2  ;;  %v2806_v8 = vpop.permute.xlu1 %2805  ;;  %v10945_v12 = vld [vmem:[#allocation94_spill] sm:$0xff] }
 0x387   :  { %v2800_v34 = vsel %vm10939_vm7, %v2797_v11, 0.0  ;;  %v2776_v45 = vsel %vm10940_vm11, %v2774_v46, 0.0  ;;  %v2777_v31 = vsel %vm8401_vm8, %v2775_v47, 0.0  ;;  %v2830_v15 = vsel %vm2697_vm13, %v8185_v59, %v8196_v57 }
 0x388   :  { %v2831_v27 = vsel %vm2697_vm13, %v8196_v57, %v8185_v59  ;;  %v8477_v41 = vadd.f32 %v2776_v45, %v2768_v49  ;;  %v8479_v53 = vadd.f32 %v2777_v31, %v2769_v52  ;;  %vm10943_vm7 = vcmp.lt.s32.totalorder %v4103_v21, 17  ;;  %v10952_v31 = vld [vmem:[#allocation96_spill] sm:$0xff] }
 0x389   :  { %v2189_v20 = vsel %vm10943_vm7, %v10942_v36, %v7999_v1  ;;  %vm10944_vm11 = vmmov %vm10943_vm7  ;;  %v2543_v61 = vmul.f32 %v7997_v13, %v10945_v12  ;;  %v2542_v59 = vmul.f32 %v7995_v35, %v10945_v12  ;;  %v2801_v57 = vadd.f32 %v2799_v7, %v2791_v55  ;;  %v2837_v47 = vpop.permute.xlu0 %2836  ;;  %v10971_v12 = vld [vmem:[#allocation154_spill] sm:$0xff] }
 0x38a   :  { %10941 = vst [vmem:[#allocation151_spill] sm:$0xff] %v8477_v41  ;;  %v2190_v37 = vsel %vm10944_vm11, %v7999_v1, %v10942_v36  ;;  %v2802_v30 = vadd.f32 %v2800_v34, %v2792_v10  ;;  %v2807_v11 = vsel %vm10340_vm10, %v2804_v0, %v2806_v8  ;;  %v2808_v26 = vsel %vm10340_vm10, %v2806_v8, %v2804_v0  ;;  %v2839_v45 = vpop.permute.xlu1 %2838  ;;  %v3753_v0 = vld [vmem:[%s10578_s29 + $0x1e8] sm:$0xff] }
 0x38b   :  { %v2832_v43 = vsel %vm8151_vm6, %v2831_v27, 0.0  ;;  %vm10946_vm7 = vcmp.lt.s32.totalorder %v10746_v14, 14  ;;  %vm10947_vm11 = vcmp.ge.s32.totalorder %v10745_v3, 1  ;;  %v2810_v49 = vsel %vm8345_vm9, %v2808_v26, 0.0 }
 0x38c   :  { %v2833_v1 = vsel %vm10946_vm7, %v2830_v15, 0.0  ;;  %v2809_v4 = vsel %vm10947_vm11, %v2807_v11, 0.0  ;;  %vm10948_vm12 = vcmp.lt.s32.totalorder %v4103_v21, 94  ;;  %v8515_v46 = vadd.f32 %v2810_v49, %v2802_v30 }
 0x38d   :  { %v2166_v55 = vsel %vm10948_vm12, %v8236_v24, %v8246_v18  ;;  %vm10949_vm10 = vmmov %vm10948_vm12  ;;  %v8513_v52 = vadd.f32 %v2809_v4, %v2801_v57  ;;  %vm10950_vm7 = vcmp.lt.s32.totalorder %v4103_v21, 34  ;;  %v2631_v15 = vmul.f32 %v7997_v13, %v10952_v31  ;;  %v2870_v4 = vpop.permute.xlu0 %2869 }
 0x38e   :  { %v2167_v10 = vsel %vm10949_vm10, %v8246_v18, %v8236_v24  ;;  %v2222_v7 = vsel %vm10950_vm7, %v8013_v39, %v8019_v63  ;;  %vm10951_vm11 = vmmov %vm10950_vm7  ;;  %v2630_v18 = vmul.f32 %v7995_v35, %v10952_v31  ;;  %v3752_v24 = vld [vmem:[%s10578_s29 + $0x1e0] sm:$0xff]  ;;  %v2835_v36 = vadd.f32 %v3753_v0, %v2833_v1  ;;  %v11017_v35 = vld [vmem:[#allocation39_spill] sm:$0xff] }
 0x38f   :  { %v2223_v34 = vsel %vm10951_vm11, %v8019_v63, %v8013_v39  ;;  %v2834_v27 = vadd.f32 %v3752_v24, %v2832_v43  ;;  %v2840_v39 = vsel %vm2708_vm2, %v2837_v47, %v2839_v45  ;;  %v2841_v63 = vsel %vm2708_vm2, %v2839_v45, %v2837_v47 }
 0x390   :  { %vm10953_vm10 = vcmp.lt.s32.totalorder %v10745_v3, 14  ;;  %v2169_v8 = vsel %vm7335_vm15, %v2167_v10, 0.0  ;;  %v2842_v57 = vsel %vm8274_vm14, %v2841_v63, 0.0  ;;  %vm10955_vm12 = vcmp.lt.s32.totalorder %v10746_v14, 15 }
 0x391   :  { %v2168_v13 = vsel %vm10953_vm10, %v2166_v55, 0.0  ;;  %v2843_v30 = vsel %vm10955_vm12, %v2840_v39, 0.0  ;;  %v2191_v11 = vsel %vm7249_vm0, %v2190_v37, 0.0  ;;  %v2192_v26 = vsel %vm10353_vm5, %v2189_v20, 0.0  ;;  %v2872_v37 = vpop.permute.xlu1 %2871  ;;  %v8589_v0 = vpop.permute.xlu0 %2205 }
 0x392   :  { %v8551_v43 = vadd.f32 %v2842_v57, %v2834_v27  ;;  %v8553_v1 = vadd.f32 %v2843_v30, %v2835_v36  ;;  %v2224_v49 = vsel %vm7233_vm1, %v2223_v34, 0.0  ;;  %v2225_v55 = vsel %vm10354_vm3, %v2222_v7, 0.0 }
 0x393   :  { %vm10956_vm7 = vcmp.lt.s32.totalorder %v4103_v21, 111  ;;  %v8568_v47 = vadd.f32 %v2168_v13, %v8409_v58  ;;  %v8571_v45 = vadd.f32 %v2169_v8, %v8411_v51  ;;  %v8575_v7 = vsel %vm2697_vm13, %v2870_v4, %v2872_v37  ;;  %v10965_v13 = vld [vmem:[#allocation102_spill] sm:$0xff] }
 0x394   :  { %v2199_v10 = vsel %vm10956_vm7, %v8297_v23, %v8307_v56  ;;  %vm10957_vm11 = vmmov %vm10956_vm7  ;;  %v8579_v34 = vsel %vm2697_vm13, %v2872_v37, %v2870_v4  ;;  %v2193_v24 = vadd.f32 %v2191_v11, %v8362_v25  ;;  %v2194_v27 = vadd.f32 %v2192_v26, %v8367_v48  ;;  %v3754_v25 = vld [vmem:[%s10578_s29 + $0x1a0] sm:$0xff] }
 0x395   :  { %v2200_v20 = vsel %vm10957_vm11, %v8307_v56, %v8297_v23  ;;  %10958 = vst [vmem:[#allocation134_spill] sm:$0xff] %v8568_v47  ;;  %10959 = vst [vmem:[#allocation153_spill] sm:$0xff] %v8571_v45  ;;  %v2545_v23 = vadd.f32 %v2543_v61, %v8258_v32  ;;  %v2544_v56 = vadd.f32 %v2542_v59, %v8260_v62  ;;  %vm10960_vm10 = vcmp.lt.s32.totalorder %v10745_v3, 15  ;;  %v3755_v32 = vld [vmem:[%s10578_s29 + $0x1a8] sm:$0xff]  ;;  %v10961_v61 = vld [vmem:[#allocation128_spill] sm:$0xff] }
 0x396   :  { %v2201_v58 = vsel %vm10960_vm10, %v2199_v10, 0.0  ;;  %v2202_v51 = vsel %vm7307_vm4, %v2200_v20, 0.0  ;;  %v2633_v36 = vadd.f32 %v2631_v15, %v8309_v60  ;;  %v2632_v39 = vadd.f32 %v2630_v18, %v8311_v54  ;;  %v2208_v54 = vpop.permute.xlu1 %2207  ;;  %v10964_v15 = vld [vmem:[#allocation100_spill] sm:$0xff]  ;;  %v8627_v10 = vpop.permute.xlu0 %2238  ;;  %v10967_v20 = vld [vmem:[#allocation106_spill] sm:$0xff] }
 0x397   :  { %v2226_v48 = vadd.f32 %v3754_v25, %v2224_v49  ;;  %v2227_v62 = vadd.f32 %v3755_v32, %v2225_v55  ;;  %vm10962_vm12 = vcmp.lt.s32.totalorder %v4103_v21, 17  ;;  %v2303_v18 = vmul.f32 %v8571_v45, %v10964_v15  ;;  %v10966_v26 = vld [vmem:[#allocation104_spill] sm:$0xff]  ;;  %v10969_v32 = vld [vmem:[#allocation103_spill] sm:$0xff] }
 0x398   :  { %v2232_v59 = vsel %vm10962_vm12, %v10961_v61, %v8369_v9  ;;  %vm10963_vm7 = vmmov %vm10962_vm12  ;;  %v2302_v63 = vmul.f32 %v8568_v47, %v10964_v15  ;;  %v2391_v8 = vmul.f32 %v8571_v45, %v10965_v13  ;;  %v2390_v57 = vmul.f32 %v8568_v47, %v10965_v13 }
 0x399   :  { %v2233_v60 = vsel %vm10963_vm7, %v8369_v9, %v10961_v61  ;;  %v8615_v30 = vadd.f32 %v2201_v58, %v2193_v24  ;;  %v8617_v11 = vadd.f32 %v2202_v51, %v2194_v27  ;;  %v2551_v9 = vmul.f32 %v8571_v45, %v10966_v26  ;;  %v10968_v58 = vld [vmem:[#allocation101_spill] sm:$0xff] }
 0x39a   :  { %v2550_v4 = vmul.f32 %v8568_v47, %v10966_v26  ;;  %v2234_v49 = vsel %vm7249_vm0, %v2233_v60, 0.0  ;;  %v2235_v55 = vsel %vm10353_vm5, %v2232_v59, 0.0  ;;  %v2639_v37 = vmul.f32 %v8571_v45, %v10967_v20  ;;  %v8633_v27 = vpop.permute.xlu1 %2240 }
 0x39b   :  { %v2638_v24 = vmul.f32 %v8568_v47, %v10967_v20  ;;  %v2306_v51 = vmul.f32 %v8568_v47, %v10968_v58  ;;  %v2307_v25 = vmul.f32 %v8571_v45, %v10968_v58  ;;  %v2394_v61 = vmul.f32 %v8568_v47, %v10969_v32 }
 0x39c   :  { %v2395_v59 = vmul.f32 %v8571_v45, %v10969_v32  ;;  %v8644_v60 = vadd.f32 %v2303_v18, %v8446_v40  ;;  %v8647_v22 = vadd.f32 %v2302_v63, %v8449_v19  ;;  %v2554_v20 = vmul.f32 %v8568_v47, %v10970_v29  ;;  %v2814_v18 = vpop.permute.xlu0 %2813 }
 0x39d   :  { %v2555_v26 = vmul.f32 %v8571_v45, %v10970_v29  ;;  %v8654_v58 = vadd.f32 %v2391_v8, %v8452_v33  ;;  %v8657_v13 = vadd.f32 %v2390_v57, %v8455_v50  ;;  %v8659_v15 = vadd.f32 %v2551_v9, %v2545_v23  ;;  %v10972_v8 = vld [vmem:[#allocation155_spill] sm:$0xff]  ;;  %v10973_v23 = vld [vmem:[#allocation156_spill] sm:$0xff] }
 0x39e   :  { %v8661_v32 = vadd.f32 %v2550_v4, %v2544_v56  ;;  %v8663_v40 = vadd.f32 %v2234_v49, %v2226_v48  ;;  %v8665_v19 = vadd.f32 %v2235_v55, %v2227_v62  ;;  %v8667_v63 = vadd.f32 %v2639_v37, %v2633_v36  ;;  %v2816_v29 = vpop.permute.xlu1 %2815  ;;  %v10974_v56 = vld [vmem:[#allocation157_spill] sm:$0xff]  ;;  %v10982_v37 = vld [vmem:[#allocation107_spill] sm:$0xff] }
 0x39f   :  { %v8669_v31 = vadd.f32 %v2638_v24, %v2632_v39  ;;  %v8672_v33 = vadd.f32 %v2306_v51, %v10971_v12  ;;  %v8675_v50 = vadd.f32 %v2307_v25, %v10972_v8  ;;  %v8678_v57 = vadd.f32 %v2394_v61, %v10973_v23  ;;  %v10977_v39 = vld [vmem:[#allocation158_spill] sm:$0xff]  ;;  %v10979_v12 = vld [vmem:[#allocation159_spill] sm:$0xff]  ;;  %v10984_v8 = vld [vmem:[#allocation40_spill] sm:$0xff] }
 0x3a0   :  { %v8681_v48 = vadd.f32 %v2395_v59, %v10974_v56  ;;  %vm10975_vm11 = vcmp.lt.s32.totalorder %v4103_v21, 98  ;;  %v8688_v9 = vadd.f32 %v2554_v20, %v10977_v39  ;;  %v8691_v4 = vadd.f32 %v2555_v26, %v10979_v12  ;;  %v2847_v26 = vpop.permute.xlu0 %2846  ;;  %v10983_v25 = vld [vmem:[#allocation38_spill] sm:$0xff] }
 0x3a1   :  { %v2817_v62 = vsel %vm10975_vm11, %v2814_v18, %v2816_v29  ;;  %vm10976_vm10 = vmmov %vm10975_vm11  ;;  %vm10981_vm12 = vcmp.ge.s32.totalorder %v10745_v3, 2  ;;  %v2642_v24 = vmul.f32 %v8568_v47, %v10982_v37  ;;  %v2643_v51 = vmul.f32 %v8571_v45, %v10982_v37 }
 0x3a2   :  { %v2818_v36 = vsel %vm10976_vm10, %v2816_v29, %v2814_v18  ;;  %10978 = vst [vmem:[#allocation136_spill] sm:$0xff] %v8688_v9  ;;  %10980 = vst [vmem:[#allocation59_spill] sm:$0xff] %v8691_v4  ;;  %v2819_v49 = vsel %vm10981_vm12, %v2817_v62, 0.0  ;;  %v3082_v61 = vmul.f32 %v8443_v5, %v10983_v25  ;;  %v3081_v59 = vmul.f32 %v8441_v2, %v10983_v25  ;;  %v2849_v18 = vpop.permute.xlu1 %2848  ;;  %v10985_v62 = vld [vmem:[#allocation42_spill] sm:$0xff]  ;;  %v11004_v9 = vld [vmem:[#allocation52_spill] sm:$0xff] }
 0x3a3   :  { %v2820_v55 = vsel %vm8401_vm8, %v2818_v36, 0.0  ;;  %v8702_v29 = vadd.f32 %v2819_v49, %v8513_v52  ;;  %v3170_v23 = vmul.f32 %v8443_v5, %v10984_v8  ;;  %v3169_v56 = vmul.f32 %v8441_v2, %v10984_v8 }
 0x3a4   :  { %v8705_v20 = vadd.f32 %v2820_v55, %v8515_v46  ;;  %v3330_v52 = vmul.f32 %v8443_v5, %v10985_v62  ;;  %v3329_v46 = vmul.f32 %v8441_v2, %v10985_v62  ;;  %v2875_v36 = vsel %vm8151_vm6, %v8579_v34, 0.0 }
 0x3a5   :  { %vm10986_vm7 = vcmp.lt.s32.totalorder %v10746_v14, 14  ;;  %vm10987_vm11 = vcmp.lt.s32.totalorder %v4103_v21, 113  ;;  %vm10989_vm12 = vcmp.lt.s32.totalorder %v4103_v21, 94  ;;  %vm10991_vm3 = vcmp.ge.s32.totalorder %v10745_v3, 1 }
 0x3a6   :  { %v2876_v39 = vsel %vm10986_vm7, %v8575_v7, 0.0  ;;  %v2850_v12 = vsel %vm10987_vm11, %v2847_v26, %v2849_v18  ;;  %vm10988_vm10 = vmmov %vm10987_vm11  ;;  %v2209_v55 = vsel %vm10989_vm12, %v8589_v0, %v2208_v54  ;;  %vm10999_vm7 = vcmp.lt.s32.totalorder %v4103_v21, 111 }
 0x3a7   :  { %v2851_v49 = vsel %vm10988_vm10, %v2849_v18, %v2847_v26  ;;  %vm10990_vm5 = vmmov %vm10989_vm12  ;;  %v2852_v34 = vsel %vm10991_vm3, %v2850_v12, 0.0  ;;  %v2880_v26 = vpop.permute.xlu0 %2879  ;;  %v10994_v18 = vld [vmem:[#allocation46_spill] sm:$0xff]  ;;  %vm10996_vm3 = vcmp.lt.s32.totalorder %v10745_v3, 14  ;;  %vm11007_vm10 = vcmp.lt.s32.totalorder %v10745_v3, 15 }
 0x3a8   :  { %v2210_v25 = vsel %vm10990_vm5, %v2208_v54, %v8589_v0  ;;  %v2853_v7 = vsel %vm8345_vm9, %v2851_v49, 0.0  ;;  %v8740_v8 = vadd.f32 %v2852_v34, %v8551_v43  ;;  %v3418_v37 = vmul.f32 %v8443_v5, %v10994_v18  ;;  %v3756_v0 = vld [vmem:[%s10578_s29 + $0x1f0] sm:$0xff]  ;;  %v3757_v43 = vld [vmem:[%s10578_s29 + $0x1f8] sm:$0xff]  ;;  %v2882_v49 = vpop.permute.xlu1 %2881  ;;  %vm11000_vm11 = vmmov %vm10999_vm7 }
 0x3a9   :  { %v8743_v62 = vadd.f32 %v2853_v7, %v8553_v1  ;;  %v3417_v17 = vmul.f32 %v8441_v2, %v10994_v18  ;;  %v2877_v54 = vadd.f32 %v3756_v0, %v2875_v36  ;;  %v2878_v12 = vadd.f32 %v3757_v43, %v2876_v39  ;;  %v10995_v1 = vld [vmem:[#allocation47_spill] sm:$0xff] }
 0x3aa   :  { %10992 = vst [vmem:[#allocation137_spill] sm:$0xff] %v8740_v8  ;;  %v3086_v34 = vmul.f32 %v8479_v53, %v10995_v1  ;;  %v3085_v7 = vmul.f32 %v8477_v41, %v10995_v1  ;;  %v2211_v18 = vsel %vm10996_vm3, %v2209_v55, 0.0  ;;  %v2212_v44 = vsel %vm7335_vm15, %v2210_v25, 0.0  ;;  %vm11010_vm3 = vmmov %vm10989_vm12 }
 0x3ab   :  { %10993 = vst [vmem:[#allocation144_spill] sm:$0xff] %v8743_v62  ;;  %v2883_v36 = vsel %vm2708_vm2, %v2880_v26, %v2882_v49  ;;  %v2884_v0 = vsel %vm2708_vm2, %v2882_v49, %v2880_v26  ;;  %vm10997_vm5 = vcmp.lt.s32.totalorder %v10746_v14, 15  ;;  %v3174_v1 = vmul.f32 %v8479_v53, %v10998_v16 }
 0x3ac   :  { %v2885_v39 = vsel %vm8274_vm14, %v2884_v0, 0.0  ;;  %v2886_v43 = vsel %vm10997_vm5, %v2883_v36, 0.0  ;;  %v3173_v55 = vmul.f32 %v8477_v41, %v10998_v16  ;;  %v2242_v25 = vsel %vm10999_vm7, %v8627_v10, %v8633_v27  ;;  %v2913_v36 = vpop.permute.xlu0 %2912  ;;  %v2915_v4 = vpop.permute.xlu1 %2914 }
 0x3ad   :  { %v2243_v26 = vsel %vm11000_vm11, %v8633_v27, %v8627_v10  ;;  %v8783_v49 = vadd.f32 %v2885_v39, %v2877_v54  ;;  %v8785_v0 = vadd.f32 %v2886_v43, %v2878_v12  ;;  %v8788_v38 = vadd.f32 %v2211_v18, %v8615_v30  ;;  %v11005_v30 = vld [vmem:[#allocation160_spill] sm:$0xff] }
 0x3ae   :  { %v8791_v16 = vadd.f32 %v2212_v44, %v8617_v11  ;;  %v3334_v62 = vmul.f32 %v8479_v53, %v11004_v9  ;;  %v3333_v8 = vmul.f32 %v8477_v41, %v11004_v9  ;;  %v8799_v10 = vsel %vm2697_vm13, %v2913_v36, %v2915_v4  ;;  %v11006_v44 = vld [vmem:[#allocation161_spill] sm:$0xff] }
 0x3af   :  { %11001 = vst [vmem:[#allocation138_spill] sm:$0xff] %v8785_v0  ;;  %11002 = vst [vmem:[#allocation128_spill] sm:$0xff] %v8788_v38  ;;  %v8803_v27 = vsel %vm2697_vm13, %v2915_v4, %v2913_v36  ;;  %v8806_v54 = vadd.f32 %v2642_v24, %v11005_v30  ;;  %v8809_v11 = vadd.f32 %v2643_v51, %v11006_v44  ;;  %v2244_v12 = vsel %vm11007_vm10, %v2242_v25, 0.0  ;;  %v11008_v24 = vld [vmem:[#allocation56_spill] sm:$0xff]  ;;  %v11009_v25 = vld [vmem:[#allocation110_spill] sm:$0xff] }
 0x3b0   :  { %11003 = vst [vmem:[#allocation154_spill] sm:$0xff] %v8791_v16  ;;  %v2245_v9 = vsel %vm7307_vm4, %v2243_v26, 0.0  ;;  %v8815_v18 = vadd.f32 %v3086_v34, %v3082_v61  ;;  %v8817_v39 = vadd.f32 %v3085_v7, %v3081_v59  ;;  %v2249_v43 = vpop.permute.xlu0 %2248  ;;  %v8819_v0 = vadd.f32 %v3174_v1, %v3170_v23  ;;  %v2251_v30 = vpop.permute.xlu1 %2250 }
 0x3b1   :  { %v8821_v4 = vadd.f32 %v3173_v55, %v3169_v56  ;;  %v3422_v36 = vmul.f32 %v8479_v53, %v11008_v24  ;;  %v3421_v51 = vmul.f32 %v8477_v41, %v11008_v24  ;;  %v2311_v44 = vmul.f32 %v8791_v16, %v11009_v25 }
 0x3b2   :  { %v2310_v61 = vmul.f32 %v8788_v38, %v11009_v25  ;;  %v8831_v59 = vadd.f32 %v3334_v62, %v3330_v52  ;;  %v8833_v34 = vadd.f32 %v3333_v8, %v3329_v46  ;;  %v2246_v23 = vadd.f32 %v2244_v12, %v8663_v40  ;;  %v11012_v52 = vld [vmem:[#allocation48_spill] sm:$0xff]  ;;  %v11024_v25 = vld [vmem:[#allocation121_spill] sm:$0xff] }
 0x3b3   :  { %v2247_v56 = vadd.f32 %v2245_v9, %v8665_v19  ;;  %v2252_v7 = vsel %vm10989_vm12, %v2249_v43, %v2251_v30  ;;  %v2253_v1 = vsel %vm11010_vm3, %v2251_v30, %v2249_v43  ;;  %vm11011_vm5 = vcmp.lt.s32.totalorder %v10745_v3, 14  ;;  %v11013_v8 = vld [vmem:[#allocation108_spill] sm:$0xff] }
 0x3b4   :  { %v2254_v55 = vsel %vm11011_vm5, %v2252_v7, 0.0  ;;  %v2255_v26 = vsel %vm7335_vm15, %v2253_v1, 0.0  ;;  %v3090_v46 = vmul.f32 %v8479_v53, %v11012_v52  ;;  %v2478_v40 = vmul.f32 %v8568_v47, %v11013_v8  ;;  %v8853_v12 = vpop.permute.xlu0 %2856  ;;  %v8859_v24 = vpop.permute.xlu1 %2858  ;;  %v11016_v30 = vld [vmem:[#allocation112_spill] sm:$0xff]  ;;  %v11020_v47 = vld [vmem:[#allocation162_spill] sm:$0xff]  ;;  %v11022_v52 = vld [vmem:[#allocation41_spill] sm:$0xff] }
 0x3b5   :  { %v8849_v62 = vadd.f32 %v2254_v55, %v2246_v23  ;;  %v8851_v19 = vadd.f32 %v2255_v26, %v2247_v56  ;;  %v8855_v9 = vadd.f32 %v3422_v36, %v3418_v37  ;;  %v8857_v43 = vadd.f32 %v3421_v51, %v3417_v17  ;;  %v11018_v37 = vld [vmem:[#allocation118_spill] sm:$0xff] }
 0x3b6   :  { %v2399_v7 = vmul.f32 %v8791_v16, %v11016_v30  ;;  %v2398_v1 = vmul.f32 %v8788_v38, %v11016_v30  ;;  %v3084_v23 = vmul.f32 %v8443_v5, %v11017_v35  ;;  %v2479_v56 = vmul.f32 %v8571_v45, %v11013_v8  ;;  %v11023_v30 = vld [vmem:[#allocation51_spill] sm:$0xff] }
 0x3b7   :  { %11014 = vst [vmem:[#allocation155_spill] sm:$0xff] %v8849_v62  ;;  %11015 = vst [vmem:[#allocation156_spill] sm:$0xff] %v8851_v19  ;;  %v2313_v55 = vadd.f32 %v2311_v44, %v8644_v60  ;;  %v2319_v17 = vmul.f32 %v8851_v19, %v11018_v37  ;;  %v2312_v36 = vadd.f32 %v2310_v61, %v8647_v22  ;;  %vm11048_vm7 = vcmp.lt.s32.totalorder %v4103_v21, 98 }
 0x3b8   :  { %v2318_v51 = vmul.f32 %v8849_v62, %v11018_v37  ;;  %v8875_v26 = vadd.f32 %v3090_v46, %v3084_v23  ;;  %v8878_v42 = vadd.f32 %v2478_v40, %v11020_v47  ;;  %v3171_v35 = vmul.f32 %v8441_v2, %v11022_v52  ;;  %v8884_v60 = vpop.permute.xlu0 %2889  ;;  %v8890_v46 = vpop.permute.xlu1 %2891  ;;  %v11025_v40 = vld [vmem:[#allocation163_spill] sm:$0xff]  ;;  %vm11049_vm11 = vmmov %vm11048_vm7 }
 0x3b9   :  { %v3177_v45 = vmul.f32 %v8477_v41, %v11023_v30  ;;  %v2321_v44 = vadd.f32 %v2319_v17, %v2313_v55  ;;  %v2407_v22 = vmul.f32 %v8851_v19, %v11024_v25  ;;  %v2406_v61 = vmul.f32 %v8849_v62, %v11024_v25 }
 0x3ba   :  { %11019 = vst [vmem:[#allocation157_spill] sm:$0xff] %v8875_v26  ;;  %11021 = vst [vmem:[#allocation158_spill] sm:$0xff] %v8878_v42  ;;  %v2320_v8 = vadd.f32 %v2318_v51, %v2312_v36  ;;  %v2401_v47 = vadd.f32 %v2399_v7, %v8654_v58  ;;  %v8894_v23 = vadd.f32 %v2479_v56, %v11025_v40  ;;  %v11027_v26 = vld [vmem:[#allocation55_spill] sm:$0xff]  ;;  %v11028_v36 = vld [vmem:[#allocation114_spill] sm:$0xff]  ;;  %vm11050_vm10 = vcmp.lt.s32.totalorder %v10746_v14, 14 }
 0x3bb   :  { %v3178_v42 = vmul.f32 %v8479_v53, %v11023_v30  ;;  %v3337_v55 = vmul.f32 %v8477_v41, %v11027_v26  ;;  %2328 = vrot.lane.b32.xlu1 %v2321_v44, %s3789_s22  ;;  %v2400_v17 = vadd.f32 %v2398_v1, %v8657_v13  ;;  %v2559_v51 = vmul.f32 %v8791_v16, %v11028_v36  ;;  %v11030_v56 = vld [vmem:[#allocation45_spill] sm:$0xff] }
 0x3bc   :  { %11026 = vst [vmem:[#allocation159_spill] sm:$0xff] %v8894_v23  ;;  %2326 = vrot.lane.b32.xlu0 %v2320_v8, %s3789_s22  ;;  %v2558_v58 = vmul.f32 %v8788_v38, %v11028_v36  ;;  %v8907_v7 = vadd.f32 %v3177_v45, %v3171_v35  ;;  %v3172_v30 = vmul.f32 %v8443_v5, %v11022_v52  ;;  %v8915_v8 = vpop.permute.xlu0 %2922  ;;  %v11031_v23 = vld [vmem:[#allocation6_spill] sm:$0xff]  ;;  %v8921_v45 = vpop.permute.xlu1 %2924  ;;  %vm11052_vm12 = vcmp.ge.s32.totalorder %v10745_v3, 2 }
 0x3bd   :  { %v3331_v40 = vmul.f32 %v8441_v2, %v11030_v56  ;;  %v3338_v44 = vmul.f32 %v8479_v53, %v11027_v26  ;;  %v2409_v13 = vadd.f32 %v2407_v22, %v2401_v47  ;;  %v2408_v1 = vadd.f32 %v2406_v61, %v2400_v17 }
 0x3be   :  { %11029 = vst [vmem:[#allocation38_spill] sm:$0xff] %v8907_v7  ;;  %v2567_v25 = vmul.f32 %v8851_v19, %v11031_v23  ;;  %v2566_v35 = vmul.f32 %v8849_v62, %v11031_v23  ;;  %v11032_v7 = vld [vmem:[#allocation116_spill] sm:$0xff]  ;;  %v8925_v36 = vadd.f32 %v3178_v42, %v3172_v30  ;;  %v3332_v26 = vmul.f32 %v8443_v5, %v11030_v56  ;;  %v11035_v42 = vld [vmem:[#allocation50_spill] sm:$0xff]  ;;  %v11036_v30 = vld [vmem:[#allocation57_spill] sm:$0xff] }
 0x3bf   :  { %v2647_v52 = vmul.f32 %v8791_v16, %v11032_v7  ;;  %v8927_v37 = vadd.f32 %v3337_v55, %v3331_v40  ;;  %2416 = vrot.lane.b32.xlu1 %v2409_v13, %s3790_s4  ;;  %v2561_v22 = vadd.f32 %v2559_v51, %v8659_v15  ;;  %v2560_v61 = vadd.f32 %v2558_v58, %v8661_v32  ;;  %v11037_v40 = vld [vmem:[#allocation53_spill] sm:$0xff]  ;;  %v11038_v58 = vld [vmem:[#allocation130_spill] sm:$0xff]  ;;  %v11047_v23 = vld [vmem:[#allocation67_spill] sm:$0xff] }
 0x3c0   :  { %11033 = vst [vmem:[#allocation40_spill] sm:$0xff] %v8925_v36  ;;  %2414 = vrot.lane.b32.xlu0 %v2408_v1, %s3790_s4  ;;  %v2646_v47 = vmul.f32 %v8788_v38, %v11032_v7  ;;  %v8937_v17 = vadd.f32 %v3338_v44, %v3332_v26  ;;  %v8941_v55 = vmul.f32 %v8441_v2, %v11035_v42  ;;  %v8951_v15 = vpop.permute.xlu0 %2955  ;;  %v8957_v26 = vpop.permute.xlu1 %2957  ;;  %vm11056_vm3 = vcmp.lt.s32.totalorder %v4103_v21, 113 }
 0x3c1   :  { %11034 = vst [vmem:[#allocation42_spill] sm:$0xff] %v8927_v37  ;;  %v8945_v56 = vmul.f32 %v8477_v41, %v11036_v30  ;;  %v8949_v13 = vmul.f32 %v8441_v2, %v11037_v40  ;;  %v2569_v32 = vadd.f32 %v2567_v25, %v2561_v22  ;;  %v2568_v51 = vadd.f32 %v2566_v35, %v2560_v61  ;;  %v11039_v37 = vld [vmem:[#allocation60_spill] sm:$0xff]  ;;  %v11041_v25 = vld [vmem:[#allocation58_spill] sm:$0xff]  ;;  %v11043_v2 = vld [vmem:[#allocation111_spill] sm:$0xff] }
 0x3c2   :  { %v2655_v44 = vmul.f32 %v8851_v19, %v11038_v58  ;;  %v2654_v1 = vmul.f32 %v8849_v62, %v11038_v58  ;;  %v3094_v36 = vmul.f32 %v8705_v20, %v11039_v37  ;;  %v3093_v30 = vmul.f32 %v8702_v29, %v11039_v37  ;;  %v11044_v37 = vld [vmem:[#allocation63_spill] sm:$0xff]  ;;  %vm11061_vm5 = vmmov %vm11056_vm3 }
 0x3c3   :  { %v8965_v42 = vmul.f32 %v8443_v5, %v11037_v40  ;;  %v8969_v35 = vmul.f32 %v8477_v41, %v11041_v25  ;;  %2576 = vrot.lane.b32.xlu1 %v2569_v32, %s3791_s12  ;;  %v2649_v22 = vadd.f32 %v2647_v52, %v8667_v63  ;;  %v2648_v61 = vadd.f32 %v2646_v47, %v8669_v31  ;;  %v11045_v5 = vld [vmem:[#allocation65_spill] sm:$0xff] }
 0x3c4   :  { %2574 = vrot.lane.b32.xlu0 %v2568_v51, %s3791_s12  ;;  %v2314_v19 = vmul.f32 %v8788_v38, %v11043_v2  ;;  %v3182_v62 = vmul.f32 %v8705_v20, %v11044_v37  ;;  %v3181_v40 = vmul.f32 %v8702_v29, %v11044_v37  ;;  %v3342_v41 = vmul.f32 %v8705_v20, %v11045_v5  ;;  %v2900_v51 = vpop.permute.xlu0 %2899  ;;  %v11046_v52 = vld [vmem:[#allocation113_spill] sm:$0xff]  ;;  %v2902_v7 = vpop.permute.xlu1 %2901 }
 0x3c5   :  { %11040 = vst [vmem:[#allocation46_spill] sm:$0xff] %v8965_v42  ;;  %11042 = vst [vmem:[#allocation47_spill] sm:$0xff] %v8969_v35  ;;  %v3341_v32 = vmul.f32 %v8702_v29, %v11045_v5  ;;  %v2657_v58 = vadd.f32 %v2655_v44, %v2649_v22  ;;  %v2656_v63 = vadd.f32 %v2654_v1, %v2648_v61 }
 0x3c6   :  { %v2315_v31 = vmul.f32 %v8791_v16, %v11043_v2  ;;  %v2402_v47 = vmul.f32 %v8788_v38, %v11046_v52  ;;  %v8990_v42 = vadd.f32 %v3094_v36, %v8815_v18  ;;  %v8993_v37 = vadd.f32 %v3093_v30, %v8817_v39  ;;  %v11077_v2 = vld [vmem:[#allocation66_spill] sm:$0xff] }
 0x3c7   :  { %v3430_v35 = vmul.f32 %v8705_v20, %v11047_v23  ;;  %v2403_v5 = vmul.f32 %v8791_v16, %v11046_v52  ;;  %v2860_v44 = vsel %vm11048_vm7, %v8853_v12, %v8859_v24  ;;  %v2861_v18 = vsel %vm11049_vm11, %v8859_v24, %v8853_v12  ;;  %2664 = vrot.lane.b32.xlu1 %v2657_v58, %s3792_s8  ;;  %v11053_v58 = vld [vmem:[#allocation131_spill] sm:$0xff] }
 0x3c8   :  { %2662 = vrot.lane.b32.xlu0 %v2656_v63, %s3792_s8  ;;  %v3429_v39 = vmul.f32 %v8702_v29, %v11047_v23  ;;  %v9012_v36 = vadd.f32 %v3182_v62, %v8819_v0  ;;  %v9015_v30 = vadd.f32 %v3181_v40, %v8821_v4  ;;  %v9018_v1 = vadd.f32 %v3342_v41, %v8831_v59  ;;  %v2933_v23 = vpop.permute.xlu0 %2932  ;;  %v11051_v0 = vld [vmem:[#allocation115_spill] sm:$0xff] }
 0x3c9   :  { %v9021_v22 = vadd.f32 %v3341_v32, %v8833_v34  ;;  %v2918_v12 = vsel %vm8151_vm6, %v8803_v27, 0.0  ;;  %v2919_v24 = vsel %vm11050_vm10, %v8799_v10, 0.0  ;;  %v2562_v62 = vmul.f32 %v8788_v38, %v11051_v0  ;;  %v2935_v34 = vpop.permute.xlu1 %2934  ;;  %v11064_v52 = vld [vmem:[#allocation59_spill] sm:$0xff]  ;;  %vm11075_vm10 = vmmov %vm11049_vm11 }
 0x3ca   :  { %v2563_v4 = vmul.f32 %v8791_v16, %v11051_v0  ;;  %v2862_v41 = vsel %vm11052_vm12, %v2860_v44, 0.0  ;;  %v2863_v59 = vsel %vm8401_vm8, %v2861_v18, 0.0  ;;  %v2650_v27 = vmul.f32 %v8788_v38, %v11053_v58  ;;  %v3758_v44 = vld [vmem:[%s10578_s29 + $0x200] sm:$0xff] }
 0x3cb   :  { %v2651_v10 = vmul.f32 %v8791_v16, %v11053_v58  ;;  %v9042_v61 = vadd.f32 %v3430_v35, %v8855_v9  ;;  %v9045_v40 = vadd.f32 %v3429_v39, %v8857_v43  ;;  %v9048_v32 = vadd.f32 %v2314_v19, %v8672_v33  ;;  %v3759_v33 = vld [vmem:[%s10578_s29 + $0x208] sm:$0xff]  ;;  %v11060_v39 = vld [vmem:[#allocation144_spill] sm:$0xff] }
 0x3cc   :  { %v9051_v63 = vadd.f32 %v2315_v31, %v8675_v50  ;;  %v2920_v18 = vadd.f32 %v3758_v44, %v2918_v12  ;;  %v2893_v9 = vsel %vm11056_vm3, %v8884_v60, %v8890_v46  ;;  %v9061_v35 = vadd.f32 %v2402_v47, %v8678_v57  ;;  %v11059_v19 = vld [vmem:[#allocation137_spill] sm:$0xff]  ;;  %v9079_v47 = vpop.permute.xlu0 %2965 }
 0x3cd   :  { %11054 = vst [vmem:[#allocation49_spill] sm:$0xff] %v9048_v32  ;;  %v9064_v43 = vadd.f32 %v2403_v5, %v8681_v48  ;;  %v2921_v50 = vadd.f32 %v3759_v33, %v2919_v24  ;;  %v9070_v31 = vadd.f32 %v2862_v41, %v11059_v19  ;;  %v9073_v12 = vadd.f32 %v2863_v59, %v11060_v39  ;;  %v9081_v48 = vpop.permute.xlu1 %2967  ;;  %v11062_v5 = vld [vmem:[#allocation136_spill] sm:$0xff] }
 0x3ce   :  { %11055 = vst [vmem:[#allocation52_spill] sm:$0xff] %v9051_v63  ;;  %11057 = vst [vmem:[#allocation160_spill] sm:$0xff] %v9061_v35  ;;  %v2894_v57 = vsel %vm11061_vm5, %v8890_v46, %v8884_v60  ;;  %v9084_v44 = vadd.f32 %v2562_v62, %v11062_v5  ;;  %v9087_v24 = vadd.f32 %v2563_v4, %v11064_v52  ;;  %vm11068_vm7 = vcmp.ge.s32.totalorder %v10745_v3, 1  ;;  %v11069_v46 = vld [vmem:[#allocation62_spill] sm:$0xff]  ;;  %v11070_v62 = vld [vmem:[#allocation117_spill] sm:$0xff] }
 0x3cf   :  { %11058 = vst [vmem:[#allocation161_spill] sm:$0xff] %v9064_v43  ;;  %v9090_v41 = vadd.f32 %v2650_v27, %v8806_v54  ;;  %v9093_v59 = vadd.f32 %v2651_v10, %v8809_v11  ;;  %v2895_v33 = vsel %vm11068_vm7, %v2893_v9, 0.0  ;;  %v2904_v60 = vsel %vm11049_vm11, %v2902_v7, %v2900_v51  ;;  %v11073_v10 = vld [vmem:[#allocation64_spill] sm:$0xff]  ;;  %vm11084_vm7 = vmmov %vm11061_vm5  ;;  %v11171_v4 = vld [vmem:[#allocation71_spill] sm:$0xff] }
 0x3d0   :  { %11063 = vst [vmem:[#allocation56_spill] sm:$0xff] %v9084_v44  ;;  %11065 = vst [vmem:[#allocation162_spill] sm:$0xff] %v9087_v24  ;;  %v9101_v19 = vmul.f32 %v8705_v20, %v11069_v46  ;;  %v9105_v52 = vmul.f32 %v8788_v38, %v11070_v62  ;;  %v2896_v54 = vsel %vm8345_vm9, %v2894_v57, 0.0  ;;  %v2927_v11 = vsel %vm2708_vm2, %v8921_v45, %v8915_v8  ;;  %v9127_v5 = vpop.permute.xlu0 %2998  ;;  %v11076_v38 = vld [vmem:[#allocation70_spill] sm:$0xff]  ;;  %v11088_v32 = vld [vmem:[#allocation80_spill] sm:$0xff] }
 0x3d1   :  { %11066 = vst [vmem:[#allocation41_spill] sm:$0xff] %v9090_v41  ;;  %11067 = vst [vmem:[#allocation51_spill] sm:$0xff] %v9093_v59  ;;  %v9115_v27 = vmul.f32 %v8791_v16, %v11070_v62  ;;  %v9119_v9 = vmul.f32 %v8702_v29, %v11073_v10  ;;  %v2926_v39 = vsel %vm2708_vm2, %v8915_v8, %v8921_v45  ;;  %v2906_v24 = vsel %vm8401_vm8, %v2904_v60, 0.0  ;;  %v3001_v44 = vpop.permute.xlu1 %3000  ;;  %v11078_v45 = vld [vmem:[#allocation138_spill] sm:$0xff] }
 0x3d2   :  { %v2903_v57 = vsel %vm11075_vm10, %v2900_v51, %v2902_v7  ;;  %v3102_v59 = vmul.f32 %v9073_v12, %v11076_v38  ;;  %v3101_v16 = vmul.f32 %v9070_v31, %v11076_v38  ;;  %v2897_v41 = vadd.f32 %v2895_v33, %v8783_v49  ;;  %v11080_v38 = vld [vmem:[#allocation72_spill] sm:$0xff] }
 0x3d3   :  { %11072 = vst [vmem:[#allocation163_spill] sm:$0xff] %v9115_v27  ;;  %11074 = vst [vmem:[#allocation55_spill] sm:$0xff] %v9119_v9  ;;  %v9138_v8 = vmul.f32 %v8705_v20, %v11077_v2  ;;  %v9142_v7 = vadd.f32 %v8945_v56, %v8941_v55  ;;  %v2898_v51 = vadd.f32 %v2896_v54, %v11078_v45  ;;  %v2928_v35 = vsel %vm8274_vm14, %v2927_v11, 0.0  ;;  %v11083_v2 = vld [vmem:[#allocation74_spill] sm:$0xff] }
 0x3d4   :  { %v3190_v49 = vmul.f32 %v9073_v12, %v11080_v38  ;;  %v3189_v33 = vmul.f32 %v9070_v31, %v11080_v38  ;;  %vm11081_vm12 = vcmp.lt.s32.totalorder %v10746_v14, 15  ;;  %v2959_v55 = vsel %vm2697_vm13, %v8951_v15, %v8957_v26  ;;  %v2943_v45 = vpop.permute.xlu0 %2942 }
 0x3d5   :  { %v2929_v60 = vsel %vm11081_vm12, %v2926_v39, 0.0  ;;  %v2960_v56 = vsel %vm2697_vm13, %v8957_v26, %v8951_v15  ;;  %vm11082_vm3 = vcmp.ge.s32.totalorder %v10745_v3, 2  ;;  %v9163_v11 = vadd.f32 %v2906_v24, %v2898_v51  ;;  %v2945_v15 = vpop.permute.xlu1 %2944  ;;  %v11085_v24 = vld [vmem:[#allocation76_spill] sm:$0xff] }
 0x3d6   :  { %v2905_v54 = vsel %vm11082_vm3, %v2903_v57, 0.0  ;;  %v3104_v38 = vadd.f32 %v3102_v59, %v8990_v42  ;;  %v3103_v39 = vadd.f32 %v3101_v16, %v8993_v37  ;;  %v3350_v63 = vmul.f32 %v9073_v12, %v11083_v2 }
 0x3d7   :  { %v2936_v10 = vsel %vm11061_vm5, %v2933_v23, %v2935_v34  ;;  %v2937_v9 = vsel %vm11084_vm7, %v2935_v34, %v2933_v23  ;;  %v3349_v26 = vmul.f32 %v9070_v31, %v11083_v2  ;;  %v3438_v57 = vmul.f32 %v9073_v12, %v11085_v24 }
 0x3d8   :  { %v2961_v42 = vsel %vm8151_vm6, %v2960_v56, 0.0  ;;  %vm11086_vm11 = vcmp.lt.s32.totalorder %v10746_v14, 14  ;;  %v9181_v37 = vadd.f32 %v2905_v54, %v2897_v41  ;;  %v3437_v59 = vmul.f32 %v9070_v31, %v11085_v24  ;;  %v2976_v46 = vpop.permute.xlu0 %2975  ;;  %v11091_v24 = vld [vmem:[#allocation82_spill] sm:$0xff] }
 0x3d9   :  { %v2962_v16 = vsel %vm11086_vm11, %v2959_v55, 0.0  ;;  %v2930_v51 = vadd.f32 %v2928_v35, %v2920_v18  ;;  %v2931_v23 = vadd.f32 %v2929_v60, %v2921_v50  ;;  %v3192_v34 = vadd.f32 %v3190_v49, %v9012_v36  ;;  %v3760_v18 = vld [vmem:[%s10578_s29 + $0x210] sm:$0xff]  ;;  %v3761_v36 = vld [vmem:[%s10578_s29 + $0x218] sm:$0xff] }
 0x3da   :  { %v3191_v2 = vadd.f32 %v3189_v33, %v9015_v30  ;;  %vm11087_vm10 = vcmp.ge.s32.totalorder %v10745_v3, 1  ;;  %v2939_v56 = vsel %vm8345_vm9, %v2937_v9, 0.0  ;;  %v3110_v41 = vmul.f32 %v9163_v11, %v11088_v32 }
 0x3db   :  { %v2938_v27 = vsel %vm11087_vm10, %v2936_v10, 0.0  ;;  %v3352_v55 = vadd.f32 %v3350_v63, %v9018_v1  ;;  %v2963_v35 = vadd.f32 %v3760_v18, %v2961_v42  ;;  %v2964_v30 = vadd.f32 %v3761_v36, %v2962_v16  ;;  %v2978_v10 = vpop.permute.xlu1 %2977 }
 0x3dc   :  { %vm11089_vm12 = vcmp.lt.s32.totalorder %v4103_v21, 98  ;;  %v3351_v9 = vadd.f32 %v3349_v26, %v9021_v22  ;;  %v3109_v1 = vmul.f32 %v9181_v37, %v11088_v32  ;;  %v3440_v63 = vadd.f32 %v3438_v57, %v9042_v61  ;;  %v3009_v32 = vpop.permute.xlu0 %3008  ;;  %v11093_v57 = vld [vmem:[#allocation84_spill] sm:$0xff] }
 0x3dd   :  { %v2947_v50 = vsel %vm11089_vm12, %v2945_v15, %v2943_v45  ;;  %vm11090_vm3 = vmmov %vm11089_vm12  ;;  %v3439_v33 = vadd.f32 %v3437_v59, %v9045_v40  ;;  %v2940_v60 = vadd.f32 %v2938_v27, %v2930_v51  ;;  %v2941_v54 = vadd.f32 %v2939_v56, %v2931_v23 }
 0x3de   :  { %v2946_v49 = vsel %vm11090_vm3, %v2943_v45, %v2945_v15  ;;  %v3198_v42 = vmul.f32 %v9163_v11, %v11091_v24  ;;  %v3197_v16 = vmul.f32 %v9181_v37, %v11091_v24  ;;  %v2969_v22 = vsel %vm2708_vm2, %v9079_v47, %v9081_v48 }
 0x3df   :  { %v2970_v61 = vsel %vm2708_vm2, %v9081_v48, %v9079_v47  ;;  %v2949_v40 = vsel %vm8401_vm8, %v2947_v50, 0.0  ;;  %v3112_v27 = vadd.f32 %v3110_v41, %v3104_v38  ;;  %v3003_v45 = vsel %vm2697_vm13, %v3001_v44, %v9127_v5  ;;  %v3011_v26 = vpop.permute.xlu1 %3010  ;;  %v11094_v38 = vld [vmem:[#allocation86_spill] sm:$0xff] }
 0x3e0   :  { %vm11092_vm5 = vcmp.ge.s32.totalorder %v10745_v3, 2  ;;  %v3358_v59 = vmul.f32 %v9163_v11, %v11093_v57  ;;  %v3357_v51 = vmul.f32 %v9181_v37, %v11093_v57  ;;  %v3002_v47 = vsel %vm2697_vm13, %v9127_v5, %v3001_v44 }
 0x3e1   :  { %v2948_v15 = vsel %vm11092_vm5, %v2946_v49, 0.0  ;;  %v3111_v48 = vadd.f32 %v3109_v1, %v3103_v39  ;;  %v3446_v23 = vmul.f32 %v9163_v11, %v11094_v38  ;;  %v3445_v56 = vmul.f32 %v9181_v37, %v11094_v38  ;;  %v3042_v49 = vpop.permute.xlu0 %3041 }
 0x3e2   :  { %v2971_v41 = vsel %vm8274_vm14, %v2970_v61, 0.0  ;;  %vm11095_vm7 = vcmp.lt.s32.totalorder %v10746_v14, 15  ;;  %v9243_v36 = vadd.f32 %v2949_v40, %v2941_v54  ;;  %vm11096_vm11 = vcmp.lt.s32.totalorder %v4103_v21, 113 }
 0x3e3   :  { %v2972_v18 = vsel %vm11095_vm7, %v2969_v22, 0.0  ;;  %v2979_v50 = vsel %vm11096_vm11, %v2976_v46, %v2978_v10  ;;  %v3004_v44 = vsel %vm8151_vm6, %v3003_v45, 0.0  ;;  %v9249_v5 = vadd.f32 %v2948_v15, %v2940_v60  ;;  %vm11097_vm10 = vmmov %vm11096_vm11  ;;  %v3044_v61 = vpop.permute.xlu1 %3043  ;;  %v3762_v60 = vld [vmem:[%s10578_s29 + $0x220] sm:$0xff] }
 0x3e4   :  { %v2980_v39 = vsel %vm11097_vm10, %v2978_v10, %v2976_v46  ;;  %v3200_v1 = vadd.f32 %v3198_v42, %v3192_v34  ;;  %vm11098_vm12 = vcmp.lt.s32.totalorder %v10746_v14, 14  ;;  %v3199_v22 = vadd.f32 %v3197_v16, %v3191_v2  ;;  %v11100_v10 = vld [vmem:[#allocation90_spill] sm:$0xff] }
 0x3e5   :  { %v3005_v24 = vsel %vm11098_vm12, %v3002_v47, 0.0  ;;  %v3360_v54 = vadd.f32 %v3358_v59, %v3352_v55  ;;  %v3359_v40 = vadd.f32 %v3357_v51, %v3351_v9  ;;  %v2973_v57 = vadd.f32 %v2971_v41, %v2963_v35  ;;  %v3763_v55 = vld [vmem:[%s10578_s29 + $0x228] sm:$0xff]  ;;  %v11102_v47 = vld [vmem:[#allocation75_spill] sm:$0xff] }
 0x3e6   :  { %v2974_v38 = vadd.f32 %v2972_v18, %v2964_v30  ;;  %vm11099_vm3 = vcmp.ge.s32.totalorder %v10745_v3, 1  ;;  %v3448_v45 = vadd.f32 %v3446_v23, %v3440_v63  ;;  %v3006_v46 = vadd.f32 %v3762_v60, %v3004_v44  ;;  %v2986_v30 = vpop.permute.xlu0 %2985  ;;  %v11101_v63 = vld [vmem:[#allocation92_spill] sm:$0xff] }
 0x3e7   :  { %v2981_v62 = vsel %vm11099_vm3, %v2979_v50, 0.0  ;;  %v2982_v34 = vsel %vm8345_vm9, %v2980_v39, 0.0  ;;  %v3118_v42 = vmul.f32 %v9243_v36, %v11100_v10  ;;  %v3447_v2 = vadd.f32 %v3445_v56, %v3439_v33  ;;  %v2988_v51 = vpop.permute.xlu1 %2987  ;;  %v11103_v56 = vld [vmem:[#allocation85_spill] sm:$0xff]  ;;  %v11104_v39 = vld [vmem:[#allocation94_spill] sm:$0xff] }
 0x3e8   :  { %v3007_v35 = vadd.f32 %v3763_v55, %v3005_v24  ;;  %v3117_v9 = vmul.f32 %v9249_v5, %v11100_v10  ;;  %v3206_v16 = vmul.f32 %v9243_v36, %v11101_v63  ;;  %v3348_v15 = vadd.f32 %v9138_v8, %v8937_v17 }
 0x3e9   :  { %v2983_v59 = vadd.f32 %v2981_v62, %v2973_v57  ;;  %v3205_v33 = vmul.f32 %v9249_v5, %v11101_v63  ;;  %v3354_v23 = vmul.f32 %v9073_v12, %v11102_v47  ;;  %v3362_v41 = vmul.f32 %v9163_v11, %v11103_v56 }
 0x3ea   :  { %v2984_v18 = vadd.f32 %v2982_v34, %v2974_v38  ;;  %v3012_v50 = vsel %vm2708_vm2, %v3009_v32, %v3011_v26  ;;  %v3013_v44 = vsel %vm2708_vm2, %v3011_v26, %v3009_v32  ;;  %v3366_v17 = vmul.f32 %v9243_v36, %v11104_v39  ;;  %v3019_v26 = vpop.permute.xlu0 %3018 }
 0x3eb   :  { %vm11105_vm5 = vcmp.lt.s32.totalorder %v4103_v21, 98  ;;  %v9289_v24 = vadd.f32 %v3118_v42, %v3112_v27  ;;  %v3365_v57 = vmul.f32 %v9249_v5, %v11104_v39  ;;  %v3045_v38 = vsel %vm2697_vm13, %v3042_v49, %v3044_v61  ;;  %v3021_v42 = vpop.permute.xlu1 %3020 }
 0x3ec   :  { %v2989_v62 = vsel %vm11105_vm5, %v2986_v30, %v2988_v51  ;;  %vm11106_vm7 = vmmov %vm11105_vm5  ;;  %v3046_v32 = vsel %vm2697_vm13, %v3044_v61, %v3042_v49  ;;  %v9297_v60 = vadd.f32 %v3117_v9, %v3111_v48  ;;  %v9299_v34 = vadd.f32 %v3206_v16, %v3200_v1 }
 0x3ed   :  { %v2990_v8 = vsel %vm11106_vm7, %v2988_v51, %v2986_v30  ;;  %v3014_v10 = vsel %vm8274_vm14, %v3013_v44, 0.0  ;;  %vm11107_vm11 = vcmp.lt.s32.totalorder %v10746_v14, 15  ;;  %v9305_v55 = vadd.f32 %v3205_v33, %v3199_v22  ;;  %v11108_v30 = vld [vmem:[#allocation96_spill] sm:$0xff] }
 0x3ee   :  { %v3015_v27 = vsel %vm11107_vm11, %v3012_v50, 0.0  ;;  %v3454_v63 = vmul.f32 %v9243_v36, %v11108_v30  ;;  %vm11109_vm10 = vcmp.ge.s32.totalorder %v10745_v3, 2  ;;  %v2992_v48 = vsel %vm8401_vm8, %v2990_v8, 0.0  ;;  %v11110_v51 = vld [vmem:[#allocation68_spill] sm:$0xff]  ;;  %v3052_v39 = vpop.permute.xlu0 %3051 }
 0x3ef   :  { %v2991_v49 = vsel %vm11109_vm10, %v2989_v62, 0.0  ;;  %v9313_v1 = vadd.f32 %v3366_v17, %v3360_v54  ;;  %v3453_v61 = vmul.f32 %v9249_v5, %v11108_v30  ;;  %v3047_v9 = vsel %vm8151_vm6, %v3046_v32, 0.0  ;;  %v11111_v54 = vld [vmem:[#allocation95_spill] sm:$0xff] }
 0x3f0   :  { %v3048_v22 = vsel %vm11098_vm12, %v3045_v38, 0.0  ;;  %v9321_v16 = vadd.f32 %v3365_v57, %v3359_v40  ;;  %v3433_v33 = vmul.f32 %v8702_v29, %v11110_v51  ;;  %v3016_v50 = vadd.f32 %v3014_v10, %v3006_v46  ;;  %v3054_v57 = vpop.permute.xlu1 %3053  ;;  %v3764_v46 = vld [vmem:[%s10578_s29 + $0x230] sm:$0xff] }
 0x3f1   :  { %v3017_v44 = vadd.f32 %v3015_v27, %v3007_v35  ;;  %v3356_v62 = vadd.f32 %v3354_v23, %v3348_v15  ;;  %v3370_v17 = vmul.f32 %v9243_v36, %v11111_v54  ;;  %v9327_v8 = vadd.f32 %v2991_v49, %v2983_v59  ;;  %v3765_v15 = vld [vmem:[%s10578_s29 + $0x238] sm:$0xff]  ;;  %v11114_v27 = vld [vmem:[#allocation77_spill] sm:$0xff] }
 0x3f2   :  { %v9329_v30 = vadd.f32 %v2992_v48, %v2984_v18  ;;  %vm11112_vm3 = vcmp.lt.s32.totalorder %v4103_v21, 113  ;;  %v3049_v35 = vadd.f32 %v3764_v46, %v3047_v9  ;;  %v3050_v59 = vadd.f32 %v3765_v15, %v3048_v22  ;;  %v3029_v22 = vpop.permute.xlu0 %3028 }
 0x3f3   :  { %v3022_v32 = vsel %vm11112_vm3, %v3019_v26, %v3021_v42  ;;  %vm11113_vm5 = vmmov %vm11112_vm3  ;;  %v9341_v23 = vadd.f32 %v3454_v63, %v3448_v45  ;;  %v9343_v18 = vadd.f32 %v3453_v61, %v3447_v2  ;;  %v3364_v38 = vadd.f32 %v3362_v41, %v3356_v62  ;;  %v11117_v45 = vld [vmem:[#allocation97_spill] sm:$0xff]  ;;  %v11118_v63 = vld [vmem:[#allocation100_spill] sm:$0xff] }
 0x3f4   :  { %v3023_v40 = vsel %vm11113_vm5, %v3021_v42, %v3019_v26  ;;  %v3435_v10 = vadd.f32 %v3433_v33, %v9142_v7  ;;  %v3441_v26 = vmul.f32 %v9070_v31, %v11114_v27  ;;  %v11115_v42 = vld [vmem:[#allocation87_spill] sm:$0xff]  ;;  %vm11116_vm7 = vcmp.ge.s32.totalorder %v10745_v3, 1  ;;  %v3031_v41 = vpop.permute.xlu1 %3030  ;;  %v11119_v62 = vld [vmem:[#allocation102_spill] sm:$0xff] }
 0x3f5   :  { %v3449_v49 = vmul.f32 %v9181_v37, %v11115_v42  ;;  %v3024_v48 = vsel %vm11116_vm7, %v3022_v32, 0.0  ;;  %v3025_v9 = vsel %vm8345_vm9, %v3023_v40, 0.0  ;;  %v9356_v2 = vmul.f32 %v9249_v5, %v11117_v45  ;;  %v11124_v42 = vld [vmem:[#allocation69_spill] sm:$0xff]  ;;  %vm11126_vm7 = vmmov %vm11113_vm5 }
 0x3f6   :  { %v9360_v7 = vmul.f32 %v8479_v53, %v11041_v25  ;;  %v3126_v61 = vmul.f32 %v9329_v30, %v11118_v63  ;;  %v3125_v33 = vmul.f32 %v9327_v8, %v11118_v63  ;;  %v3214_v32 = vmul.f32 %v9329_v30, %v11119_v62 }
 0x3f7   :  { %v3372_v40 = vadd.f32 %v3370_v17, %v3364_v38  ;;  %v3055_v46 = vsel %vm2708_vm2, %v3052_v39, %v3054_v57  ;;  %v3056_v15 = vsel %vm2708_vm2, %v3054_v57, %v3052_v39  ;;  %vm11120_vm11 = vcmp.lt.s32.totalorder %v4103_v21, 98  ;;  %v3062_v38 = vpop.permute.xlu0 %3061  ;;  %v11123_v39 = vld [vmem:[#allocation47_spill] sm:$0xff] }
 0x3f8   :  { %v3032_v25 = vsel %vm11120_vm11, %v3029_v22, %v3031_v41  ;;  %vm11121_vm10 = vmmov %vm11120_vm11  ;;  %v3026_v54 = vadd.f32 %v3024_v48, %v3016_v50  ;;  %v3027_v56 = vadd.f32 %v3025_v9, %v3017_v44  ;;  %vm11122_vm12 = vcmp.ge.s32.totalorder %v10745_v3, 2  ;;  %v3064_v9 = vpop.permute.xlu1 %3063 }
 0x3f9   :  { %v3033_v6 = vsel %vm11121_vm10, %v3031_v41, %v3029_v22  ;;  %v3034_v63 = vsel %vm11122_vm12, %v3032_v25, 0.0  ;;  %v3213_v47 = vmul.f32 %v9327_v8, %v11119_v62  ;;  %v3443_v45 = vadd.f32 %v3441_v26, %v3435_v10  ;;  %vm11131_vm12 = vmmov %vm11121_vm10 }
 0x3fa   :  { %v3035_v17 = vsel %vm8401_vm8, %v3033_v6, 0.0  ;;  %v9384_v57 = vadd.f32 %v11123_v39, %v8949_v13  ;;  %v9388_v22 = vmul.f32 %v8702_v29, %v11124_v42  ;;  %v3057_v50 = vsel %vm8274_vm14, %v3056_v15, 0.0 }
 0x3fb   :  { %vm11125_vm3 = vcmp.lt.s32.totalorder %v10746_v14, 15  ;;  %v9394_v6 = vadd.f32 %v3034_v63, %v3026_v54  ;;  %v9396_v48 = vadd.f32 %v3035_v17, %v3027_v56  ;;  %v3065_v10 = vsel %vm11113_vm5, %v3062_v38, %v3064_v9  ;;  %v3072_v17 = vpop.permute.xlu0 %3071 }
 0x3fc   :  { %v3058_v44 = vsel %vm11125_vm3, %v3055_v46, 0.0  ;;  %v3066_v13 = vsel %vm11126_vm7, %v3064_v9, %v3062_v38  ;;  %v3128_v26 = vadd.f32 %v3126_v61, %v9289_v24  ;;  %v3127_v41 = vadd.f32 %v3125_v33, %v9297_v60  ;;  %v11128_v46 = vld [vmem:[#allocation104_spill] sm:$0xff]  ;;  %v11129_v24 = vld [vmem:[#allocation106_spill] sm:$0xff]  ;;  %v3074_v61 = vpop.permute.xlu1 %3073 }
 0x3fd   :  { %vm11127_vm11 = vcmp.ge.s32.totalorder %v10745_v3, 1  ;;  %v3068_v54 = vsel %vm8345_vm9, %v3066_v13, 0.0  ;;  %v3216_v56 = vadd.f32 %v3214_v32, %v9299_v34  ;;  %v3374_v15 = vmul.f32 %v9329_v30, %v11128_v46  ;;  %v11130_v33 = vld [vmem:[#allocation110_spill] sm:$0xff] }
 0x3fe   :  { %v3067_v62 = vsel %vm11127_vm11, %v3065_v10, 0.0  ;;  %v3059_v25 = vadd.f32 %v3057_v50, %v3049_v35  ;;  %v3060_v63 = vadd.f32 %v3058_v44, %v3050_v59  ;;  %v3373_v38 = vmul.f32 %v9327_v8, %v11128_v46 }
 0x3ff   :  { %v3462_v60 = vmul.f32 %v9329_v30, %v11129_v24  ;;  %v3134_v39 = vmul.f32 %v9396_v48, %v11130_v33  ;;  %v3133_v9 = vmul.f32 %v9394_v6, %v11130_v33  ;;  %v3215_v34 = vadd.f32 %v3213_v47, %v9305_v55  ;;  %v11133_v47 = vld [vmem:[#allocation105_spill] sm:$0xff] }
 0x400   :  { %v3461_v35 = vmul.f32 %v9327_v8, %v11129_v24  ;;  %v3069_v59 = vadd.f32 %v3067_v62, %v3059_v25  ;;  %v3070_v32 = vadd.f32 %v3068_v54, %v3060_v63  ;;  %v3075_v50 = vsel %vm11121_vm10, %v3072_v17, %v3074_v61  ;;  %v11134_v63 = vld [vmem:[#allocation112_spill] sm:$0xff] }
 0x401   :  { %v3076_v44 = vsel %vm11131_vm12, %v3074_v61, %v3072_v17  ;;  %vm11132_vm3 = vcmp.ge.s32.totalorder %v10745_v3, 2  ;;  %v3376_v46 = vadd.f32 %v3374_v15, %v9313_v1  ;;  %v3378_v55 = vmul.f32 %v9329_v30, %v11133_v47 }
 0x402   :  { %v3077_v10 = vsel %vm11132_vm3, %v3075_v50, 0.0  ;;  %v3078_v13 = vsel %vm8401_vm8, %v3076_v44, 0.0  ;;  %v3375_v54 = vadd.f32 %v3373_v38, %v9321_v16  ;;  %v3464_v25 = vadd.f32 %v3462_v60, %v9341_v23  ;;  %v11135_v50 = vld [vmem:[#allocation118_spill] sm:$0xff] }
 0x403   :  { %v9433_v24 = vadd.f32 %v3077_v10, %v3069_v59  ;;  %v9435_v62 = vadd.f32 %v3078_v13, %v3070_v32  ;;  %v3222_v17 = vmul.f32 %v9396_v48, %v11134_v63  ;;  %v3221_v61 = vmul.f32 %v9394_v6, %v11134_v63  ;;  %v11136_v16 = vld [vmem:[#allocation114_spill] sm:$0xff] }
 0x404   :  { %v3463_v33 = vadd.f32 %v3461_v35, %v9343_v18  ;;  %v3451_v1 = vadd.f32 %v3449_v49, %v3443_v45  ;;  %v3136_v15 = vadd.f32 %v3134_v39, %v3128_v26  ;;  %v3135_v44 = vadd.f32 %v3133_v9, %v3127_v41  ;;  %v11137_v49 = vld [vmem:[#allocation121_spill] sm:$0xff]  ;;  %v11139_v35 = vld [vmem:[#allocation107_spill] sm:$0xff] }
 0x405   :  { %v3142_v59 = vmul.f32 %v9435_v62, %v11135_v50  ;;  %v3141_v32 = vmul.f32 %v9433_v24, %v11135_v50  ;;  %v3382_v23 = vmul.f32 %v9396_v48, %v11136_v16  ;;  %v3381_v38 = vmul.f32 %v9394_v6, %v11136_v16  ;;  %v11138_v39 = vld [vmem:[#allocation6_spill] sm:$0xff]  ;;  %v11140_v50 = vld [vmem:[#allocation46_spill] sm:$0xff] }
 0x406   :  { %v3380_v60 = vadd.f32 %v3378_v55, %v3372_v40  ;;  %v3459_v10 = vadd.f32 %v9356_v2, %v3451_v1  ;;  %v3230_v45 = vmul.f32 %v9435_v62, %v11137_v49  ;;  %v3229_v26 = vmul.f32 %v9433_v24, %v11137_v49  ;;  %v11141_v1 = vld [vmem:[#allocation116_spill] sm:$0xff] }
 0x407   :  { %v3144_v13 = vadd.f32 %v3142_v59, %v3136_v15  ;;  %v3143_v18 = vadd.f32 %v3141_v32, %v3135_v44  ;;  %v3224_v41 = vadd.f32 %v3222_v17, %v3216_v56  ;;  %v3390_v9 = vmul.f32 %v9435_v62, %v11138_v39  ;;  %v11142_v59 = vld [vmem:[#allocation130_spill] sm:$0xff] }
 0x408   :  { %v3465_v63 = vmul.f32 %v9327_v8, %v11139_v35  ;;  %v3264_v40 = vadd.f32 %v9360_v7, %v11140_v50  ;;  %v3223_v2 = vadd.f32 %v3221_v61, %v3215_v34  ;;  %v3389_v55 = vmul.f32 %v9433_v24, %v11138_v39  ;;  %v11143_v34 = vld [vmem:[#allocation129_spill] sm:$0xff] }
 0x409   :  { %3151 = vrot.lane.b32.xlu1 %v3144_v13, %s3793_s2  ;;  %3149 = vrot.lane.b32.xlu0 %v3143_v18, %s3793_s2  ;;  %v3470_v56 = vmul.f32 %v9396_v48, %v11141_v1  ;;  %v3384_v17 = vadd.f32 %v3382_v23, %v3376_v46  ;;  %v3383_v15 = vadd.f32 %v3381_v38, %v3375_v54  ;;  %vm11207_vm5 = vcmp.lt.s32.totalorder %v4103_v21, 34 }
 0x40a   :  { %v3478_v44 = vmul.f32 %v9435_v62, %v11142_v59  ;;  %v3469_v32 = vmul.f32 %v9394_v6, %v11141_v1  ;;  %v3232_v7 = vadd.f32 %v3230_v45, %v3224_v41  ;;  %v3231_v16 = vadd.f32 %v3229_v26, %v3223_v2  ;;  %v11144_v45 = vld [vmem:[#allocation132_spill] sm:$0xff]  ;;  %vm11208_vm7 = vmmov %vm11207_vm5 }
 0x40b   :  { %v3386_v13 = vmul.f32 %v9396_v48, %v11051_v0  ;;  %v3394_v61 = vmul.f32 %v9435_v62, %v11143_v34  ;;  %v3392_v18 = vadd.f32 %v3390_v9, %v3384_v17  ;;  %v3477_v49 = vmul.f32 %v9433_v24, %v11142_v59  ;;  %v11149_v59 = vld [vmem:[#allocation98_spill] sm:$0xff] }
 0x40c   :  { %v3467_v46 = vadd.f32 %v3465_v63, %v3459_v10  ;;  %v3473_v54 = vmul.f32 %v9394_v6, %v11053_v58  ;;  %v3391_v23 = vadd.f32 %v3389_v55, %v3383_v15  ;;  %v3481_v26 = vmul.f32 %v9433_v24, %v11144_v45  ;;  %v11145_v10 = vld [vmem:[#allocation78_spill] sm:$0xff]  ;;  %v11147_v55 = vld [vmem:[#allocation88_spill] sm:$0xff] }
 0x40d   :  { %3239 = vrot.lane.b32.xlu1 %v3232_v7, %s3794_s24  ;;  %3237 = vrot.lane.b32.xlu0 %v3231_v16, %s3794_s24  ;;  %v3388_v38 = vadd.f32 %v3386_v13, %v3380_v60  ;;  %v3270_v39 = vmul.f32 %v8705_v20, %v11124_v42  ;;  %v3271_v9 = vadd.f32 %v9388_v22, %v9384_v57  ;;  %v11150_v16 = vld [vmem:[#allocation120_spill] sm:$0xff]  ;;  %v11151_v13 = vld [vmem:[#allocation155_spill] sm:$0xff]  ;;  %vm11210_vm11 = vcmp.ge.s32.totalorder %v10746_v14, 2 }
 0x40e   :  { %v3475_v41 = vadd.f32 %v3473_v54, %v3467_v46  ;;  %v3277_v63 = vmul.f32 %v9070_v31, %v11145_v10  ;;  %v3278_v2 = vmul.f32 %v9073_v12, %v11145_v10  ;;  %v3285_v60 = vmul.f32 %v9181_v37, %v11147_v55  ;;  %v11155_v10 = vld [vmem:[#allocation117_spill] sm:$0xff] }
 0x40f   :  { %v9491_v50 = vadd.f32 %v3394_v61, %v3388_v38  ;;  %v3286_v1 = vmul.f32 %v9163_v11, %v11147_v55  ;;  %v3272_v42 = vadd.f32 %v3270_v39, %v3264_v40  ;;  %v3293_v57 = vmul.f32 %v9249_v5, %v11149_v59  ;;  %v11158_v55 = vld [vmem:[#allocation122_spill] sm:$0xff] }
 0x410   :  { %v9499_v17 = vadd.f32 %v3481_v26, %v3475_v41  ;;  %v3279_v15 = vadd.f32 %v3277_v63, %v3271_v9  ;;  %v3472_v22 = vadd.f32 %v3470_v56, %v3464_v25  ;;  %v3471_v7 = vadd.f32 %v3469_v32, %v3463_v33  ;;  %v11152_v26 = vld [vmem:[#allocation108_spill] sm:$0xff]  ;;  %v11153_v9 = vld [vmem:[#allocation157_spill] sm:$0xff] }
 0x411   :  { %11146 = vst [vmem:[#allocation45_spill] sm:$0xff] %v9491_v50  ;;  %3399 = vrot.lane.b32.xlu1 %v3392_v18, %s3795_s20  ;;  %3397 = vrot.lane.b32.xlu0 %v3391_v23, %s3795_s20  ;;  %v2322_v61 = vmul.f32 %v11151_v13, %v11150_v16  ;;  %v3280_v46 = vadd.f32 %v3278_v2, %v3272_v42  ;;  %v11154_v23 = vld [vmem:[#allocation158_spill] sm:$0xff]  ;;  %v11179_v50 = vld [vmem:[#allocation152_spill] sm:$0xff]  ;;  %vm11216_vm10 = vcmp.lt.s32.totalorder %v4103_v21, 17  ;;  %vm11219_vm3 = vcmp.ge.s32.totalorder %v10746_v14, 1 }
 0x412   :  { %11148 = vst [vmem:[#allocation53_spill] sm:$0xff] %v9499_v17  ;;  %v3287_v54 = vadd.f32 %v3285_v60, %v3279_v15  ;;  %v3294_v38 = vmul.f32 %v9243_v36, %v11149_v59  ;;  %v3301_v40 = vmul.f32 %v9327_v8, %v11152_v26  ;;  %v3480_v41 = vadd.f32 %v3478_v44, %v3472_v22  ;;  %v11156_v44 = vld [vmem:[#allocation49_spill] sm:$0xff]  ;;  %v11159_v15 = vld [vmem:[#allocation124_spill] sm:$0xff]  ;;  %v11160_v22 = vld [vmem:[#allocation39_spill] sm:$0xff] }
 0x413   :  { %v3479_v39 = vadd.f32 %v3477_v49, %v3471_v7  ;;  %v9513_v18 = vadd.f32 %v9101_v19, %v11153_v9  ;;  %v9517_v25 = vadd.f32 %v9105_v52, %v11154_v23  ;;  %v3288_v33 = vadd.f32 %v3286_v1, %v3280_v46  ;;  %v11157_v19 = vld [vmem:[#allocation156_spill] sm:$0xff]  ;;  %v11161_v7 = vld [vmem:[#allocation150_spill] sm:$0xff]  ;;  %v11176_v17 = vld [vmem:[#allocation81_spill] sm:$0xff] }
 0x414   :  { %v3295_v56 = vadd.f32 %v3293_v57, %v3287_v54  ;;  %v3302_v32 = vmul.f32 %v9329_v30, %v11152_v26  ;;  %v3309_v63 = vmul.f32 %v9394_v6, %v11155_v10  ;;  %v2324_v49 = vadd.f32 %v2322_v61, %v11156_v44  ;;  %v11162_v46 = vld [vmem:[#allocation48_spill] sm:$0xff]  ;;  %v11163_v54 = vld [vmem:[#allocation151_spill] sm:$0xff]  ;;  %vm11217_vm12 = vmmov %vm11216_vm10 }
 0x415   :  { %3487 = vrot.lane.b32.xlu1 %v3480_v41, %s3796_s1  ;;  %3485 = vrot.lane.b32.xlu0 %v3479_v39, %s3796_s1  ;;  %v2323_v2 = vmul.f32 %v11157_v19, %v11150_v16  ;;  %v2410_v52 = vmul.f32 %v11151_v13, %v11158_v55  ;;  %v3296_v60 = vadd.f32 %v3294_v38, %v3288_v33  ;;  %v11164_v41 = vld [vmem:[#allocation62_spill] sm:$0xff]  ;;  %v11165_v38 = vld [vmem:[#allocation159_spill] sm:$0xff] }
 0x416   :  { %v3303_v1 = vadd.f32 %v3301_v40, %v3295_v56  ;;  %v3310_v42 = vmul.f32 %v9396_v48, %v11155_v10  ;;  %v3317_v59 = vmul.f32 %v9433_v24, %v11159_v15  ;;  %v2411_v57 = vmul.f32 %v11157_v19, %v11158_v55  ;;  %v11166_v40 = vld [vmem:[#allocation163_spill] sm:$0xff]  ;;  %v11168_v10 = vld [vmem:[#allocation38_spill] sm:$0xff] }
 0x417   :  { %v3083_v61 = vmul.f32 %v11161_v7, %v11160_v22  ;;  %v3089_v26 = vmul.f32 %v11163_v54, %v11162_v46  ;;  %v3097_v39 = vmul.f32 %v8702_v29, %v11164_v41  ;;  %v9544_v9 = vadd.f32 %v11166_v40, %v11165_v38  ;;  %v11169_v44 = vld [vmem:[#allocation55_spill] sm:$0xff]  ;;  %v11172_v40 = vld [vmem:[#allocation52_spill] sm:$0xff] }
 0x418   :  { %v3304_v23 = vadd.f32 %v3302_v32, %v3296_v60  ;;  %v3311_v33 = vadd.f32 %v3309_v63, %v3303_v1  ;;  %v3318_v56 = vmul.f32 %v9435_v62, %v11159_v15  ;;  %v9551_v22 = vadd.f32 %v11169_v44, %v11168_v10  ;;  %v11175_v10 = vld [vmem:[#allocation161_spill] sm:$0xff] }
 0x419   :  { %11167 = vst [vmem:[#allocation60_spill] sm:$0xff] %v9544_v9  ;;  %2336 = vrot.lane.b32.xlu1 %v2324_v49, %s3789_s22  ;;  %v9555_v46 = vmul.f32 %v8705_v20, %v11170_v28  ;;  %v3091_v41 = vadd.f32 %v3089_v26, %v3083_v61  ;;  %v3105_v38 = vmul.f32 %v9070_v31, %v11171_v4  ;;  %v11174_v49 = vld [vmem:[#allocation160_spill] sm:$0xff]  ;;  %v11178_v26 = vld [vmem:[#allocation50_spill] sm:$0xff] }
 0x41a   :  { %v2325_v32 = vadd.f32 %v2323_v2, %v11172_v40  ;;  %v2570_v63 = vmul.f32 %v11151_v13, %v11143_v34  ;;  %v3312_v60 = vadd.f32 %v3310_v42, %v3304_v23  ;;  %v9562_v1 = vadd.f32 %v3317_v59, %v3311_v33  ;;  %v11180_v2 = vld [vmem:[#allocation57_spill] sm:$0xff]  ;;  %v11181_v59 = vld [vmem:[#allocation91_spill] sm:$0xff] }
 0x41b   :  { %v2412_v43 = vadd.f32 %v2410_v52, %v11174_v49  ;;  %v2413_v44 = vadd.f32 %v2411_v57, %v11175_v10  ;;  %v3099_v3 = vadd.f32 %v3097_v39, %v3091_v41  ;;  %v3113_v28 = vmul.f32 %v9181_v37, %v11176_v17  ;;  %v11182_v39 = vld [vmem:[#allocation101_spill] sm:$0xff]  ;;  %v11183_v33 = vld [vmem:[#allocation111_spill] sm:$0xff] }
 0x41c   :  { %11173 = vst [vmem:[#allocation58_spill] sm:$0xff] %v9562_v1  ;;  %v9568_v61 = vadd.f32 %v3318_v56, %v3312_v60  ;;  %v3420_v0 = vmul.f32 %v11179_v50, %v11178_v26  ;;  %v3426_v40 = vmul.f32 %v8479_v53, %v11180_v2  ;;  %v3434_v42 = vmul.f32 %v8705_v20, %v11110_v51  ;;  %v11184_v49 = vld [vmem:[#allocation87_spill] sm:$0xff]  ;;  %v11185_v51 = vld [vmem:[#allocation54_spill] sm:$0xff]  ;;  %v11186_v26 = vld [vmem:[#allocation61_spill] sm:$0xff] }
 0x41d   :  { %2338 = vrot.lane.b32.xlu1 %v2325_v32, %s3789_s22  ;;  %v3107_v52 = vadd.f32 %v3105_v38, %v3099_v3  ;;  %v3121_v57 = vmul.f32 %v9249_v5, %v11181_v59  ;;  %v3129_v23 = vmul.f32 %v9327_v8, %v11182_v39  ;;  %v3137_v56 = vmul.f32 %v9394_v6, %v11183_v33  ;;  %v11188_v1 = vld [vmem:[#allocation89_spill] sm:$0xff] }
 0x41e   :  { %11177 = vst [vmem:[#allocation63_spill] sm:$0xff] %v9568_v61  ;;  %v3428_v41 = vadd.f32 %v3426_v40, %v3420_v0  ;;  %v3442_v60 = vmul.f32 %v9073_v12, %v11114_v27  ;;  %v3450_v10 = vmul.f32 %v9163_v11, %v11184_v49  ;;  %v3259_v32 = vmul.f32 %v11161_v7, %v11185_v51  ;;  %v11187_v40 = vld [vmem:[#allocation79_spill] sm:$0xff] }
 0x41f   :  { %v3115_v3 = vadd.f32 %v3113_v28, %v3107_v52  ;;  %v3260_v38 = vmul.f32 %v11179_v50, %v11185_v51  ;;  %v3265_v2 = vmul.f32 %v11163_v54, %v11186_v26  ;;  %v3266_v61 = vmul.f32 %v8479_v53, %v11186_v26  ;;  %v11190_v26 = vld [vmem:[#allocation99_spill] sm:$0xff] }
 0x420   :  { %v3436_v0 = vadd.f32 %v3434_v42, %v3428_v41  ;;  %v3273_v27 = vmul.f32 %v8702_v29, %v11187_v40  ;;  %v3274_v49 = vmul.f32 %v8705_v20, %v11187_v40  ;;  %v3281_v7 = vmul.f32 %v9070_v31, %v11188_v1  ;;  %v11189_v41 = vld [vmem:[#allocation97_spill] sm:$0xff] }
 0x421   :  { %2424 = vrot.lane.b32.xlu1 %v2412_v43, %s3790_s4  ;;  %v3123_v28 = vadd.f32 %v3121_v57, %v3115_v3  ;;  %v3267_v50 = vadd.f32 %v3265_v2, %v3259_v32  ;;  %v3268_v52 = vadd.f32 %v3266_v61, %v3260_v38  ;;  %v3282_v54 = vmul.f32 %v9073_v12, %v11188_v1  ;;  %v11191_v61 = vld [vmem:[#allocation56_spill] sm:$0xff]  ;;  %v11192_v3 = vld [vmem:[#allocation109_spill] sm:$0xff] }
 0x422   :  { %v3145_v53 = vmul.f32 %v9433_v24, %v11150_v16  ;;  %v3444_v42 = vadd.f32 %v3442_v60, %v3436_v0  ;;  %v3458_v51 = vmul.f32 %v9243_v36, %v11189_v41  ;;  %v3289_v20 = vmul.f32 %v9181_v37, %v11190_v26 }
 0x423   :  { %v3131_v40 = vadd.f32 %v3129_v23, %v3123_v28  ;;  %v3275_v47 = vadd.f32 %v3273_v27, %v3267_v50  ;;  %v3276_v9 = vadd.f32 %v3274_v49, %v3268_v52  ;;  %v3290_v43 = vmul.f32 %v9163_v11, %v11190_v26 }
 0x424   :  { %v2572_v57 = vadd.f32 %v2570_v63, %v11191_v61  ;;  %v3452_v32 = vadd.f32 %v3450_v10, %v3444_v42  ;;  %v3466_v1 = vmul.f32 %v9329_v30, %v11139_v35  ;;  %v3297_v60 = vmul.f32 %v9249_v5, %v11192_v3  ;;  %v11193_v10 = vld [vmem:[#allocation119_spill] sm:$0xff] }
 0x425   :  { %2426 = vrot.lane.b32.xlu1 %v2413_v44, %s3790_s4  ;;  %v3139_v38 = vadd.f32 %v3137_v56, %v3131_v40  ;;  %v3283_v2 = vadd.f32 %v3281_v7, %v3275_v47  ;;  %v3284_v0 = vadd.f32 %v3282_v54, %v3276_v9  ;;  %v3298_v23 = vmul.f32 %v9243_v36, %v11192_v3  ;;  %s11236_s4 = sld [smem:[#allocation168_spill]] }
 0x426   :  { %v2571_v27 = vmul.f32 %v11157_v19, %v11143_v34  ;;  %v3460_v49 = vadd.f32 %v3458_v51, %v3452_v32  ;;  %v3474_v63 = vmul.f32 %v9396_v48, %v11053_v58  ;;  %v3305_v35 = vmul.f32 %v9327_v8, %v11193_v10  ;;  %v11195_v51 = vld [vmem:[#allocation162_spill] sm:$0xff] }
 0x427   :  { %v9626_v28 = vadd.f32 %v3145_v53, %v3139_v38  ;;  %v3291_v50 = vadd.f32 %v3289_v20, %v3283_v2  ;;  %v3292_v44 = vadd.f32 %v3290_v43, %v3284_v0  ;;  %v3306_v47 = vmul.f32 %v9329_v30, %v11193_v10  ;;  %v11194_v53 = vld [vmem:[#allocation125_spill] sm:$0xff]  ;;  %v11198_v2 = vld [vmem:[#allocation66_spill] sm:$0xff] }
 0x428   :  { %v2658_v9 = vmul.f32 %v11151_v13, %v11144_v45  ;;  %v3106_v56 = vmul.f32 %v9073_v12, %v11171_v4  ;;  %v3468_v7 = vadd.f32 %v3466_v1, %v3460_v49  ;;  %v3482_v58 = vmul.f32 %v9435_v62, %v11144_v45 }
 0x429   :  { %2584 = vrot.lane.b32.xlu1 %v2572_v57, %s3791_s12  ;;  %v3299_v52 = vadd.f32 %v3297_v60, %v3291_v50  ;;  %v3300_v54 = vadd.f32 %v3298_v23, %v3292_v44  ;;  %v3313_v42 = vmul.f32 %v9394_v6, %v11194_v53  ;;  %v3314_v41 = vmul.f32 %v9396_v48, %v11194_v53  ;;  %v11196_v57 = vld [vmem:[#allocation123_spill] sm:$0xff]  ;;  %v11197_v60 = vld [vmem:[#allocation73_spill] sm:$0xff] }
 0x42a   :  { %v2573_v26 = vadd.f32 %v2571_v27, %v11195_v51  ;;  %v2659_v20 = vmul.f32 %v11157_v19, %v11144_v45  ;;  %v3114_v4 = vmul.f32 %v9163_v11, %v11176_v17  ;;  %v3476_v40 = vadd.f32 %v3474_v63, %v3468_v7  ;;  %v11199_v63 = vld [vmem:[#allocation41_spill] sm:$0xff]  ;;  %v11201_v44 = vld [vmem:[#allocation83_spill] sm:$0xff] }
 0x42b   :  { %v3307_v43 = vadd.f32 %v3305_v35, %v3299_v52  ;;  %v3308_v61 = vadd.f32 %v3306_v47, %v3300_v54  ;;  %v3321_v32 = vmul.f32 %v9433_v24, %v11196_v57  ;;  %v3322_v1 = vmul.f32 %v9435_v62, %v11196_v57  ;;  %v11200_v35 = vld [vmem:[#allocation51_spill] sm:$0xff]  ;;  %v11202_v54 = vld [vmem:[#allocation93_spill] sm:$0xff] }
 0x42c   :  { %v3108_v3 = vadd.f32 %v3106_v56, %v9513_v18  ;;  %v3193_v38 = vmul.f32 %v9070_v31, %v11197_v60  ;;  %v3345_v45 = vmul.f32 %v8702_v29, %v11198_v2  ;;  %v9655_v0 = vadd.f32 %v3482_v58, %v3476_v40 }
 0x42d   :  { %2586 = vrot.lane.b32.xlu1 %v2573_v26, %s3791_s12  ;;  %v3122_v17 = vmul.f32 %v9243_v36, %v11181_v59  ;;  %v2494_v23 = vmul.f32 %v11151_v13, %v11159_v15  ;;  %v3315_v27 = vadd.f32 %v3313_v42, %v3307_v43  ;;  %v3316_v49 = vadd.f32 %v3314_v41, %v3308_v61  ;;  %v11203_v42 = vld [vmem:[#allocation40_spill] sm:$0xff] }
 0x42e   :  { %v2660_v18 = vadd.f32 %v2658_v9, %v11199_v63  ;;  %v2661_v50 = vadd.f32 %v2659_v20, %v11200_v35  ;;  %v3201_v47 = vmul.f32 %v9181_v37, %v11201_v44  ;;  %v3194_v29 = vmul.f32 %v9073_v12, %v11197_v60  ;;  %v2327_v61 = vpop.permute.xlu0 %2326 }
 0x42f   :  { %v3116_v56 = vadd.f32 %v3114_v4, %v3108_v3  ;;  %v3130_v7 = vmul.f32 %v9329_v30, %v11182_v39  ;;  %v9670_v59 = vadd.f32 %v3321_v32, %v3315_v27  ;;  %v9672_v58 = vadd.f32 %v3322_v1, %v3316_v49  ;;  %v11211_v27 = vld [vmem:[#allocation113_spill] sm:$0xff] }
 0x430   :  { %v3195_v52 = vadd.f32 %v3193_v38, %v9551_v22  ;;  %v3209_v9 = vmul.f32 %v9249_v5, %v11202_v54  ;;  %v3188_v41 = vadd.f32 %v9555_v46, %v11203_v42  ;;  %v3202_v51 = vmul.f32 %v9163_v11, %v11201_v44  ;;  %v11204_v46 = vld [vmem:[#allocation75_spill] sm:$0xff]  ;;  %v2329_v11 = vpop.permute.xlu1 %2328 }
 0x431   :  { %2672 = vrot.lane.b32.xlu1 %v2660_v18, %s3792_s8  ;;  %v3124_v12 = vadd.f32 %v3122_v17, %v3116_v56  ;;  %v3138_v39 = vmul.f32 %v9396_v48, %v11183_v33  ;;  %v2495_v26 = vmul.f32 %v11157_v19, %v11159_v15  ;;  %v2496_v22 = vadd.f32 %v2494_v23, %v9517_v25  ;;  %v11205_v33 = vld [vmem:[#allocation103_spill] sm:$0xff]  ;;  %v11206_v15 = vld [vmem:[#allocation42_spill] sm:$0xff]  ;;  %v11212_v18 = vld [vmem:[#allocation85_spill] sm:$0xff] }
 0x432   :  { %v3203_v20 = vadd.f32 %v3201_v47, %v3195_v52  ;;  %v3196_v4 = vadd.f32 %v3194_v29, %v3188_v41  ;;  %v3210_v40 = vmul.f32 %v9243_v36, %v11202_v54  ;;  %v3353_v43 = vmul.f32 %v9070_v31, %v11204_v46  ;;  %v11213_v44 = vld [vmem:[#allocation95_spill] sm:$0xff]  ;;  %v2415_v56 = vpop.permute.xlu0 %2414  ;;  %v11215_v41 = vld [vmem:[#allocation148_spill] sm:$0xff] }
 0x433   :  { %v3132_v32 = vadd.f32 %v3130_v7, %v3124_v12  ;;  %v3146_v1 = vmul.f32 %v9435_v62, %v11150_v16  ;;  %v3217_v3 = vmul.f32 %v9327_v8, %v11205_v33  ;;  %v3347_v60 = vadd.f32 %v3345_v45, %v11206_v15 }
 0x434   :  { %v2330_v25 = vsel %vm11207_vm5, %v2327_v61, %v2329_v11  ;;  %v2331_v36 = vsel %vm11208_vm7, %v2329_v11, %v2327_v61  ;;  %v3211_v38 = vadd.f32 %v3209_v9, %v3203_v20  ;;  %v3204_v2 = vadd.f32 %v3202_v51, %v3196_v4  ;;  %v2417_v29 = vpop.permute.xlu1 %2416  ;;  %v11214_v9 = vld [vmem:[#allocation141_spill] sm:$0xff] }
 0x435   :  { %v2332_v17 = vsel %vm7233_vm1, %v2331_v36, 0.0  ;;  %v2333_v23 = vsel %vm11210_vm11, %v2330_v25, 0.0  ;;  %2674 = vrot.lane.b32.xlu1 %v2661_v50, %s3792_s8  ;;  %v3140_v16 = vadd.f32 %v3138_v39, %v3132_v32  ;;  %v3225_v45 = vmul.f32 %v9394_v6, %v11211_v27 }
 0x436   :  { %v3212_v49 = vadd.f32 %v3210_v40, %v3204_v2  ;;  %v3355_v63 = vadd.f32 %v3353_v43, %v3347_v60  ;;  %v3361_v35 = vmul.f32 %v9181_v37, %v11212_v18  ;;  %v3369_v47 = vmul.f32 %v9249_v5, %v11213_v44  ;;  %v11220_v43 = vld [vmem:[#allocation60_spill] sm:$0xff] }
 0x437   :  { %v3148_v7 = vadd.f32 %v3146_v1, %v3140_v16  ;;  %v3219_v52 = vadd.f32 %v3217_v3, %v3211_v38  ;;  %v3233_v54 = vmul.f32 %v9433_v24, %v11158_v55  ;;  %v3218_v50 = vmul.f32 %v9329_v30, %v11205_v33  ;;  %v11221_v3 = vld [vmem:[#allocation105_spill] sm:$0xff]  ;;  %v11229_v18 = vld [vmem:[#allocation44_spill] sm:$0xff] }
 0x438   :  { %v2334_v42 = vadd.f32 %v2332_v17, %v11214_v9  ;;  %v2335_v51 = vadd.f32 %v2333_v23, %v11215_v41  ;;  %v2418_v37 = vsel %vm11216_vm10, %v2415_v56, %v2417_v29  ;;  %v2419_v5 = vsel %vm11217_vm12, %v2417_v29, %v2415_v56  ;;  %v2577_v16 = vpop.permute.xlu1 %2576 }
 0x439   :  { %v2420_v39 = vsel %vm7249_vm0, %v2419_v5, 0.0  ;;  %v2421_v20 = vsel %vm11219_vm3, %v2418_v37, 0.0  ;;  %3161 = vrot.lane.b32.xlu1 %v3148_v7, %s3793_s2  ;;  %v3227_v4 = vadd.f32 %v3225_v45, %v3219_v52  ;;  %v3226_v30 = vmul.f32 %v9396_v48, %v11211_v27  ;;  %v11222_v48 = vld [vmem:[#allocation115_spill] sm:$0xff]  ;;  %v2575_v27 = vpop.permute.xlu0 %2574 }
 0x43a   :  { %v2422_v40 = vadd.f32 %v2420_v39, %v2334_v42  ;;  %v2423_v46 = vadd.f32 %v2421_v20, %v2335_v51  ;;  %v2497_v11 = vadd.f32 %v2495_v26, %v11220_v43  ;;  %v3363_v61 = vadd.f32 %v3361_v35, %v3355_v63 }
 0x43b   :  { %v3235_v32 = vadd.f32 %v3233_v54, %v3227_v4  ;;  %v3220_v1 = vadd.f32 %v3218_v50, %v3212_v49  ;;  %v3234_v33 = vmul.f32 %v9435_v62, %v11158_v55  ;;  %v3377_v15 = vmul.f32 %v9327_v8, %v11221_v3  ;;  %v11223_v8 = vld [vmem:[#allocation45_spill] sm:$0xff] }
 0x43c   :  { %v2502_v60 = vadd.f32 %v2496_v22, %v2422_v40  ;;  %v2503_v25 = vadd.f32 %v2497_v11, %v2423_v46  ;;  %v3371_v38 = vadd.f32 %v3369_v47, %v3363_v61  ;;  %v3385_v2 = vmul.f32 %v9394_v6, %v11222_v48  ;;  %v11224_v22 = vld [vmem:[#allocation53_spill] sm:$0xff]  ;;  %v2665_v6 = vpop.permute.xlu1 %2664  ;;  %v3505_v61 = vld [vmem:[%s11236_s4] sm:$0xff] }
 0x43d   :  { %3247 = vrot.lane.b32.xlu1 %v3235_v32, %s3794_s24  ;;  %v3228_v36 = vadd.f32 %v3226_v30, %v3220_v1  ;;  %v3393_v23 = vmul.f32 %v9433_v24, %v11143_v34  ;;  %v2663_v45 = vpop.permute.xlu0 %2662  ;;  %vm11225_vm5 = vcmp.lt.s32.totalorder %v4103_v21, 111  ;;  %vm11227_vm11 = vcmp.lt.s32.totalorder %v4103_v21, 94  ;;  %v3506_v32 = vld [vmem:[%s11236_s4 + $0x8] sm:$0xff] }
 0x43e   :  { %v3379_v26 = vadd.f32 %v3377_v15, %v3371_v38  ;;  %v2578_v49 = vsel %vm11225_vm5, %v2575_v27, %v2577_v16  ;;  %vm11226_vm7 = vmmov %vm11225_vm5  ;;  %v2666_v34 = vsel %vm11227_vm11, %v2663_v45, %v2665_v6  ;;  %vm11230_vm12 = vcmp.lt.s32.totalorder %v11229_v18, 15 }
 0x43f   :  { %v3236_v17 = vadd.f32 %v3234_v33, %v3228_v36  ;;  %v2579_v24 = vsel %vm11226_vm7, %v2577_v16, %v2575_v27  ;;  %vm11228_vm10 = vmmov %vm11227_vm11  ;;  %v2580_v35 = vsel %vm11230_vm12, %v2578_v49, 0.0  ;;  %vm11232_vm3 = vcmp.lt.s32.totalorder %v11229_v18, 14 }
 0x440   :  { %v3387_v62 = vadd.f32 %v3385_v2, %v3379_v26  ;;  %v2667_v63 = vsel %vm11228_vm10, %v2665_v6, %v2663_v45  ;;  %v2581_v47 = vsel %vm7307_vm4, %v2579_v24, 0.0  ;;  %v2668_v29 = vsel %vm11232_vm3, %v2666_v34, 0.0  ;;  %v11239_v2 = vld [vmem:[#allocation58_spill] sm:$0xff]  ;;  %v11240_v26 = vld [vmem:[#allocation63_spill] sm:$0xff] }
 0x441   :  { %3249 = vrot.lane.b32.xlu1 %v3236_v17, %s3794_s24  ;;  %v2669_v7 = vsel %vm7335_vm15, %v2667_v63, 0.0  ;;  %v2582_v50 = vadd.f32 %v2580_v35, %v2502_v60  ;;  %v2583_v9 = vadd.f32 %v2581_v47, %v2503_v25  ;;  %vm11235_vm5 = vcmp.lt.s32.totalorder %v10746_v14, 14 }
 0x442   :  { %v3395_v55 = vadd.f32 %v3393_v23, %v3387_v62  ;;  %vm11238_vm7 = vcmp.lt.s32.totalorder %v10746_v14, 15  ;;  %v3705_v38 = vadd.f32 -1.0, %v3505_v61  ;;  %v3706_v48 = vadd.f32 -1.0, %v3506_v32  ;;  %v11259_v61 = vld [vmem:[#allocation134_spill] sm:$0xff] }
 0x443   :  { %v2670_v39 = vadd.f32 %v2668_v29, %v2582_v50  ;;  %v2671_v20 = vadd.f32 %v2669_v7, %v2583_v9  ;;  %vm11241_vm11 = vcmp.lt.s32.totalorder %v4103_v21, 113  ;;  %vm11243_vm12 = vcmp.ge.s32.totalorder %v11229_v18, 1 }
 0x444   :  { %vm11242_vm10 = vmmov %vm11241_vm11  ;;  %v3509_v6 = vmul.f32 100.0, %v3705_v38  ;;  %v3510_v45 = vmul.f32 100.0, %v3706_v48  ;;  %vm11245_vm3 = vcmp.lt.s32.totalorder %v4103_v21, 98  ;;  %v2482_v32 = vmul.f32 %v11259_v61, %v11193_v10  ;;  %v11265_v48 = vld [vmem:[#allocation128_spill] sm:$0xff] }
 0x445   :  { %3407 = vrot.lane.b32.xlu1 %v3395_v55, %s3795_s20 }
 0x449   :  { %3409 = vrot.lane.b32.xlu1 %v11223_v8, %s3795_s20 }
 0x44d   :  { %3495 = vrot.lane.b32.xlu1 %v11224_v22, %s3796_s1 }
 0x47b   :  { %v3152_v52 = vpop.permute.xlu1 %3151  ;;  %v3150_v54 = vpop.permute.xlu0 %3149 }
 0x47c   :  { %v3153_v42 = vsel %vm2697_vm13, %v3150_v54, %v3152_v52  ;;  %v3154_v41 = vsel %vm2697_vm13, %v3152_v52, %v3150_v54 }
 0x47d   :  { %v3155_v37 = vsel %vm8151_vm6, %v3154_v41, 0.0  ;;  %v3156_v5 = vsel %vm11235_vm5, %v3153_v42, 0.0  ;;  %vm11246_vm5 = vmmov %vm11245_vm3  ;;  %v11249_v41 = vld [vmem:[#allocation140_spill] sm:$0xff] }
 0x47e   :  { %v3157_v40 = vadd.f32 %v3155_v37, %v2670_v39  ;;  %v3158_v46 = vadd.f32 %v3156_v5, %v2671_v20  ;;  %v11250_v37 = vld [vmem:[#allocation135_spill] sm:$0xff] }
 0x47f   :  { %v3240_v4 = vpop.permute.xlu1 %3239  ;;  %v3238_v30 = vpop.permute.xlu0 %3237 }
 0x480   :  { %v3241_v43 = vsel %vm2708_vm2, %v3238_v30, %v3240_v4  ;;  %v3242_v11 = vsel %vm2708_vm2, %v3240_v4, %v3238_v30  ;;  %v11253_v4 = vld [vmem:[#allocation142_spill] sm:$0xff]  ;;  %v11254_v30 = vld [vmem:[#allocation5_spill] sm:$0xff] }
 0x481   :  { %v3243_v33 = vsel %vm8274_vm14, %v3242_v11, 0.0  ;;  %v3244_v3 = vsel %vm11238_vm7, %v3241_v43, 0.0  ;;  %vm11247_vm7 = vcmp.ge.s32.totalorder %v11229_v18, 2  ;;  %v11257_v43 = vld [vmem:[#allocation43_spill] sm:$0xff] }
 0x482   :  { %v3245_v15 = vadd.f32 %v3243_v33, %v3157_v40  ;;  %v3246_v60 = vadd.f32 %v3244_v3, %v3158_v46  ;;  %v11260_v33 = vld [vmem:[#allocation153_spill] sm:$0xff] }
 0x483   :  { %v3400_v25 = vpop.permute.xlu1 %3399  ;;  %v3398_v36 = vpop.permute.xlu0 %3397  ;;  %v2483_v3 = vmul.f32 %v11260_v33, %v11193_v10  ;;  %v11266_v10 = vld [vmem:[#allocation154_spill] sm:$0xff] }
 0x484   :  { %v3325_v17 = vadd.f32 %v11239_v2, %v3245_v15  ;;  %v3326_v23 = vadd.f32 %v11240_v26, %v3246_v60  ;;  %v3401_v62 = vsel %vm11241_vm11, %v3398_v36, %v3400_v25  ;;  %v3402_v55 = vsel %vm11242_vm10, %v3400_v25, %v3398_v36  ;;  %v11267_v26 = vld [vmem:[#allocation139_spill] sm:$0xff] }
 0x485   :  { %v3403_v8 = vsel %vm11243_vm12, %v3401_v62, 0.0  ;;  %v3404_v16 = vsel %vm8345_vm9, %v3402_v55, 0.0  ;;  %vm11251_vm11 = vcmp.lt.s32.totalorder %v4103_v21, 112  ;;  %vm11255_vm10 = vcmp.lt.s32.totalorder %v4103_v21, 96  ;;  %v11268_v62 = vld [vmem:[#allocation133_spill] sm:$0xff] }
 0x486   :  { %v3405_v24 = vadd.f32 %v3403_v8, %v3325_v17  ;;  %v3406_v34 = vadd.f32 %v3404_v16, %v3326_v23  ;;  %v1766_v5 = vsel %vm11251_vm11, %v11250_v37, %v11249_v41  ;;  %v1854_v40 = vsel %vm11255_vm10, %v11254_v30, %v11253_v4  ;;  %vm11256_vm12 = vmmov %vm11251_vm11 }
 0x487   :  { %v3488_v27 = vpop.permute.xlu1 %3487  ;;  %v3486_v49 = vpop.permute.xlu0 %3485  ;;  %v1765_v46 = vsel %vm11256_vm12, %v11249_v41, %v11250_v37  ;;  %vm11263_vm11 = vmmov %vm11255_vm10  ;;  %vm11264_vm10 = vcmp.lt.s32.totalorder %v11257_v43, 224  ;;  %v2490_v2 = vmul.f32 %v11265_v48, %v11194_v53  ;;  %v2491_v17 = vmul.f32 %v11266_v10, %v11194_v53 }
 0x488   :  { %v3489_v63 = vsel %vm11245_vm3, %v3486_v49, %v3488_v27  ;;  %v3490_v35 = vsel %vm11246_vm5, %v3488_v27, %v3486_v49  ;;  %vm11258_vm3 = vcmp.lt.s32.totalorder %v11257_v43, 240  ;;  %vm11261_vm5 = vcmp.lt.s32.totalorder %v4103_v21, 34  ;;  %v11270_v27 = vld [vmem:[#allocation164_spill] sm:$0xff] }
 0x489   :  { %v3491_v47 = vsel %vm11247_vm7, %v3489_v63, 0.0  ;;  %v3492_v7 = vsel %vm8401_vm8, %v3490_v35, 0.0  ;;  %v1768_v11 = vsel %vm11258_vm3, %v1766_v5, 0.0  ;;  %vm11262_vm7 = vmmov %vm11261_vm5  ;;  %v1853_v25 = vsel %vm11263_vm11, %v11253_v4, %v11254_v30 }
 0x48a   :  { %v3493_v52 = vadd.f32 %v3491_v47, %v3405_v24  ;;  %v3494_v54 = vadd.f32 %v3492_v7, %v3406_v34  ;;  %v1856_v36 = vsel %vm11264_vm10, %v1854_v40, 0.0  ;;  %v1769_v23 = vadd.f32 %v1765_v46, %v11267_v26 }
 0x48b   :  { %v2337_v50 = vpop.permute.xlu1 %2336  ;;  %v1770_v55 = vadd.f32 %v1768_v11, %v11268_v62  ;;  %vm11269_vm12 = vcmp.ge.s32.totalorder %v10746_v14, 2  ;;  %v2498_v63 = vmul.f32 %v11151_v13, %v11196_v57  ;;  %v2499_v53 = vmul.f32 %v11157_v19, %v11196_v57 }
 0x48c   :  { %v9800_v9 = vadd.f32 %v3509_v6, %v3493_v52  ;;  %v9802_v42 = vadd.f32 %v3510_v45, %v3494_v54  ;;  %v2484_v6 = vadd.f32 %v2482_v32, %v11270_v27  ;;  %v11271_v45 = vld [vmem:[#allocation165_spill] sm:$0xff]  ;;  %v1857_v24 = vadd.f32 %v1853_v25, %v1769_v23 }
 0x48d   :  { %v2485_v49 = vadd.f32 %v2483_v3, %v11271_v45  ;;  %v1858_v34 = vadd.f32 %v1856_v36, %v1770_v55  ;;  %vm11277_vm11 = vcmp.lt.s32.totalorder %v4103_v21, 94 }
 0x48e   :  { %3513 = vst [vmem:[%s11252_s6] sm:$0xff] %v9800_v9  ;;  %3514 = vst [vmem:[%s11252_s6 + $0x8] sm:$0xff] %v9802_v42  ;;  %v3515_v39 = vmax.f32 %v9800_v9, %v9802_v42  ;;  %v2492_v47 = vadd.f32 %v2490_v2, %v2484_v6 }
 0x48f   :  { %v2339_v20 = vpop.permute.xlu1 %2338  ;;  %v2493_v7 = vadd.f32 %v2491_v17, %v2485_v49  ;;  %vm11278_vm10 = vmmov %vm11277_vm11 }
 0x490   :  { %3516 = vmax.xlane.f32.xlu0 %v3515_v39  ;;  %v2340_v15 = vsel %vm11261_vm5, %v2337_v50, %v2339_v20  ;;  %v2341_v60 = vsel %vm11262_vm7, %v2339_v20, %v2337_v50  ;;  %vm11274_vm5 = vcmp.ge.s32.totalorder %v10746_v14, 1  ;;  %v2500_v19 = vadd.f32 %v2498_v63, %v2492_v47 }
 0x491   :  { %v2342_v8 = vsel %vm7233_vm1, %v2341_v60, 0.0  ;;  %v2343_v16 = vsel %vm11269_vm12, %v2340_v15, 0.0  ;;  %vm11272_vm1 = vcmp.lt.s32.totalorder %v4103_v21, 17  ;;  %v2501_v57 = vadd.f32 %v2499_v53, %v2493_v7 }
 0x492   :  { %v2344_v31 = vadd.f32 %v2342_v8, %v1857_v24  ;;  %v2345_v52 = vadd.f32 %v2343_v16, %v1858_v34  ;;  %vm11273_vm3 = vmmov %vm11272_vm1  ;;  %vm11279_vm12 = vcmp.lt.s32.totalorder %v11229_v18, 15 }
 0x493   :  { %v2425_v38 = vpop.permute.xlu1 %2424 }
 0x497   :  { %v2427_v35 = vpop.permute.xlu1 %2426 }
 0x498   :  { %v2428_v54 = vsel %vm11272_vm1, %v2425_v38, %v2427_v35  ;;  %v2429_v50 = vsel %vm11273_vm3, %v2427_v35, %v2425_v38  ;;  %vm11280_vm1 = vcmp.lt.s32.totalorder %v11229_v18, 14 }
 0x499   :  { %v2430_v41 = vsel %vm7249_vm0, %v2429_v50, 0.0  ;;  %v2431_v13 = vsel %vm11274_vm5, %v2428_v54, 0.0  ;;  %vm11275_vm0 = vcmp.lt.s32.totalorder %v4103_v21, 111  ;;  %vm11288_vm5 = vcmp.ge.s32.totalorder %v11229_v18, 2 }
 0x49a   :  { %v2432_v37 = vadd.f32 %v2430_v41, %v2344_v31  ;;  %v2433_v5 = vadd.f32 %v2431_v13, %v2345_v52  ;;  %vm11276_vm7 = vmmov %vm11275_vm0 }
 0x49b   :  { %v2585_v4 = vpop.permute.xlu1 %2584 }
 0x49c   :  { %v2504_v39 = vadd.f32 %v2500_v19, %v2432_v37  ;;  %v2505_v20 = vadd.f32 %v2501_v57, %v2433_v5 }
 0x49f   :  { %v2587_v30 = vpop.permute.xlu1 %2586 }
 0x4a0   :  { %v2588_v61 = vsel %vm11275_vm0, %v2585_v4, %v2587_v30  ;;  %v2589_v32 = vsel %vm11276_vm7, %v2587_v30, %v2585_v4 }
 0x4a1   :  { %v2591_v3 = vsel %vm7307_vm4, %v2589_v32, 0.0  ;;  %vm11281_vm4 = vcmp.lt.s32.totalorder %v10746_v14, 14 }
 0x4a2   :  { %v2593_v10 = vadd.f32 %v2591_v3, %v2505_v20 }
 0x4a3   :  { %v2673_v40 = vpop.permute.xlu1 %2672 }
 0x4a6   :  { %3159 = vrot.lane.b32.xlu0 %v9626_v28, %s3793_s2 }
 0x4a7   :  { %v2675_v12 = vpop.permute.xlu1 %2674 }
 0x4a8   :  { %v2676_v33 = vsel %vm11277_vm11, %v2673_v40, %v2675_v12  ;;  %v2677_v28 = vsel %vm11278_vm10, %v2675_v12, %v2673_v40 }
 0x4a9   :  { %v2678_v25 = vsel %vm11280_vm1, %v2676_v33, 0.0  ;;  %v2679_v36 = vsel %vm7335_vm15, %v2677_v28, 0.0  ;;  %vm11282_vm15 = vcmp.lt.s32.totalorder %v10746_v14, 15 }
 0x4aa   :  { %3497 = vrot.lane.b32.xlu0 %v9655_v0, %s3796_s1  ;;  %v2590_v0 = vsel %vm11279_vm12, %v2588_v61, 0.0  ;;  %v2681_v62 = vadd.f32 %v2679_v36, %v2593_v10 }
 0x4ab   :  { %v3162_v46 = vpop.permute.xlu1 %3161  ;;  %v2592_v2 = vadd.f32 %v2590_v0, %v2504_v39 }
 0x4ad   :  { %v2680_v23 = vadd.f32 %v2678_v25, %v2592_v2 }
 0x4af   :  { %v3248_v43 = vpop.permute.xlu1 %3247 }
 0x4b3   :  { %v3250_v11 = vpop.permute.xlu1 %3249 }
 0x4b4   :  { %v3251_v44 = vsel %vm2708_vm2, %v3248_v43, %v3250_v11  ;;  %v3252_v8 = vsel %vm2708_vm2, %v3250_v11, %v3248_v43  ;;  %vm11283_vm2 = vcmp.lt.s32.totalorder %v4103_v21, 113 }
 0x4b5   :  { %v3253_v49 = vsel %vm8274_vm14, %v3252_v8, 0.0  ;;  %v3254_v24 = vsel %vm11282_vm15, %v3251_v44, 0.0  ;;  %vm11286_vm14 = vcmp.lt.s32.totalorder %v4103_v21, 98 }
 0x4b6   :  { %vm11287_vm3 = vmmov %vm11286_vm14 }
 0x4b7   :  { %v3408_v15 = vpop.permute.xlu1 %3407 }
 0x519   :  { %v3517_v60 = vpop.xlane.xlu0 %3516 }
 0x51a   :  { %v3518_v38 = vsub.f32 %v9800_v9, %v3517_v60  ;;  %v3519_v48 = vsub.f32 %v9802_v42, %v3517_v60  ;;  %v3410_v42 = vpop.permute.xlu1 %3409 }
 0x51b   :  { %v3411_v34 = vsel %vm11283_vm2, %v3408_v15, %v3410_v42 }
 0x51c   :  { %v3520_v17 = vmul.f32 1.442695, %v3518_v38  ;;  %v3522_v26 = vmul.f32 1.442695, %v3519_v48 }
 0x51d   :  { %v3160_v55 = vpop.permute.xlu0 %3159 }
 0x51e   :  { %3724 = vpow2.f32 %v3520_v17  ;;  %v3163_v56 = vsel %vm2697_vm13, %v3160_v55, %v3162_v46  ;;  %v3164_v9 = vsel %vm2697_vm13, %v3162_v46, %v3160_v55  ;;  %vm11284_vm13 = vmmov %vm11283_vm2  ;;  %v3496_v31 = vpop.permute.xlu1 %3495 }
 0x51f   :  { %3726 = vpow2.f32 %v3522_v26  ;;  %v3165_v16 = vsel %vm8151_vm6, %v3164_v9, 0.0  ;;  %v3166_v27 = vsel %vm11281_vm4, %v3163_v56, 0.0  ;;  %v3412_v51 = vsel %vm11284_vm13, %v3410_v42, %v3408_v15 }
 0x520   :  { %v3167_v6 = vadd.f32 %v3165_v16, %v2680_v23  ;;  %v3168_v45 = vadd.f32 %v3166_v27, %v2681_v62  ;;  %vm11285_vm6 = vcmp.ge.s32.totalorder %v11229_v18, 1  ;;  %v3414_v14 = vsel %vm8345_vm9, %v3412_v51, 0.0 }
 0x521   :  { %v3498_v35 = vpop.permute.xlu0 %3497  ;;  %v3413_v1 = vsel %vm11285_vm6, %v3411_v34, 0.0  ;;  %vm3535_vm9 = vcmask 7168  }
 0x522   :  { %v3255_v63 = vadd.f32 %v3253_v49, %v3167_v6  ;;  %v3256_v53 = vadd.f32 %v3254_v24, %v3168_v45  ;;  %v3499_v54 = vsel %vm11286_vm14, %v3496_v31, %v3498_v35  ;;  %v3500_v41 = vsel %vm11287_vm3, %v3498_v35, %v3496_v31 }
 0x524   :  { %v3327_v47 = vadd.f32 %v9670_v59, %v3255_v63  ;;  %v3328_v7 = vadd.f32 %v9672_v58, %v3256_v53  ;;  %v3501_v59 = vsel %vm11288_vm5, %v3499_v54, 0.0  ;;  %v3502_v58 = vsel %vm8401_vm8, %v3500_v41, 0.0 }
 0x526   :  { %v3415_v52 = vadd.f32 %v3413_v1, %v3327_v47  ;;  %v3416_v50 = vadd.f32 %v3414_v14, %v3328_v7 }
 0x528   :  { %v3503_v13 = vadd.f32 %v3501_v59, %v3415_v52  ;;  %v3504_v5 = vadd.f32 %v3502_v58, %v3416_v50 }
 0x52b   :  { %v3725_v37 = vpop.eup %3724 }
 0x52c   :  { %v3727_v19 = vpop.eup %3726  ;;  %v3524_v22 = vmul.f32 %v3725_v37, %v3503_v13 }
 0x52d   :  { %v3525_v57 = vmul.f32 %v3727_v19, %v3504_v5  ;;  %v3529_v39 = vadd.f32 %v3727_v19, %v3725_v37 }
 0x52f   :  { %3530 = vadd.xlane.f32.xlu1 %v3529_v39  ;;  %v3526_v20 = vadd.f32 %v3525_v57, %v3524_v22 }
 0x531   :  { %3527 = vadd.xlane.f32.xlu0 %v3526_v20 }
 0x5b8   :  { %v3531_v4 = vpop.xlane.xlu1 %3530 }
 0x5b9   :  { %3728 = vrcp.f32 %v3531_v4 }
 0x5ba   :  { %v3528_v30 = vpop.xlane.xlu0 %3527 }
 0x5c6   :  { %v3729_v21 = vpop.eup %3728 }
 0x5c7   :  { %v3533_v40 = vmul.f32 %v3729_v21, %v3528_v30 }
 0x5c9   :  { %3730 = vtanh.f32 %v3533_v40 }
 0x5d6   :  { %v3731_v18 = vpop.eup %3730 }
 0x5d7   :  { %3536 = vst.msk [vmem:[%s11289_s19] sm:$0xff] %vm3535_vm9, %v3731_v18 }
 0x5d8   :  { %3545 = vsyncpa [#allocation3], 1 }

</bundles_post_ra>
